<compile_context>
chip_gen: v6e
topology: v6e:2x2x1
jax: 0.10.0
libtpu: 0.0.40
codegen_flags: <defaults>
</compile_context>

<pallas_src>
import functools

import jax
import jax.numpy as jnp
from jax.experimental import pallas as pl
from jax.experimental.pallas import tpu as pltpu


def _residual_block_kernel(x_ref, w1_ref, b1_ref, w2_ref, b2_ref, prelu_ref,
                           edge_ref, out_ref, xpad_ref, *, N, W, C, P):
    """One image per grid step.

    x_ref    : (1, N, C)      flattened NHWC image, N = H*W, channels on lanes
    w1_ref   : (9, C, C)      conv1 taps, tap = (kh*3 + kw), each (Cin, Cout)
    b1_ref   : (1, C)         conv1 bias
    w2_ref   : (9, C, C)      conv2 taps
    b2_ref   : (1, C)         conv2 bias
    prelu_ref: (1, 2) SMEM    [slope1, slope2]
    edge_ref : (N, 2)         keep-masks: col0 zeroes w==0 rows, col1 zeroes w==W-1
    out_ref  : (1, N, C)      x + residual
    xpad_ref : (P + N + P, C) f32 scratch with a P-row zero halo above/below
    """
    f32 = jnp.float32

    # Zero the halo rows (vertical zero padding of the conv). The interior is
    # always overwritten below, so only the halo needs initialization.
    halo = jnp.zeros((P, C), f32)
    xpad_ref[pl.ds(0, P), :] = halo
    xpad_ref[pl.ds(P + N, P), :] = halo

    edge = edge_ref[...].astype(f32)     # (N, 2)
    left_keep = edge[:, 0:1]             # 0.0 where w == 0     (kills dw = -1 wrap)
    right_keep = edge[:, 1:2]            # 0.0 where w == W - 1 (kills dw = +1 wrap)

    def conv3x3_bias_prelu(w_ref, b_ref, slope):
        # Start the accumulator from the broadcast bias.
        acc = jnp.broadcast_to(b_ref[...].astype(f32), (N, C))
        tap = 0
        for dh in (-1, 0, 1):
            for dw in (-1, 0, 1):
                xs = xpad_ref[pl.ds(P + dh * W + dw, N), :]      # (N, Cin)
                if dw == -1:
                    xs = xs * left_keep
                elif dw == 1:
                    xs = xs * right_keep
                acc = acc + jnp.dot(xs, w_ref[tap],
                                    preferred_element_type=f32)  # MXU
                tap += 1
        # PReLU with a single learnable slope (nn.PReLU() default).
        return jnp.where(acc > 0, acc, slope * acc)

    # conv1 + PReLU
    xpad_ref[pl.ds(P, N), :] = x_ref[0].astype(f32)
    y1 = conv3x3_bias_prelu(w1_ref, b1_ref, prelu_ref[0, 0])

    # conv2 + PReLU (reuse the scratch; halo is still zero)
    xpad_ref[pl.ds(P, N), :] = y1
    y2 = conv3x3_bias_prelu(w2_ref, b2_ref, prelu_ref[0, 1])

    # residual add
    out_ref[0] = (x_ref[0].astype(f32) + y2).astype(out_ref.dtype)

    # TODO(synk): no dropout / batch-norm in this module; nothing omitted.


def residual_block(x, w1, b1, w2, b2, a1, a2):
    """Pallas TPU forward of ResidualBlock.

    x       : (B, C, H, W)  NCHW, as in PyTorch
    w1, w2  : (C, C, 3, 3)  conv weights, OIHW (PyTorch layout)
    b1, b2  : (C,)          conv biases
    a1, a2  : python floats PReLU slopes (nn.PReLU() single-parameter)
    Returns : (B, C, H, W)
    """
    B, C, H, W = x.shape
    assert w1.shape == (C, C, 3, 3) and w2.shape == (C, C, 3, 3)
    N = H * W
    P = W + 1                     # halo rows: every shifted slice stays in-bounds
    Npad = N + 2 * P

    # NCHW -> (B, H*W, C): channels on lanes, pixels on sublanes.
    x_flat = jnp.transpose(x, (0, 2, 3, 1)).reshape(B, N, C)

    def taps(w):
        # OIHW -> (kh*3+kw, Cin, Cout): each tap is a ready-to-use matmul RHS.
        return jnp.transpose(w, (2, 3, 1, 0)).reshape(9, C, C).astype(jnp.float32)

    w1t, w2t = taps(w1), taps(w2)
    b1r = b1.reshape(1, C).astype(jnp.float32)
    b2r = b2.reshape(1, C).astype(jnp.float32)
    prelu = jnp.array([[a1, a2]], dtype=jnp.float32)          # (1, 2) -> SMEM

    # Edge keep-masks for the flattened layout (shared by all batches; the
    # constant block index means they are DMA'd once and stay in VMEM).
    col = jnp.arange(N, dtype=jnp.int32) % W
    edge = jnp.stack(
        [(col != 0).astype(jnp.float32), (col != W - 1).astype(jnp.float32)],
        axis=1,
    )                                                          # (N, 2)

    kernel = functools.partial(_residual_block_kernel, N=N, W=W, C=C, P=P)

    out_flat = pl.pallas_call(
        kernel,
        out_shape=jax.ShapeDtypeStruct((B, N, C), x.dtype),
        grid_spec=pltpu.PrefetchScalarGridSpec(
            num_scalar_prefetch=0,
            grid=(B,),
            in_specs=[
                pl.BlockSpec((1, N, C), lambda b: (b, 0, 0)),        # x (per image)
                pl.BlockSpec((9, C, C), lambda b: (0, 0, 0)),        # w1 taps
                pl.BlockSpec((1, C), lambda b: (0, 0)),              # b1
                pl.BlockSpec((9, C, C), lambda b: (0, 0, 0)),        # w2 taps
                pl.BlockSpec((1, C), lambda b: (0, 0)),              # b2
                pl.BlockSpec(memory_space=pltpu.MemorySpace.SMEM),   # PReLU slopes
                pl.BlockSpec((N, 2), lambda b: (0, 0)),              # edge keep-masks
            ],
            out_specs=pl.BlockSpec((1, N, C), lambda b: (b, 0, 0)),
            scratch_shapes=[pltpu.VMEM((Npad, C), jnp.float32)],
        ),
        compiler_params=pltpu.CompilerParams(
            dimension_semantics=("parallel",),   # batch axis -> megacore / 2-TC sharding
            vmem_limit_bytes=64 * 1024 * 1024,
        ),
    )(x_flat, w1t, b1r, w2t, b2r, prelu, edge)

    return jnp.transpose(out_flat.reshape(B, H, W, C), (0, 3, 1, 2))


def _reference(x, w1, b1, w2, b2, a1, a2):
    """Pure-JAX reference matching the PyTorch module."""
    def conv(h, w, b):
        y = jax.lax.conv_general_dilated(
            h, w, window_strides=(1, 1), padding="SAME",
            dimension_numbers=("NCHW", "OIHW", "NCHW"))
        return y + b[None, :, None, None]

    def prelu(y, a):
        return jnp.where(y > 0, y, a * y)

    r = prelu(conv(x, w1, b1), a1)
    r = prelu(conv(r, w2, b2), a2)
    return x + r


if __name__ == "__main__":
    B, C, H, W = 2, 8, 16, 16
    key = jax.random.PRNGKey(0)
    kx, kw1, kb1, kw2, kb2 = jax.random.split(key, 5)

    def bf16_repr(a):
        # Round values to bf16-representable f32 so that kernel vs reference
        # differences reflect structure, not MXU precision mode.
        return a.astype(jnp.bfloat16).astype(jnp.float32)

    x = bf16_repr(jax.random.normal(kx, (B, C, H, W), dtype=jnp.float32))
    w1 = bf16_repr(0.1 * jax.random.normal(kw1, (C, C, 3, 3), dtype=jnp.float32))
    b1 = bf16_repr(0.1 * jax.random.normal(kb1, (C,), dtype=jnp.float32))
    w2 = bf16_repr(0.1 * jax.random.normal(kw2, (C, C, 3, 3), dtype=jnp.float32))
    b2 = bf16_repr(0.1 * jax.random.normal(kb2, (C,), dtype=jnp.float32))
    a1, a2 = 0.25, 0.1   # PReLU slopes (nn.PReLU() initializes to 0.25)

    out = residual_block(x, w1, b1, w2, b2, a1, a2)
    out = jax.block_until_ready(out)

    ref = _reference(x, w1, b1, w2, b2, a1, a2)
    assert out.shape == x.shape
    max_err = float(jnp.max(jnp.abs(out - ref)))
    assert jnp.allclose(out, ref, atol=1e-2, rtol=1e-2), max_err

    print("KERNEL_OK")
</pallas_src>

<mosaic_0001>
module attributes {stable_mosaic.version = 11 : i64} {
  func.func @_residual_block_kernel(%arg0: i32, %arg1: memref<1x256x8xf32, #tpu.memory_space<vmem>>, %arg2: memref<9x8x8xf32, #tpu.memory_space<vmem>>, %arg3: memref<1x8xf32, #tpu.memory_space<vmem>>, %arg4: memref<9x8x8xf32, #tpu.memory_space<vmem>>, %arg5: memref<1x8xf32, #tpu.memory_space<vmem>>, %arg6: memref<1x2xf32, #tpu.memory_space<smem>>, %arg7: memref<256x2xf32, #tpu.memory_space<vmem>>, %arg8: memref<1x256x8xf32, #tpu.memory_space<vmem>>, %arg9: memref<290x8xf32, #tpu.memory_space<vmem>>) attributes {dimension_semantics = [#tpu.dimension_semantics<parallel>], iteration_bounds = array<i64: 2>, scalar_prefetch = 0 : i64, scratch_operands = 1 : i64, tpu.core_type = #tpu.core_type<tc>, window_params = [{transform_indices = @transform_0, window_bounds = array<i64: 1, 256, 8>}, {pipeline_mode = #tpu.pipeline_mode<synchronous>, transform_indices = @transform_1, window_bounds = array<i64: 9, 8, 8>}, {pipeline_mode = #tpu.pipeline_mode<synchronous>, transform_indices = @transform_2, window_bounds = array<i64: 1, 8>}, {pipeline_mode = #tpu.pipeline_mode<synchronous>, transform_indices = @transform_3, window_bounds = array<i64: 9, 8, 8>}, {pipeline_mode = #tpu.pipeline_mode<synchronous>, transform_indices = @transform_4, window_bounds = array<i64: 1, 8>}, {transform_indices = @transform_5, window_bounds = array<i64: 1, 2>}, {pipeline_mode = #tpu.pipeline_mode<synchronous>, transform_indices = @transform_6, window_bounds = array<i64: 256, 2>}, {transform_indices = @transform_7, window_bounds = array<i64: 1, 256, 8>}]} {
    %cst = arith.constant 0.000000e+00 : f32
    %0 = vector.broadcast %cst : f32 to vector<17x8xf32>
    %c0 = arith.constant 0 : index
    %c0_0 = arith.constant 0 : index
    %1 = vector.load %arg9[%c0, %c0_0] : memref<290x8xf32, #tpu.memory_space<vmem>>, vector<17x8xf32>
    tpu.vector_store %arg9[%c0, %c0_0], %0 {strides = array<i32>} : memref<290x8xf32, #tpu.memory_space<vmem>>, vector<17x8xf32>,
    %c273 = arith.constant 273 : index
    %c0_1 = arith.constant 0 : index
    %2 = vector.load %arg9[%c273, %c0_1] : memref<290x8xf32, #tpu.memory_space<vmem>>, vector<17x8xf32>
    tpu.vector_store %arg9[%c273, %c0_1], %0 {strides = array<i32>} : memref<290x8xf32, #tpu.memory_space<vmem>>, vector<17x8xf32>,
    %c0_2 = arith.constant 0 : index
    %c0_3 = arith.constant 0 : index
    %3 = vector.load %arg7[%c0_2, %c0_3] : memref<256x2xf32, #tpu.memory_space<vmem>>, vector<256x2xf32>
    %4 = vector.extract_strided_slice %3 {offsets = [0, 0], sizes = [256, 1], strides = [1, 1]} : vector<256x2xf32> to vector<256x1xf32>
    %5 = vector.extract_strided_slice %3 {offsets = [0, 1], sizes = [256, 1], strides = [1, 1]} : vector<256x2xf32> to vector<256x1xf32>
    %c0_4 = arith.constant 0 : index
    %c0_5 = arith.constant 0 : index
    %c0_6 = arith.constant 0 : index
    %6 = vector.load %arg1[%c0_4, %c0_5, %c0_6] : memref<1x256x8xf32, #tpu.memory_space<vmem>>, vector<1x256x8xf32>
    %7 = vector.shape_cast %6 : vector<1x256x8xf32> to vector<256x8xf32>
    %c17 = arith.constant 17 : index
    %c0_7 = arith.constant 0 : index
    %8 = vector.load %arg9[%c17, %c0_7] : memref<290x8xf32, #tpu.memory_space<vmem>>, vector<256x8xf32>
    tpu.vector_store %arg9[%c17, %c0_7], %7 {strides = array<i32>} : memref<290x8xf32, #tpu.memory_space<vmem>>, vector<256x8xf32>,
    %c0_8 = arith.constant 0 : index
    %c0_9 = arith.constant 0 : index
    %9 = memref.load %arg6[%c0_8, %c0_9] : memref<1x2xf32, #tpu.memory_space<smem>>
    %c0_10 = arith.constant 0 : index
    %c0_11 = arith.constant 0 : index
    %10 = vector.load %arg3[%c0_10, %c0_11] : memref<1x8xf32, #tpu.memory_space<vmem>>, vector<1x8xf32>
    %11 = vector.shape_cast %10 : vector<1x8xf32> to vector<1x8xf32>
    %12 = vector.broadcast %11 : vector<1x8xf32> to vector<256x8xf32>
    %c0_12 = arith.constant 0 : index
    %c0_13 = arith.constant 0 : index
    %13 = vector.load %arg9[%c0_12, %c0_13] : memref<290x8xf32, #tpu.memory_space<vmem>>, vector<256x8xf32>
    %14 = vector.broadcast %4 : vector<256x1xf32> to vector<256x8xf32>
    %15 = arith.mulf %13, %14 : vector<256x8xf32>
    %c0_14 = arith.constant 0 : index
    %c0_15 = arith.constant 0 : index
    %c0_16 = arith.constant 0 : index
    %16 = vector.load %arg2[%c0_14, %c0_15, %c0_16] : memref<9x8x8xf32, #tpu.memory_space<vmem>>, vector<1x8x8xf32>
    %17 = vector.shape_cast %16 : vector<1x8x8xf32> to vector<8x8xf32>
    %cst_17 = arith.constant dense<0.000000e+00> : vector<256x8xf32>
    %18 = tpu.matmul %15, %17, %cst_17 {dimension_numbers = #tpu.dot_dimension_numbers<[1], [0], [0], [1], [0, 0, 1, 1], [], []>} : vector<256x8xf32>, vector<8x8xf32>, vector<256x8xf32> -> vector<256x8xf32>
    %19 = arith.addf %12, %18 : vector<256x8xf32>
    %c1 = arith.constant 1 : index
    %c0_18 = arith.constant 0 : index
    %20 = vector.load %arg9[%c1, %c0_18] : memref<290x8xf32, #tpu.memory_space<vmem>>, vector<256x8xf32>
    %c1_19 = arith.constant 1 : index
    %c0_20 = arith.constant 0 : index
    %c0_21 = arith.constant 0 : index
    %21 = vector.load %arg2[%c1_19, %c0_20, %c0_21] : memref<9x8x8xf32, #tpu.memory_space<vmem>>, vector<1x8x8xf32>
    %22 = vector.shape_cast %21 : vector<1x8x8xf32> to vector<8x8xf32>
    %cst_22 = arith.constant dense<0.000000e+00> : vector<256x8xf32>
    %23 = tpu.matmul %20, %22, %cst_22 {dimension_numbers = #tpu.dot_dimension_numbers<[1], [0], [0], [1], [0, 0, 1, 1], [], []>} : vector<256x8xf32>, vector<8x8xf32>, vector<256x8xf32> -> vector<256x8xf32>
    %24 = arith.addf %19, %23 : vector<256x8xf32>
    %c2 = arith.constant 2 : index
    %c0_23 = arith.constant 0 : index
    %25 = vector.load %arg9[%c2, %c0_23] : memref<290x8xf32, #tpu.memory_space<vmem>>, vector<256x8xf32>
    %26 = vector.broadcast %5 : vector<256x1xf32> to vector<256x8xf32>
    %27 = arith.mulf %25, %26 : vector<256x8xf32>
    %c2_24 = arith.constant 2 : index
    %c0_25 = arith.constant 0 : index
    %c0_26 = arith.constant 0 : index
    %28 = vector.load %arg2[%c2_24, %c0_25, %c0_26] : memref<9x8x8xf32, #tpu.memory_space<vmem>>, vector<1x8x8xf32>
    %29 = vector.shape_cast %28 : vector<1x8x8xf32> to vector<8x8xf32>
    %cst_27 = arith.constant dense<0.000000e+00> : vector<256x8xf32>
    %30 = tpu.matmul %27, %29, %cst_27 {dimension_numbers = #tpu.dot_dimension_numbers<[1], [0], [0], [1], [0, 0, 1, 1], [], []>} : vector<256x8xf32>, vector<8x8xf32>, vector<256x8xf32> -> vector<256x8xf32>
    %31 = arith.addf %24, %30 : vector<256x8xf32>
    %c16 = arith.constant 16 : index
    %c0_28 = arith.constant 0 : index
    %32 = vector.load %arg9[%c16, %c0_28] : memref<290x8xf32, #tpu.memory_space<vmem>>, vector<256x8xf32>
    %33 = vector.broadcast %4 : vector<256x1xf32> to vector<256x8xf32>
    %34 = arith.mulf %32, %33 : vector<256x8xf32>
    %c3 = arith.constant 3 : index
    %c0_29 = arith.constant 0 : index
    %c0_30 = arith.constant 0 : index
    %35 = vector.load %arg2[%c3, %c0_29, %c0_30] : memref<9x8x8xf32, #tpu.memory_space<vmem>>, vector<1x8x8xf32>
    %36 = vector.shape_cast %35 : vector<1x8x8xf32> to vector<8x8xf32>
    %cst_31 = arith.constant dense<0.000000e+00> : vector<256x8xf32>
    %37 = tpu.matmul %34, %36, %cst_31 {dimension_numbers = #tpu.dot_dimension_numbers<[1], [0], [0], [1], [0, 0, 1, 1], [], []>} : vector<256x8xf32>, vector<8x8xf32>, vector<256x8xf32> -> vector<256x8xf32>
    %38 = arith.addf %31, %37 : vector<256x8xf32>
    %c17_32 = arith.constant 17 : index
    %c0_33 = arith.constant 0 : index
    %39 = vector.load %arg9[%c17_32, %c0_33] : memref<290x8xf32, #tpu.memory_space<vmem>>, vector<256x8xf32>
    %c4 = arith.constant 4 : index
    %c0_34 = arith.constant 0 : index
    %c0_35 = arith.constant 0 : index
    %40 = vector.load %arg2[%c4, %c0_34, %c0_35] : memref<9x8x8xf32, #tpu.memory_space<vmem>>, vector<1x8x8xf32>
    %41 = vector.shape_cast %40 : vector<1x8x8xf32> to vector<8x8xf32>
    %cst_36 = arith.constant dense<0.000000e+00> : vector<256x8xf32>
    %42 = tpu.matmul %39, %41, %cst_36 {dimension_numbers = #tpu.dot_dimension_numbers<[1], [0], [0], [1], [0, 0, 1, 1], [], []>} : vector<256x8xf32>, vector<8x8xf32>, vector<256x8xf32> -> vector<256x8xf32>
    %43 = arith.addf %38, %42 : vector<256x8xf32>
    %c18 = arith.constant 18 : index
    %c0_37 = arith.constant 0 : index
    %44 = vector.load %arg9[%c18, %c0_37] : memref<290x8xf32, #tpu.memory_space<vmem>>, vector<256x8xf32>
    %45 = vector.broadcast %5 : vector<256x1xf32> to vector<256x8xf32>
    %46 = arith.mulf %44, %45 : vector<256x8xf32>
    %c5 = arith.constant 5 : index
    %c0_38 = arith.constant 0 : index
    %c0_39 = arith.constant 0 : index
    %47 = vector.load %arg2[%c5, %c0_38, %c0_39] : memref<9x8x8xf32, #tpu.memory_space<vmem>>, vector<1x8x8xf32>
    %48 = vector.shape_cast %47 : vector<1x8x8xf32> to vector<8x8xf32>
    %cst_40 = arith.constant dense<0.000000e+00> : vector<256x8xf32>
    %49 = tpu.matmul %46, %48, %cst_40 {dimension_numbers = #tpu.dot_dimension_numbers<[1], [0], [0], [1], [0, 0, 1, 1], [], []>} : vector<256x8xf32>, vector<8x8xf32>, vector<256x8xf32> -> vector<256x8xf32>
    %50 = arith.addf %43, %49 : vector<256x8xf32>
    %c32 = arith.constant 32 : index
    %c0_41 = arith.constant 0 : index
    %51 = vector.load %arg9[%c32, %c0_41] : memref<290x8xf32, #tpu.memory_space<vmem>>, vector<256x8xf32>
    %52 = vector.broadcast %4 : vector<256x1xf32> to vector<256x8xf32>
    %53 = arith.mulf %51, %52 : vector<256x8xf32>
    %c6 = arith.constant 6 : index
    %c0_42 = arith.constant 0 : index
    %c0_43 = arith.constant 0 : index
    %54 = vector.load %arg2[%c6, %c0_42, %c0_43] : memref<9x8x8xf32, #tpu.memory_space<vmem>>, vector<1x8x8xf32>
    %55 = vector.shape_cast %54 : vector<1x8x8xf32> to vector<8x8xf32>
    %cst_44 = arith.constant dense<0.000000e+00> : vector<256x8xf32>
    %56 = tpu.matmul %53, %55, %cst_44 {dimension_numbers = #tpu.dot_dimension_numbers<[1], [0], [0], [1], [0, 0, 1, 1], [], []>} : vector<256x8xf32>, vector<8x8xf32>, vector<256x8xf32> -> vector<256x8xf32>
    %57 = arith.addf %50, %56 : vector<256x8xf32>
    %c33 = arith.constant 33 : index
    %c0_45 = arith.constant 0 : index
    %58 = vector.load %arg9[%c33, %c0_45] : memref<290x8xf32, #tpu.memory_space<vmem>>, vector<256x8xf32>
    %c7 = arith.constant 7 : index
    %c0_46 = arith.constant 0 : index
    %c0_47 = arith.constant 0 : index
    %59 = vector.load %arg2[%c7, %c0_46, %c0_47] : memref<9x8x8xf32, #tpu.memory_space<vmem>>, vector<1x8x8xf32>
    %60 = vector.shape_cast %59 : vector<1x8x8xf32> to vector<8x8xf32>
    %cst_48 = arith.constant dense<0.000000e+00> : vector<256x8xf32>
    %61 = tpu.matmul %58, %60, %cst_48 {dimension_numbers = #tpu.dot_dimension_numbers<[1], [0], [0], [1], [0, 0, 1, 1], [], []>} : vector<256x8xf32>, vector<8x8xf32>, vector<256x8xf32> -> vector<256x8xf32>
    %62 = arith.addf %57, %61 : vector<256x8xf32>
    %c34 = arith.constant 34 : index
    %c0_49 = arith.constant 0 : index
    %63 = vector.load %arg9[%c34, %c0_49] : memref<290x8xf32, #tpu.memory_space<vmem>>, vector<256x8xf32>
    %64 = vector.broadcast %5 : vector<256x1xf32> to vector<256x8xf32>
    %65 = arith.mulf %63, %64 : vector<256x8xf32>
    %c8 = arith.constant 8 : index
    %c0_50 = arith.constant 0 : index
    %c0_51 = arith.constant 0 : index
    %66 = vector.load %arg2[%c8, %c0_50, %c0_51] : memref<9x8x8xf32, #tpu.memory_space<vmem>>, vector<1x8x8xf32>
    %67 = vector.shape_cast %66 : vector<1x8x8xf32> to vector<8x8xf32>
    %cst_52 = arith.constant dense<0.000000e+00> : vector<256x8xf32>
    %68 = tpu.matmul %65, %67, %cst_52 {dimension_numbers = #tpu.dot_dimension_numbers<[1], [0], [0], [1], [0, 0, 1, 1], [], []>} : vector<256x8xf32>, vector<8x8xf32>, vector<256x8xf32> -> vector<256x8xf32>
    %69 = arith.addf %62, %68 : vector<256x8xf32>
    %cst_53 = arith.constant 0.000000e+00 : f32
    %70 = vector.broadcast %cst_53 : f32 to vector<256x8xf32>
    %71 = arith.cmpf ogt, %69, %70 : vector<256x8xf32>
    %72 = vector.broadcast %9 : f32 to vector<256x8xf32>
    %73 = arith.mulf %72, %69 : vector<256x8xf32>
    %74 = arith.select %71, %69, %73 : vector<256x8xi1>, vector<256x8xf32>
    %c17_54 = arith.constant 17 : index
    %c0_55 = arith.constant 0 : index
    %75 = vector.load %arg9[%c17_54, %c0_55] : memref<290x8xf32, #tpu.memory_space<vmem>>, vector<256x8xf32>
    tpu.vector_store %arg9[%c17_54, %c0_55], %74 {strides = array<i32>} : memref<290x8xf32, #tpu.memory_space<vmem>>, vector<256x8xf32>,
    %c0_56 = arith.constant 0 : index
    %c1_57 = arith.constant 1 : index
    %76 = memref.load %arg6[%c0_56, %c1_57] : memref<1x2xf32, #tpu.memory_space<smem>>
    %c0_58 = arith.constant 0 : index
    %c0_59 = arith.constant 0 : index
    %77 = vector.load %arg5[%c0_58, %c0_59] : memref<1x8xf32, #tpu.memory_space<vmem>>, vector<1x8xf32>
    %78 = vector.shape_cast %77 : vector<1x8xf32> to vector<1x8xf32>
    %79 = vector.broadcast %78 : vector<1x8xf32> to vector<256x8xf32>
    %c0_60 = arith.constant 0 : index
    %c0_61 = arith.constant 0 : index
    %80 = vector.load %arg9[%c0_60, %c0_61] : memref<290x8xf32, #tpu.memory_space<vmem>>, vector<256x8xf32>
    %81 = vector.broadcast %4 : vector<256x1xf32> to vector<256x8xf32>
    %82 = arith.mulf %80, %81 : vector<256x8xf32>
    %c0_62 = arith.constant 0 : index
    %c0_63 = arith.constant 0 : index
    %c0_64 = arith.constant 0 : index
    %83 = vector.load %arg4[%c0_62, %c0_63, %c0_64] : memref<9x8x8xf32, #tpu.memory_space<vmem>>, vector<1x8x8xf32>
    %84 = vector.shape_cast %83 : vector<1x8x8xf32> to vector<8x8xf32>
    %cst_65 = arith.constant dense<0.000000e+00> : vector<256x8xf32>
    %85 = tpu.matmul %82, %84, %cst_65 {dimension_numbers = #tpu.dot_dimension_numbers<[1], [0], [0], [1], [0, 0, 1, 1], [], []>} : vector<256x8xf32>, vector<8x8xf32>, vector<256x8xf32> -> vector<256x8xf32>
    %86 = arith.addf %79, %85 : vector<256x8xf32>
    %c1_66 = arith.constant 1 : index
    %c0_67 = arith.constant 0 : index
    %87 = vector.load %arg9[%c1_66, %c0_67] : memref<290x8xf32, #tpu.memory_space<vmem>>, vector<256x8xf32>
    %c1_68 = arith.constant 1 : index
    %c0_69 = arith.constant 0 : index
    %c0_70 = arith.constant 0 : index
    %88 = vector.load %arg4[%c1_68, %c0_69, %c0_70] : memref<9x8x8xf32, #tpu.memory_space<vmem>>, vector<1x8x8xf32>
    %89 = vector.shape_cast %88 : vector<1x8x8xf32> to vector<8x8xf32>
    %cst_71 = arith.constant dense<0.000000e+00> : vector<256x8xf32>
    %90 = tpu.matmul %87, %89, %cst_71 {dimension_numbers = #tpu.dot_dimension_numbers<[1], [0], [0], [1], [0, 0, 1, 1], [], []>} : vector<256x8xf32>, vector<8x8xf32>, vector<256x8xf32> -> vector<256x8xf32>
    %91 = arith.addf %86, %90 : vector<256x8xf32>
    %c2_72 = arith.constant 2 : index
    %c0_73 = arith.constant 0 : index
    %92 = vector.load %arg9[%c2_72, %c0_73] : memref<290x8xf32, #tpu.memory_space<vmem>>, vector<256x8xf32>
    %93 = vector.broadcast %5 : vector<256x1xf32> to vector<256x8xf32>
    %94 = arith.mulf %92, %93 : vector<256x8xf32>
    %c2_74 = arith.constant 2 : index
    %c0_75 = arith.constant 0 : index
    %c0_76 = arith.constant 0 : index
    %95 = vector.load %arg4[%c2_74, %c0_75, %c0_76] : memref<9x8x8xf32, #tpu.memory_space<vmem>>, vector<1x8x8xf32>
    %96 = vector.shape_cast %95 : vector<1x8x8xf32> to vector<8x8xf32>
    %cst_77 = arith.constant dense<0.000000e+00> : vector<256x8xf32>
    %97 = tpu.matmul %94, %96, %cst_77 {dimension_numbers = #tpu.dot_dimension_numbers<[1], [0], [0], [1], [0, 0, 1, 1], [], []>} : vector<256x8xf32>, vector<8x8xf32>, vector<256x8xf32> -> vector<256x8xf32>
    %98 = arith.addf %91, %97 : vector<256x8xf32>
    %c16_78 = arith.constant 16 : index
    %c0_79 = arith.constant 0 : index
    %99 = vector.load %arg9[%c16_78, %c0_79] : memref<290x8xf32, #tpu.memory_space<vmem>>, vector<256x8xf32>
    %100 = vector.broadcast %4 : vector<256x1xf32> to vector<256x8xf32>
    %101 = arith.mulf %99, %100 : vector<256x8xf32>
    %c3_80 = arith.constant 3 : index
    %c0_81 = arith.constant 0 : index
    %c0_82 = arith.constant 0 : index
    %102 = vector.load %arg4[%c3_80, %c0_81, %c0_82] : memref<9x8x8xf32, #tpu.memory_space<vmem>>, vector<1x8x8xf32>
    %103 = vector.shape_cast %102 : vector<1x8x8xf32> to vector<8x8xf32>
    %cst_83 = arith.constant dense<0.000000e+00> : vector<256x8xf32>
    %104 = tpu.matmul %101, %103, %cst_83 {dimension_numbers = #tpu.dot_dimension_numbers<[1], [0], [0], [1], [0, 0, 1, 1], [], []>} : vector<256x8xf32>, vector<8x8xf32>, vector<256x8xf32> -> vector<256x8xf32>
    %105 = arith.addf %98, %104 : vector<256x8xf32>
    %c17_84 = arith.constant 17 : index
    %c0_85 = arith.constant 0 : index
    %106 = vector.load %arg9[%c17_84, %c0_85] : memref<290x8xf32, #tpu.memory_space<vmem>>, vector<256x8xf32>
    %c4_86 = arith.constant 4 : index
    %c0_87 = arith.constant 0 : index
    %c0_88 = arith.constant 0 : index
    %107 = vector.load %arg4[%c4_86, %c0_87, %c0_88] : memref<9x8x8xf32, #tpu.memory_space<vmem>>, vector<1x8x8xf32>
    %108 = vector.shape_cast %107 : vector<1x8x8xf32> to vector<8x8xf32>
    %cst_89 = arith.constant dense<0.000000e+00> : vector<256x8xf32>
    %109 = tpu.matmul %106, %108, %cst_89 {dimension_numbers = #tpu.dot_dimension_numbers<[1], [0], [0], [1], [0, 0, 1, 1], [], []>} : vector<256x8xf32>, vector<8x8xf32>, vector<256x8xf32> -> vector<256x8xf32>
    %110 = arith.addf %105, %109 : vector<256x8xf32>
    %c18_90 = arith.constant 18 : index
    %c0_91 = arith.constant 0 : index
    %111 = vector.load %arg9[%c18_90, %c0_91] : memref<290x8xf32, #tpu.memory_space<vmem>>, vector<256x8xf32>
    %112 = vector.broadcast %5 : vector<256x1xf32> to vector<256x8xf32>
    %113 = arith.mulf %111, %112 : vector<256x8xf32>
    %c5_92 = arith.constant 5 : index
    %c0_93 = arith.constant 0 : index
    %c0_94 = arith.constant 0 : index
    %114 = vector.load %arg4[%c5_92, %c0_93, %c0_94] : memref<9x8x8xf32, #tpu.memory_space<vmem>>, vector<1x8x8xf32>
    %115 = vector.shape_cast %114 : vector<1x8x8xf32> to vector<8x8xf32>
    %cst_95 = arith.constant dense<0.000000e+00> : vector<256x8xf32>
    %116 = tpu.matmul %113, %115, %cst_95 {dimension_numbers = #tpu.dot_dimension_numbers<[1], [0], [0], [1], [0, 0, 1, 1], [], []>} : vector<256x8xf32>, vector<8x8xf32>, vector<256x8xf32> -> vector<256x8xf32>
    %117 = arith.addf %110, %116 : vector<256x8xf32>
    %c32_96 = arith.constant 32 : index
    %c0_97 = arith.constant 0 : index
    %118 = vector.load %arg9[%c32_96, %c0_97] : memref<290x8xf32, #tpu.memory_space<vmem>>, vector<256x8xf32>
    %119 = vector.broadcast %4 : vector<256x1xf32> to vector<256x8xf32>
    %120 = arith.mulf %118, %119 : vector<256x8xf32>
    %c6_98 = arith.constant 6 : index
    %c0_99 = arith.constant 0 : index
    %c0_100 = arith.constant 0 : index
    %121 = vector.load %arg4[%c6_98, %c0_99, %c0_100] : memref<9x8x8xf32, #tpu.memory_space<vmem>>, vector<1x8x8xf32>
    %122 = vector.shape_cast %121 : vector<1x8x8xf32> to vector<8x8xf32>
    %cst_101 = arith.constant dense<0.000000e+00> : vector<256x8xf32>
    %123 = tpu.matmul %120, %122, %cst_101 {dimension_numbers = #tpu.dot_dimension_numbers<[1], [0], [0], [1], [0, 0, 1, 1], [], []>} : vector<256x8xf32>, vector<8x8xf32>, vector<256x8xf32> -> vector<256x8xf32>
    %124 = arith.addf %117, %123 : vector<256x8xf32>
    %c33_102 = arith.constant 33 : index
    %c0_103 = arith.constant 0 : index
    %125 = vector.load %arg9[%c33_102, %c0_103] : memref<290x8xf32, #tpu.memory_space<vmem>>, vector<256x8xf32>
    %c7_104 = arith.constant 7 : index
    %c0_105 = arith.constant 0 : index
    %c0_106 = arith.constant 0 : index
    %126 = vector.load %arg4[%c7_104, %c0_105, %c0_106] : memref<9x8x8xf32, #tpu.memory_space<vmem>>, vector<1x8x8xf32>
    %127 = vector.shape_cast %126 : vector<1x8x8xf32> to vector<8x8xf32>
    %cst_107 = arith.constant dense<0.000000e+00> : vector<256x8xf32>
    %128 = tpu.matmul %125, %127, %cst_107 {dimension_numbers = #tpu.dot_dimension_numbers<[1], [0], [0], [1], [0, 0, 1, 1], [], []>} : vector<256x8xf32>, vector<8x8xf32>, vector<256x8xf32> -> vector<256x8xf32>
    %129 = arith.addf %124, %128 : vector<256x8xf32>
    %c34_108 = arith.constant 34 : index
    %c0_109 = arith.constant 0 : index
    %130 = vector.load %arg9[%c34_108, %c0_109] : memref<290x8xf32, #tpu.memory_space<vmem>>, vector<256x8xf32>
    %131 = vector.broadcast %5 : vector<256x1xf32> to vector<256x8xf32>
    %132 = arith.mulf %130, %131 : vector<256x8xf32>
    %c8_110 = arith.constant 8 : index
    %c0_111 = arith.constant 0 : index
    %c0_112 = arith.constant 0 : index
    %133 = vector.load %arg4[%c8_110, %c0_111, %c0_112] : memref<9x8x8xf32, #tpu.memory_space<vmem>>, vector<1x8x8xf32>
    %134 = vector.shape_cast %133 : vector<1x8x8xf32> to vector<8x8xf32>
    %cst_113 = arith.constant dense<0.000000e+00> : vector<256x8xf32>
    %135 = tpu.matmul %132, %134, %cst_113 {dimension_numbers = #tpu.dot_dimension_numbers<[1], [0], [0], [1], [0, 0, 1, 1], [], []>} : vector<256x8xf32>, vector<8x8xf32>, vector<256x8xf32> -> vector<256x8xf32>
    %136 = arith.addf %129, %135 : vector<256x8xf32>
    %cst_114 = arith.constant 0.000000e+00 : f32
    %137 = vector.broadcast %cst_114 : f32 to vector<256x8xf32>
    %138 = arith.cmpf ogt, %136, %137 : vector<256x8xf32>
    %139 = vector.broadcast %76 : f32 to vector<256x8xf32>
    %140 = arith.mulf %139, %136 : vector<256x8xf32>
    %141 = arith.select %138, %136, %140 : vector<256x8xi1>, vector<256x8xf32>
    %c0_115 = arith.constant 0 : index
    %c0_116 = arith.constant 0 : index
    %c0_117 = arith.constant 0 : index
    %142 = vector.load %arg1[%c0_115, %c0_116, %c0_117] : memref<1x256x8xf32, #tpu.memory_space<vmem>>, vector<1x256x8xf32>
    %143 = vector.shape_cast %142 : vector<1x256x8xf32> to vector<256x8xf32>
    %144 = arith.addf %143, %141 : vector<256x8xf32>
    %c0_118 = arith.constant 0 : index
    %c0_119 = arith.constant 0 : index
    %c0_120 = arith.constant 0 : index
    %145 = vector.load %arg8[%c0_118, %c0_119, %c0_120] : memref<1x256x8xf32, #tpu.memory_space<vmem>>, vector<1x256x8xf32>
    %146 = vector.shape_cast %145 : vector<1x256x8xf32> to vector<256x8xf32>
    %147 = vector.shape_cast %144 : vector<256x8xf32> to vector<1x256x8xf32>
    tpu.vector_store %arg8[%c0_118, %c0_119, %c0_120], %147 {strides = array<i32>} : memref<1x256x8xf32, #tpu.memory_space<vmem>>, vector<1x256x8xf32>,
    return
  }
  func.func @transform_0(%arg0: i32) -> (i32, i32, i32) {
    %c0_i32 = arith.constant 0 : i32
    %c0_i32_0 = arith.constant 0 : i32
    %c0_i32_1 = arith.constant 0 : i32
    return %arg0, %c0_i32, %c0_i32_0 : i32, i32, i32
  }
  func.func @transform_1(%arg0: i32) -> (i32, i32, i32) {
    %c0_i32 = arith.constant 0 : i32
    %c0_i32_0 = arith.constant 0 : i32
    %c0_i32_1 = arith.constant 0 : i32
    %c0_i32_2 = arith.constant 0 : i32
    return %c0_i32, %c0_i32_0, %c0_i32_1 : i32, i32, i32
  }
  func.func @transform_2(%arg0: i32) -> (i32, i32) {
    %c0_i32 = arith.constant 0 : i32
    %c0_i32_0 = arith.constant 0 : i32
    %c0_i32_1 = arith.constant 0 : i32
    return %c0_i32, %c0_i32_0 : i32, i32
  }
  func.func @transform_3(%arg0: i32) -> (i32, i32, i32) {
    %c0_i32 = arith.constant 0 : i32
    %c0_i32_0 = arith.constant 0 : i32
    %c0_i32_1 = arith.constant 0 : i32
    %c0_i32_2 = arith.constant 0 : i32
    return %c0_i32, %c0_i32_0, %c0_i32_1 : i32, i32, i32
  }
  func.func @transform_4(%arg0: i32) -> (i32, i32) {
    %c0_i32 = arith.constant 0 : i32
    %c0_i32_0 = arith.constant 0 : i32
    %c0_i32_1 = arith.constant 0 : i32
    return %c0_i32, %c0_i32_0 : i32, i32
  }
  func.func @transform_5(%arg0: i32) -> (i32, i32) {
    %c0_i32 = arith.constant 0 : i32
    %c0_i32_0 = arith.constant 0 : i32
    %c0_i32_1 = arith.constant 0 : i32
    return %c0_i32, %c0_i32_0 : i32, i32
  }
  func.func @transform_6(%arg0: i32) -> (i32, i32) {
    %c0_i32 = arith.constant 0 : i32
    %c0_i32_0 = arith.constant 0 : i32
    %c0_i32_1 = arith.constant 0 : i32
    return %c0_i32, %c0_i32_0 : i32, i32
  }
  func.func @transform_7(%arg0: i32) -> (i32, i32, i32) {
    %c0_i32 = arith.constant 0 : i32
    %c0_i32_0 = arith.constant 0 : i32
    %c0_i32_1 = arith.constant 0 : i32
    return %arg0, %c0_i32, %c0_i32_0 : i32, i32, i32
  }
}

</mosaic_0001>

<bundles_post_ra>
// kernel: tpu_custom_call.1
= control target key start
LH: loop header
LB: loop body
LE: loop exit
PB: predicated region body
PF: predicated region fallthrough
CT: control target
= control target key end

     0   :  { %12 = vsyncpa [#allocation4], 0  ;;  %s10644_s24 = smov 0   ;;  %s14303_s0 = inlined_call_operand.vmem [shape: f32[2,256,8], index: 0, kind: input, shape index: {}]   ;;  %s14304_s1 = inlined_call_operand.vmem [shape: f32[9,8,8], index: 1, kind: input, shape index: {}]   ;;  %s14305_s2 = inlined_call_operand.vmem [shape: f32[1,8], index: 2, kind: input, shape index: {}]   ;;  %s14306_s3 = inlined_call_operand.vmem [shape: f32[9,8,8], index: 3, kind: input, shape index: {}]   ;;  %s14307_s4 = inlined_call_operand.vmem [shape: f32[1,8], index: 4, kind: input, shape index: {}]   ;;  %s14308_s5 = inlined_call_operand.vmem [shape: f32[1,2], index: 5, kind: input, shape index: {}]   ;;  %s14309_s6 = inlined_call_operand.vmem [shape: f32[256,2], index: 6, kind: input, shape index: {}]   ;;  %s14310_s7 = inlined_call_operand.vmem [shape: f32[2,256,8], index: 7, kind: output, shape index: {}]  }
   0x1 LB: > { %s10650_s25 = sadd.s32 4294967295, %s10598_s24   ;;  %p8440_p0 = scmp.ge.s32.totalorder %s10598_s24, 1  ;;  %s10598_s24 = sphi %s10644_s24, %s18_s24  }
   0x2   : > { %p201_p1 = scmp.lt.s32.totalorder %s10598_s24, 3  ;;  %s226_s28 = sshll.u32 %s14308_s5, 4  ;;  %s227_s28 = int_to_ptr.vmem [resolvable:$true] %s226_s28 }
   0x3   : > { %p10550_p3 = scmp.eq.s32.totalorder %s10650_s25, 0  ;;  %s10573_s30 = scalar_lea.vmem %s227_s28, 16 }
   0x4   : > { %p10657_p2 = pnand %p8440_p0, %p201_p1  ;;  %p10574_p6 = scmp.ne.s32.totalorder %s227_s28, %s10573_s30 }
   0x5   : > { %p10581_p10 = scmp.lt.s32.totalorder %s227_s28, %s227_s28  ;;  %p10582_p11 = scmp.lt.s32.totalorder %s10573_s30, %s10573_s30 }
   0x6   : > { %p10546_p4 = pneg %p10657_p2 }
   0x7   : > { %p10583_p12 = por %p10582_p11, %p10581_p10 }
   0x8   : > { %p10547_p5 = pnand %p10550_p3, %p10546_p4 }
   0xa   : > { %p10575_p7 = pneg %p10547_p5 }
   0xc   : > { %p10576_p8 = pnand %p10575_p7, %p10574_p6 }
   0xe   : > { %p10577_p9 = pneg %p10576_p8 }
  0x10   : > { %p10584_p13 = pnand %p10583_p12, %p10577_p9 }
  0x12   : > { %10587 = shalt.err (!%p10584_p13)
}
  0x13   : > { %s10600_s8 = smov [#allocation3]   ;;  %250 = sbr.rel (%p10657_p2) target bundleno = 1147 (0x47b), region = 48 }
  0x14   : > { %10549 = dma.vmem_to_smem (!%p10547_p5), %s227_s28, 16, %s10600_s8, [#allocation4]  }
  0x18   : > { %10593 = dma.done.wait (%p10550_p3), [#allocation4], 16  }
  0x19   : > { %10595 = vsyncadd (%p10550_p3), [#allocation4], 4294967280 }
  0x1a   : > { %256 = sfence }
  0x1b   : > { %v10675_v0 = vld [vmem:[%s14309_s6 + $0x10] sm:$0xff]  ;;  %v10680_v1 = vld [vmem:[%s14309_s6] sm:$0xff]  ;;  %vm293_vm0 = vcmask 64512   ;;  %v10601_v2 = vmov 0   ;;  %vm296_vm1 = vcmask 57344   ;;  %p283_p0 = scmp.lt.s32.totalorder %s10650_s25, 1 }
  0x1c   : > { %10565 = vset.pattern.permute.xlu1 %v10601_v2  ;;  %10564 = vset.pattern.permute.xlu0 %v10601_v2  ;;  %v10602_v3 = vmov 0.0   ;;  %v10692_v4 = vld [vmem:[%s14309_s6 + $0x18] sm:$0xff]  ;;  %v10697_v5 = vld [vmem:[%s14309_s6 + $0x8] sm:$0xff]  ;;  %v10713_v7 = vld [vmem:[%s14309_s6 + $0x20] sm:$0xff]  ;;  %s12384_s10 = sld [smem:[#allocation3]] }
  0x1d   : > { %449 = vperm.xlu1 %10565, %v10675_v0   ;;  %439 = vperm.xlu0 %10564, %v10680_v1   ;;  %294 = vst.msk [vmem:[#allocation2] sm:$0xff] %vm293_vm0, %v10602_v3  ;;  %295 = vst.msk [vmem:[#allocation2 + $0x8] sm:$0xff] %vm293_vm0, %v10602_v3  ;;  %s15209_s25 = smov (!%p283_p0, %s10650_s25), 1  ;;  %v10708_v6 = vld [vmem:[%s14309_s6 + $0x28] sm:$0xff]  ;;  %v10727_v8 = vld [vmem:[%s14309_s6 + $0x38] sm:$0xff]  ;;  %s8746_s29 = sld [smem:[#allocation3 + $0x1]] }
  0x1e   : > { %298 = vst.msk [vmem:[#allocation2 + $0x111] sm:$0xff] %vm293_vm0, %v10602_v3  ;;  %299 = vst.msk [vmem:[#allocation2 + $0x119] sm:$0xff] %vm293_vm0, %v10602_v3  ;;  %s9046_s17 = sshll.u32 %s15209_s25, 8  ;;  %v10732_v9 = vld [vmem:[%s14309_s6 + $0x30] sm:$0xff]  ;;  %v8482_v10 = vld [vmem:[%s14304_s1 + $0x8] sm:$0xff] }
  0x1f   : > { %297 = vst.msk [vmem:[#allocation2 + $0x10] sm:$0x1] %vm296_vm1, %v10602_v3  ;;  %300 = vst.msk [vmem:[#allocation2 + $0x121] sm:$0x1] %vm296_vm1, %v10602_v3  ;;  %s10720_s26 = scalar_lea.vmem %s14303_s0, %s9046_s17  ;;  %9692 = vmatprep.subr.mxu1 %v8482_v10  ;;  %v10746_v17 = vld [vmem:[%s14309_s6 + $0x48] sm:$0xff]  ;;  %v10751_v18 = vld [vmem:[%s14309_s6 + $0x40] sm:$0xff]  ;;  %s14055_s9 = scalar_lea.vmem %s14310_s7, %s9046_s17 }
  0x20   : > { %v333_v13 = vld [vmem:[%s10720_s26] sm:$0xff]  ;;  %9693 = vmatpush3.msra.mxu1 %v8482_v10  ;;  %v334_v14 = vld [vmem:[%s10720_s26 + $0x8] sm:$0xff]  ;;  %v335_v15 = vld [vmem:[%s10720_s26 + $0x10] sm:$0xff] }
  0x21   : > { %454 = vperm.xlu1 %10565, %v10692_v4   ;;  %444 = vperm.xlu0 %10564, %v10697_v5   ;;  %365 = vst.msk [vmem:[#allocation2 + $0x11] sm:$0xff] %vm293_vm0, %v333_v13  ;;  %v336_v16 = vld [vmem:[%s10720_s26 + $0x18] sm:$0xff]  ;;  %366 = vst.msk [vmem:[#allocation2 + $0x19] sm:$0xff] %vm293_vm0, %v334_v14  ;;  %v337_v19 = vld [vmem:[%s10720_s26 + $0x20] sm:$0xff] }
  0x22   : > { %367 = vst.msk [vmem:[#allocation2 + $0x21] sm:$0xff] %vm293_vm0, %v335_v15  ;;  %368 = vst.msk [vmem:[#allocation2 + $0x29] sm:$0xff] %vm293_vm0, %v336_v16  ;;  %v338_v20 = vld [vmem:[%s10720_s26 + $0x28] sm:$0xff]  ;;  %v339_v21 = vld [vmem:[%s10720_s26 + $0x30] sm:$0xff] }
  0x23   : > { %369 = vst.msk [vmem:[#allocation2 + $0x31] sm:$0xff] %vm293_vm0, %v337_v19  ;;  %370 = vst.msk [vmem:[#allocation2 + $0x39] sm:$0xff] %vm293_vm0, %v338_v20  ;;  %v340_v22 = vld [vmem:[%s10720_s26 + $0x38] sm:$0xff]  ;;  %v341_v23 = vld [vmem:[%s10720_s26 + $0x40] sm:$0xff] }
  0x24   : > { %v983_v11 = vld [vmem:[#allocation2 + $0x1] sm:$0xff]  ;;  %371 = vst.msk [vmem:[#allocation2 + $0x41] sm:$0xff] %vm293_vm0, %v339_v21  ;;  %372 = vst.msk [vmem:[#allocation2 + $0x49] sm:$0xff] %vm293_vm0, %v340_v22  ;;  %v343_v25 = vld [vmem:[%s10720_s26 + $0x50] sm:$0xff] }
  0x25   : > { %464 = vperm.xlu1 %10565, %v10708_v6   ;;  %459 = vperm.xlu0 %10564, %v10713_v7   ;;  %v342_v24 = vld [vmem:[%s10720_s26 + $0x48] sm:$0xff]  ;;  %373 = vst.msk [vmem:[#allocation2 + $0x51] sm:$0xff] %vm293_vm0, %v341_v23  ;;  %v344_v26 = vld [vmem:[%s10720_s26 + $0x58] sm:$0xff]  ;;  %v345_v27 = vld [vmem:[%s10720_s26 + $0x60] sm:$0xff] }
  0x26   : > { %v984_v12 = vld [vmem:[#allocation2 + $0x9] sm:$0xff]  ;;  %9694 = vmatprep.mubr.msk.f32.mxu1 %vm293_vm0, %v983_v11  ;;  %374 = vst.msk [vmem:[#allocation2 + $0x59] sm:$0xff] %vm293_vm0, %v342_v24  ;;  %375 = vst.msk [vmem:[#allocation2 + $0x61] sm:$0xff] %vm293_vm0, %v343_v25  ;;  %v348_v30 = vld [vmem:[%s10720_s26 + $0x78] sm:$0xff] }
  0x27   : > { %9695 = vmatmul.mubr.msk.f32.vlgmr.msra.gmra.mxu1 %vm293_vm0, %v984_v12  ;;  %376 = vst.msk [vmem:[#allocation2 + $0x69] sm:$0xff] %vm293_vm0, %v344_v26  ;;  %377 = vst.msk [vmem:[#allocation2 + $0x71] sm:$0xff] %vm293_vm0, %v345_v27  ;;  %v346_v28 = vld [vmem:[%s10720_s26 + $0x68] sm:$0xff]  ;;  %v347_v29 = vld [vmem:[%s10720_s26 + $0x70] sm:$0xff] }
  0x28   : > { %v10783_v31 = vld [vmem:[%s14309_s6 + $0x58] sm:$0xff]  ;;  %v10788_v32 = vld [vmem:[%s14309_s6 + $0x50] sm:$0xff]  ;;  %378 = vst.msk [vmem:[#allocation2 + $0x79] sm:$0xff] %vm293_vm0, %v346_v28  ;;  %379 = vst.msk [vmem:[#allocation2 + $0x81] sm:$0xff] %vm293_vm0, %v347_v29 }
  0x29   : > { %474 = vperm.xlu1 %10565, %v10727_v8   ;;  %469 = vperm.xlu0 %10564, %v10732_v9   ;;  %380 = vst.msk [vmem:[#allocation2 + $0x89] sm:$0xff] %vm293_vm0, %v348_v30  ;;  %v349_v33 = vld [vmem:[%s10720_s26 + $0x80] sm:$0xff]  ;;  %v350_v34 = vld [vmem:[%s10720_s26 + $0x88] sm:$0xff]  ;;  %v351_v35 = vld [vmem:[%s10720_s26 + $0x90] sm:$0xff] }
  0x2a   : > { %381 = vst.msk [vmem:[#allocation2 + $0x91] sm:$0xff] %vm293_vm0, %v349_v33  ;;  %382 = vst.msk [vmem:[#allocation2 + $0x99] sm:$0xff] %vm293_vm0, %v350_v34  ;;  %v352_v36 = vld [vmem:[%s10720_s26 + $0x98] sm:$0xff]  ;;  %v353_v37 = vld [vmem:[%s10720_s26 + $0xa0] sm:$0xff] }
  0x2b   : > { %383 = vst.msk [vmem:[#allocation2 + $0xa1] sm:$0xff] %vm293_vm0, %v351_v35  ;;  %v354_v38 = vld [vmem:[%s10720_s26 + $0xa8] sm:$0xff]  ;;  %v985_v39 = vld [vmem:[#allocation2 + $0x11] sm:$0xff]  ;;  %384 = vst.msk [vmem:[#allocation2 + $0xa9] sm:$0xff] %vm293_vm0, %v352_v36 }
  0x2c   : > { %385 = vst.msk [vmem:[#allocation2 + $0xb1] sm:$0xff] %vm293_vm0, %v353_v37  ;;  %386 = vst.msk [vmem:[#allocation2 + $0xb9] sm:$0xff] %vm293_vm0, %v354_v38  ;;  %v355_v40 = vld [vmem:[%s10720_s26 + $0xb0] sm:$0xff]  ;;  %v356_v41 = vld [vmem:[%s10720_s26 + $0xb8] sm:$0xff]  ;;  %9697 = vmatprep.mubr.msk.f32.mxu1 %vm293_vm0, %v985_v39 }
  0x2d   : > { %484 = vperm.xlu1 %10565, %v10746_v17   ;;  %479 = vperm.xlu0 %10564, %v10751_v18   ;;  %v986_v42 = vld [vmem:[#allocation2 + $0x19] sm:$0xff]  ;;  %v987_v43 = vld [vmem:[#allocation2 + $0x21] sm:$0xff]  ;;  %387 = vst.msk [vmem:[#allocation2 + $0xc1] sm:$0xff] %vm293_vm0, %v355_v40  ;;  %388 = vst.msk [vmem:[#allocation2 + $0xc9] sm:$0xff] %vm293_vm0, %v356_v41 }
  0x2e   : > { %9698 = vmatmul.mubr.msk.f32.gmra.mxu1 %vm293_vm0, %v986_v42  ;;  %v988_v44 = vld [vmem:[#allocation2 + $0x29] sm:$0xff]  ;;  %v10823_v46 = vld [vmem:[%s14309_s6 + $0x60] sm:$0xff]  ;;  %v989_v47 = vld [vmem:[#allocation2 + $0x31] sm:$0xff] }
  0x2f   : > { %v10818_v45 = vld [vmem:[%s14309_s6 + $0x68] sm:$0xff]  ;;  %9700 = vmatprep.mubr.msk.f32.mxu1 %vm293_vm0, %v987_v43  ;;  %v10832_v48 = vld [vmem:[%s14309_s6 + $0x78] sm:$0xff]  ;;  %v10837_v50 = vld [vmem:[%s14309_s6 + $0x70] sm:$0xff] }
  0x30   : > { %v990_v49 = vld [vmem:[#allocation2 + $0x39] sm:$0xff]  ;;  %v991_v51 = vld [vmem:[#allocation2 + $0x41] sm:$0xff]  ;;  %v359_v54 = vld [vmem:[%s10720_s26 + $0xd0] sm:$0xff] }
  0x31   : > { %494 = vperm.xlu1 %10565, %v10783_v31   ;;  %489 = vperm.xlu0 %10564, %v10788_v32   ;;  %v357_v52 = vld [vmem:[%s10720_s26 + $0xc0] sm:$0xff]  ;;  %v358_v53 = vld [vmem:[%s10720_s26 + $0xc8] sm:$0xff]  ;;  %v360_v55 = vld [vmem:[%s10720_s26 + $0xd8] sm:$0xff]  ;;  %391 = vst.msk [vmem:[#allocation2 + $0xe1] sm:$0xff] %vm293_vm0, %v359_v54 }
  0x32   : > { %9701 = vmatmul.mubr.msk.f32.gmra.mxu1 %vm293_vm0, %v988_v44  ;;  %389 = vst.msk [vmem:[#allocation2 + $0xd1] sm:$0xff] %vm293_vm0, %v357_v52  ;;  %390 = vst.msk [vmem:[#allocation2 + $0xd9] sm:$0xff] %vm293_vm0, %v358_v53  ;;  %v361_v56 = vld [vmem:[%s10720_s26 + $0xe0] sm:$0xff]  ;;  %v362_v57 = vld [vmem:[%s10720_s26 + $0xe8] sm:$0xff] }
  0x33   : > { %9703 = vmatprep.mubr.msk.f32.mxu1 %vm293_vm0, %v989_v47  ;;  %392 = vst.msk [vmem:[#allocation2 + $0xe9] sm:$0xff] %vm293_vm0, %v360_v55  ;;  %v992_v58 = vld [vmem:[#allocation2 + $0x49] sm:$0xff]  ;;  %393 = vst.msk [vmem:[#allocation2 + $0xf1] sm:$0xff] %vm293_vm0, %v361_v56  ;;  %v629_v59 = vld [vmem:[%s14304_s1] sm:$0xff]  ;;  %v10603_v47 = vmov 1  }
  0x34   : > { %394 = vst.msk [vmem:[#allocation2 + $0xf9] sm:$0xff] %vm293_vm0, %v362_v57  ;;  %v10861_v60 = vld [vmem:[%s14309_s6 + $0x88] sm:$0xff]  ;;  %v10866_v61 = vld [vmem:[%s14309_s6 + $0x80] sm:$0xff]  ;;  %9642 = vmatprep.subr.mxu0 %v629_v59  ;;  %v8548_v62 = vld [vmem:[%s14304_s1 + $0x18] sm:$0xff] }
  0x35   : > { %504 = vperm.xlu1 %10565, %v10818_v45   ;;  %499 = vperm.xlu0 %10564, %v10823_v46   ;;  %v993_v63 = vld [vmem:[#allocation2 + $0x51] sm:$0xff]  ;;  %v994_v3 = vld [vmem:[#allocation2 + $0x59] sm:$0xff]  ;;  %v995_v12 = vld [vmem:[#allocation2 + $0x61] sm:$0xff] }
  0x36   : > { %9704 = vmatmul.mubr.msk.f32.gmra.mxu1 %vm293_vm0, %v990_v49  ;;  %9643 = vmatpush3.msra.mxu0 %v629_v59  ;;  %v10875_v2 = vld [vmem:[%s14304_s1 + $0x10] sm:$0xff]  ;;  %v10884_v10 = vld [vmem:[%s14309_s6 + $0x98] sm:$0xff]  ;;  %v10898_v14 = vld [vmem:[%s14309_s6 + $0xa8] sm:$0xff] }
  0x37   : > { %9706 = vmatprep.mubr.msk.f32.mxu1 %vm293_vm0, %v991_v51  ;;  %9792 = vmatprep.subr.mxu1 %v8548_v62  ;;  %v10889_v11 = vld [vmem:[%s14309_s6 + $0x90] sm:$0xff]  ;;  %v10903_v15 = vld [vmem:[%s14309_s6 + $0xa0] sm:$0xff]  ;;  %v10912_v20 = vld [vmem:[%s14309_s6 + $0xb8] sm:$0xff] }
  0x38   : > { %9742 = vmatprep.subr.mxu0 %v10875_v2  ;;  %9793 = vmatpush3.msra.mxu1 %v8548_v62  ;;  %v996_v13 = vld [vmem:[#allocation2 + $0x69] sm:$0xff]  ;;  %v997_v16 = vld [vmem:[#allocation2 + $0x71] sm:$0xff]  ;;  %v998_v19 = vld [vmem:[#allocation2 + $0x79] sm:$0xff] }
  0x39   : > { %514 = vperm.xlu1 %10565, %v10832_v48   ;;  %509 = vperm.xlu0 %10564, %v10837_v50   ;;  %v10917_v21 = vld [vmem:[%s14309_s6 + $0xb0] sm:$0xff]  ;;  %v999_v22 = vld [vmem:[#allocation2 + $0x81] sm:$0xff]  ;;  %v364_v25 = vld [vmem:[%s10720_s26 + $0xf8] sm:$0xff] }
  0x3a   : > { %9707 = vmatmul.mubr.msk.f32.gmra.mxu1 %vm293_vm0, %v992_v58  ;;  %v1000_v23 = vld [vmem:[#allocation2 + $0x89] sm:$0xff]  ;;  %v10933_v27 = vld [vmem:[%s14309_s6 + $0xc0] sm:$0xff]  ;;  %396 = vst.msk [vmem:[#allocation2 + $0x109] sm:$0xff] %vm293_vm0, %v364_v25  ;;  %v1001_v28 = vld [vmem:[#allocation2 + $0x91] sm:$0xff] }
  0x3b   : > { %9709 = vmatprep.mubr.msk.f32.mxu1 %vm293_vm0, %v993_v63  ;;  %v363_v24 = vld [vmem:[%s10720_s26 + $0xf0] sm:$0xff]  ;;  %v10928_v26 = vld [vmem:[%s14309_s6 + $0xc8] sm:$0xff]  ;;  %v1002_v29 = vld [vmem:[#allocation2 + $0x99] sm:$0xff] }
  0x3c   : > { %395 = vst.msk [vmem:[#allocation2 + $0x101] sm:$0xff] %vm293_vm0, %v363_v24  ;;  %v10944_v30 = vld [vmem:[%s14309_s6 + $0xd8] sm:$0xff]  ;;  %v10949_v33 = vld [vmem:[%s14309_s6 + $0xd0] sm:$0xff]  ;;  %v1003_v34 = vld [vmem:[#allocation2 + $0xa1] sm:$0xff] }
  0x3d   : > { %524 = vperm.xlu1 %10565, %v10861_v60   ;;  %519 = vperm.xlu0 %10564, %v10866_v61   ;;  %v1004_v35 = vld [vmem:[#allocation2 + $0xa9] sm:$0xff]  ;;  %v329_v37 = vld [vmem:[%s14309_s6 + $0xe0] sm:$0xff]  ;;  %v1005_v38 = vld [vmem:[#allocation2 + $0xb1] sm:$0xff] }
  0x3e   : > { %9710 = vmatmul.mubr.msk.f32.gmra.mxu1 %vm293_vm0, %v994_v3  ;;  %v10958_v36 = vld [vmem:[%s14309_s6 + $0xe8] sm:$0xff]  ;;  %v1006_v39 = vld [vmem:[#allocation2 + $0xb9] sm:$0xff]  ;;  %v331_v41 = vld [vmem:[%s14309_s6 + $0xf0] sm:$0xff] }
  0x3f   : > { %9712 = vmatprep.mubr.msk.f32.mxu1 %vm293_vm0, %v995_v12  ;;  %v10969_v40 = vld [vmem:[%s14309_s6 + $0xf8] sm:$0xff]  ;;  %v1007_v42 = vld [vmem:[#allocation2 + $0xc1] sm:$0xff]  ;;  %v1008_v43 = vld [vmem:[#allocation2 + $0xc9] sm:$0xff] }
  0x40   : > { %v1009_v44 = vld [vmem:[#allocation2 + $0xd1] sm:$0xff]  ;;  %v1010_v49 = vld [vmem:[#allocation2 + $0xd9] sm:$0xff]  ;;  %v10982_v51 = vld [vmem:[%s14304_s1 + $0x28] sm:$0xff] }
  0x41   : > { %534 = vperm.xlu1 %10565, %v10884_v10   ;;  %529 = vperm.xlu0 %10564, %v10889_v11   ;;  %v1011_v52 = vld [vmem:[#allocation2 + $0xe1] sm:$0xff]  ;;  %v1012_v53 = vld [vmem:[#allocation2 + $0xe9] sm:$0xff]  ;;  %v1013_v54 = vld [vmem:[#allocation2 + $0xf1] sm:$0xff] }
  0x42   : > { %9713 = vmatmul.mubr.msk.f32.gmra.mxu1 %vm293_vm0, %v996_v13  ;;  %9892 = vmatprep.subr.mxu1 %v10982_v51  ;;  %v1921_v55 = vld [vmem:[#allocation2 + $0x30] sm:$0xff]  ;;  %v11042_v57 = vld [vmem:[%s14304_s1 + $0x20] sm:$0xff]  ;;  %v1922_v3 = vld [vmem:[#allocation2 + $0x38] sm:$0xff] }
  0x43   : > { %9715 = vmatprep.mubr.msk.f32.mxu1 %vm293_vm0, %v997_v16 }
  0x45   : > { %544 = vperm.xlu1 %10565, %v10898_v14   ;;  %539 = vperm.xlu0 %10564, %v10903_v15  }
  0x46   : > { %9716 = vmatmul.mubr.msk.f32.gmra.mxu1 %vm293_vm0, %v998_v19  ;;  %v1924_v19 = vld [vmem:[#allocation2 + $0x48] sm:$0xff] }
  0x47   : > { %9718 = vmatprep.mubr.msk.f32.mxu1 %vm293_vm0, %v999_v22 }
  0x49   : > { %554 = vperm.xlu1 %10565, %v10912_v20   ;;  %549 = vperm.xlu0 %10564, %v10917_v21  }
  0x4a   : > { %9719 = vmatmul.mubr.msk.f32.gmra.mxu1 %vm293_vm0, %v1000_v23 }
  0x4b   : > { %9721 = vmatprep.mubr.msk.f32.mxu1 %vm293_vm0, %v1001_v28  ;;  %v1927_v28 = vld [vmem:[#allocation2 + $0x60] sm:$0xff] }
  0x4d   : > { %564 = vperm.xlu1 %10565, %v10928_v26   ;;  %559 = vperm.xlu0 %10564, %v10933_v27  }
  0x4e   : > { %9722 = vmatmul.mubr.msk.f32.gmra.mxu1 %vm293_vm0, %v1002_v29 }
  0x4f   : > { %9724 = vmatprep.mubr.msk.f32.mxu1 %vm293_vm0, %v1003_v34 }
  0x51   : > { %574 = vperm.xlu1 %10565, %v10944_v30   ;;  %569 = vperm.xlu0 %10564, %v10949_v33  }
  0x52   : > { %9725 = vmatmul.mubr.msk.f32.gmra.mxu1 %vm293_vm0, %v1004_v35 }
  0x53   : > { %9727 = vmatprep.mubr.msk.f32.mxu1 %vm293_vm0, %v1005_v38  ;;  %v1929_v38 = vld [vmem:[#allocation2 + $0x70] sm:$0xff] }
  0x55   : > { %584 = vperm.xlu1 %10565, %v10958_v36   ;;  %579 = vperm.xlu0 %10564, %v329_v37  }
  0x56   : > { %9728 = vmatmul.mubr.msk.f32.gmra.mxu1 %vm293_vm0, %v1006_v39 }
  0x57   : > { %9730 = vmatprep.mubr.msk.f32.mxu1 %vm293_vm0, %v1007_v42 }
  0x59   : > { %594 = vperm.xlu1 %10565, %v10969_v40   ;;  %589 = vperm.xlu0 %10564, %v331_v41  }
  0x5a   : > { %9731 = vmatmul.mubr.msk.f32.gmra.mxu1 %vm293_vm0, %v1008_v43 }
  0x5b   : > { %9733 = vmatprep.mubr.msk.f32.mxu1 %vm293_vm0, %v1009_v44 }
  0x5d   : > { %10567 = vset.pattern.permute.xlu1 %v10603_v47  ;;  %10566 = vset.pattern.permute.xlu0 %v10603_v47  ;;  %v1930_v47 = vld [vmem:[#allocation2 + $0x78] sm:$0xff] }
  0x5e   : > { %1407 = vperm.xlu1 %10567, %v10697_v5   ;;  %1403 = vperm.xlu0 %10566, %v10680_v1   ;;  %v1014_v1 = vld [vmem:[#allocation2 + $0xf9] sm:$0xff] }
  0x5f   : > { %9734 = vmatmul.mubr.msk.f32.gmra.mxu1 %vm293_vm0, %v1010_v49  ;;  %v1931_v49 = vld [vmem:[#allocation2 + $0x80] sm:$0xff] }
  0x60   : > { %9736 = vmatprep.mubr.msk.f32.mxu1 %vm293_vm0, %v1011_v52 }
  0x62   : > { %1411 = vperm.xlu1 %10567, %v10675_v0   ;;  %1415 = vperm.xlu0 %10566, %v10692_v4   ;;  %v405_v0 = vld [vmem:[#allocation2] sm:$0xff]  ;;  %v1917_v4 = vld [vmem:[#allocation2 + $0x10] sm:$0xff] }
  0x63   : > { %9737 = vmatmul.mubr.msk.f32.gmra.mxu1 %vm293_vm0, %v1012_v53 }
  0x64   : > { %9739 = vmatprep.mubr.msk.f32.mxu1 %vm293_vm0, %v1013_v54 }
  0x66   : > { %1419 = vperm.xlu1 %10567, %v10713_v7   ;;  %1423 = vperm.xlu0 %10566, %v10708_v6  }
  0x67   : > { %9740 = vmatmul.mubr.msk.f32.gmra.mxu1 %vm293_vm0, %v1014_v1 }
  0x6a   : > { %1427 = vperm.xlu1 %10567, %v10732_v9   ;;  %1431 = vperm.xlu0 %10566, %v10727_v8   ;;  %v1918_v9 = vld [vmem:[#allocation2 + $0x18] sm:$0xff] }
  0x6e   : > { %1435 = vperm.xlu1 %10567, %v10751_v18   ;;  %1439 = vperm.xlu0 %10566, %v10746_v17   ;;  %v4505_v17 = vld [vmem:[#allocation2 + $0x8] sm:$0xff] }
  0x72   : > { %1443 = vperm.xlu1 %10567, %v10788_v32   ;;  %1447 = vperm.xlu0 %10566, %v10783_v31   ;;  %v1919_v32 = vld [vmem:[#allocation2 + $0x20] sm:$0xff] }
  0x76   : > { %1451 = vperm.xlu1 %10567, %v10823_v46   ;;  %1455 = vperm.xlu0 %10566, %v10818_v45  }
  0x7a   : > { %1459 = vperm.xlu1 %10567, %v10837_v50   ;;  %1463 = vperm.xlu0 %10566, %v10832_v48   ;;  %v3143_v48 = vld [vmem:[#allocation2 + $0x28] sm:$0xff] }
  0x7e   : > { %1467 = vperm.xlu1 %10567, %v10866_v61   ;;  %1471 = vperm.xlu0 %10566, %v10861_v60  }
  0x82   : > { %1475 = vperm.xlu1 %10567, %v10889_v11   ;;  %1479 = vperm.xlu0 %10566, %v10884_v10   ;;  %v1923_v10 = vld [vmem:[#allocation2 + $0x40] sm:$0xff] }
  0x86   : > { %1483 = vperm.xlu1 %10567, %v10903_v15   ;;  %1487 = vperm.xlu0 %10566, %v10898_v14  }
  0x8a   : > { %1491 = vperm.xlu1 %10567, %v10917_v21   ;;  %1495 = vperm.xlu0 %10566, %v10912_v20   ;;  %v1925_v20 = vld [vmem:[#allocation2 + $0x50] sm:$0xff] }
  0x8e   : > { %1499 = vperm.xlu1 %10567, %v10933_v27   ;;  %1503 = vperm.xlu0 %10566, %v10928_v26   ;;  %v1926_v27 = vld [vmem:[#allocation2 + $0x58] sm:$0xff] }
  0x92   : > { %1507 = vperm.xlu1 %10567, %v10949_v33   ;;  %1511 = vperm.xlu0 %10566, %v10944_v30  }
  0x96   : > { %1515 = vperm.xlu1 %10567, %v329_v37   ;;  %1519 = vperm.xlu0 %10566, %v10958_v36   ;;  %v1928_v37 = vld [vmem:[#allocation2 + $0x68] sm:$0xff] }
  0x98   : > { %v11020_v5 = vpop.permute.xlu1 %449  ;;  %v11022_v6 = vpop.permute.xlu0 %439 }
  0x99   : > { %14516 = vst [vmem:[#allocation6_spill] sm:$0xff] %v11020_v5  ;;  %14517 = vst [vmem:[#allocation7_spill] sm:$0xff] %v11022_v6  ;;  %v597_v7 = vmul.f32 %v11022_v6, %v405_v0  ;;  %v1949_v8 = vmul.f32 %v1917_v4, %v11022_v6  ;;  %v599_v50 = vmul.f32 %v1917_v4, %v11020_v5  ;;  %v1932_v4 = vld [vmem:[#allocation2 + $0x88] sm:$0xff] }
  0x9a   : > { %1523 = vperm.xlu1 %10567, %v331_v41   ;;  %1527 = vperm.xlu0 %10566, %v10969_v40   ;;  %v1951_v56 = vmul.f32 %v1919_v32, %v11020_v5 }
  0x9b   : > { %9644 = vmatprep.mubr.msk.f32.mxu0 %vm293_vm0, %v597_v7  ;;  %9794 = vmatprep.mubr.msk.f32.mxu1 %vm293_vm0, %v1949_v8  ;;  %v1933_v7 = vld [vmem:[#allocation2 + $0x90] sm:$0xff] }
  0x9c   : > { %v11029_v18 = vpop.permute.xlu1 %454  ;;  %v11031_v31 = vpop.permute.xlu0 %444 }
  0x9d   : > { %14518 = vst [vmem:[#allocation8_spill] sm:$0xff] %v11029_v18  ;;  %14519 = vst [vmem:[#allocation9_spill] sm:$0xff] %v11031_v31  ;;  %v1950_v45 = vmul.f32 %v1918_v9, %v11031_v31  ;;  %v598_v46 = vmul.f32 %v4505_v17, %v11031_v31  ;;  %v600_v60 = vmul.f32 %v1918_v9, %v11029_v18 }
  0x9e   : > { %v1952_v61 = vmul.f32 %v3143_v48, %v11029_v18 }
  0x9f   : > { %9645 = vmatmul.mubr.msk.f32.vlgmr.msra.gmra.mxu0 %vm293_vm0, %v598_v46  ;;  %9795 = vmatmul.mubr.msk.f32.vlgmr.msra.gmra.mxu1 %vm293_vm0, %v1950_v45 }
  0xa0   : > { %9743 = vmatpush3.msra.mxu0 %v10875_v2  ;;  %v11045_v58 = vpop.permute.xlu1 %464  ;;  %v11047_v59 = vpop.permute.xlu0 %459  ;;  %9647 = vmatprep.mubr.msk.f32.mxu0 %vm293_vm0, %v599_v50  ;;  %v11060_v2 = vld [vmem:[%s14304_s1 + $0x38] sm:$0xff]  ;;  %v1935_v50 = vld [vmem:[#allocation2 + $0xa0] sm:$0xff] }
  0xa1   : > { %14520 = vst [vmem:[#allocation10_spill] sm:$0xff] %v11045_v58  ;;  %14521 = vst [vmem:[#allocation11_spill] sm:$0xff] %v11047_v59  ;;  %9797 = vmatprep.mubr.msk.f32.mxu1 %vm293_vm0, %v1951_v56  ;;  %v601_v62 = vmul.f32 %v1919_v32, %v11047_v59  ;;  %v1953_v63 = vmul.f32 %v1921_v55, %v11047_v59  ;;  %9842 = vmatprep.subr.mxu0 %v11042_v57 }
  0xa2   : > { %9893 = vmatpush3.msra.mxu1 %v10982_v51  ;;  %v602_v13 = vmul.f32 %v3143_v48, %v11045_v58  ;;  %v1954_v14 = vmul.f32 %v1922_v3, %v11045_v58  ;;  %v1934_v48 = vld [vmem:[#allocation2 + $0x98] sm:$0xff] }
  0xa3   : > { %9648 = vmatmul.mubr.msk.f32.gmra.mxu0 %vm293_vm0, %v600_v60  ;;  %9798 = vmatmul.mubr.msk.f32.gmra.mxu1 %vm293_vm0, %v1952_v61 }
  0xa4   : > { %v11064_v11 = vpop.permute.xlu1 %474  ;;  %v11066_v12 = vpop.permute.xlu0 %469  ;;  %9650 = vmatprep.mubr.msk.f32.mxu0 %vm293_vm0, %v601_v62  ;;  %9800 = vmatprep.mubr.msk.f32.mxu1 %vm293_vm0, %v1953_v63 }
  0xa5   : > { %14522 = vst [vmem:[#allocation12_spill] sm:$0xff] %v11064_v11  ;;  %14523 = vst [vmem:[#allocation13_spill] sm:$0xff] %v11066_v12  ;;  %v603_v15 = vmul.f32 %v1921_v55, %v11066_v12  ;;  %v1955_v16 = vmul.f32 %v1923_v10, %v11066_v12  ;;  %9992 = vmatprep.subr.mxu1 %v11060_v2  ;;  %v604_v23 = vmul.f32 %v1922_v3, %v11064_v11  ;;  %v1937_v3 = vld [vmem:[#allocation2 + $0xb0] sm:$0xff] }
  0xa6   : > { %v1956_v24 = vmul.f32 %v1924_v19, %v11064_v11 }
  0xa7   : > { %9651 = vmatmul.mubr.msk.f32.gmra.mxu0 %vm293_vm0, %v602_v13  ;;  %9801 = vmatmul.mubr.msk.f32.gmra.mxu1 %vm293_vm0, %v1954_v14 }
  0xa8   : > { %v11077_v21 = vpop.permute.xlu1 %484  ;;  %v11079_v22 = vpop.permute.xlu0 %479  ;;  %9653 = vmatprep.mubr.msk.f32.mxu0 %vm293_vm0, %v603_v15  ;;  %9803 = vmatprep.mubr.msk.f32.mxu1 %vm293_vm0, %v1955_v16 }
  0xa9   : > { %14524 = vst [vmem:[#allocation14_spill] sm:$0xff] %v11077_v21  ;;  %14525 = vst [vmem:[#allocation15_spill] sm:$0xff] %v11079_v22  ;;  %v605_v25 = vmul.f32 %v1923_v10, %v11079_v22  ;;  %v1957_v26 = vmul.f32 %v1925_v20, %v11079_v22  ;;  %v606_v33 = vmul.f32 %v1924_v19, %v11077_v21  ;;  %v11149_v10 = vld [vmem:[#allocation2 + $0xa8] sm:$0xff] }
  0xaa   : > { %v1958_v34 = vmul.f32 %v1926_v27, %v11077_v21 }
  0xab   : > { %9654 = vmatmul.mubr.msk.f32.gmra.mxu0 %vm293_vm0, %v604_v23  ;;  %9804 = vmatmul.mubr.msk.f32.gmra.mxu1 %vm293_vm0, %v1956_v24  ;;  %v1939_v23 = vld [vmem:[#allocation2 + $0xc0] sm:$0xff]  ;;  %v11164_v24 = vld [vmem:[#allocation2 + $0xb8] sm:$0xff] }
  0xac   : > { %v11089_v29 = vpop.permute.xlu1 %494  ;;  %v11091_v30 = vpop.permute.xlu0 %489  ;;  %9656 = vmatprep.mubr.msk.f32.mxu0 %vm293_vm0, %v605_v25  ;;  %9806 = vmatprep.mubr.msk.f32.mxu1 %vm293_vm0, %v1957_v26 }
  0xad   : > { %14526 = vst [vmem:[#allocation16_spill] sm:$0xff] %v11089_v29  ;;  %14527 = vst [vmem:[#allocation17_spill] sm:$0xff] %v11091_v30  ;;  %v607_v35 = vmul.f32 %v1925_v20, %v11091_v30  ;;  %v1959_v36 = vmul.f32 %v1927_v28, %v11091_v30  ;;  %v608_v41 = vmul.f32 %v1926_v27, %v11089_v29 }
  0xae   : > { %v1960_v42 = vmul.f32 %v1928_v37, %v11089_v29 }
  0xaf   : > { %9657 = vmatmul.mubr.msk.f32.gmra.mxu0 %vm293_vm0, %v606_v33  ;;  %9807 = vmatmul.mubr.msk.f32.gmra.mxu1 %vm293_vm0, %v1958_v34 }
  0xb0   : > { %v11101_v39 = vpop.permute.xlu1 %504  ;;  %v11103_v40 = vpop.permute.xlu0 %499  ;;  %9659 = vmatprep.mubr.msk.f32.mxu0 %vm293_vm0, %v607_v35  ;;  %9809 = vmatprep.mubr.msk.f32.mxu1 %vm293_vm0, %v1959_v36  ;;  %v1941_v35 = vld [vmem:[#allocation2 + $0xd0] sm:$0xff]  ;;  %v11180_v36 = vld [vmem:[#allocation2 + $0xc8] sm:$0xff] }
  0xb1   : > { %14528 = vst [vmem:[#allocation18_spill] sm:$0xff] %v11101_v39  ;;  %14529 = vst [vmem:[#allocation19_spill] sm:$0xff] %v11103_v40  ;;  %v609_v43 = vmul.f32 %v1927_v28, %v11103_v40  ;;  %v1961_v44 = vmul.f32 %v1929_v38, %v11103_v40  ;;  %v610_v53 = vmul.f32 %v1928_v37, %v11101_v39 }
  0xb2   : > { %v1962_v54 = vmul.f32 %v1930_v47, %v11101_v39 }
  0xb3   : > { %9660 = vmatmul.mubr.msk.f32.gmra.mxu0 %vm293_vm0, %v608_v41  ;;  %9810 = vmatmul.mubr.msk.f32.gmra.mxu1 %vm293_vm0, %v1960_v42 }
  0xb4   : > { %v11113_v51 = vpop.permute.xlu1 %514  ;;  %v11115_v52 = vpop.permute.xlu0 %509  ;;  %9662 = vmatprep.mubr.msk.f32.mxu0 %vm293_vm0, %v609_v43  ;;  %9812 = vmatprep.mubr.msk.f32.mxu1 %vm293_vm0, %v1961_v44 }
  0xb5   : > { %14530 = vst [vmem:[#allocation20_spill] sm:$0xff] %v11113_v51  ;;  %14531 = vst [vmem:[#allocation21_spill] sm:$0xff] %v11115_v52  ;;  %v611_v1 = vmul.f32 %v1929_v38, %v11115_v52  ;;  %v1963_v0 = vmul.f32 %v1931_v49, %v11115_v52  ;;  %v612_v17 = vmul.f32 %v1930_v47, %v11113_v51  ;;  %v1943_v47 = vld [vmem:[#allocation2 + $0xe0] sm:$0xff] }
  0xb6   : > { %v1964_v32 = vmul.f32 %v1932_v4, %v11113_v51 }
  0xb7   : > { %9663 = vmatmul.mubr.msk.f32.gmra.mxu0 %vm293_vm0, %v610_v53  ;;  %9813 = vmatmul.mubr.msk.f32.gmra.mxu1 %vm293_vm0, %v1962_v54 }
  0xb8   : > { %v11125_v8 = vpop.permute.xlu1 %524  ;;  %v11127_v9 = vpop.permute.xlu0 %519  ;;  %9665 = vmatprep.mubr.msk.f32.mxu0 %vm293_vm0, %v611_v1  ;;  %9815 = vmatprep.mubr.msk.f32.mxu1 %vm293_vm0, %v1963_v0 }
  0xb9   : > { %14532 = vst [vmem:[#allocation22_spill] sm:$0xff] %v11125_v8  ;;  %14533 = vst [vmem:[#allocation23_spill] sm:$0xff] %v11127_v9  ;;  %v613_v45 = vmul.f32 %v1931_v49, %v11127_v9  ;;  %v1965_v46 = vmul.f32 %v1933_v7, %v11127_v9  ;;  %v614_v60 = vmul.f32 %v1932_v4, %v11125_v8  ;;  %v11196_v49 = vld [vmem:[#allocation2 + $0xd8] sm:$0xff] }
  0xba   : > { %v1966_v61 = vmul.f32 %v1934_v48, %v11125_v8 }
  0xbb   : > { %9666 = vmatmul.mubr.msk.f32.gmra.mxu0 %vm293_vm0, %v612_v17  ;;  %9816 = vmatmul.mubr.msk.f32.gmra.mxu1 %vm293_vm0, %v1964_v32  ;;  %v1945_v17 = vld [vmem:[#allocation2 + $0xf0] sm:$0xff]  ;;  %v11212_v32 = vld [vmem:[#allocation2 + $0xe8] sm:$0xff] }
  0xbc   : > { %v11137_v55 = vpop.permute.xlu1 %534  ;;  %v11139_v56 = vpop.permute.xlu0 %529  ;;  %9668 = vmatprep.mubr.msk.f32.mxu0 %vm293_vm0, %v613_v45  ;;  %9818 = vmatprep.mubr.msk.f32.mxu1 %vm293_vm0, %v1965_v46 }
  0xbd   : > { %14534 = vst [vmem:[#allocation24_spill] sm:$0xff] %v11137_v55  ;;  %14535 = vst [vmem:[#allocation25_spill] sm:$0xff] %v11139_v56  ;;  %v615_v62 = vmul.f32 %v1933_v7, %v11139_v56  ;;  %v1967_v63 = vmul.f32 %v1935_v50, %v11139_v56  ;;  %v616_v15 = vmul.f32 %v1934_v48, %v11137_v55 }
  0xbe   : > { %v1968_v16 = vmul.f32 %v11149_v10, %v11137_v55 }
  0xbf   : > { %9669 = vmatmul.mubr.msk.f32.gmra.mxu0 %vm293_vm0, %v614_v60  ;;  %9819 = vmatmul.mubr.msk.f32.gmra.mxu1 %vm293_vm0, %v1966_v61 }
  0xc0   : > { %v11151_v13 = vpop.permute.xlu1 %544  ;;  %v11153_v14 = vpop.permute.xlu0 %539  ;;  %9671 = vmatprep.mubr.msk.f32.mxu0 %vm293_vm0, %v615_v62  ;;  %9821 = vmatprep.mubr.msk.f32.mxu1 %vm293_vm0, %v1967_v63  ;;  %v1947_v62 = vld [vmem:[#allocation2 + $0x100] sm:$0xff]  ;;  %v11228_v63 = vld [vmem:[#allocation2 + $0xf8] sm:$0xff] }
  0xc1   : > { %14536 = vst [vmem:[#allocation26_spill] sm:$0xff] %v11151_v13  ;;  %14537 = vst [vmem:[#allocation27_spill] sm:$0xff] %v11153_v14  ;;  %v617_v19 = vmul.f32 %v1935_v50, %v11153_v14  ;;  %v1969_v20 = vmul.f32 %v1937_v3, %v11153_v14  ;;  %v618_v27 = vmul.f32 %v11149_v10, %v11151_v13 }
  0xc2   : > { %v1970_v28 = vmul.f32 %v11164_v24, %v11151_v13 }
  0xc3   : > { %9672 = vmatmul.mubr.msk.f32.gmra.mxu0 %vm293_vm0, %v616_v15  ;;  %9822 = vmatmul.mubr.msk.f32.gmra.mxu1 %vm293_vm0, %v1968_v16 }
  0xc4   : > { %v11166_v25 = vpop.permute.xlu1 %554  ;;  %v11168_v26 = vpop.permute.xlu0 %549  ;;  %9674 = vmatprep.mubr.msk.f32.mxu0 %vm293_vm0, %v617_v19  ;;  %9824 = vmatprep.mubr.msk.f32.mxu1 %vm293_vm0, %v1969_v20 }
  0xc5   : > { %14538 = vst [vmem:[#allocation28_spill] sm:$0xff] %v11166_v25  ;;  %14539 = vst [vmem:[#allocation29_spill] sm:$0xff] %v11168_v26  ;;  %v619_v33 = vmul.f32 %v1937_v3, %v11168_v26  ;;  %v1971_v34 = vmul.f32 %v1939_v23, %v11168_v26  ;;  %v620_v41 = vmul.f32 %v11164_v24, %v11166_v25 }
  0xc6   : > { %v1972_v42 = vmul.f32 %v11180_v36, %v11166_v25 }
  0xc7   : > { %9675 = vmatmul.mubr.msk.f32.gmra.mxu0 %vm293_vm0, %v618_v27  ;;  %9825 = vmatmul.mubr.msk.f32.gmra.mxu1 %vm293_vm0, %v1970_v28  ;;  %v11242_v27 = vld [vmem:[#allocation2 + $0x108] sm:$0xff] }
  0xc8   : > { %v11182_v37 = vpop.permute.xlu1 %564  ;;  %v11184_v38 = vpop.permute.xlu0 %559  ;;  %9677 = vmatprep.mubr.msk.f32.mxu0 %vm293_vm0, %v619_v33  ;;  %9827 = vmatprep.mubr.msk.f32.mxu1 %vm293_vm0, %v1971_v34  ;;  %v1370_v28 = vld [vmem:[#allocation2 + $0x2] sm:$0xff]  ;;  %v1371_v33 = vld [vmem:[#allocation2 + $0xa] sm:$0xff]  ;;  %v2724_v34 = vld [vmem:[#allocation2 + $0x1a] sm:$0xff] }
  0xc9   : > { %14540 = vst [vmem:[#allocation30_spill] sm:$0xff] %v11182_v37  ;;  %14541 = vst [vmem:[#allocation31_spill] sm:$0xff] %v11184_v38  ;;  %v621_v43 = vmul.f32 %v1939_v23, %v11184_v38  ;;  %v1973_v44 = vmul.f32 %v1941_v35, %v11184_v38  ;;  %v622_v1 = vmul.f32 %v11180_v36, %v11182_v37 }
  0xca   : > { %v1974_v0 = vmul.f32 %v11196_v49, %v11182_v37 }
  0xcb   : > { %9678 = vmatmul.mubr.msk.f32.gmra.mxu0 %vm293_vm0, %v620_v41  ;;  %9828 = vmatmul.mubr.msk.f32.gmra.mxu1 %vm293_vm0, %v1972_v42 }
  0xcc   : > { %v11198_v53 = vpop.permute.xlu1 %574  ;;  %v11200_v54 = vpop.permute.xlu0 %569  ;;  %9680 = vmatprep.mubr.msk.f32.mxu0 %vm293_vm0, %v621_v43  ;;  %9830 = vmatprep.mubr.msk.f32.mxu1 %vm293_vm0, %v1973_v44 }
  0xcd   : > { %14542 = vst [vmem:[#allocation32_spill] sm:$0xff] %v11198_v53  ;;  %14543 = vst [vmem:[#allocation33_spill] sm:$0xff] %v11200_v54  ;;  %v623_v4 = vmul.f32 %v1941_v35, %v11200_v54  ;;  %v1975_v7 = vmul.f32 %v1943_v47, %v11200_v54  ;;  %v624_v48 = vmul.f32 %v11196_v49, %v11198_v53  ;;  %v2723_v35 = vld [vmem:[#allocation2 + $0x12] sm:$0xff] }
  0xce   : > { %v1976_v50 = vmul.f32 %v11212_v32, %v11198_v53 }
  0xcf   : > { %9681 = vmatmul.mubr.msk.f32.gmra.mxu0 %vm293_vm0, %v622_v1  ;;  %9831 = vmatmul.mubr.msk.f32.gmra.mxu1 %vm293_vm0, %v1974_v0 }
  0xd0   : > { %v11214_v45 = vpop.permute.xlu1 %584  ;;  %v11216_v46 = vpop.permute.xlu0 %579  ;;  %9683 = vmatprep.mubr.msk.f32.mxu0 %vm293_vm0, %v623_v4  ;;  %9833 = vmatprep.mubr.msk.f32.mxu1 %vm293_vm0, %v1975_v7  ;;  %v2725_v7 = vld [vmem:[#allocation2 + $0x22] sm:$0xff] }
  0xd1   : > { %14544 = vst [vmem:[#allocation34_spill] sm:$0xff] %v11214_v45  ;;  %14545 = vst [vmem:[#allocation35_spill] sm:$0xff] %v11216_v46  ;;  %v625_v60 = vmul.f32 %v1943_v47, %v11216_v46  ;;  %v1977_v61 = vmul.f32 %v1945_v17, %v11216_v46  ;;  %v626_v16 = vmul.f32 %v11212_v32, %v11214_v45 }
  0xd2   : > { %v1978_v19 = vmul.f32 %v11228_v63, %v11214_v45 }
  0xd3   : > { %9684 = vmatmul.mubr.msk.f32.gmra.mxu0 %vm293_vm0, %v624_v48  ;;  %9834 = vmatmul.mubr.msk.f32.gmra.mxu1 %vm293_vm0, %v1976_v50 }
  0xd4   : > { %v11230_v3 = vpop.permute.xlu1 %594  ;;  %v11232_v15 = vpop.permute.xlu0 %589  ;;  %9686 = vmatprep.mubr.msk.f32.mxu0 %vm293_vm0, %v625_v60  ;;  %9836 = vmatprep.mubr.msk.f32.mxu1 %vm293_vm0, %v1977_v61  ;;  %v11273_v61 = vld [vmem:[%s14304_s1 + $0x30] sm:$0xff] }
  0xd5   : > { %14546 = vst [vmem:[#allocation36_spill] sm:$0xff] %v11230_v3  ;;  %14547 = vst [vmem:[#allocation37_spill] sm:$0xff] %v11232_v15  ;;  %v627_v20 = vmul.f32 %v1945_v17, %v11232_v15  ;;  %v1979_v23 = vmul.f32 %v1947_v62, %v11232_v15  ;;  %v628_v43 = vmul.f32 %v11228_v63, %v11230_v3  ;;  %v2727_v62 = vld [vmem:[#allocation2 + $0x32] sm:$0xff] }
  0xd6   : > { %v1980_v44 = vmul.f32 %v11242_v27, %v11230_v3 }
  0xd7   : > { %9687 = vmatmul.mubr.msk.f32.gmra.mxu0 %vm293_vm0, %v626_v16  ;;  %9837 = vmatmul.mubr.msk.f32.gmra.mxu1 %vm293_vm0, %v1978_v19  ;;  %v11277_v16 = vld [vmem:[#allocation2 + $0x2a] sm:$0xff] }
  0xd8   : > { %9689 = vmatprep.mubr.msk.f32.mxu0 %vm293_vm0, %v627_v20  ;;  %9839 = vmatprep.mubr.msk.f32.mxu1 %vm293_vm0, %v1979_v23 }
  0xd9   : > { %v11248_v41 = vpop.permute.xlu1 %1407  ;;  %v11250_v42 = vpop.permute.xlu0 %1403 }
  0xda   : > { %14548 = vst [vmem:[#allocation38_spill] sm:$0xff] %v11248_v41  ;;  %14549 = vst [vmem:[#allocation39_spill] sm:$0xff] %v11250_v42  ;;  %v1530_v47 = vmul.f32 %v11250_v42, %v1370_v28  ;;  %v1531_v1 = vmul.f32 %v11248_v41, %v1371_v33  ;;  %v2756_v0 = vmul.f32 %v2724_v34, %v11248_v41 }
  0xdb   : > { %9690 = vmatmul.mubr.msk.f32.gmra.mxu0 %vm293_vm0, %v628_v43  ;;  %9840 = vmatmul.mubr.msk.f32.gmra.mxu1 %vm293_vm0, %v1980_v44  ;;  %v2755_v4 = vmul.f32 %v2723_v35, %v11250_v42  ;;  %v11300_v43 = vld [vmem:[#allocation2 + $0x3a] sm:$0xff] }
  0xdc   : > { %9744 = vmatprep.mubr.msk.f32.mxu0 %vm293_vm0, %v1530_v47 }
  0xdd   : > { %v11263_v17 = vpop.permute.xlu1 %1411  ;;  %v11265_v48 = vpop.permute.xlu0 %1415  ;;  %9894 = vmatprep.mubr.msk.f32.mxu1 %vm293_vm0, %v2755_v4 }
  0xde   : > { %14550 = vst [vmem:[#allocation40_spill] sm:$0xff] %v11263_v17  ;;  %14551 = vst [vmem:[#allocation41_spill] sm:$0xff] %v11265_v48  ;;  %v1532_v50 = vmul.f32 %v2723_v35, %v11263_v17  ;;  %v2757_v60 = vmul.f32 %v2725_v7, %v11263_v17  ;;  %v1533_v23 = vmul.f32 %v2724_v34, %v11265_v48  ;;  %v2729_v34 = vld [vmem:[#allocation2 + $0x42] sm:$0xff] }
  0xdf   : > { %9745 = vmatmul.mubr.msk.f32.vlgmr.msra.gmra.mxu0 %vm293_vm0, %v1531_v1  ;;  %9895 = vmatmul.mubr.msk.f32.vlgmr.msra.gmra.mxu1 %vm293_vm0, %v2756_v0  ;;  %v2758_v28 = vmul.f32 %v11277_v16, %v11265_v48 }
  0xe0   : > { %9843 = vmatpush3.msra.mxu0 %v11042_v57  ;;  %9747 = vmatprep.mubr.msk.f32.mxu0 %vm293_vm0, %v1532_v50  ;;  %v11296_v57 = vld [vmem:[%s14306_s3] sm:$0xff]  ;;  %v11317_v50 = vld [vmem:[#allocation2 + $0x4a] sm:$0xff] }
  0xe1   : > { %9897 = vmatprep.mubr.msk.f32.mxu1 %vm293_vm0, %v2757_v60  ;;  %v11282_v19 = vpop.permute.xlu1 %1419  ;;  %v11284_v20 = vpop.permute.xlu0 %1423  ;;  %9942 = vmatprep.subr.mxu0 %v11273_v61  ;;  %14556 = vst [vmem:[#allocation46_spill] sm:$0xff] %v11317_v50 }
  0xe2   : > { %14552 = vst [vmem:[#allocation42_spill] sm:$0xff] %v11282_v19  ;;  %14553 = vst [vmem:[#allocation43_spill] sm:$0xff] %v11284_v20  ;;  %v1534_v33 = vmul.f32 %v2725_v7, %v11282_v19  ;;  %v2759_v35 = vmul.f32 %v2727_v62, %v11282_v19  ;;  %9993 = vmatpush3.msra.mxu1 %v11060_v2  ;;  %v1535_v2 = vmul.f32 %v11277_v16, %v11284_v20  ;;  %v2731_v7 = vld [vmem:[#allocation2 + $0x52] sm:$0xff] }
  0xe3   : > { %9748 = vmatmul.mubr.msk.f32.gmra.mxu0 %vm293_vm0, %v1533_v23  ;;  %9898 = vmatmul.mubr.msk.f32.gmra.mxu1 %vm293_vm0, %v2758_v28  ;;  %v2760_v1 = vmul.f32 %v11300_v43, %v11284_v20 }
  0xe4   : > { %9750 = vmatprep.mubr.msk.f32.mxu0 %vm293_vm0, %v1534_v33  ;;  %9900 = vmatprep.mubr.msk.f32.mxu1 %vm293_vm0, %v2759_v35 }
  0xe5   : > { %v11304_v44 = vpop.permute.xlu1 %1427  ;;  %v11306_v47 = vpop.permute.xlu0 %1431  ;;  %10092 = vmatprep.subr.mxu1 %v11296_v57 }
  0xe6   : > { %14554 = vst [vmem:[#allocation44_spill] sm:$0xff] %v11304_v44  ;;  %14555 = vst [vmem:[#allocation45_spill] sm:$0xff] %v11306_v47  ;;  %v1536_v0 = vmul.f32 %v2727_v62, %v11304_v44  ;;  %v2761_v4 = vmul.f32 %v2729_v34, %v11304_v44  ;;  %v1537_v62 = vmul.f32 %v11300_v43, %v11306_v47 }
  0xe7   : > { %9751 = vmatmul.mubr.msk.f32.gmra.mxu0 %vm293_vm0, %v1535_v2  ;;  %9901 = vmatmul.mubr.msk.f32.gmra.mxu1 %vm293_vm0, %v2760_v1  ;;  %v11321_v60 = vpop.f32.mrf.mxu1  ;;  %v2762_v33 = vmul.f32 %v11317_v50, %v11306_v47  ;;  %v2733_v1 = vld [vmem:[#allocation2 + $0x62] sm:$0xff] }
  0xe8   : > { %9753 = vmatprep.mubr.msk.f32.mxu0 %vm293_vm0, %v1536_v0  ;;  %9903 = vmatprep.mubr.msk.f32.mxu1 %vm293_vm0, %v2761_v4  ;;  %v11335_v0 = vld [vmem:[#allocation2 + $0x5a] sm:$0xff] }
  0xe9   : > { %v11323_v23 = vpop.permute.xlu1 %1435  ;;  %v11325_v28 = vpop.permute.xlu0 %1439  ;;  %14559 = vst [vmem:[#allocation49_spill] sm:$0xff] %v11335_v0 }
  0xea   : > { %14557 = vst [vmem:[#allocation47_spill] sm:$0xff] %v11323_v23  ;;  %14558 = vst [vmem:[#allocation48_spill] sm:$0xff] %v11325_v28  ;;  %v1538_v35 = vmul.f32 %v2729_v34, %v11323_v23  ;;  %v2763_v2 = vmul.f32 %v2731_v7, %v11323_v23  ;;  %v11339_v4 = vpop.f32.mrf.mxu1  ;;  %v1539_v34 = vmul.f32 %v11317_v50, %v11325_v28 }
  0xeb   : > { %9754 = vmatmul.mubr.msk.f32.gmra.mxu0 %vm293_vm0, %v1537_v62  ;;  %9904 = vmatmul.mubr.msk.f32.gmra.mxu1 %vm293_vm0, %v2762_v33  ;;  %v2764_v62 = vmul.f32 %v11335_v0, %v11325_v28 }
  0xec   : > { %9756 = vmatprep.mubr.msk.f32.mxu0 %vm293_vm0, %v1538_v35  ;;  %9906 = vmatprep.mubr.msk.f32.mxu1 %vm293_vm0, %v2763_v2  ;;  %v2735_v35 = vld [vmem:[#allocation2 + $0x72] sm:$0xff]  ;;  %v11353_v2 = vld [vmem:[#allocation2 + $0x6a] sm:$0xff] }
  0xed   : > { %v11341_v44 = vpop.permute.xlu1 %1443  ;;  %v11343_v47 = vpop.permute.xlu0 %1447  ;;  %14562 = vst [vmem:[#allocation52_spill] sm:$0xff] %v11353_v2 }
  0xee   : > { %14560 = vst [vmem:[#allocation50_spill] sm:$0xff] %v11341_v44  ;;  %14561 = vst [vmem:[#allocation51_spill] sm:$0xff] %v11343_v47  ;;  %v1540_v33 = vmul.f32 %v2731_v7, %v11341_v44  ;;  %v2765_v23 = vmul.f32 %v2733_v1, %v11341_v44  ;;  %v11357_v20 = vpop.f32.mrf.mxu1  ;;  %v1541_v7 = vmul.f32 %v11335_v0, %v11343_v47 }
  0xef   : > { %9757 = vmatmul.mubr.msk.f32.gmra.mxu0 %vm293_vm0, %v1539_v34  ;;  %9907 = vmatmul.mubr.msk.f32.gmra.mxu1 %vm293_vm0, %v2764_v62  ;;  %14563 = vst [vmem:[#allocation53_spill] sm:$0xff] %v11357_v20  ;;  %v2766_v34 = vmul.f32 %v11353_v2, %v11343_v47 }
  0xf0   : > { %9759 = vmatprep.mubr.msk.f32.mxu0 %vm293_vm0, %v1540_v33  ;;  %9909 = vmatprep.mubr.msk.f32.mxu1 %vm293_vm0, %v2765_v23  ;;  %v11369_v19 = vpop.f32.mrf.mxu1  ;;  %v2737_v23 = vld [vmem:[#allocation2 + $0x82] sm:$0xff]  ;;  %v11373_v33 = vld [vmem:[#allocation2 + $0x7a] sm:$0xff] }
  0xf1   : > { %v11359_v50 = vpop.permute.xlu1 %1451  ;;  %v11361_v28 = vpop.permute.xlu0 %1455  ;;  %14566 = vst [vmem:[#allocation56_spill] sm:$0xff] %v11369_v19  ;;  %14567 = vst [vmem:[#allocation57_spill] sm:$0xff] %v11373_v33 }
  0xf2   : > { %14564 = vst [vmem:[#allocation54_spill] sm:$0xff] %v11359_v50  ;;  %14565 = vst [vmem:[#allocation55_spill] sm:$0xff] %v11361_v28  ;;  %v1542_v62 = vmul.f32 %v2733_v1, %v11359_v50  ;;  %v2767_v44 = vmul.f32 %v2735_v35, %v11359_v50  ;;  %v11377_v0 = vpop.f32.mrf.mxu1  ;;  %v1543_v50 = vmul.f32 %v11353_v2, %v11361_v28 }
  0xf3   : > { %9760 = vmatmul.mubr.msk.f32.gmra.mxu0 %vm293_vm0, %v1541_v7  ;;  %9910 = vmatmul.mubr.msk.f32.gmra.mxu1 %vm293_vm0, %v2766_v34  ;;  %v2768_v7 = vmul.f32 %v11373_v33, %v11361_v28 }
  0xf4   : > { %9762 = vmatprep.mubr.msk.f32.mxu0 %vm293_vm0, %v1542_v62  ;;  %9912 = vmatprep.mubr.msk.f32.mxu1 %vm293_vm0, %v2767_v44  ;;  %v11389_v20 = vpop.f32.mrf.mxu1  ;;  %v2739_v44 = vld [vmem:[#allocation2 + $0x92] sm:$0xff]  ;;  %v11393_v62 = vld [vmem:[#allocation2 + $0x8a] sm:$0xff] }
  0xf5   : > { %v11379_v47 = vpop.permute.xlu1 %1459  ;;  %v11381_v1 = vpop.permute.xlu0 %1463  ;;  %14570 = vst [vmem:[#allocation60_spill] sm:$0xff] %v11389_v20  ;;  %14571 = vst [vmem:[#allocation61_spill] sm:$0xff] %v11393_v62 }
  0xf6   : > { %14568 = vst [vmem:[#allocation58_spill] sm:$0xff] %v11379_v47  ;;  %14569 = vst [vmem:[#allocation59_spill] sm:$0xff] %v11381_v1  ;;  %v1544_v34 = vmul.f32 %v2735_v35, %v11379_v47  ;;  %v2769_v19 = vmul.f32 %v2737_v23, %v11379_v47  ;;  %v11397_v2 = vpop.f32.mrf.mxu1  ;;  %v1545_v47 = vmul.f32 %v11373_v33, %v11381_v1 }
  0xf7   : > { %9763 = vmatmul.mubr.msk.f32.gmra.mxu0 %vm293_vm0, %v1543_v50  ;;  %9913 = vmatmul.mubr.msk.f32.gmra.mxu1 %vm293_vm0, %v2768_v7  ;;  %14572 = vst [vmem:[#allocation62_spill] sm:$0xff] %v11397_v2  ;;  %v2770_v50 = vmul.f32 %v11393_v62, %v11381_v1  ;;  %v11413_v2 = vld [vmem:[#allocation2 + $0x9a] sm:$0xff] }
  0xf8   : > { %9765 = vmatprep.mubr.msk.f32.mxu0 %vm293_vm0, %v1544_v34  ;;  %9915 = vmatprep.mubr.msk.f32.mxu1 %vm293_vm0, %v2769_v19  ;;  %v2741_v19 = vld [vmem:[#allocation2 + $0xa2] sm:$0xff]  ;;  %v11411_v34 = vpop.f32.mrf.mxu1  ;;  %14576 = vst [vmem:[#allocation66_spill] sm:$0xff] %v11413_v2 }
  0xf9   : > { %v11399_v28 = vpop.permute.xlu1 %1467  ;;  %v11401_v35 = vpop.permute.xlu0 %1471  ;;  %14575 = vst [vmem:[#allocation65_spill] sm:$0xff] %v11411_v34  ;;  %v11431_v34 = vld [vmem:[#allocation2 + $0xaa] sm:$0xff] }
  0xfa   : > { %14573 = vst [vmem:[#allocation63_spill] sm:$0xff] %v11399_v28  ;;  %14574 = vst [vmem:[#allocation64_spill] sm:$0xff] %v11401_v35  ;;  %v1546_v7 = vmul.f32 %v2737_v23, %v11399_v28  ;;  %v2771_v20 = vmul.f32 %v2739_v44, %v11399_v28  ;;  %v1547_v23 = vmul.f32 %v11393_v62, %v11401_v35 }
  0xfb   : > { %9766 = vmatmul.mubr.msk.f32.gmra.mxu0 %vm293_vm0, %v1545_v47  ;;  %9916 = vmatmul.mubr.msk.f32.gmra.mxu1 %vm293_vm0, %v2770_v50  ;;  %v2772_v47 = vmul.f32 %v11413_v2, %v11401_v35  ;;  %14580 = vst [vmem:[#allocation70_spill] sm:$0xff] %v11431_v34 }
  0xfc   : > { %9768 = vmatprep.mubr.msk.f32.mxu0 %vm293_vm0, %v1546_v7  ;;  %9918 = vmatprep.mubr.msk.f32.mxu1 %vm293_vm0, %v2771_v20  ;;  %v2743_v7 = vld [vmem:[#allocation2 + $0xb2] sm:$0xff]  ;;  %v11429_v20 = vpop.f32.mrf.mxu1 }
  0xfd   : > { %v11417_v33 = vpop.permute.xlu1 %1475  ;;  %v11419_v1 = vpop.permute.xlu0 %1479  ;;  %14579 = vst [vmem:[#allocation69_spill] sm:$0xff] %v11429_v20  ;;  %v11449_v20 = vld [vmem:[#allocation2 + $0xba] sm:$0xff] }
  0xfe   : > { %14577 = vst [vmem:[#allocation67_spill] sm:$0xff] %v11417_v33  ;;  %14578 = vst [vmem:[#allocation68_spill] sm:$0xff] %v11419_v1  ;;  %v1548_v50 = vmul.f32 %v2739_v44, %v11417_v33  ;;  %v2773_v28 = vmul.f32 %v2741_v19, %v11417_v33  ;;  %v1549_v44 = vmul.f32 %v11413_v2, %v11419_v1 }
  0xff   : > { %9769 = vmatmul.mubr.msk.f32.gmra.mxu0 %vm293_vm0, %v1547_v23  ;;  %9919 = vmatmul.mubr.msk.f32.gmra.mxu1 %vm293_vm0, %v2772_v47  ;;  %v2774_v23 = vmul.f32 %v11431_v34, %v11419_v1  ;;  %14584 = vst [vmem:[#allocation74_spill] sm:$0xff] %v11449_v20 }
 0x100   : > { %9771 = vmatprep.mubr.msk.f32.mxu0 %vm293_vm0, %v1548_v50  ;;  %9921 = vmatprep.mubr.msk.f32.mxu1 %vm293_vm0, %v2773_v28  ;;  %v2745_v50 = vld [vmem:[#allocation2 + $0xc2] sm:$0xff]  ;;  %v11447_v28 = vpop.f32.mrf.mxu1 }
 0x101   : > { %v11435_v62 = vpop.permute.xlu1 %1483  ;;  %v11437_v35 = vpop.permute.xlu0 %1487  ;;  %14583 = vst [vmem:[#allocation73_spill] sm:$0xff] %v11447_v28  ;;  %v11467_v28 = vld [vmem:[#allocation2 + $0xca] sm:$0xff] }
 0x102   : > { %14581 = vst [vmem:[#allocation71_spill] sm:$0xff] %v11435_v62  ;;  %14582 = vst [vmem:[#allocation72_spill] sm:$0xff] %v11437_v35  ;;  %v1550_v47 = vmul.f32 %v2741_v19, %v11435_v62  ;;  %v2775_v33 = vmul.f32 %v2743_v7, %v11435_v62  ;;  %v1551_v19 = vmul.f32 %v11431_v34, %v11437_v35 }
 0x103   : > { %9772 = vmatmul.mubr.msk.f32.gmra.mxu0 %vm293_vm0, %v1549_v44  ;;  %9922 = vmatmul.mubr.msk.f32.gmra.mxu1 %vm293_vm0, %v2774_v23  ;;  %v2776_v44 = vmul.f32 %v11449_v20, %v11437_v35  ;;  %14588 = vst [vmem:[#allocation78_spill] sm:$0xff] %v11467_v28 }
 0x104   : > { %9774 = vmatprep.mubr.msk.f32.mxu0 %vm293_vm0, %v1550_v47  ;;  %9924 = vmatprep.mubr.msk.f32.mxu1 %vm293_vm0, %v2775_v33  ;;  %v2747_v47 = vld [vmem:[#allocation2 + $0xd2] sm:$0xff]  ;;  %v11465_v33 = vpop.f32.mrf.mxu1 }
 0x105   : > { %v11453_v2 = vpop.permute.xlu1 %1491  ;;  %v11455_v1 = vpop.permute.xlu0 %1495  ;;  %14587 = vst [vmem:[#allocation77_spill] sm:$0xff] %v11465_v33  ;;  %v11485_v33 = vld [vmem:[#allocation2 + $0xda] sm:$0xff] }
 0x106   : > { %14585 = vst [vmem:[#allocation75_spill] sm:$0xff] %v11453_v2  ;;  %14586 = vst [vmem:[#allocation76_spill] sm:$0xff] %v11455_v1  ;;  %v1552_v23 = vmul.f32 %v2743_v7, %v11453_v2  ;;  %v2777_v62 = vmul.f32 %v2745_v50, %v11453_v2  ;;  %v1553_v7 = vmul.f32 %v11449_v20, %v11455_v1 }
 0x107   : > { %9775 = vmatmul.mubr.msk.f32.gmra.mxu0 %vm293_vm0, %v1551_v19  ;;  %9925 = vmatmul.mubr.msk.f32.gmra.mxu1 %vm293_vm0, %v2776_v44  ;;  %v2778_v19 = vmul.f32 %v11467_v28, %v11455_v1  ;;  %14592 = vst [vmem:[#allocation82_spill] sm:$0xff] %v11485_v33 }
 0x108   : > { %9777 = vmatprep.mubr.msk.f32.mxu0 %vm293_vm0, %v1552_v23  ;;  %9927 = vmatprep.mubr.msk.f32.mxu1 %vm293_vm0, %v2777_v62  ;;  %v2749_v23 = vld [vmem:[#allocation2 + $0xe2] sm:$0xff]  ;;  %v11483_v62 = vpop.f32.mrf.mxu1 }
 0x109   : > { %v11471_v34 = vpop.permute.xlu1 %1499  ;;  %v11473_v35 = vpop.permute.xlu0 %1503  ;;  %14591 = vst [vmem:[#allocation81_spill] sm:$0xff] %v11483_v62  ;;  %v11503_v62 = vld [vmem:[#allocation2 + $0xea] sm:$0xff] }
 0x10a   : > { %14589 = vst [vmem:[#allocation79_spill] sm:$0xff] %v11471_v34  ;;  %14590 = vst [vmem:[#allocation80_spill] sm:$0xff] %v11473_v35  ;;  %v1554_v44 = vmul.f32 %v2745_v50, %v11471_v34  ;;  %v2779_v2 = vmul.f32 %v2747_v47, %v11471_v34  ;;  %v1555_v50 = vmul.f32 %v11467_v28, %v11473_v35 }
 0x10b   : > { %9778 = vmatmul.mubr.msk.f32.gmra.mxu0 %vm293_vm0, %v1553_v7  ;;  %9928 = vmatmul.mubr.msk.f32.gmra.mxu1 %vm293_vm0, %v2778_v19  ;;  %v2780_v7 = vmul.f32 %v11485_v33, %v11473_v35  ;;  %14596 = vst [vmem:[#allocation86_spill] sm:$0xff] %v11503_v62 }
 0x10c   : > { %9780 = vmatprep.mubr.msk.f32.mxu0 %vm293_vm0, %v1554_v44  ;;  %9930 = vmatprep.mubr.msk.f32.mxu1 %vm293_vm0, %v2779_v2  ;;  %v2751_v44 = vld [vmem:[#allocation2 + $0xf2] sm:$0xff]  ;;  %v11501_v2 = vpop.f32.mrf.mxu1 }
 0x10d   : > { %v11489_v20 = vpop.permute.xlu1 %1507  ;;  %v11491_v1 = vpop.permute.xlu0 %1511  ;;  %14595 = vst [vmem:[#allocation85_spill] sm:$0xff] %v11501_v2  ;;  %v11521_v2 = vld [vmem:[#allocation2 + $0xfa] sm:$0xff] }
 0x10e   : > { %14593 = vst [vmem:[#allocation83_spill] sm:$0xff] %v11489_v20  ;;  %14594 = vst [vmem:[#allocation84_spill] sm:$0xff] %v11491_v1  ;;  %v1556_v19 = vmul.f32 %v2747_v47, %v11489_v20  ;;  %v2781_v34 = vmul.f32 %v2749_v23, %v11489_v20  ;;  %v1557_v47 = vmul.f32 %v11485_v33, %v11491_v1 }
 0x10f   : > { %9781 = vmatmul.mubr.msk.f32.gmra.mxu0 %vm293_vm0, %v1555_v50  ;;  %9931 = vmatmul.mubr.msk.f32.gmra.mxu1 %vm293_vm0, %v2780_v7  ;;  %v2782_v50 = vmul.f32 %v11503_v62, %v11491_v1  ;;  %14599 = vst [vmem:[#allocation89_spill] sm:$0xff] %v11521_v2 }
 0x110   : > { %9783 = vmatprep.mubr.msk.f32.mxu0 %vm293_vm0, %v1556_v19  ;;  %9933 = vmatprep.mubr.msk.f32.mxu1 %vm293_vm0, %v2781_v34  ;;  %v2753_v19 = vld [vmem:[#allocation2 + $0x102] sm:$0xff]  ;;  %v11519_v34 = vpop.f32.mrf.mxu1 }
 0x111   : > { %v11507_v28 = vpop.permute.xlu1 %1515  ;;  %v11509_v35 = vpop.permute.xlu0 %1519 }
 0x112   : > { %14597 = vst [vmem:[#allocation87_spill] sm:$0xff] %v11507_v28  ;;  %14598 = vst [vmem:[#allocation88_spill] sm:$0xff] %v11509_v35  ;;  %v1558_v7 = vmul.f32 %v2749_v23, %v11507_v28  ;;  %v2783_v20 = vmul.f32 %v2751_v44, %v11507_v28  ;;  %v1559_v23 = vmul.f32 %v11503_v62, %v11509_v35  ;;  %v2336_v62 = vld [vmem:[#allocation2 + $0x11] sm:$0xff] }
 0x113   : > { %9784 = vmatmul.mubr.msk.f32.gmra.mxu0 %vm293_vm0, %v1557_v47  ;;  %9934 = vmatmul.mubr.msk.f32.gmra.mxu1 %vm293_vm0, %v2782_v50  ;;  %v2784_v28 = vmul.f32 %v11521_v2, %v11509_v35 }
 0x114   : > { %9786 = vmatprep.mubr.msk.f32.mxu0 %vm293_vm0, %v1558_v7  ;;  %9936 = vmatprep.mubr.msk.f32.mxu1 %vm293_vm0, %v2783_v20  ;;  %v11537_v7 = vpop.f32.mrf.mxu1  ;;  %v11539_v20 = vld [vmem:[#allocation2 + $0x10a] sm:$0xff] }
 0x115   : > { %v11525_v33 = vpop.permute.xlu1 %1523  ;;  %v11531_v47 = vpop.permute.xlu0 %1527  ;;  %14602 = vst [vmem:[#allocation92_spill] sm:$0xff] %v11539_v20 }
 0x116   : > { %14600 = vst [vmem:[#allocation90_spill] sm:$0xff] %v11525_v33  ;;  %14601 = vst [vmem:[#allocation91_spill] sm:$0xff] %v11531_v47  ;;  %v1560_v50 = vmul.f32 %v2751_v44, %v11525_v33  ;;  %v2785_v1 = vmul.f32 %v2753_v19, %v11525_v33  ;;  %v1561_v35 = vmul.f32 %v11521_v2, %v11531_v47  ;;  %v3561_v19 = vld [vmem:[#allocation2 + $0x21] sm:$0xff] }
 0x117   : > { %9787 = vmatmul.mubr.msk.f32.gmra.mxu0 %vm293_vm0, %v1559_v23  ;;  %9937 = vmatmul.mubr.msk.f32.gmra.mxu1 %vm293_vm0, %v2784_v28  ;;  %v2786_v44 = vmul.f32 %v11539_v20, %v11531_v47  ;;  %v11549_v28 = vpop.f32.mrf.mxu1  ;;  %v2337_v23 = vld [vmem:[#allocation2 + $0x19] sm:$0xff]  ;;  %v3571_v20 = vld [vmem:[#allocation2 + $0x71] sm:$0xff]  ;;  %v3573_v2 = vld [vmem:[#allocation2 + $0x81] sm:$0xff] }
 0x118   : > { %9789 = vmatprep.mubr.msk.f32.mxu0 %vm293_vm0, %v1560_v50  ;;  %9939 = vmatprep.mubr.msk.f32.mxu1 %vm293_vm0, %v2785_v1  ;;  %v3562_v1 = vld [vmem:[#allocation2 + $0x29] sm:$0xff]  ;;  %v3563_v50 = vld [vmem:[#allocation2 + $0x31] sm:$0xff]  ;;  %v11556_v33 = vld [vmem:[%s14304_s1 + $0x40] sm:$0xff] }
 0x11b   : > { %9790 = vmatmul.mubr.msk.f32.gmra.mxu0 %vm293_vm0, %v1561_v35  ;;  %9940 = vmatmul.mubr.msk.f32.gmra.mxu1 %vm293_vm0, %v2786_v44  ;;  %v11560_v35 = vpop.f32.mrf.mxu1  ;;  %v3565_v44 = vld [vmem:[#allocation2 + $0x41] sm:$0xff] }
 0x11c   : > { %9844 = vmatprep.mubr.msk.f32.mxu0 %vm293_vm0, %v2336_v62  ;;  %9994 = vmatprep.mubr.msk.f32.mxu1 %vm293_vm0, %v3561_v19  ;;  %14603 = vst [vmem:[#allocation93_spill] sm:$0xff] %v11560_v35  ;;  %v3564_v62 = vld [vmem:[#allocation2 + $0x39] sm:$0xff] }
 0x11f   : > { %9845 = vmatmul.mubr.msk.f32.vlgmr.msra.gmra.mxu0 %vm293_vm0, %v2337_v23  ;;  %9995 = vmatmul.mubr.msk.f32.vlgmr.msra.gmra.mxu1 %vm293_vm0, %v3562_v1  ;;  %v11569_v23 = vpop.f32.mrf.mxu1 }
 0x120   : > { %9943 = vmatpush3.msra.mxu0 %v11273_v61  ;;  %9847 = vmatprep.mubr.msk.f32.mxu0 %vm293_vm0, %v3561_v19  ;;  %14604 = vst [vmem:[#allocation94_spill] sm:$0xff] %v11569_v23  ;;  %v3566_v61 = vld [vmem:[#allocation2 + $0x49] sm:$0xff]  ;;  %v3567_v19 = vld [vmem:[#allocation2 + $0x51] sm:$0xff] }
 0x121   : > { %9997 = vmatprep.mubr.msk.f32.mxu1 %vm293_vm0, %v3563_v50  ;;  %10042 = vmatprep.subr.mxu0 %v11556_v33  ;;  %v11575_v47 = vpop.f32.mrf.mxu1  ;;  %v3144_v23 = vld [vmem:[#allocation2 + $0x30] sm:$0xff] }
 0x122   : > { %10093 = vmatpush3.msra.mxu1 %v11296_v57  ;;  %14605 = vst [vmem:[#allocation95_spill] sm:$0xff] %v11575_v47  ;;  %v3568_v57 = vld [vmem:[#allocation2 + $0x59] sm:$0xff] }
 0x123   : > { %9848 = vmatmul.mubr.msk.f32.gmra.mxu0 %vm293_vm0, %v3562_v1  ;;  %9998 = vmatmul.mubr.msk.f32.gmra.mxu1 %vm293_vm0, %v3564_v62  ;;  %v3569_v1 = vld [vmem:[#allocation2 + $0x61] sm:$0xff] }
 0x124   : > { %9850 = vmatprep.mubr.msk.f32.mxu0 %vm293_vm0, %v3563_v50  ;;  %10000 = vmatprep.mubr.msk.f32.mxu1 %vm293_vm0, %v3565_v44  ;;  %v11581_v50 = vpop.f32.mrf.mxu1  ;;  %v4504_v47 = vld [vmem:[#allocation2] sm:$0xff] }
 0x125   : > { %14606 = vst [vmem:[#allocation96_spill] sm:$0xff] %v11581_v50  ;;  %v3575_v50 = vld [vmem:[#allocation2 + $0x91] sm:$0xff] }
 0x127   : > { %9851 = vmatmul.mubr.msk.f32.gmra.mxu0 %vm293_vm0, %v3564_v62  ;;  %10001 = vmatmul.mubr.msk.f32.gmra.mxu1 %vm293_vm0, %v3566_v61  ;;  %v3570_v62 = vld [vmem:[#allocation2 + $0x69] sm:$0xff] }
 0x128   : > { %9853 = vmatprep.mubr.msk.f32.mxu0 %vm293_vm0, %v3565_v44  ;;  %10003 = vmatprep.mubr.msk.f32.mxu1 %vm293_vm0, %v3567_v19  ;;  %v11587_v44 = vpop.f32.mrf.mxu1 }
 0x129   : > { %14607 = vst [vmem:[#allocation97_spill] sm:$0xff] %v11587_v44  ;;  %v3577_v44 = vld [vmem:[#allocation2 + $0xa1] sm:$0xff] }
 0x12b   : > { %9854 = vmatmul.mubr.msk.f32.gmra.mxu0 %vm293_vm0, %v3566_v61  ;;  %10004 = vmatmul.mubr.msk.f32.gmra.mxu1 %vm293_vm0, %v3568_v57  ;;  %v3572_v61 = vld [vmem:[#allocation2 + $0x79] sm:$0xff] }
 0x12c   : > { %9856 = vmatprep.mubr.msk.f32.mxu0 %vm293_vm0, %v3567_v19  ;;  %10006 = vmatprep.mubr.msk.f32.mxu1 %vm293_vm0, %v3569_v1  ;;  %v11593_v19 = vpop.f32.mrf.mxu1 }
 0x12d   : > { %14608 = vst [vmem:[#allocation98_spill] sm:$0xff] %v11593_v19  ;;  %v3579_v19 = vld [vmem:[#allocation2 + $0xb1] sm:$0xff] }
 0x12f   : > { %9857 = vmatmul.mubr.msk.f32.gmra.mxu0 %vm293_vm0, %v3568_v57  ;;  %10007 = vmatmul.mubr.msk.f32.gmra.mxu1 %vm293_vm0, %v3570_v62  ;;  %v3574_v57 = vld [vmem:[#allocation2 + $0x89] sm:$0xff] }
 0x130   : > { %9859 = vmatprep.mubr.msk.f32.mxu0 %vm293_vm0, %v3569_v1  ;;  %10009 = vmatprep.mubr.msk.f32.mxu1 %vm293_vm0, %v3571_v20  ;;  %v11599_v1 = vpop.f32.mrf.mxu1 }
 0x131   : > { %14609 = vst [vmem:[#allocation99_spill] sm:$0xff] %v11599_v1  ;;  %v3581_v1 = vld [vmem:[#allocation2 + $0xc1] sm:$0xff] }
 0x133   : > { %9860 = vmatmul.mubr.msk.f32.gmra.mxu0 %vm293_vm0, %v3570_v62  ;;  %10010 = vmatmul.mubr.msk.f32.gmra.mxu1 %vm293_vm0, %v3572_v61  ;;  %v3576_v62 = vld [vmem:[#allocation2 + $0x99] sm:$0xff] }
 0x134   : > { %9862 = vmatprep.mubr.msk.f32.mxu0 %vm293_vm0, %v3571_v20  ;;  %10012 = vmatprep.mubr.msk.f32.mxu1 %vm293_vm0, %v3573_v2  ;;  %v11605_v20 = vpop.f32.mrf.mxu1 }
 0x135   : > { %14610 = vst [vmem:[#allocation100_spill] sm:$0xff] %v11605_v20  ;;  %v3583_v20 = vld [vmem:[#allocation2 + $0xd1] sm:$0xff] }
 0x137   : > { %9863 = vmatmul.mubr.msk.f32.gmra.mxu0 %vm293_vm0, %v3572_v61  ;;  %10013 = vmatmul.mubr.msk.f32.gmra.mxu1 %vm293_vm0, %v3574_v57  ;;  %v3578_v61 = vld [vmem:[#allocation2 + $0xa9] sm:$0xff] }
 0x138   : > { %9865 = vmatprep.mubr.msk.f32.mxu0 %vm293_vm0, %v3573_v2  ;;  %10015 = vmatprep.mubr.msk.f32.mxu1 %vm293_vm0, %v3575_v50  ;;  %v11611_v2 = vpop.f32.mrf.mxu1 }
 0x139   : > { %14611 = vst [vmem:[#allocation101_spill] sm:$0xff] %v11611_v2  ;;  %v3585_v2 = vld [vmem:[#allocation2 + $0xe1] sm:$0xff] }
 0x13b   : > { %9866 = vmatmul.mubr.msk.f32.gmra.mxu0 %vm293_vm0, %v3574_v57  ;;  %10016 = vmatmul.mubr.msk.f32.gmra.mxu1 %vm293_vm0, %v3576_v62  ;;  %v3580_v57 = vld [vmem:[#allocation2 + $0xb9] sm:$0xff] }
 0x13c   : > { %9868 = vmatprep.mubr.msk.f32.mxu0 %vm293_vm0, %v3575_v50  ;;  %10018 = vmatprep.mubr.msk.f32.mxu1 %vm293_vm0, %v3577_v44  ;;  %v11617_v50 = vpop.f32.mrf.mxu1 }
 0x13d   : > { %14612 = vst [vmem:[#allocation102_spill] sm:$0xff] %v11617_v50  ;;  %v3587_v50 = vld [vmem:[#allocation2 + $0xf1] sm:$0xff] }
 0x13f   : > { %9869 = vmatmul.mubr.msk.f32.gmra.mxu0 %vm293_vm0, %v3576_v62  ;;  %10019 = vmatmul.mubr.msk.f32.gmra.mxu1 %vm293_vm0, %v3578_v61  ;;  %v3582_v62 = vld [vmem:[#allocation2 + $0xc9] sm:$0xff] }
 0x140   : > { %9871 = vmatprep.mubr.msk.f32.mxu0 %vm293_vm0, %v3577_v44  ;;  %10021 = vmatprep.mubr.msk.f32.mxu1 %vm293_vm0, %v3579_v19  ;;  %v11623_v44 = vpop.f32.mrf.mxu1 }
 0x141   : > { %14613 = vst [vmem:[#allocation103_spill] sm:$0xff] %v11623_v44  ;;  %v3589_v44 = vld [vmem:[#allocation2 + $0x101] sm:$0xff] }
 0x143   : > { %9872 = vmatmul.mubr.msk.f32.gmra.mxu0 %vm293_vm0, %v3578_v61  ;;  %10022 = vmatmul.mubr.msk.f32.gmra.mxu1 %vm293_vm0, %v3580_v57  ;;  %v3584_v61 = vld [vmem:[#allocation2 + $0xd9] sm:$0xff] }
 0x144   : > { %9874 = vmatprep.mubr.msk.f32.mxu0 %vm293_vm0, %v3579_v19  ;;  %10024 = vmatprep.mubr.msk.f32.mxu1 %vm293_vm0, %v3581_v1  ;;  %v11629_v19 = vpop.f32.mrf.mxu1 }
 0x145   : > { %14614 = vst [vmem:[#allocation104_spill] sm:$0xff] %v11629_v19  ;;  %v3591_v19 = vld [vmem:[#allocation2 + $0x111] sm:$0xff] }
 0x147   : > { %9875 = vmatmul.mubr.msk.f32.gmra.mxu0 %vm293_vm0, %v3580_v57  ;;  %10025 = vmatmul.mubr.msk.f32.gmra.mxu1 %vm293_vm0, %v3582_v62  ;;  %v3586_v57 = vld [vmem:[#allocation2 + $0xe9] sm:$0xff] }
 0x148   : > { %9877 = vmatprep.mubr.msk.f32.mxu0 %vm293_vm0, %v3581_v1  ;;  %10027 = vmatprep.mubr.msk.f32.mxu1 %vm293_vm0, %v3583_v20  ;;  %v11635_v1 = vpop.f32.mrf.mxu1 }
 0x149   : > { %14615 = vst [vmem:[#allocation105_spill] sm:$0xff] %v11635_v1  ;;  %v3142_v1 = vld [vmem:[#allocation2 + $0x20] sm:$0xff] }
 0x14b   : > { %9878 = vmatmul.mubr.msk.f32.gmra.mxu0 %vm293_vm0, %v3582_v62  ;;  %10028 = vmatmul.mubr.msk.f32.gmra.mxu1 %vm293_vm0, %v3584_v61  ;;  %v3588_v62 = vld [vmem:[#allocation2 + $0xf9] sm:$0xff] }
 0x14c   : > { %9880 = vmatprep.mubr.msk.f32.mxu0 %vm293_vm0, %v3583_v20  ;;  %10030 = vmatprep.mubr.msk.f32.mxu1 %vm293_vm0, %v3585_v2  ;;  %v11641_v20 = vpop.f32.mrf.mxu1 }
 0x14d   : > { %14616 = vst [vmem:[#allocation106_spill] sm:$0xff] %v11641_v20  ;;  %v3174_v20 = vmul.f32 %v3142_v1, %v11022_v6  ;;  %v3176_v1 = vmul.f32 %v3144_v23, %v11020_v5 }
 0x14f   : > { %9881 = vmatmul.mubr.msk.f32.gmra.mxu0 %vm293_vm0, %v3584_v61  ;;  %10031 = vmatmul.mubr.msk.f32.gmra.mxu1 %vm293_vm0, %v3586_v57  ;;  %v3590_v61 = vld [vmem:[#allocation2 + $0x109] sm:$0xff] }
 0x150   : > { %9883 = vmatprep.mubr.msk.f32.mxu0 %vm293_vm0, %v3585_v2  ;;  %10033 = vmatprep.mubr.msk.f32.mxu1 %vm293_vm0, %v3587_v50  ;;  %v11647_v2 = vpop.f32.mrf.mxu1 }
 0x151   : > { %14617 = vst [vmem:[#allocation107_spill] sm:$0xff] %v11647_v2  ;;  %v10568_v2 = vld [vmem:[#allocation2 + $0x28] sm:$0xff] }
 0x153   : > { %9884 = vmatmul.mubr.msk.f32.gmra.mxu0 %vm293_vm0, %v3586_v57  ;;  %10034 = vmatmul.mubr.msk.f32.gmra.mxu1 %vm293_vm0, %v3588_v62  ;;  %v3592_v57 = vld [vmem:[#allocation2 + $0x119] sm:$0xff] }
 0x154   : > { %9886 = vmatprep.mubr.msk.f32.mxu0 %vm293_vm0, %v3587_v50  ;;  %10036 = vmatprep.mubr.msk.f32.mxu1 %vm293_vm0, %v3589_v44  ;;  %v4536_v50 = vmul.f32 %v4504_v47, %v11022_v6  ;;  %v3145_v47 = vld [vmem:[#allocation2 + $0x38] sm:$0xff] }
 0x157   : > { %9887 = vmatmul.mubr.msk.f32.gmra.mxu0 %vm293_vm0, %v3588_v62  ;;  %10037 = vmatmul.mubr.msk.f32.gmra.mxu1 %vm293_vm0, %v3590_v61  ;;  %v11655_v62 = vpop.f32.mrf.mxu1 }
 0x158   : > { %9889 = vmatprep.mubr.msk.f32.mxu0 %vm293_vm0, %v3589_v44  ;;  %10039 = vmatprep.mubr.msk.f32.mxu1 %vm293_vm0, %v3591_v19  ;;  %14618 = vst [vmem:[#allocation108_spill] sm:$0xff] %v11655_v62  ;;  %v3175_v44 = vmul.f32 %v10568_v2, %v11031_v31  ;;  %v10569_v19 = vld [vmem:[#allocation2 + $0x8] sm:$0xff]  ;;  %v3149_v62 = vld [vmem:[#allocation2 + $0x58] sm:$0xff] }
 0x159   : > { %v4537_v35 = vmul.f32 %v10569_v19, %v11031_v31  ;;  %v3147_v31 = vld [vmem:[#allocation2 + $0x48] sm:$0xff] }
 0x15b   : > { %9890 = vmatmul.mubr.msk.f32.gmra.mxu0 %vm293_vm0, %v3590_v61  ;;  %10040 = vmatmul.mubr.msk.f32.gmra.mxu1 %vm293_vm0, %v3592_v57  ;;  %v11665_v61 = vld [vmem:[%s14306_s3 + $0x8] sm:$0xff] }
 0x15c   : > { %9944 = vmatprep.mubr.msk.f32.mxu0 %vm293_vm0, %v3174_v20  ;;  %10094 = vmatprep.mubr.msk.f32.mxu1 %vm293_vm0, %v4536_v50  ;;  %v3146_v20 = vld [vmem:[#allocation2 + $0x40] sm:$0xff]  ;;  %v3177_v50 = vmul.f32 %v3145_v47, %v11029_v18  ;;  %v3179_v47 = vmul.f32 %v3147_v31, %v11045_v58  ;;  %v3151_v58 = vld [vmem:[#allocation2 + $0x68] sm:$0xff] }
 0x15d   : > { %v3178_v19 = vmul.f32 %v3146_v20, %v11047_v59 }
 0x15f   : > { %v11667_v57 = vpop.f32.mrf.mxu0  ;;  %v11669_v6 = vpop.f32.mrf.mxu1  ;;  %9945 = vmatmul.mubr.msk.f32.vlgmr.msra.gmra.mxu0 %vm293_vm0, %v3175_v44  ;;  %10095 = vmatmul.mubr.msk.f32.vlgmr.msra.gmra.mxu1 %vm293_vm0, %v4537_v35 }
 0x160   : > { %10043 = vmatpush3.msra.mxu0 %v11556_v33  ;;  %9947 = vmatprep.mubr.msk.f32.mxu0 %vm293_vm0, %v3176_v1  ;;  %v3148_v33 = vld [vmem:[#allocation2 + $0x50] sm:$0xff] }
 0x161   : > { %v11675_v23 = vpop.f32.mrf.mxu0  ;;  %v11677_v2 = vpop.f32.mrf.mxu1  ;;  %10142 = vmatprep.subr.mxu0 %v11665_v61  ;;  %v3180_v18 = vmul.f32 %v3148_v33, %v11066_v12 }
 0x162   : > { %14619 = vst [vmem:[#allocation109_spill] sm:$0xff] %v11677_v2  ;;  %v3150_v2 = vld [vmem:[#allocation2 + $0x60] sm:$0xff] }
 0x163   : > { %v11682_v5 = vpop.f32.mrf.mxu0  ;;  %v11684_v44 = vpop.f32.mrf.mxu1  ;;  %9948 = vmatmul.mubr.msk.f32.gmra.mxu0 %vm293_vm0, %v3177_v50  ;;  %v3182_v31 = vmul.f32 %v3150_v2, %v11079_v22 }
 0x164   : > { %9950 = vmatprep.mubr.msk.f32.mxu0 %vm293_vm0, %v3178_v19 }
 0x165   : > { %v11688_v35 = vpop.f32.mrf.mxu0  ;;  %v11690_v1 = vpop.f32.mrf.mxu1 }
 0x166   : > { %14620 = vst [vmem:[#allocation110_spill] sm:$0xff] %v11690_v1  ;;  %v3181_v1 = vmul.f32 %v3149_v62, %v11064_v11  ;;  %v3153_v11 = vld [vmem:[#allocation2 + $0x78] sm:$0xff] }
 0x167   : > { %v11694_v20 = vpop.f32.mrf.mxu0  ;;  %v11696_v59 = vpop.f32.mrf.mxu1  ;;  %9951 = vmatmul.mubr.msk.f32.gmra.mxu0 %vm293_vm0, %v3179_v47 }
 0x168   : > { %14621 = vst [vmem:[#allocation111_spill] sm:$0xff] %v11696_v59  ;;  %9953 = vmatprep.mubr.msk.f32.mxu0 %vm293_vm0, %v3180_v18  ;;  %v3152_v59 = vld [vmem:[#allocation2 + $0x70] sm:$0xff] }
 0x169   : > { %v11700_v50 = vpop.f32.mrf.mxu0  ;;  %v11702_v19 = vpop.f32.mrf.mxu1  ;;  %v3184_v62 = vmul.f32 %v3152_v59, %v11091_v30 }
 0x16a   : > { %14622 = vst [vmem:[#allocation112_spill] sm:$0xff] %v11702_v19  ;;  %v3183_v19 = vmul.f32 %v3151_v58, %v11077_v21  ;;  %v3155_v21 = vld [vmem:[#allocation2 + $0x88] sm:$0xff] }
 0x16b   : > { %v11706_v33 = vpop.f32.mrf.mxu0  ;;  %v11708_v12 = vpop.f32.mrf.mxu1  ;;  %9954 = vmatmul.mubr.msk.f32.gmra.mxu0 %vm293_vm0, %v3181_v1 }
 0x16c   : > { %14623 = vst [vmem:[#allocation113_spill] sm:$0xff] %v11708_v12  ;;  %9956 = vmatprep.mubr.msk.f32.mxu0 %vm293_vm0, %v3182_v31  ;;  %v3154_v12 = vld [vmem:[#allocation2 + $0x80] sm:$0xff] }
 0x16d   : > { %v11712_v47 = vpop.f32.mrf.mxu0  ;;  %v11714_v18 = vpop.f32.mrf.mxu1  ;;  %v3186_v58 = vmul.f32 %v3154_v12, %v11103_v40 }
 0x16e   : > { %14624 = vst [vmem:[#allocation114_spill] sm:$0xff] %v11714_v18  ;;  %v3185_v18 = vmul.f32 %v3153_v11, %v11089_v29  ;;  %v3157_v29 = vld [vmem:[#allocation2 + $0x98] sm:$0xff] }
 0x16f   : > { %v11718_v2 = vpop.f32.mrf.mxu0  ;;  %v11720_v22 = vpop.f32.mrf.mxu1  ;;  %9957 = vmatmul.mubr.msk.f32.gmra.mxu0 %vm293_vm0, %v3183_v19 }
 0x170   : > { %14625 = vst [vmem:[#allocation115_spill] sm:$0xff] %v11720_v22  ;;  %9959 = vmatprep.mubr.msk.f32.mxu0 %vm293_vm0, %v3184_v62  ;;  %v3156_v22 = vld [vmem:[#allocation2 + $0x90] sm:$0xff] }
 0x171   : > { %v11724_v1 = vpop.f32.mrf.mxu0  ;;  %v11726_v31 = vpop.f32.mrf.mxu1  ;;  %v3188_v11 = vmul.f32 %v3156_v22, %v11115_v52  ;;  %v3160_v52 = vld [vmem:[#allocation2 + $0xb0] sm:$0xff] }
 0x172   : > { %14626 = vst [vmem:[#allocation116_spill] sm:$0xff] %v11726_v31  ;;  %v3187_v31 = vmul.f32 %v3155_v21, %v11101_v39 }
 0x173   : > { %v11730_v59 = vpop.f32.mrf.mxu0  ;;  %v11732_v30 = vpop.f32.mrf.mxu1  ;;  %9960 = vmatmul.mubr.msk.f32.gmra.mxu0 %vm293_vm0, %v3185_v18 }
 0x174   : > { %14627 = vst [vmem:[#allocation117_spill] sm:$0xff] %v11732_v30  ;;  %9962 = vmatprep.mubr.msk.f32.mxu0 %vm293_vm0, %v3186_v58  ;;  %v3158_v30 = vld [vmem:[#allocation2 + $0xa0] sm:$0xff] }
 0x175   : > { %v11736_v19 = vpop.f32.mrf.mxu0  ;;  %v11738_v62 = vpop.f32.mrf.mxu1  ;;  %v3190_v21 = vmul.f32 %v3158_v30, %v11127_v9  ;;  %v3162_v9 = vld [vmem:[#allocation2 + $0xc0] sm:$0xff] }
 0x176   : > { %14628 = vst [vmem:[#allocation118_spill] sm:$0xff] %v11738_v62  ;;  %v3189_v62 = vmul.f32 %v3157_v29, %v11113_v51  ;;  %v3192_v29 = vmul.f32 %v3160_v52, %v11139_v56  ;;  %v3164_v56 = vld [vmem:[#allocation2 + $0xd0] sm:$0xff] }
 0x177   : > { %v11742_v12 = vpop.f32.mrf.mxu0  ;;  %v11744_v40 = vpop.f32.mrf.mxu1  ;;  %9963 = vmatmul.mubr.msk.f32.gmra.mxu0 %vm293_vm0, %v3187_v31  ;;  %v3191_v31 = vmul.f32 %v11149_v10, %v11125_v8  ;;  %v3194_v8 = vmul.f32 %v3162_v9, %v11153_v14  ;;  %v3166_v14 = vld [vmem:[#allocation2 + $0xe0] sm:$0xff] }
 0x178   : > { %14629 = vst [vmem:[#allocation119_spill] sm:$0xff] %v11744_v40  ;;  %9965 = vmatprep.mubr.msk.f32.mxu0 %vm293_vm0, %v3188_v11 }
 0x179   : > { %v11748_v18 = vpop.f32.mrf.mxu0  ;;  %v11750_v58 = vpop.f32.mrf.mxu1 }
 0x17a   : > { %14630 = vst [vmem:[#allocation120_spill] sm:$0xff] %v11750_v58 }
 0x17b   : > { %v11754_v39 = vpop.f32.mrf.mxu0  ;;  %v11756_v22 = vpop.f32.mrf.mxu1  ;;  %9966 = vmatmul.mubr.msk.f32.gmra.mxu0 %vm293_vm0, %v3189_v62  ;;  %v3193_v62 = vmul.f32 %v11164_v24, %v11137_v55  ;;  %v3196_v55 = vmul.f32 %v3164_v56, %v11168_v26  ;;  %v3168_v26 = vld [vmem:[#allocation2 + $0xf0] sm:$0xff] }
 0x17c   : > { %9968 = vmatprep.mubr.msk.f32.mxu0 %vm293_vm0, %v3190_v21 }
 0x17d   : > { %v11762_v11 = vpop.f32.mrf.mxu0  ;;  %v11764_v40 = vpop.f32.mrf.mxu1 }
 0x17e   : > { %14631 = vst [vmem:[#allocation121_spill] sm:$0xff] %v11764_v40 }
 0x17f   : > { %v11767_v51 = vpop.f32.mrf.mxu0  ;;  %v11769_v30 = vpop.f32.mrf.mxu1  ;;  %9969 = vmatmul.mubr.msk.f32.gmra.mxu0 %vm293_vm0, %v3191_v31  ;;  %v3195_v31 = vmul.f32 %v11180_v36, %v11151_v13  ;;  %v3198_v13 = vmul.f32 %v3166_v14, %v11184_v38  ;;  %v3170_v38 = vld [vmem:[#allocation2 + $0x100] sm:$0xff] }
 0x180   : > { %9971 = vmatprep.mubr.msk.f32.mxu0 %vm293_vm0, %v3192_v29 }
 0x181   : > { %v11775_v21 = vpop.f32.mrf.mxu0  ;;  %v11777_v10 = vpop.f32.mrf.mxu1 }
 0x182   : > { %14632 = vst [vmem:[#allocation122_spill] sm:$0xff] %v11777_v10 }
 0x183   : > { %v11780_v40 = vpop.f32.mrf.mxu0  ;;  %v11782_v52 = vpop.f32.mrf.mxu1  ;;  %9972 = vmatmul.mubr.msk.f32.gmra.mxu0 %vm293_vm0, %v3193_v62 }
 0x184   : > { %9974 = vmatprep.mubr.msk.f32.mxu0 %vm293_vm0, %v3194_v8  ;;  %v3197_v8 = vmul.f32 %v11196_v49, %v11166_v25  ;;  %v3200_v25 = vmul.f32 %v3168_v26, %v11200_v54  ;;  %v3172_v54 = vld [vmem:[#allocation2 + $0x110] sm:$0xff] }
 0x185   : > { %v11788_v29 = vpop.f32.mrf.mxu0  ;;  %v11790_v24 = vpop.f32.mrf.mxu1 }
 0x186   : > { %14633 = vst [vmem:[#allocation123_spill] sm:$0xff] %v11790_v24 }
 0x187   : > { %v11793_v10 = vpop.f32.mrf.mxu0  ;;  %v11795_v9 = vpop.f32.mrf.mxu1  ;;  %9975 = vmatmul.mubr.msk.f32.gmra.mxu0 %vm293_vm0, %v3195_v31 }
 0x188   : > { %9977 = vmatprep.mubr.msk.f32.mxu0 %vm293_vm0, %v3196_v55  ;;  %v3199_v55 = vmul.f32 %v11212_v32, %v11182_v37  ;;  %v3202_v37 = vmul.f32 %v3170_v38, %v11216_v46  ;;  %v11848_v38 = vld [vmem:[%s14305_s2] ss:$0 sm:$0xff] }
 0x189   : > { %v11801_v62 = vpop.f32.mrf.mxu0  ;;  %v11803_v36 = vpop.f32.mrf.mxu1 }
 0x18a   : > { %14634 = vst [vmem:[#allocation124_spill] sm:$0xff] %v11803_v36 }
 0x18b   : > { %v11806_v24 = vpop.f32.mrf.mxu0  ;;  %v11808_v56 = vpop.f32.mrf.mxu1  ;;  %9978 = vmatmul.mubr.msk.f32.gmra.mxu0 %vm293_vm0, %v3197_v8 }
 0x18c   : > { %9980 = vmatprep.mubr.msk.f32.mxu0 %vm293_vm0, %v3198_v13  ;;  %v3201_v13 = vmul.f32 %v11228_v63, %v11198_v53  ;;  %v3173_v53 = vld [vmem:[#allocation2 + $0x118] sm:$0xff] }
 0x18d   : > { %v11814_v31 = vpop.f32.mrf.mxu0  ;;  %v11816_v49 = vpop.f32.mrf.mxu1 }
 0x18e   : > { %14635 = vst [vmem:[#allocation125_spill] sm:$0xff] %v11816_v49 }
 0x18f   : > { %v11819_v36 = vpop.f32.mrf.mxu0  ;;  %v11821_v14 = vpop.f32.mrf.mxu1  ;;  %9981 = vmatmul.mubr.msk.f32.gmra.mxu0 %vm293_vm0, %v3199_v55 }
 0x190   : > { %9983 = vmatprep.mubr.msk.f32.mxu0 %vm293_vm0, %v3200_v25  ;;  %v3203_v25 = vmul.f32 %v11242_v27, %v11214_v45  ;;  %v11857_v27 = vmul.f32 %v3173_v53, %v11230_v3  ;;  %v951_v53 = vadd.f32 %v11848_v38, %v11675_v23  ;;  %v3952_v23 = vld [vmem:[#allocation2 + $0x42] sm:$0xff] }
 0x191   : > { %v11827_v8 = vpop.f32.mrf.mxu0  ;;  %v11829_v32 = vpop.f32.mrf.mxu1 }
 0x192   : > { %14636 = vst [vmem:[#allocation126_spill] sm:$0xff] %v11829_v32  ;;  %v3204_v32 = vmul.f32 %v3172_v54, %v11232_v15  ;;  %14639 = vst [vmem:[#allocation129_spill] sm:$0xff] %v11857_v27  ;;  %v952_v15 = vadd.f32 %v11667_v57, %v11848_v38 }
 0x193   : > { %v11832_v49 = vpop.f32.mrf.mxu0  ;;  %v11834_v26 = vpop.f32.mrf.mxu1  ;;  %9984 = vmatmul.mubr.msk.f32.gmra.mxu0 %vm293_vm0, %v3201_v13 }
 0x194   : > { %9986 = vmatprep.mubr.msk.f32.mxu0 %vm293_vm0, %v3202_v37  ;;  %v3948_v37 = vld [vmem:[#allocation2 + $0x22] sm:$0xff] }
 0x195   : > { %v11840_v55 = vpop.f32.mrf.mxu0  ;;  %v11842_v63 = vpop.f32.mrf.mxu1 }
 0x196   : > { %14637 = vst [vmem:[#allocation127_spill] sm:$0xff] %v11840_v55  ;;  %14638 = vst [vmem:[#allocation128_spill] sm:$0xff] %v11842_v63  ;;  %v3980_v63 = vmul.f32 %v3948_v37, %v11250_v42  ;;  %v954_v37 = vadd.f32 %v11682_v5, %v11848_v38  ;;  %v1339_v42 = vadd.f32 %v11321_v60, %v952_v15 }
 0x197   : > { %v11850_v46 = vpop.f32.mrf.mxu0  ;;  %v11852_v13 = vpop.f32.mrf.mxu1  ;;  %9987 = vmatmul.mubr.msk.f32.gmra.mxu0 %vm293_vm0, %v3203_v25  ;;  %v3981_v25 = vmul.f32 %v11277_v16, %v11248_v41  ;;  %v953_v16 = vadd.f32 %v11848_v38, %v11688_v35  ;;  %v1338_v41 = vadd.f32 %v11339_v4, %v951_v53  ;;  %v3983_v5 = vmul.f32 %v11300_v43, %v11265_v48  ;;  %v14644_v35 = vld [vmem:[#allocation53_spill] sm:$0xff]  ;;  %v3954_v4 = vld [vmem:[#allocation2 + $0x52] sm:$0xff] }
 0x198   : > { %9989 = vmatprep.mubr.msk.f32.mxu0 %vm293_vm0, %v3204_v32  ;;  %v3950_v32 = vld [vmem:[#allocation2 + $0x32] sm:$0xff]  ;;  %v955_v43 = vadd.f32 %v11848_v38, %v11700_v50 }
 0x199   : > { %v11859_v45 = vpop.f32.mrf.mxu0  ;;  %v11861_v54 = vpop.f32.mrf.mxu1  ;;  %v14648_v53 = vld [vmem:[#allocation43_spill] sm:$0xff]  ;;  %v14651_v50 = vld [vmem:[#allocation44_spill] sm:$0xff] }
 0x19a   : > { %14640 = vst [vmem:[#allocation130_spill] sm:$0xff] %v11859_v45  ;;  %14641 = vst [vmem:[#allocation131_spill] sm:$0xff] %v11861_v54 }
 0x19b   : > { %v11866_v58 = vpop.f32.mrf.mxu0  ;;  %v11868_v55 = vpop.f32.mrf.mxu1  ;;  %9990 = vmatmul.mubr.msk.f32.gmra.mxu0 %vm293_vm0, %v11857_v27  ;;  %v3982_v27 = vmul.f32 %v3950_v32, %v11263_v17  ;;  %v956_v32 = vadd.f32 %v11694_v20, %v11848_v38  ;;  %v14647_v20 = vld [vmem:[#allocation56_spill] sm:$0xff] }
 0x19c   : > { %10044 = vmatprep.mubr.msk.f32.mxu0 %vm293_vm0, %v3980_v63 }
 0x19d   : > { %v11877_v3 = vpop.f32.mrf.mxu0  ;;  %v11879_v57 = vpop.f32.mrf.mxu1  ;;  %v1343_v48 = vadd.f32 %v11377_v0, %v956_v32  ;;  %v960_v0 = vadd.f32 %v11718_v2, %v11848_v38  ;;  %v14658_v2 = vld [vmem:[#allocation65_spill] sm:$0xff] }
 0x19e   : > { %14642 = vst [vmem:[#allocation132_spill] sm:$0xff] %v11879_v57 }
 0x19f   : > { %v9746_v54 = vpop.f32.mrf.mxu0  ;;  %v11885_v45 = vpop.f32.mrf.mxu1  ;;  %10045 = vmatmul.mubr.msk.f32.vlgmr.msra.gmra.mxu0 %vm293_vm0, %v3981_v25 }
 0x1a0   : > { %v11890_v63 = vadd.f32 %v9746_v54, %v1339_v42  ;;  %10047 = vmatprep.mubr.msk.f32.mxu0 %vm293_vm0, %v3982_v27  ;;  %10143 = vmatpush3.msra.mxu0 %v11665_v61  ;;  %v1341_v42 = vadd.f32 %v14644_v35, %v954_v37  ;;  %v14645_v54 = vld [vmem:[#allocation42_spill] sm:$0xff] }
 0x1a1   : > { %v1726_v15 = vpop.f32.mrf.mxu0  ;;  %v11897_v60 = vpop.f32.mrf.mxu1  ;;  %v3984_v17 = vmul.f32 %v3952_v23, %v14645_v54  ;;  %v958_v23 = vadd.f32 %v11706_v33, %v11848_v38  ;;  %v14652_v33 = vld [vmem:[#allocation60_spill] sm:$0xff] }
 0x1a2   : > { %14643 = vst [vmem:[#allocation133_spill] sm:$0xff] %v11897_v60  ;;  %v11901_v25 = vadd.f32 %v1726_v15, %v1338_v41  ;;  %v1340_v41 = vadd.f32 %v14647_v20, %v953_v16  ;;  %v14649_v15 = vld [vmem:[#allocation46_spill] sm:$0xff]  ;;  %v957_v16 = vadd.f32 %v11848_v38, %v11712_v47  ;;  %v14657_v47 = vld [vmem:[#allocation47_spill] sm:$0xff] }
 0x1a3   : > { %v9749_v27 = vpop.f32.mrf.mxu0  ;;  %v11905_v57 = vpop.f32.mrf.mxu1  ;;  %10048 = vmatmul.mubr.msk.f32.gmra.mxu0 %vm293_vm0, %v3983_v5  ;;  %v3985_v37 = vmul.f32 %v14649_v15, %v14648_v53  ;;  %v14653_v15 = vld [vmem:[#allocation45_spill] sm:$0xff] }
 0x1a4   : > { %14646 = vst [vmem:[#allocation53_spill] sm:$0xff] %v11905_v57  ;;  %v11910_v61 = vadd.f32 %v9749_v27, %v1341_v42  ;;  %10050 = vmatprep.mubr.msk.f32.mxu0 %vm293_vm0, %v3984_v17  ;;  %v3986_v42 = vmul.f32 %v3954_v4, %v14651_v50  ;;  %v3956_v17 = vld [vmem:[#allocation2 + $0x62] sm:$0xff] }
 0x1a5   : > { %v1736_v35 = vpop.f32.mrf.mxu0  ;;  %v11920_v5 = vpop.f32.mrf.mxu1 }
 0x1a6   : > { %v11918_v54 = vadd.f32 %v1736_v35, %v1340_v41  ;;  %14650 = vst [vmem:[#allocation56_spill] sm:$0xff] %v11920_v5  ;;  %v1342_v41 = vadd.f32 %v14652_v33, %v955_v43  ;;  %v14654_v35 = vld [vmem:[#allocation49_spill] sm:$0xff]  ;;  %v959_v43 = vadd.f32 %v11848_v38, %v11724_v1  ;;  %v14663_v1 = vld [vmem:[#allocation50_spill] sm:$0xff] }
 0x1a7   : > { %v9752_v27 = vpop.f32.mrf.mxu0  ;;  %10051 = vmatmul.mubr.msk.f32.gmra.mxu0 %vm293_vm0, %v3985_v37  ;;  %v3987_v53 = vmul.f32 %v14654_v35, %v14653_v15  ;;  %v11935_v32 = vpop.f32.mrf.mxu1  ;;  %v14656_v37 = vld [vmem:[#allocation62_spill] sm:$0xff]  ;;  %v1344_v35 = vadd.f32 %v14658_v2, %v957_v16  ;;  %v14659_v15 = vld [vmem:[#allocation48_spill] sm:$0xff]  ;;  %v961_v16 = vadd.f32 %v11848_v38, %v11736_v19 }
 0x1a8   : > { %v11927_v20 = vadd.f32 %v9752_v27, %v1343_v48  ;;  %10053 = vmatprep.mubr.msk.f32.mxu0 %vm293_vm0, %v3986_v42  ;;  %14655 = vst [vmem:[#allocation46_spill] sm:$0xff] %v11935_v32  ;;  %v1345_v50 = vadd.f32 %v14656_v37, %v958_v23  ;;  %v3988_v48 = vmul.f32 %v3956_v17, %v14657_v47  ;;  %v3958_v42 = vld [vmem:[#allocation2 + $0x72] sm:$0xff]  ;;  %v14662_v37 = vld [vmem:[#allocation69_spill] sm:$0xff]  ;;  %v14669_v19 = vld [vmem:[#allocation54_spill] sm:$0xff] }
 0x1a9   : > { %v1746_v5 = vpop.f32.mrf.mxu0  ;;  %v962_v23 = vadd.f32 %v11730_v59, %v11848_v38  ;;  %v11952_v17 = vpop.f32.mrf.mxu1  ;;  %v1347_v47 = vadd.f32 %v14662_v37, %v960_v0  ;;  %v14664_v59 = vld [vmem:[#allocation73_spill] sm:$0xff]  ;;  %v964_v0 = vadd.f32 %v11742_v12, %v11848_v38 }
 0x1aa   : > { %v11937_v4 = vadd.f32 %v1746_v5, %v1342_v41  ;;  %v14660_v5 = vld [vmem:[#allocation52_spill] sm:$0xff]  ;;  %14661 = vst [vmem:[#allocation60_spill] sm:$0xff] %v11952_v17  ;;  %v14668_v37 = vld [vmem:[#allocation77_spill] sm:$0xff] }
 0x1ab   : > { %v9755_v27 = vpop.f32.mrf.mxu0  ;;  %10054 = vmatmul.mubr.msk.f32.gmra.mxu0 %vm293_vm0, %v3987_v53  ;;  %v3989_v41 = vmul.f32 %v14660_v5, %v14659_v15  ;;  %v1346_v5 = vadd.f32 %v14664_v59, %v959_v43  ;;  %v14665_v15 = vld [vmem:[#allocation51_spill] sm:$0xff]  ;;  %v963_v43 = vadd.f32 %v11848_v38, %v11748_v18  ;;  %v14670_v12 = vld [vmem:[#allocation81_spill] sm:$0xff]  ;;  %v14675_v18 = vld [vmem:[#allocation58_spill] sm:$0xff] }
 0x1ac   : > { %v11944_v33 = vadd.f32 %v9755_v27, %v1345_v50  ;;  %10056 = vmatprep.mubr.msk.f32.mxu0 %vm293_vm0, %v3988_v48  ;;  %v3990_v50 = vmul.f32 %v3958_v42, %v14663_v1  ;;  %v3960_v48 = vld [vmem:[#allocation2 + $0x82] sm:$0xff]  ;;  %v11969_v42 = vpop.f32.mrf.mxu1  ;;  %v1349_v1 = vadd.f32 %v14668_v37, %v962_v23  ;;  %v966_v23 = vadd.f32 %v11754_v39, %v11848_v38 }
 0x1ad   : > { %v1756_v32 = vpop.f32.mrf.mxu0  ;;  %14667 = vst [vmem:[#allocation49_spill] sm:$0xff] %v11969_v42  ;;  %v14674_v37 = vld [vmem:[#allocation85_spill] sm:$0xff]  ;;  %v1350_v39 = vadd.f32 %v11519_v34, %v963_v43  ;;  %v967_v34 = vadd.f32 %v11848_v38, %v11775_v21  ;;  %v14684_v21 = vld [vmem:[#allocation67_spill] sm:$0xff] }
 0x1ae   : > { %v11954_v53 = vadd.f32 %v1756_v32, %v1344_v35  ;;  %v14666_v32 = vld [vmem:[#allocation57_spill] sm:$0xff] }
 0x1af   : > { %v9758_v27 = vpop.f32.mrf.mxu0  ;;  %10057 = vmatmul.mubr.msk.f32.gmra.mxu0 %vm293_vm0, %v3989_v41  ;;  %v3991_v35 = vmul.f32 %v14666_v32, %v14665_v15  ;;  %v1348_v32 = vadd.f32 %v14670_v12, %v961_v16  ;;  %v14671_v15 = vld [vmem:[#allocation55_spill] sm:$0xff]  ;;  %v965_v16 = vadd.f32 %v11848_v38, %v11762_v11 }
 0x1b0   : > { %v11961_v2 = vadd.f32 %v9758_v27, %v1347_v47  ;;  %10059 = vmatprep.mubr.msk.f32.mxu0 %vm293_vm0, %v3990_v50  ;;  %v3992_v47 = vmul.f32 %v3960_v48, %v14669_v19  ;;  %v3962_v50 = vld [vmem:[#allocation2 + $0x92] sm:$0xff]  ;;  %v11986_v48 = vpop.f32.mrf.mxu1  ;;  %v1351_v19 = vadd.f32 %v14674_v37, %v964_v0  ;;  %v968_v0 = vadd.f32 %v11767_v51, %v11848_v38 }
 0x1b1   : > { %v1766_v17 = vpop.f32.mrf.mxu0  ;;  %14673 = vst [vmem:[#allocation62_spill] sm:$0xff] %v11986_v48  ;;  %v1353_v37 = vadd.f32 %v11537_v7, %v966_v23  ;;  %v14679_v11 = vld [vmem:[#allocation63_spill] sm:$0xff]  ;;  %v1352_v51 = vadd.f32 %v11549_v28, %v965_v16  ;;  %v970_v7 = vadd.f32 %v11780_v40, %v11848_v38  ;;  %v14685_v16 = vld [vmem:[#allocation94_spill] sm:$0xff] }
 0x1b2   : > { %v11971_v41 = vadd.f32 %v1766_v17, %v1346_v5  ;;  %v14672_v17 = vld [vmem:[#allocation61_spill] sm:$0xff]  ;;  %v14687_v40 = vld [vmem:[#allocation74_spill] sm:$0xff] }
 0x1b3   : > { %v9761_v27 = vpop.f32.mrf.mxu0  ;;  %10060 = vmatmul.mubr.msk.f32.gmra.mxu0 %vm293_vm0, %v3991_v35  ;;  %v3993_v5 = vmul.f32 %v14672_v17, %v14671_v15  ;;  %v14676_v17 = vld [vmem:[#allocation59_spill] sm:$0xff] }
 0x1b4   : > { %v11978_v59 = vadd.f32 %v9761_v27, %v1349_v1  ;;  %10062 = vmatprep.mubr.msk.f32.mxu0 %vm293_vm0, %v3992_v47  ;;  %v3994_v1 = vmul.f32 %v3962_v50, %v14675_v18  ;;  %v3964_v47 = vld [vmem:[#allocation2 + $0xa2] sm:$0xff]  ;;  %v12003_v50 = vpop.f32.mrf.mxu1 }
 0x1b5   : > { %v1776_v42 = vpop.f32.mrf.mxu0  ;;  %14678 = vst [vmem:[#allocation65_spill] sm:$0xff] %v12003_v50 }
 0x1b6   : > { %v11988_v35 = vadd.f32 %v1776_v42, %v1348_v32  ;;  %v14677_v42 = vld [vmem:[#allocation66_spill] sm:$0xff]  ;;  %v12020_v23 = vpop.f32.mrf.mxu1 }
 0x1b7   : > { %v9764_v27 = vpop.f32.mrf.mxu0  ;;  %10063 = vmatmul.mubr.msk.f32.gmra.mxu0 %vm293_vm0, %v3993_v5  ;;  %v3995_v32 = vmul.f32 %v14677_v42, %v14676_v17  ;;  %v14680_v42 = vld [vmem:[#allocation64_spill] sm:$0xff]  ;;  %14682 = vst [vmem:[#allocation52_spill] sm:$0xff] %v12020_v23 }
 0x1b8   : > { %v11995_v12 = vadd.f32 %v9764_v27, %v1351_v19  ;;  %10065 = vmatprep.mubr.msk.f32.mxu0 %vm293_vm0, %v3994_v1  ;;  %v3996_v19 = vmul.f32 %v3964_v47, %v14679_v11  ;;  %v3966_v1 = vld [vmem:[#allocation2 + $0xb2] sm:$0xff] }
 0x1b9   : > { %v1786_v15 = vpop.f32.mrf.mxu0 }
 0x1ba   : > { %v12005_v5 = vadd.f32 %v1786_v15, %v1350_v39  ;;  %v14681_v15 = vld [vmem:[#allocation70_spill] sm:$0xff] }
 0x1bb   : > { %v9767_v27 = vpop.f32.mrf.mxu0  ;;  %10066 = vmatmul.mubr.msk.f32.gmra.mxu0 %vm293_vm0, %v3995_v32  ;;  %v3997_v39 = vmul.f32 %v14681_v15, %v14680_v42  ;;  %v14683_v32 = vld [vmem:[#allocation93_spill] sm:$0xff]  ;;  %v1354_v15 = vadd.f32 %v14685_v16, %v967_v34  ;;  %v14686_v42 = vld [vmem:[#allocation68_spill] sm:$0xff] }
 0x1bc   : > { %v12012_v43 = vadd.f32 %v9767_v27, %v1353_v37  ;;  %10068 = vmatprep.mubr.msk.f32.mxu0 %vm293_vm0, %v3996_v19  ;;  %v1355_v11 = vadd.f32 %v14683_v32, %v968_v0  ;;  %v3998_v37 = vmul.f32 %v3966_v1, %v14684_v21  ;;  %v3968_v19 = vld [vmem:[#allocation2 + $0xc2] sm:$0xff]  ;;  %v3999_v18 = vmul.f32 %v14687_v40, %v14686_v42  ;;  %v12035_v0 = vpop.f32.mrf.mxu1  ;;  %v14690_v32 = vld [vmem:[#allocation71_spill] sm:$0xff]  ;;  %v14691_v16 = vld [vmem:[#allocation72_spill] sm:$0xff] }
 0x1bd   : > { %v1796_v17 = vpop.f32.mrf.mxu0  ;;  %14688 = vst [vmem:[#allocation69_spill] sm:$0xff] %v12035_v0  ;;  %v14692_v40 = vld [vmem:[#allocation78_spill] sm:$0xff] }
 0x1be   : > { %v12022_v47 = vadd.f32 %v1796_v17, %v1352_v51  ;;  %v972_v17 = vadd.f32 %v11793_v10, %v11848_v38  ;;  %v14689_v51 = vld [vmem:[#allocation95_spill] sm:$0xff]  ;;  %v4001_v42 = vmul.f32 %v14692_v40, %v14691_v16  ;;  %v14697_v40 = vld [vmem:[#allocation82_spill] sm:$0xff] }
 0x1bf   : > { %v9770_v27 = vpop.f32.mrf.mxu0  ;;  %10069 = vmatmul.mubr.msk.f32.gmra.mxu0 %vm293_vm0, %v3997_v39  ;;  %v1357_v39 = vadd.f32 %v14689_v51, %v970_v7  ;;  %v14694_v7 = vld [vmem:[#allocation97_spill] sm:$0xff]  ;;  %v14695_v51 = vld [vmem:[#allocation75_spill] sm:$0xff] }
 0x1c0   : > { %v12027_v28 = vadd.f32 %v9770_v27, %v1355_v11  ;;  %10071 = vmatprep.mubr.msk.f32.mxu0 %vm293_vm0, %v3998_v37  ;;  %v4000_v11 = vmul.f32 %v3968_v19, %v14690_v32  ;;  %v3970_v37 = vld [vmem:[#allocation2 + $0xd2] sm:$0xff]  ;;  %v1359_v19 = vadd.f32 %v14694_v7, %v972_v17 }
 0x1c1   : > { %v1806_v23 = vpop.f32.mrf.mxu0  ;;  %v4002_v32 = vmul.f32 %v3970_v37, %v14695_v51  ;;  %v14699_v17 = vld [vmem:[#allocation99_spill] sm:$0xff] }
 0x1c2   : > { %v12037_v1 = vadd.f32 %v1806_v23, %v1354_v15  ;;  %v974_v23 = vadd.f32 %v11806_v24, %v11848_v38  ;;  %v12051_v15 = vpop.f32.mrf.mxu1  ;;  %v976_v24 = vadd.f32 %v11819_v36, %v11848_v38  ;;  %v14700_v7 = vld [vmem:[#allocation79_spill] sm:$0xff]  ;;  %v978_v36 = vadd.f32 %v11832_v49, %v11848_v38 }
 0x1c3   : > { %v9773_v27 = vpop.f32.mrf.mxu0  ;;  %10072 = vmatmul.mubr.msk.f32.gmra.mxu0 %vm293_vm0, %v3999_v18  ;;  %14693 = vst [vmem:[#allocation73_spill] sm:$0xff] %v12051_v15  ;;  %v980_v49 = vadd.f32 %v11850_v46, %v11848_v38  ;;  %v3979_v46 = vld [vmem:[#allocation2 + $0x11a] sm:$0xff] }
 0x1c4   : > { %v12042_v34 = vadd.f32 %v9773_v27, %v1357_v39  ;;  %10074 = vmatprep.mubr.msk.f32.mxu0 %vm293_vm0, %v4000_v11  ;;  %v3972_v39 = vld [vmem:[#allocation2 + $0xe2] sm:$0xff]  ;;  %v14696_v11 = vld [vmem:[#allocation76_spill] sm:$0xff]  ;;  %v12065_v15 = vpop.f32.mrf.mxu1  ;;  %v1361_v37 = vadd.f32 %v14699_v17, %v974_v23  ;;  %v14705_v17 = vld [vmem:[#allocation83_spill] sm:$0xff] }
 0x1c5   : > { %v12047_v10 = vpop.f32.mrf.mxu0  ;;  %v4003_v16 = vmul.f32 %v14697_v40, %v14696_v11  ;;  %14698 = vst [vmem:[#allocation57_spill] sm:$0xff] %v12065_v15  ;;  %v4004_v51 = vmul.f32 %v3972_v39, %v14700_v7  ;;  %v14702_v40 = vld [vmem:[#allocation86_spill] sm:$0xff]  ;;  %v14704_v23 = vld [vmem:[#allocation101_spill] sm:$0xff] }
 0x1c6   : > { %v12079_v15 = vpop.f32.mrf.mxu1  ;;  %v1363_v39 = vadd.f32 %v14704_v23, %v976_v24  ;;  %v14709_v24 = vld [vmem:[#allocation103_spill] sm:$0xff] }
 0x1c7   : > { %v9776_v18 = vpop.f32.mrf.mxu0  ;;  %10075 = vmatmul.mubr.msk.f32.gmra.mxu0 %vm293_vm0, %v4001_v42  ;;  %14703 = vst [vmem:[#allocation77_spill] sm:$0xff] %v12079_v15  ;;  %v14710_v23 = vld [vmem:[#allocation87_spill] sm:$0xff] }
 0x1c8   : > { %v12056_v27 = vadd.f32 %v9776_v18, %v1359_v19  ;;  %10077 = vmatprep.mubr.msk.f32.mxu0 %vm293_vm0, %v4002_v32  ;;  %v3974_v19 = vld [vmem:[#allocation2 + $0xf2] sm:$0xff]  ;;  %v12093_v15 = vpop.f32.mrf.mxu1 }
 0x1c9   : > { %v12061_v21 = vpop.f32.mrf.mxu0  ;;  %v14701_v32 = vld [vmem:[#allocation80_spill] sm:$0xff]  ;;  %v4006_v7 = vmul.f32 %v3974_v19, %v14705_v17  ;;  %14708 = vst [vmem:[#allocation81_spill] sm:$0xff] %v12093_v15  ;;  %v1365_v19 = vadd.f32 %v14709_v24, %v978_v36  ;;  %v982_v15 = vadd.f32 %v11866_v58, %v11848_v38 }
 0x1ca   : > { %v4005_v11 = vmul.f32 %v14702_v40, %v14701_v32  ;;  %v14707_v40 = vld [vmem:[#allocation89_spill] sm:$0xff]  ;;  %v12107_v36 = vpop.f32.mrf.mxu1 }
 0x1cb   : > { %v9779_v42 = vpop.f32.mrf.mxu0  ;;  %10078 = vmatmul.mubr.msk.f32.gmra.mxu0 %vm293_vm0, %v4003_v16  ;;  %14713 = vst [vmem:[#allocation61_spill] sm:$0xff] %v12107_v36  ;;  %v14719_v36 = vld [vmem:[#allocation107_spill] sm:$0xff] }
 0x1cc   : > { %v12070_v18 = vadd.f32 %v9779_v42, %v1361_v37  ;;  %10080 = vmatprep.mubr.msk.f32.mxu0 %vm293_vm0, %v4004_v51  ;;  %v3976_v37 = vld [vmem:[#allocation2 + $0x102] sm:$0xff]  ;;  %v14706_v51 = vld [vmem:[#allocation84_spill] sm:$0xff]  ;;  %v12120_v58 = vpop.f32.mrf.mxu1  ;;  %v1369_v60 = vadd.f32 %v14719_v36, %v982_v15 }
 0x1cd   : > { %v12075_v0 = vpop.f32.mrf.mxu0  ;;  %v4007_v32 = vmul.f32 %v14707_v40, %v14706_v51  ;;  %v4008_v17 = vmul.f32 %v3976_v37, %v14710_v23  ;;  %v14712_v40 = vld [vmem:[#allocation92_spill] sm:$0xff]  ;;  %v14714_v37 = vld [vmem:[#allocation105_spill] sm:$0xff]  ;;  %v14715_v23 = vld [vmem:[#allocation90_spill] sm:$0xff]  ;;  %14718 = vst [vmem:[#allocation66_spill] sm:$0xff] %v12120_v58 }
 0x1ce   : > { %v1367_v24 = vadd.f32 %v14714_v37, %v980_v49  ;;  %v2305_v37 = vadd.f32 %v11669_v6, %v11890_v63  ;;  %v14723_v6 = vld [vmem:[#allocation111_spill] sm:$0xff] }
 0x1cf   : > { %v9782_v16 = vpop.f32.mrf.mxu0  ;;  %10081 = vmatmul.mubr.msk.f32.gmra.mxu0 %vm293_vm0, %v4005_v11  ;;  %v2309_v63 = vadd.f32 %v14723_v6, %v11927_v20 }
 0x1d0   : > { %v12084_v42 = vadd.f32 %v9782_v16, %v1363_v39  ;;  %10083 = vmatprep.mubr.msk.f32.mxu0 %vm293_vm0, %v4006_v7  ;;  %v3978_v39 = vld [vmem:[#allocation2 + $0x112] sm:$0xff] }
 0x1d1   : > { %v12089_v50 = vpop.f32.mrf.mxu0  ;;  %v14711_v7 = vld [vmem:[#allocation88_spill] sm:$0xff] }
 0x1d2   : > { %v4009_v51 = vmul.f32 %v14712_v40, %v14711_v7  ;;  %v4922_v7 = vld [vmem:[#allocation2 + $0x1] sm:$0xff] }
 0x1d3   : > { %v9785_v11 = vpop.f32.mrf.mxu0  ;;  %10084 = vmatmul.mubr.msk.f32.gmra.mxu0 %vm293_vm0, %v4007_v32  ;;  %v4010_v32 = vmul.f32 %v3978_v39, %v14715_v23 }
 0x1d4   : > { %v12098_v16 = vadd.f32 %v9785_v11, %v1365_v19  ;;  %10086 = vmatprep.mubr.msk.f32.mxu0 %vm293_vm0, %v4008_v17  ;;  %v14716_v17 = vld [vmem:[#allocation91_spill] sm:$0xff] }
 0x1d5   : > { %v12103_v48 = vpop.f32.mrf.mxu0  ;;  %v12116_v11 = vmul.f32 %v3979_v46, %v14716_v17  ;;  %v12130_v46 = vpop.f32.mrf.mxu1 }
 0x1d6   : > { %14720 = vst [vmem:[#allocation70_spill] sm:$0xff] %v12130_v46 }
 0x1d7   : > { %v9788_v57 = vpop.f32.mrf.mxu0  ;;  %10087 = vmatmul.mubr.msk.f32.gmra.mxu0 %vm293_vm0, %v4009_v51  ;;  %14717 = vst [vmem:[#allocation85_spill] sm:$0xff] %v12116_v11 }
 0x1d8   : > { %v12112_v19 = vadd.f32 %v9788_v57, %v1367_v24  ;;  %10089 = vmatprep.mubr.msk.f32.mxu0 %vm293_vm0, %v4010_v32  ;;  %v4923_v57 = vld [vmem:[#allocation2 + $0x9] sm:$0xff]  ;;  %v12139_v32 = vpop.f32.mrf.mxu1 }
 0x1d9   : > { %v12118_v40 = vpop.f32.mrf.mxu0  ;;  %14721 = vst [vmem:[#allocation93_spill] sm:$0xff] %v12139_v32  ;;  %v14725_v32 = vld [vmem:[#allocation113_spill] sm:$0xff] }
 0x1da   : > { %v12147_v17 = vpop.f32.mrf.mxu1 }
 0x1db   : > { %v9791_v49 = vpop.f32.mrf.mxu0  ;;  %10090 = vmatmul.mubr.msk.f32.gmra.mxu0 %vm293_vm0, %v12116_v11  ;;  %14722 = vst [vmem:[#allocation94_spill] sm:$0xff] %v12147_v17  ;;  %v14727_v17 = vld [vmem:[#allocation115_spill] sm:$0xff] }
 0x1dc   : > { %v12125_v39 = vadd.f32 %v9791_v49, %v1369_v60  ;;  %10144 = vmatprep.mubr.msk.f32.mxu0 %vm293_vm0, %v4922_v7  ;;  %v2307_v60 = vadd.f32 %v11684_v44, %v11910_v61  ;;  %v12155_v23 = vpop.f32.mrf.mxu1  ;;  %v2311_v44 = vadd.f32 %v14725_v32, %v11944_v33  ;;  %v2313_v20 = vadd.f32 %v14727_v17, %v11961_v2  ;;  %v14733_v17 = vld [vmem:[#allocation119_spill] sm:$0xff] }
 0x1dd   : > { %v12128_v51 = vpop.f32.mrf.mxu0  ;;  %14724 = vst [vmem:[#allocation74_spill] sm:$0xff] %v12155_v23  ;;  %v14730_v23 = vld [vmem:[#allocation117_spill] sm:$0xff] }
 0x1de   : > { %v12163_v46 = vpop.f32.mrf.mxu1  ;;  %v2315_v33 = vadd.f32 %v14730_v23, %v11978_v59 }
 0x1df   : > { %v9846_v24 = vpop.f32.mrf.mxu0  ;;  %10145 = vmatmul.mubr.msk.f32.vlgmr.msra.gmra.mxu0 %vm293_vm0, %v4923_v57  ;;  %14726 = vst [vmem:[#allocation95_spill] sm:$0xff] %v12163_v46 }
 0x1e0   : > { %v12135_v15 = vadd.f32 %v9846_v24, %v2305_v37  ;;  %v12171_v58 = vpop.f32.mrf.mxu1 }
 0x1e1   : > { %v12137_v36 = vpop.f32.mrf.mxu0  ;;  %14729 = vst [vmem:[#allocation97_spill] sm:$0xff] %v12171_v58 }
 0x1e2   : > { %v12182_v2 = vpop.f32.mrf.mxu1 }
 0x1e3   : > { %v9849_v7 = vpop.f32.mrf.mxu0  ;;  %14732 = vst [vmem:[#allocation99_spill] sm:$0xff] %v12182_v2 }
 0x1e4   : > { %v12143_v49 = vadd.f32 %v9849_v7, %v2307_v60  ;;  %v12190_v23 = vpop.f32.mrf.mxu1 }
 0x1e5   : > { %v12145_v11 = vpop.f32.mrf.mxu0  ;;  %14735 = vst [vmem:[#allocation101_spill] sm:$0xff] %v12190_v23 }
 0x1e7   : > { %v9852_v57 = vpop.f32.mrf.mxu0 }
 0x1e8   : > { %v12151_v37 = vadd.f32 %v9852_v57, %v2309_v63 }
 0x1e9   : > { %v12153_v24 = vpop.f32.mrf.mxu0 }
 0x1eb   : > { %v9855_v61 = vpop.f32.mrf.mxu0 }
 0x1ec   : > { %v12159_v60 = vadd.f32 %v9855_v61, %v2311_v44  ;;  %v8813_v44 = vld [vmem:[%s14306_s3 + $0x10] sm:$0xff] }
 0x1ed   : > { %v12161_v7 = vpop.f32.mrf.mxu0  ;;  %10192 = vmatprep.subr.mxu1 %v8813_v44 }
 0x1ee   : > { %10193 = vmatpush3.msra.mxu1 %v8813_v44  ;;  %v12198_v44 = vpop.f32.mrf.mxu1 }
 0x1ef   : > { %v9858_v6 = vpop.f32.mrf.mxu0  ;;  %14737 = vst [vmem:[#allocation103_spill] sm:$0xff] %v12198_v44 }
 0x1f0   : > { %v12167_v63 = vadd.f32 %v9858_v6, %v2313_v20  ;;  %v2317_v20 = vadd.f32 %v14733_v17, %v11995_v12  ;;  %v2321_v12 = vadd.f32 %v11769_v30, %v12027_v28  ;;  %v12206_v2 = vpop.f32.mrf.mxu1  ;;  %v2325_v30 = vadd.f32 %v11795_v9, %v12056_v27 }
 0x1f1   : > { %v12169_v57 = vpop.f32.mrf.mxu0  ;;  %14740 = vst [vmem:[#allocation107_spill] sm:$0xff] %v12206_v2  ;;  %v2329_v9 = vadd.f32 %v11821_v14, %v12084_v42  ;;  %v2333_v14 = vadd.f32 %v11852_v13, %v12112_v19 }
 0x1f2   : > { %14728 = vst [vmem:[#allocation78_spill] sm:$0xff] %v12167_v63  ;;  %v12214_v23 = vpop.f32.mrf.mxu1 }
 0x1f3   : > { %v9861_v32 = vpop.f32.mrf.mxu0  ;;  %14743 = vst [vmem:[#allocation115_spill] sm:$0xff] %v12214_v23 }
 0x1f4   : > { %v12178_v61 = vadd.f32 %v9861_v32, %v2315_v33  ;;  %v2319_v33 = vadd.f32 %v11756_v22, %v12012_v43  ;;  %v2323_v22 = vadd.f32 %v11782_v52, %v12042_v34  ;;  %v12222_v44 = vpop.f32.mrf.mxu1  ;;  %v2327_v52 = vadd.f32 %v11808_v56, %v12070_v18 }
 0x1f5   : > { %v12180_v46 = vpop.f32.mrf.mxu0  ;;  %14746 = vst [vmem:[#allocation134_spill] sm:$0xff] %v12222_v44  ;;  %v2331_v56 = vadd.f32 %v11834_v26, %v12098_v16  ;;  %v2335_v26 = vadd.f32 %v11868_v55, %v12125_v39 }
 0x1f6   : > { %14731 = vst [vmem:[#allocation82_spill] sm:$0xff] %v12178_v61  ;;  %v12230_v2 = vpop.f32.mrf.mxu1 }
 0x1f7   : > { %v9864_v6 = vpop.f32.mrf.mxu0  ;;  %14749 = vst [vmem:[#allocation137_spill] sm:$0xff] %v12230_v2 }
 0x1f8   : > { %v12186_v58 = vadd.f32 %v9864_v6, %v2317_v20  ;;  %v12238_v23 = vpop.f32.mrf.mxu1 }
 0x1f9   : > { %v12188_v59 = vpop.f32.mrf.mxu0  ;;  %14752 = vst [vmem:[#allocation140_spill] sm:$0xff] %v12238_v23 }
 0x1fa   : > { %14734 = vst [vmem:[#allocation86_spill] sm:$0xff] %v12186_v58  ;;  %v12246_v44 = vpop.f32.mrf.mxu1 }
 0x1fb   : > { %v9867_v32 = vpop.f32.mrf.mxu0  ;;  %14755 = vst [vmem:[#allocation143_spill] sm:$0xff] %v12246_v44 }
 0x1fc   : > { %v12194_v61 = vadd.f32 %v9867_v32, %v2319_v33  ;;  %v12254_v2 = vpop.f32.mrf.mxu1 }
 0x1fd   : > { %v12196_v63 = vpop.f32.mrf.mxu0 }
 0x1fe   : > { %14736 = vst [vmem:[#allocation89_spill] sm:$0xff] %v12194_v61  ;;  %v12262_v23 = vpop.f32.mrf.mxu1  ;;  %v14795_v61 = vld [vmem:[#allocation98_spill] sm:$0xff] }
 0x1ff   : > { %v9870_v17 = vpop.f32.mrf.mxu0 }
 0x200   : > { %v12202_v20 = vadd.f32 %v9870_v17, %v2321_v12  ;;  %v12268_v19 = vpop.f32.mrf.mxu1 }
 0x201   : > { %v12204_v6 = vpop.f32.mrf.mxu0 }
 0x202   : > { %14738 = vst [vmem:[#allocation92_spill] sm:$0xff] %v12202_v20  ;;  %14739 = vst [vmem:[#allocation105_spill] sm:$0xff] %v12204_v6  ;;  %v14798_v6 = vld [vmem:[#allocation102_spill] sm:$0xff] }
 0x203   : > { %v9873_v43 = vpop.f32.mrf.mxu0 }
 0x204   : > { %v12210_v33 = vadd.f32 %v9873_v43, %v2323_v22 }
 0x205   : > { %v12212_v32 = vpop.f32.mrf.mxu0 }
 0x206   : > { %14741 = vst [vmem:[#allocation111_spill] sm:$0xff] %v12210_v33  ;;  %14742 = vst [vmem:[#allocation113_spill] sm:$0xff] %v12212_v32 }
 0x207   : > { %v9876_v28 = vpop.f32.mrf.mxu0 }
 0x208   : > { %v12218_v12 = vadd.f32 %v9876_v28, %v2325_v30 }
 0x209   : > { %v12220_v17 = vpop.f32.mrf.mxu0 }
 0x20a   : > { %14744 = vst [vmem:[#allocation117_spill] sm:$0xff] %v12218_v12  ;;  %14745 = vst [vmem:[#allocation119_spill] sm:$0xff] %v12220_v17 }
 0x20b   : > { %v9879_v34 = vpop.f32.mrf.mxu0 }
 0x20c   : > { %v12226_v22 = vadd.f32 %v9879_v34, %v2327_v52 }
 0x20d   : > { %v12228_v43 = vpop.f32.mrf.mxu0 }
 0x20e   : > { %14747 = vst [vmem:[#allocation135_spill] sm:$0xff] %v12226_v22  ;;  %14748 = vst [vmem:[#allocation136_spill] sm:$0xff] %v12228_v43 }
 0x20f   : > { %v9882_v27 = vpop.f32.mrf.mxu0 }
 0x210   : > { %v12234_v30 = vadd.f32 %v9882_v27, %v2329_v9 }
 0x211   : > { %v12236_v28 = vpop.f32.mrf.mxu0 }
 0x212   : > { %14750 = vst [vmem:[#allocation138_spill] sm:$0xff] %v12234_v30  ;;  %14751 = vst [vmem:[#allocation139_spill] sm:$0xff] %v12236_v28 }
 0x213   : > { %v9885_v18 = vpop.f32.mrf.mxu0 }
 0x214   : > { %v12242_v52 = vadd.f32 %v9885_v18, %v2331_v56 }
 0x215   : > { %v12244_v34 = vpop.f32.mrf.mxu0 }
 0x216   : > { %14753 = vst [vmem:[#allocation141_spill] sm:$0xff] %v12242_v52  ;;  %14754 = vst [vmem:[#allocation142_spill] sm:$0xff] %v12244_v34 }
 0x217   : > { %v9888_v42 = vpop.f32.mrf.mxu0 }
 0x218   : > { %v12250_v9 = vadd.f32 %v9888_v42, %v2333_v14 }
 0x219   : > { %v12252_v27 = vpop.f32.mrf.mxu0 }
 0x21a   : > { %14756 = vst [vmem:[#allocation144_spill] sm:$0xff] %v12250_v9  ;;  %14757 = vst [vmem:[#allocation145_spill] sm:$0xff] %v12252_v27  ;;  %v12274_v9 = vpop.f32.mrf.mxu1  ;;  %v8879_v27 = vld [vmem:[%s14306_s3 + $0x20] sm:$0xff] }
 0x21b   : > { %v9891_v16 = vpop.f32.mrf.mxu0  ;;  %10292 = vmatprep.subr.mxu1 %v8879_v27 }
 0x21c   : > { %v12258_v56 = vadd.f32 %v9891_v16, %v2335_v26  ;;  %v12280_v26 = vpop.f32.mrf.mxu1  ;;  %v8846_v16 = vld [vmem:[%s14306_s3 + $0x18] sm:$0xff] }
 0x21d   : > { %v12260_v18 = vpop.f32.mrf.mxu0  ;;  %14760 = vst [vmem:[#allocation148_spill] sm:$0xff] %v12280_v26  ;;  %10242 = vmatprep.subr.mxu0 %v8846_v16  ;;  %v14799_v26 = vld [vmem:[#allocation104_spill] sm:$0xff] }
 0x21e   : > { %14758 = vst [vmem:[#allocation146_spill] sm:$0xff] %v12258_v56  ;;  %14759 = vst [vmem:[#allocation147_spill] sm:$0xff] %v12260_v18  ;;  %10243 = vmatpush3.msra.mxu0 %v8846_v16  ;;  %v12292_v52 = vpop.f32.mrf.mxu1 }
 0x21f   : > { %v12264_v44 = vpop.f32.mrf.mxu0  ;;  %14763 = vst [vmem:[#allocation151_spill] sm:$0xff] %v12292_v52 }
 0x220   : > { %v12298_v28 = vpop.f32.mrf.mxu1 }
 0x221   : > { %v12266_v13 = vpop.f32.mrf.mxu0  ;;  %14766 = vst [vmem:[#allocation154_spill] sm:$0xff] %v12298_v28 }
 0x222   : > { %v12304_v16 = vpop.f32.mrf.mxu1 }
 0x223   : > { %v12270_v14 = vpop.f32.mrf.mxu0  ;;  %14769 = vst [vmem:[#allocation157_spill] sm:$0xff] %v12304_v16 }
 0x224   : > { %v12310_v33 = vpop.f32.mrf.mxu1 }
 0x225   : > { %v12272_v42 = vpop.f32.mrf.mxu0  ;;  %14772 = vst [vmem:[#allocation160_spill] sm:$0xff] %v12310_v33 }
 0x226   : > { %v12316_v20 = vpop.f32.mrf.mxu1 }
 0x227   : > { %v12276_v55 = vpop.f32.mrf.mxu0  ;;  %14775 = vst [vmem:[#allocation163_spill] sm:$0xff] %v12316_v20 }
 0x229   : > { %v12278_v39 = vpop.f32.mrf.mxu0 }
 0x22b   : > { %v12285_v56 = vpop.f32.mrf.mxu0 }
 0x22c   : > { %14761 = vst [vmem:[#allocation149_spill] sm:$0xff] %v12285_v56 }
 0x22d   : > { %v12287_v18 = vpop.f32.mrf.mxu0 }
 0x22e   : > { %14762 = vst [vmem:[#allocation150_spill] sm:$0xff] %v12287_v18 }
 0x22f   : > { %v12294_v34 = vpop.f32.mrf.mxu0 }
 0x230   : > { %14764 = vst [vmem:[#allocation152_spill] sm:$0xff] %v12294_v34 }
 0x231   : > { %v12296_v30 = vpop.f32.mrf.mxu0 }
 0x232   : > { %14765 = vst [vmem:[#allocation153_spill] sm:$0xff] %v12296_v30 }
 0x233   : > { %v12300_v22 = vpop.f32.mrf.mxu0 }
 0x234   : > { %14767 = vst [vmem:[#allocation155_spill] sm:$0xff] %v12300_v22  ;;  %v12322_v22 = vpop.f32.mrf.mxu1 }
 0x235   : > { %v12302_v43 = vpop.f32.mrf.mxu0  ;;  %14778 = vst [vmem:[#allocation166_spill] sm:$0xff] %v12322_v22  ;;  %v14794_v22 = vld [vmem:[#allocation96_spill] sm:$0xff] }
 0x236   : > { %14768 = vst [vmem:[#allocation156_spill] sm:$0xff] %v12302_v43 }
 0x237   : > { %v12306_v12 = vpop.f32.mrf.mxu0 }
 0x238   : > { %14770 = vst [vmem:[#allocation158_spill] sm:$0xff] %v12306_v12  ;;  %v12328_v12 = vpop.f32.mrf.mxu1 }
 0x239   : > { %v12308_v17 = vpop.f32.mrf.mxu0  ;;  %14781 = vst [vmem:[#allocation169_spill] sm:$0xff] %v12328_v12 }
 0x23a   : > { %14771 = vst [vmem:[#allocation159_spill] sm:$0xff] %v12308_v17 }
 0x23b   : > { %v12312_v32 = vpop.f32.mrf.mxu0 }
 0x23c   : > { %14773 = vst [vmem:[#allocation161_spill] sm:$0xff] %v12312_v32  ;;  %v12334_v32 = vpop.f32.mrf.mxu1 }
 0x23d   : > { %v12314_v27 = vpop.f32.mrf.mxu0  ;;  %14784 = vst [vmem:[#allocation172_spill] sm:$0xff] %v12334_v32  ;;  %v14789_v32 = vld [vmem:[#allocation127_spill] sm:$0xff] }
 0x23e   : > { %14774 = vst [vmem:[#allocation162_spill] sm:$0xff] %v12314_v27 }
 0x23f   : > { %v12318_v30 = vpop.f32.mrf.mxu0 }
 0x240   : > { %14776 = vst [vmem:[#allocation164_spill] sm:$0xff] %v12318_v30  ;;  %v12340_v30 = vpop.f32.mrf.mxu1 }
 0x241   : > { %v12320_v28 = vpop.f32.mrf.mxu0  ;;  %14787 = vst [vmem:[#allocation175_spill] sm:$0xff] %v12340_v30 }
 0x242   : > { %14777 = vst [vmem:[#allocation165_spill] sm:$0xff] %v12320_v28 }
 0x243   : > { %v12324_v43 = vpop.f32.mrf.mxu0 }
 0x244   : > { %14779 = vst [vmem:[#allocation167_spill] sm:$0xff] %v12324_v43  ;;  %v969_v43 = vadd.f32 %v11848_v38, %v11788_v29  ;;  %v12360_v29 = vpop.f32.mrf.mxu1 }
 0x245   : > { %v12326_v16 = vpop.f32.mrf.mxu0 }
 0x246   : > { %14780 = vst [vmem:[#allocation168_spill] sm:$0xff] %v12326_v16  ;;  %v971_v16 = vadd.f32 %v11848_v38, %v11801_v62 }
 0x247   : > { %v12330_v17 = vpop.f32.mrf.mxu0 }
 0x248   : > { %14782 = vst [vmem:[#allocation170_spill] sm:$0xff] %v12330_v17  ;;  %v973_v17 = vadd.f32 %v11848_v38, %v11814_v31  ;;  %v1356_v31 = vadd.f32 %v14794_v22, %v969_v43  ;;  %v1358_v34 = vadd.f32 %v14795_v61, %v971_v16  ;;  %v14802_v22 = vld [vmem:[#allocation110_spill] sm:$0xff] }
 0x249   : > { %v12332_v33 = vpop.f32.mrf.mxu0  ;;  %v2306_v61 = vadd.f32 %v14802_v22, %v11918_v54 }
 0x24a   : > { %14783 = vst [vmem:[#allocation171_spill] sm:$0xff] %v12332_v33  ;;  %v975_v33 = vadd.f32 %v11848_v38, %v11827_v8  ;;  %v14796_v8 = vld [vmem:[#allocation100_spill] sm:$0xff] }
 0x24b   : > { %v12336_v27 = vpop.f32.mrf.mxu0  ;;  %v1360_v52 = vadd.f32 %v14796_v8, %v973_v17  ;;  %v14803_v17 = vld [vmem:[#allocation112_spill] sm:$0xff] }
 0x24c   : > { %14785 = vst [vmem:[#allocation173_spill] sm:$0xff] %v12336_v27  ;;  %v977_v27 = vadd.f32 %v11848_v38, %v14789_v32  ;;  %v14797_v32 = vld [vmem:[#allocation109_spill] sm:$0xff]  ;;  %v2308_v43 = vadd.f32 %v14803_v17, %v11937_v4 }
 0x24d   : > { %v12338_v20 = vpop.f32.mrf.mxu0  ;;  %v2304_v18 = vadd.f32 %v14797_v32, %v11901_v25  ;;  %v14804_v25 = vld [vmem:[#allocation114_spill] sm:$0xff]  ;;  %v14812_v32 = vld [vmem:[#allocation124_spill] sm:$0xff] }
 0x24e   : > { %14786 = vst [vmem:[#allocation174_spill] sm:$0xff] %v12338_v20  ;;  %v14790_v20 = vld [vmem:[#allocation130_spill] sm:$0xff]  ;;  %v1364_v58 = vadd.f32 %v14799_v26, %v977_v27  ;;  %v2310_v16 = vadd.f32 %v14804_v25, %v11954_v53  ;;  %v14807_v26 = vld [vmem:[#allocation120_spill] sm:$0xff] }
 0x24f   : > { %v12342_v28 = vpop.f32.mrf.mxu0  ;;  %v979_v30 = vadd.f32 %v11848_v38, %v14790_v20  ;;  %14792 = vst [vmem:[#allocation130_spill] sm:$0xff] %v12360_v29  ;;  %v1362_v20 = vadd.f32 %v14798_v6, %v975_v33  ;;  %v12382_v6 = vpop.f32.mrf.mxu1  ;;  %v1903_v33 = vadd.f32 %v12047_v10, %v1356_v31  ;;  %v2316_v27 = vadd.f32 %v14807_v26, %v12005_v5  ;;  %v14809_v5 = vld [vmem:[#allocation122_spill] sm:$0xff] }
 0x250   : > { %14788 = vst [vmem:[#allocation176_spill] sm:$0xff] %v12342_v28  ;;  %v981_v28 = vadd.f32 %v11848_v38, %v11877_v3  ;;  %v14800_v3 = vld [vmem:[#allocation106_spill] sm:$0xff]  ;;  %v3111_v10 = vadd.f32 %v11885_v45, %v12135_v15  ;;  %v2320_v8 = vadd.f32 %v14809_v5, %v12037_v1  ;;  %v14810_v15 = vld [vmem:[#allocation133_spill] sm:$0xff]  ;;  %v2697_v1 = vadd.f32 %v12161_v7, %v2310_v16  ;;  %v14819_v16 = vld [vmem:[#allocation132_spill] sm:$0xff] }
 0x251   : > { %v12358_v12 = vpop.f32.mrf.mxu0  ;;  %v1366_v38 = vadd.f32 %v14800_v3, %v979_v30  ;;  %v1907_v30 = vadd.f32 %v12075_v0, %v1360_v52  ;;  %v1909_v4 = vadd.f32 %v12089_v50, %v1362_v20  ;;  %v2693_v52 = vadd.f32 %v12145_v11, %v2306_v61  ;;  %v14813_v20 = vld [vmem:[#allocation125_spill] sm:$0xff]  ;;  %v14814_v3 = vld [vmem:[#allocation126_spill] sm:$0xff]  ;;  %v14816_v61 = vld [vmem:[#allocation128_spill] sm:$0xff] }
 0x252   : > { %14791 = vst [vmem:[#allocation127_spill] sm:$0xff] %v12358_v12  ;;  %v14801_v12 = vld [vmem:[#allocation108_spill] sm:$0xff]  ;;  %v3530_v45 = vadd.f32 %v12264_v44, %v3111_v10 }
 0x253   : > { %v12362_v62 = vpop.f32.mrf.mxu0  ;;  %v1368_v56 = vadd.f32 %v14801_v12, %v981_v28  ;;  %v1905_v12 = vadd.f32 %v12061_v21, %v1358_v34  ;;  %v1911_v21 = vadd.f32 %v12103_v48, %v1364_v58  ;;  %v1913_v0 = vadd.f32 %v12118_v40, %v1366_v38  ;;  %v14811_v58 = vld [vmem:[#allocation123_spill] sm:$0xff]  ;;  %v14821_v10 = vld [vmem:[#allocation60_spill] sm:$0xff] }
 0x254   : > { %14793 = vst [vmem:[#allocation177_spill] sm:$0xff] %v12362_v62  ;;  %v2691_v62 = vadd.f32 %v12137_v36, %v2304_v18  ;;  %v14805_v36 = vld [vmem:[#allocation116_spill] sm:$0xff]  ;;  %v14806_v18 = vld [vmem:[#allocation118_spill] sm:$0xff]  ;;  %v2695_v40 = vadd.f32 %v12153_v24, %v2308_v43  ;;  %v12416_v11 = vadd.f32 %v14811_v58, %v1903_v33  ;;  %v12428_v44 = vadd.f32 %v14814_v3, %v1909_v4  ;;  %v14815_v24 = vld [vmem:[#allocation53_spill] sm:$0xff] }
 0x255   : > { %v12373_v29 = vpop.f32.mrf.mxu0  ;;  %v2312_v28 = vadd.f32 %v14805_v36, %v11971_v41  ;;  %v2314_v53 = vadd.f32 %v14806_v18, %v11988_v35  ;;  %v14808_v41 = vld [vmem:[#allocation121_spill] sm:$0xff]  ;;  %v1915_v50 = vadd.f32 %v12128_v51, %v1368_v56  ;;  %v12408_v35 = vpop.f32.mrf.mxu1  ;;  %v12422_v51 = vadd.f32 %v14813_v20, %v1907_v30  ;;  %v14817_v43 = vld [vmem:[#allocation131_spill] sm:$0xff]  ;;  %v14818_v33 = vld [vmem:[#allocation56_spill] sm:$0xff] }
 0x256   : > { %v2318_v34 = vadd.f32 %v14808_v41, %v12022_v47  ;;  %v3110_v48 = vadd.f32 %v14810_v15, %v2691_v62  ;;  %v12419_v47 = vadd.f32 %v14812_v32, %v1905_v12  ;;  %v3113_v38 = vadd.f32 %v14815_v24, %v12143_v49  ;;  %v14820_v18 = vld [vmem:[#allocation46_spill] sm:$0xff] }
 0x257   : > { %v12391_v54 = vpop.f32.mrf.mxu0  ;;  %v2699_v22 = vadd.f32 %v12169_v57, %v2312_v28  ;;  %v12435_v17 = vadd.f32 %v14816_v61, %v1911_v21  ;;  %v12438_v25 = vadd.f32 %v14817_v43, %v1913_v0  ;;  %v3112_v12 = vadd.f32 %v14818_v33, %v2693_v52  ;;  %v12443_v7 = vpop.f32.mrf.mxu1  ;;  %v14822_v52 = vld [vmem:[#allocation49_spill] sm:$0xff]  ;;  %v14824_v15 = vld [vmem:[#allocation78_spill] sm:$0xff] }
 0x258   : > { %v3529_v62 = vadd.f32 %v12266_v13, %v3110_v48  ;;  %v12446_v36 = vadd.f32 %v14819_v16, %v1915_v50  ;;  %v3532_v13 = vadd.f32 %v12270_v14, %v3113_v38  ;;  %v3917_v49 = vadd.f32 %v12254_v2, %v3530_v45  ;;  %v14823_v50 = vld [vmem:[#allocation62_spill] sm:$0xff]  ;;  %v14830_v16 = vld [vmem:[#allocation149_spill] sm:$0xff] }
 0x259   : > { %v12405_v31 = vpop.f32.mrf.mxu0  ;;  %v12451_v57 = vstv %s12384_s10  ;;  %v2701_v28 = vadd.f32 %v12180_v46, %v2314_v53  ;;  %v3531_v4 = vadd.f32 %v12272_v42, %v3112_v12  ;;  %v3115_v26 = vadd.f32 %v14820_v18, %v12151_v37  ;;  %v14825_v46 = vld [vmem:[#allocation65_spill] sm:$0xff]  ;;  %v14826_v42 = vld [vmem:[#allocation52_spill] sm:$0xff]  ;;  %v14827_v58 = vld [vmem:[#allocation82_spill] sm:$0xff]  ;;  %v12468_v20 = vpop.f32.mrf.mxu1 }
 0x25a   : > { %v3114_v21 = vadd.f32 %v14821_v10, %v2695_v40  ;;  %v3117_v41 = vadd.f32 %v14822_v52, %v12159_v60  ;;  %v3116_v5 = vadd.f32 %v14823_v50, %v2697_v1  ;;  %v3916_v2 = vadd.f32 %v12262_v23, %v3529_v62  ;;  %v14828_v37 = vld [vmem:[#allocation69_spill] sm:$0xff]  ;;  %v14837_v50 = vld [vmem:[#allocation151_spill] sm:$0xff] }
 0x25b   : > { %v12424_v56 = vpop.f32.mrf.mxu0  ;;  %v3534_v45 = vadd.f32 %v12276_v55, %v3115_v26  ;;  %v3119_v53 = vadd.f32 %v14825_v46, %v14824_v15  ;;  %v3118_v48 = vadd.f32 %v14826_v42, %v2699_v22  ;;  %v3121_v32 = vadd.f32 %v14828_v37, %v14827_v58  ;;  %v14829_v62 = vld [vmem:[#allocation73_spill] sm:$0xff]  ;;  %v12487_v18 = vpop.f32.mrf.mxu1  ;;  %v14838_v46 = vld [vmem:[#allocation152_spill] sm:$0xff] }
 0x25c   : > { %v3919_v3 = vadd.f32 %v12268_v19, %v3532_v13  ;;  %v2703_v23 = vadd.f32 %v12188_v59, %v2316_v27  ;;  %v3533_v55 = vadd.f32 %v12278_v39, %v3114_v21  ;;  %v12475_v24 = vadd.f32 %v14829_v62, %v2701_v28  ;;  %v14831_v19 = vld [vmem:[#allocation86_spill] sm:$0xff]  ;;  %v14832_v13 = vld [vmem:[#allocation57_spill] sm:$0xff]  ;;  %v14833_v27 = vld [vmem:[#allocation148_spill] sm:$0xff] }
 0x25d   : > { %v12441_v30 = vpop.f32.mrf.mxu0  ;;  %v3918_v22 = vadd.f32 %v12274_v9, %v3531_v4  ;;  %v2705_v12 = vadd.f32 %v12196_v63, %v2318_v34  ;;  %v12483_v59 = vadd.f32 %v14832_v13, %v14831_v19  ;;  %v3921_v28 = vadd.f32 %v14833_v27, %v3534_v45  ;;  %v14834_v10 = vld [vmem:[#allocation105_spill] sm:$0xff]  ;;  %v14835_v34 = vld [vmem:[#allocation150_spill] sm:$0xff] }
 0x25e   : > { %v2707_v63 = vadd.f32 %v14834_v10, %v2320_v8  ;;  %v3535_v21 = vadd.f32 %v14835_v34, %v3116_v5  ;;  %v3538_v42 = vadd.f32 %v14838_v46, %v3119_v53  ;;  %v14839_v58 = vld [vmem:[#allocation89_spill] sm:$0xff]  ;;  %v12514_v53 = vld [vmem:[%s14306_s3 + $0x28] sm:$0xff]  ;;  %v14850_v34 = vld [vmem:[#allocation111_spill] sm:$0xff] }
 0x25f   : > { %v10046_v0 = vpop.f32.mrf.mxu0  ;;  %v14840_v37 = vld [vmem:[#allocation81_spill] sm:$0xff]  ;;  %10342 = vmatprep.subr.mxu0 %v12514_v53 }
 0x260   : > { %v4336_v14 = vadd.f32 %v10046_v0, %v3917_v49  ;;  %v3536_v49 = vadd.f32 %v14830_v16, %v3117_v41  ;;  %v14836_v0 = vld [vmem:[#allocation77_spill] sm:$0xff]  ;;  %v12501_v8 = vadd.f32 %v14840_v37, %v14839_v58  ;;  %v14846_v16 = vld [vmem:[#allocation70_spill] sm:$0xff]  ;;  %v14853_v58 = vld [vmem:[#allocation156_spill] sm:$0xff] }
 0x261   : > { %v4176_v40 = vpop.f32.mrf.mxu0  ;;  %v12493_v52 = vadd.f32 %v14836_v0, %v2703_v23  ;;  %v14841_v5 = vld [vmem:[#allocation61_spill] sm:$0xff]  ;;  %v12508_v23 = vpop.f32.mrf.mxu1  ;;  %v3539_v37 = vadd.f32 %v14853_v58, %v12475_v24  ;;  %v14857_v24 = vld [vmem:[#allocation119_spill] sm:$0xff]  ;;  %v14864_v58 = vld [vmem:[#allocation10_spill] sm:$0xff] }
 0x262   : > { %vm4368_vm2 = vcmp.gt.f32.partialorder %v4336_v14, 0.0  ;;  %v4401_v60 = vmul.f32 %v12451_v57, %v4336_v14  ;;  %v4335_v1 = vadd.f32 %v4176_v40, %v3916_v2  ;;  %v12504_v40 = vadd.f32 %v14841_v5, %v2705_v12  ;;  %v14847_v13 = vld [vmem:[#allocation157_spill] sm:$0xff] }
 0x263   : > { %v10049_v38 = vpop.f32.mrf.mxu0 }
 0x264   : > { %v4433_v61 = vsel %vm4368_vm2, %v4336_v14, %v4401_v60  ;;  %vm4367_vm3 = vcmp.gt.f32.partialorder %v4335_v1, 0.0  ;;  %v4400_v43 = vmul.f32 %v12451_v57, %v4335_v1  ;;  %v4338_v33 = vadd.f32 %v10049_v38, %v3919_v3 }
 0x265   : > { %4465 = vst.msk [vmem:[#allocation2 + $0x19] sm:$0xff] %vm293_vm0, %v4433_v61  ;;  %v4186_v39 = vpop.f32.mrf.mxu0  ;;  %v3920_v14 = vadd.f32 %v14837_v50, %v3533_v55 }
 0x266   : > { %v4432_v9 = vsel %vm4367_vm3, %v4335_v1, %v4400_v43  ;;  %vm4370_vm4 = vcmp.gt.f32.partialorder %v4338_v33, 0.0  ;;  %v4403_v4 = vmul.f32 %v12451_v57, %v4338_v33  ;;  %v4337_v26 = vadd.f32 %v4186_v39, %v3918_v22  ;;  %v14842_v1 = vld [vmem:[#allocation154_spill] sm:$0xff]  ;;  %v14843_v22 = vld [vmem:[#allocation153_spill] sm:$0xff]  ;;  %v14844_v43 = vld [vmem:[#allocation92_spill] sm:$0xff] }
 0x267   : > { %4464 = vst.msk [vmem:[#allocation2 + $0x11] sm:$0xff] %vm293_vm0, %v4432_v9  ;;  %v10052_v41 = vpop.f32.mrf.mxu0  ;;  %v3923_v3 = vadd.f32 %v14842_v1, %v3536_v49  ;;  %v3537_v61 = vadd.f32 %v14843_v22, %v3118_v48  ;;  %v12522_v49 = vadd.f32 %v14846_v16, %v2707_v63  ;;  %v3922_v39 = vadd.f32 %v14847_v13, %v3535_v21  ;;  %v14848_v48 = vld [vmem:[#allocation113_spill] sm:$0xff]  ;;  %v14852_v21 = vld [vmem:[#allocation160_spill] sm:$0xff] }
 0x268   : > { %v4435_v2 = vsel %vm4370_vm4, %v4338_v33, %v4403_v4  ;;  %vm4369_vm5 = vcmp.gt.f32.partialorder %v4337_v26, 0.0  ;;  %v4402_v45 = vmul.f32 %v12451_v57, %v4337_v26  ;;  %v4340_v15 = vadd.f32 %v10052_v41, %v3921_v28  ;;  %v14845_v33 = vld [vmem:[#allocation66_spill] sm:$0xff]  ;;  %v14851_v63 = vld [vmem:[#allocation93_spill] sm:$0xff] }
 0x269   : > { %4467 = vst.msk [vmem:[#allocation2 + $0x29] sm:$0xff] %vm293_vm0, %v4435_v2  ;;  %v4196_v60 = vpop.f32.mrf.mxu0  ;;  %v12519_v12 = vadd.f32 %v14845_v33, %v14844_v43  ;;  %v2709_v4 = vadd.f32 %v14848_v48, %v12416_v11  ;;  %v12533_v0 = vadd.f32 %v14851_v63, %v14850_v34  ;;  %v3925_v50 = vadd.f32 %v14852_v21, %v3538_v42 }
 0x26a   : > { %v4434_v55 = vsel %vm4369_vm5, %v4337_v26, %v4402_v45  ;;  %vm4372_vm6 = vcmp.gt.f32.partialorder %v4340_v15, 0.0  ;;  %v4405_v62 = vmul.f32 %v12451_v57, %v4340_v15  ;;  %v4339_v38 = vadd.f32 %v4196_v60, %v3920_v14  ;;  %v14849_v26 = vld [vmem:[#allocation155_spill] sm:$0xff]  ;;  %v12537_v14 = vpop.f32.mrf.mxu1 }
 0x26b   : > { %4466 = vst.msk [vmem:[#allocation2 + $0x21] sm:$0xff] %vm293_vm0, %v4434_v55  ;;  %v10055_v19 = vpop.f32.mrf.mxu0  ;;  %v3540_v10 = vadd.f32 %v14849_v26, %v3121_v32  ;;  %v14854_v60 = vld [vmem:[#allocation163_spill] sm:$0xff]  ;;  %v2711_v16 = vadd.f32 %v14857_v24, %v12419_v47 }
 0x26c   : > { %v4437_v27 = vsel %vm4372_vm6, %v4340_v15, %v4405_v62  ;;  %vm4371_vm7 = vcmp.gt.f32.partialorder %v4339_v38, 0.0  ;;  %v4404_v28 = vmul.f32 %v12451_v57, %v4339_v38  ;;  %v4342_v9 = vadd.f32 %v10055_v19, %v3923_v3  ;;  %v4925_v42 = vld [vmem:[#allocation2 + $0x19] sm:$0xff]  ;;  %v14855_v3 = vld [vmem:[#allocation6_spill] sm:$0xff]  ;;  %v12565_v48 = vpop.f32.mrf.mxu1 }
 0x26d   : > { %4469 = vst.msk [vmem:[#allocation2 + $0x39] sm:$0xff] %vm293_vm0, %v4437_v27  ;;  %v4206_v41 = vpop.f32.mrf.mxu0  ;;  %v3924_v1 = vadd.f32 %v14854_v60, %v3537_v61  ;;  %v14856_v62 = vld [vmem:[#allocation8_spill] sm:$0xff]  ;;  %v14858_v19 = vld [vmem:[#allocation158_spill] sm:$0xff] }
 0x26e   : > { %v4436_v2 = vsel %vm4371_vm7, %v4339_v38, %v4404_v28  ;;  %vm4374_vm8 = vcmp.gt.f32.partialorder %v4342_v9, 0.0  ;;  %v4407_v45 = vmul.f32 %v12451_v57, %v4342_v9  ;;  %v4341_v15 = vadd.f32 %v4206_v41, %v3922_v39  ;;  %v4924_v46 = vld [vmem:[#allocation2 + $0x11] sm:$0xff]  ;;  %v14859_v61 = vld [vmem:[#allocation94_spill] sm:$0xff] }
 0x26f   : > { %v12540_v11 = vld [vmem:[#allocation2 + $0x10] sm:$0xff]  ;;  %v12542_v32 = vld [vmem:[#allocation2 + $0x18] sm:$0xff]  ;;  %4468 = vst.msk [vmem:[#allocation2 + $0x31] sm:$0xff] %vm293_vm0, %v4436_v2  ;;  %v10058_v5 = vpop.f32.mrf.mxu0  ;;  %10147 = vmatprep.mubr.msk.f32.mxu0 %vm293_vm0, %v4924_v46  ;;  %v3542_v13 = vadd.f32 %v14858_v19, %v12483_v59  ;;  %v12560_v39 = vadd.f32 %v14859_v61, %v2709_v4  ;;  %v14860_v28 = vld [vmem:[#allocation166_spill] sm:$0xff] }
 0x270   : > { %v4538_v55 = vmul.f32 %v12540_v11, %v14855_v3  ;;  %v4539_v38 = vmul.f32 %v12542_v32, %v14856_v62  ;;  %v4439_v22 = vsel %vm4374_vm8, %v4342_v9, %v4407_v45  ;;  %vm4373_vm9 = vcmp.gt.f32.partialorder %v4341_v15, 0.0  ;;  %10148 = vmatmul.mubr.msk.f32.gmra.mxu0 %vm293_vm0, %v4925_v42  ;;  %v14861_v41 = vld [vmem:[#allocation159_spill] sm:$0xff]  ;;  %v14862_v2 = vld [vmem:[#allocation169_spill] sm:$0xff] }
 0x271   : > { %v4406_v43 = vmul.f32 %v12451_v57, %v4341_v15  ;;  %v4344_v33 = vadd.f32 %v10058_v5, %v3925_v50  ;;  %4471 = vst.msk [vmem:[#allocation2 + $0x49] sm:$0xff] %vm293_vm0, %v4439_v22  ;;  %v4216_v27 = vpop.f32.mrf.mxu0  ;;  %v3927_v9 = vadd.f32 %v14860_v28, %v3540_v10  ;;  %v3541_v21 = vadd.f32 %v14861_v41, %v12493_v52  ;;  %v4927_v50 = vld [vmem:[#allocation2 + $0x29] sm:$0xff]  ;;  %v14865_v52 = vld [vmem:[#allocation161_spill] sm:$0xff] }
 0x272   : > { %10097 = vmatprep.mubr.msk.f32.mxu1 %vm293_vm0, %v4538_v55  ;;  %v4343_v47 = vadd.f32 %v4216_v27, %v3924_v1  ;;  %v4926_v59 = vld [vmem:[#allocation2 + $0x21] sm:$0xff]  ;;  %v3926_v45 = vadd.f32 %v14862_v2, %v3539_v37  ;;  %v3544_v55 = vadd.f32 %v14865_v52, %v12501_v8  ;;  %v14868_v37 = vld [vmem:[#allocation95_spill] sm:$0xff]  ;;  %v12596_v27 = vpop.f32.mrf.mxu1  ;;  %v14876_v52 = vld [vmem:[#allocation136_spill] sm:$0xff] }
 0x273   : > { %v4438_v26 = vsel %vm4373_vm9, %v4341_v15, %v4406_v43  ;;  %vm4376_vm10 = vcmp.gt.f32.partialorder %v4344_v33, 0.0  ;;  %v4409_v34 = vmul.f32 %v12451_v57, %v4344_v33  ;;  %10098 = vmatmul.mubr.msk.f32.gmra.mxu1 %vm293_vm0, %v4539_v38  ;;  %v12569_v63 = vld [vmem:[#allocation2 + $0x20] sm:$0xff]  ;;  %v12571_v4 = vld [vmem:[#allocation2 + $0x28] sm:$0xff]  ;;  %v10061_v10 = vpop.f32.mrf.mxu0  ;;  %10150 = vmatprep.mubr.msk.f32.mxu0 %vm293_vm0, %v4926_v59  ;;  %v14863_v15 = vld [vmem:[#allocation11_spill] sm:$0xff]  ;;  %v12591_v24 = vadd.f32 %v14868_v37, %v2711_v16 }
 0x274   : > { %4470 = vst.msk [vmem:[#allocation2 + $0x41] sm:$0xff] %vm293_vm0, %v4438_v26  ;;  %v4540_v46 = vmul.f32 %v12569_v63, %v14863_v15  ;;  %v4541_v5 = vmul.f32 %v12571_v4, %v14864_v58  ;;  %vm4375_vm11 = vcmp.gt.f32.partialorder %v4343_v47, 0.0  ;;  %v4408_v60 = vmul.f32 %v12451_v57, %v4343_v47  ;;  %10151 = vmatmul.mubr.msk.f32.gmra.mxu0 %vm293_vm0, %v4927_v50  ;;  %v14866_v38 = vld [vmem:[#allocation117_spill] sm:$0xff]  ;;  %v14867_v22 = vld [vmem:[#allocation74_spill] sm:$0xff]  ;;  %v14878_v37 = vld [vmem:[#allocation135_spill] sm:$0xff] }
 0x275   : > { %v4441_v42 = vsel %vm4376_vm10, %v4344_v33, %v4409_v34  ;;  %v4346_v1 = vadd.f32 %v10061_v10, %v3927_v9  ;;  %v12588_v43 = vadd.f32 %v14867_v22, %v14866_v38  ;;  %v4226_v19 = vpop.f32.mrf.mxu0  ;;  %v14869_v33 = vld [vmem:[#allocation172_spill] sm:$0xff]  ;;  %v14871_v59 = vld [vmem:[#allocation162_spill] sm:$0xff]  ;;  %v14873_v10 = vld [vmem:[#allocation175_spill] sm:$0xff]  ;;  %v2713_v38 = vadd.f32 %v14876_v52, %v12422_v51 }
 0x276   : > { %4473 = vst.msk [vmem:[#allocation2 + $0x59] sm:$0xff] %vm293_vm0, %v4441_v42  ;;  %10100 = vmatprep.mubr.msk.f32.mxu1 %vm293_vm0, %v4540_v46  ;;  %v3929_v61 = vadd.f32 %v14869_v33, %v3542_v13  ;;  %v4440_v28 = vsel %vm4375_vm11, %v4343_v47, %v4408_v60  ;;  %v4345_v9 = vadd.f32 %v4226_v19, %v3926_v45  ;;  %v12600_v26 = vld [vmem:[#allocation2 + $0x31] sm:$0xff]  ;;  %v12611_v47 = vld [vmem:[#allocation2 + $0x39] sm:$0xff] }
 0x277   : > { %vm4378_vm12 = vcmp.gt.f32.partialorder %v4346_v1, 0.0  ;;  %v4411_v8 = vmul.f32 %v12451_v57, %v4346_v1  ;;  %10101 = vmatmul.mubr.msk.f32.gmra.mxu1 %vm293_vm0, %v4541_v5  ;;  %14870 = vst [vmem:[#allocation96_spill] sm:$0xff] %v12600_v26  ;;  %v12602_v16 = vld [vmem:[#allocation2 + $0x30] sm:$0xff]  ;;  %v12604_v34 = vld [vmem:[#allocation2 + $0x38] sm:$0xff]  ;;  %v3543_v41 = vadd.f32 %v14871_v59, %v12504_v40  ;;  %4472 = vst.msk [vmem:[#allocation2 + $0x51] sm:$0xff] %vm293_vm0, %v4440_v28  ;;  %v10064_v13 = vpop.f32.mrf.mxu0  ;;  %10153 = vmatprep.mubr.msk.f32.mxu0 %vm293_vm0, %v12600_v26 }
 0x278   : > { %14872 = vst [vmem:[#allocation98_spill] sm:$0xff] %v12611_v47  ;;  %v3928_v50 = vadd.f32 %v14873_v10, %v3541_v21  ;;  %v14874_v2 = vld [vmem:[#allocation13_spill] sm:$0xff]  ;;  %v14875_v46 = vld [vmem:[#allocation12_spill] sm:$0xff]  ;;  %vm4377_vm13 = vcmp.gt.f32.partialorder %v4345_v9, 0.0  ;;  %v4410_v40 = vmul.f32 %v12451_v57, %v4345_v9  ;;  %v4348_v60 = vadd.f32 %v10064_v13, %v3929_v61  ;;  %10154 = vmatmul.mubr.msk.f32.gmra.mxu0 %vm293_vm0, %v12611_v47  ;;  %v14880_v28 = vld [vmem:[#allocation130_spill] sm:$0xff] }
 0x279   : > { %v4542_v45 = vmul.f32 %v12602_v16, %v14874_v2  ;;  %v4543_v5 = vmul.f32 %v12604_v34, %v14875_v46  ;;  %v4443_v42 = vsel %vm4378_vm12, %v4346_v1, %v4411_v8  ;;  %v14877_v22 = vld [vmem:[#allocation164_spill] sm:$0xff]  ;;  %v14879_v19 = vld [vmem:[#allocation97_spill] sm:$0xff]  ;;  %v4236_v1 = vpop.f32.mrf.mxu0  ;;  %v3931_v61 = vadd.f32 %v14880_v28, %v3544_v55  ;;  %v12632_v8 = vpop.f32.mrf.mxu1  ;;  %v14886_v28 = vld [vmem:[#allocation139_spill] sm:$0xff] }
 0x27a   : > { %v3546_v21 = vadd.f32 %v14877_v22, %v12519_v12  ;;  %v12627_v33 = vadd.f32 %v14879_v19, %v14878_v37  ;;  %4475 = vst.msk [vmem:[#allocation2 + $0x69] sm:$0xff] %vm293_vm0, %v4443_v42  ;;  %v4442_v59 = vsel %vm4377_vm13, %v4345_v9, %v4410_v40  ;;  %vm4380_vm14 = vcmp.gt.f32.partialorder %v4348_v60, 0.0  ;;  %v14882_v42 = vld [vmem:[#allocation165_spill] sm:$0xff]  ;;  %v12647_v9 = vld [vmem:[#allocation2 + $0x49] sm:$0xff] }
 0x27b   : > { %10103 = vmatprep.mubr.msk.f32.mxu1 %vm293_vm0, %v4542_v45  ;;  %v4413_v51 = vmul.f32 %v12451_v57, %v4348_v60  ;;  %v4347_v13 = vadd.f32 %v4236_v1, %v3928_v50  ;;  %v12636_v12 = vld [vmem:[#allocation2 + $0x41] sm:$0xff]  ;;  %v3545_v45 = vadd.f32 %v14882_v42, %v12522_v49  ;;  %4474 = vst.msk [vmem:[#allocation2 + $0x61] sm:$0xff] %vm293_vm0, %v4442_v59  ;;  %v10067_v55 = vpop.f32.mrf.mxu0  ;;  %14883 = vst [vmem:[#allocation109_spill] sm:$0xff] %v12647_v9  ;;  %v14887_v42 = vld [vmem:[#allocation167_spill] sm:$0xff] }
 0x27c   : > { %10104 = vmatmul.mubr.msk.f32.gmra.mxu1 %vm293_vm0, %v4543_v5  ;;  %14881 = vst [vmem:[#allocation100_spill] sm:$0xff] %v12636_v12  ;;  %v12638_v10 = vld [vmem:[#allocation2 + $0x40] sm:$0xff]  ;;  %v12640_v52 = vld [vmem:[#allocation2 + $0x48] sm:$0xff]  ;;  %10156 = vmatprep.mubr.msk.f32.mxu0 %vm293_vm0, %v12636_v12  ;;  %v3930_v50 = vadd.f32 %v12382_v6, %v3543_v41  ;;  %v14884_v5 = vld [vmem:[#allocation15_spill] sm:$0xff]  ;;  %v4350_v1 = vadd.f32 %v10067_v55, %v3931_v61  ;;  %v12667_v61 = vpop.f32.mrf.mxu1 }
 0x27d   : > { %v4544_v40 = vmul.f32 %v12638_v10, %v14884_v5  ;;  %v14885_v22 = vld [vmem:[#allocation14_spill] sm:$0xff]  ;;  %v4445_v19 = vsel %vm4380_vm14, %v4348_v60, %v4413_v51  ;;  %vm4379_vm15 = vcmp.gt.f32.partialorder %v4347_v13, 0.0  ;;  %v4412_v49 = vmul.f32 %v12451_v57, %v4347_v13  ;;  %10157 = vmatmul.mubr.msk.f32.gmra.mxu0 %vm293_vm0, %v12647_v9  ;;  %v14888_v41 = vld [vmem:[#allocation99_spill] sm:$0xff]  ;;  %v4246_v47 = vpop.f32.mrf.mxu0  ;;  %v14896_v9 = vld [vmem:[#allocation101_spill] sm:$0xff] }
 0x27e   : > { %v4545_v37 = vmul.f32 %v12640_v52, %v14885_v22  ;;  %v2715_v59 = vadd.f32 %v14886_v28, %v12428_v44  ;;  %v3548_v6 = vadd.f32 %v14887_v42, %v12533_v0  ;;  %v12662_v12 = vadd.f32 %v14888_v41, %v2713_v38  ;;  %4477 = vst.msk [vmem:[#allocation2 + $0x79] sm:$0xff] %vm293_vm0, %v4445_v19  ;;  %v12671_v0 = vld [vmem:[#allocation2 + $0x51] sm:$0xff] }
 0x27f   : > { %10106 = vmatprep.mubr.msk.f32.mxu1 %vm293_vm0, %v4544_v40  ;;  %v3933_v60 = vadd.f32 %v12408_v35, %v3546_v21  ;;  %v4444_v51 = vsel %vm4379_vm15, %v4347_v13, %v4412_v49  ;;  %vm4382_vm1 = vcmp.gt.f32.partialorder %v4350_v1, 0.0  ;;  %v4415_v55 = vmul.f32 %v12451_v57, %v4350_v1  ;;  %14889 = vst [vmem:[#allocation102_spill] sm:$0xff] %v12671_v0  ;;  %v12673_v38 = vld [vmem:[#allocation2 + $0x50] sm:$0xff]  ;;  %v12675_v28 = vld [vmem:[#allocation2 + $0x58] sm:$0xff]  ;;  %v10070_v35 = vpop.f32.mrf.mxu0  ;;  %v14892_v13 = vld [vmem:[#allocation17_spill] sm:$0xff] }
 0x280   : > { %v4349_v44 = vadd.f32 %v4246_v47, %v3930_v50  ;;  %10107 = vmatmul.mubr.msk.f32.gmra.mxu1 %vm293_vm0, %v4545_v37  ;;  %v14890_v19 = vld [vmem:[#allocation168_spill] sm:$0xff]  ;;  %4476 = vst.msk [vmem:[#allocation2 + $0x71] sm:$0xff] %vm293_vm0, %v4444_v51  ;;  %10159 = vmatprep.mubr.msk.f32.mxu0 %vm293_vm0, %v12671_v0  ;;  %v3932_v47 = vadd.f32 %v12443_v7, %v3545_v45  ;;  %v14894_v51 = vld [vmem:[#allocation170_spill] sm:$0xff]  ;;  %v14897_v45 = vld [vmem:[#allocation103_spill] sm:$0xff] }
 0x281   : > { %v3547_v40 = vadd.f32 %v14890_v19, %v12560_v39  ;;  %v12682_v21 = vld [vmem:[#allocation2 + $0x59] sm:$0xff]  ;;  %v4546_v50 = vmul.f32 %v12673_v38, %v14892_v13  ;;  %v4447_v42 = vsel %vm4382_vm1, %v4350_v1, %v4415_v55  ;;  %v4352_v41 = vadd.f32 %v10070_v35, %v3933_v60  ;;  %v14895_v0 = vld [vmem:[#allocation138_spill] sm:$0xff]  ;;  %v12702_v60 = vpop.f32.mrf.mxu1 }
 0x282   : > { %14891 = vst [vmem:[#allocation104_spill] sm:$0xff] %v12682_v21  ;;  %v14893_v37 = vld [vmem:[#allocation16_spill] sm:$0xff]  ;;  %vm4381_vm2 = vcmp.gt.f32.partialorder %v4349_v44, 0.0  ;;  %v4414_v39 = vmul.f32 %v12451_v57, %v4349_v44  ;;  %10160 = vmatmul.mubr.msk.f32.gmra.mxu0 %vm293_vm0, %v12682_v21  ;;  %v3550_v19 = vadd.f32 %v14894_v51, %v12588_v43  ;;  %v3135_v7 = vadd.f32 %v14896_v9, %v14895_v0  ;;  %v12706_v9 = vld [vmem:[#allocation2 + $0x61] sm:$0xff]  ;;  %v14906_v21 = vld [vmem:[#allocation107_spill] sm:$0xff] }
 0x283   : > { %v4547_v49 = vmul.f32 %v12675_v28, %v14893_v37  ;;  %v12697_v26 = vadd.f32 %v14897_v45, %v2715_v59  ;;  %4479 = vst.msk [vmem:[#allocation2 + $0x89] sm:$0xff] %vm293_vm0, %v4447_v42  ;;  %v4256_v37 = vpop.f32.mrf.mxu0  ;;  %10109 = vmatprep.mubr.msk.f32.mxu1 %vm293_vm0, %v4546_v50  ;;  %v3935_v1 = vadd.f32 %v12468_v20, %v3548_v6  ;;  %vm4384_vm3 = vcmp.gt.f32.partialorder %v4352_v41, 0.0  ;;  %v12708_v59 = vld [vmem:[#allocation2 + $0x60] sm:$0xff]  ;;  %v12710_v0 = vld [vmem:[#allocation2 + $0x68] sm:$0xff]  ;;  %v14899_v42 = vld [vmem:[#allocation171_spill] sm:$0xff] }
 0x284   : > { %v4446_v55 = vsel %vm4381_vm2, %v4349_v44, %v4414_v39  ;;  %v4417_v35 = vmul.f32 %v12451_v57, %v4352_v41  ;;  %v4351_v43 = vadd.f32 %v4256_v37, %v3932_v47  ;;  %14898 = vst [vmem:[#allocation106_spill] sm:$0xff] %v12706_v9  ;;  %v3549_v50 = vadd.f32 %v14899_v42, %v12591_v24  ;;  %v12717_v6 = vld [vmem:[#allocation2 + $0x69] sm:$0xff] }
 0x285   : > { %10110 = vmatmul.mubr.msk.f32.gmra.mxu1 %vm293_vm0, %v4547_v49  ;;  %4478 = vst.msk [vmem:[#allocation2 + $0x81] sm:$0xff] %vm293_vm0, %v4446_v55  ;;  %v10073_v20 = vpop.f32.mrf.mxu0  ;;  %10162 = vmatprep.mubr.msk.f32.mxu0 %vm293_vm0, %v12706_v9  ;;  %14900 = vst [vmem:[#allocation108_spill] sm:$0xff] %v12717_v6  ;;  %v3934_v44 = vadd.f32 %v12487_v18, %v3547_v40  ;;  %v14901_v47 = vld [vmem:[#allocation19_spill] sm:$0xff]  ;;  %v14902_v49 = vld [vmem:[#allocation18_spill] sm:$0xff] }
 0x286   : > { %v4548_v37 = vmul.f32 %v12708_v59, %v14901_v47  ;;  %v4549_v39 = vmul.f32 %v12710_v0, %v14902_v49  ;;  %v4449_v51 = vsel %vm4384_vm3, %v4352_v41, %v4417_v35  ;;  %vm4383_vm4 = vcmp.gt.f32.partialorder %v4351_v43, 0.0  ;;  %10163 = vmatmul.mubr.msk.f32.gmra.mxu0 %vm293_vm0, %v12717_v6  ;;  %v14903_v55 = vld [vmem:[#allocation142_spill] sm:$0xff]  ;;  %v14904_v9 = vld [vmem:[#allocation173_spill] sm:$0xff] }
 0x287   : > { %v4416_v24 = vmul.f32 %v12451_v57, %v4351_v43  ;;  %v4354_v45 = vadd.f32 %v10073_v20, %v3935_v1  ;;  %v2717_v42 = vadd.f32 %v14903_v55, %v12435_v17  ;;  %v3552_v18 = vadd.f32 %v14904_v9, %v12627_v33  ;;  %v14905_v40 = vld [vmem:[#allocation141_spill] sm:$0xff]  ;;  %4481 = vst.msk [vmem:[#allocation2 + $0x99] sm:$0xff] %vm293_vm0, %v4449_v51  ;;  %v4266_v49 = vpop.f32.mrf.mxu0  ;;  %v12736_v1 = vpop.f32.mrf.mxu1  ;;  %v12740_v33 = vld [vmem:[#allocation2 + $0x71] sm:$0xff]  ;;  %v14908_v51 = vld [vmem:[#allocation174_spill] sm:$0xff] }
 0x288   : > { %v3137_v47 = vadd.f32 %v14906_v21, %v14905_v40  ;;  %10112 = vmatprep.mubr.msk.f32.mxu1 %vm293_vm0, %v4548_v37  ;;  %v3937_v41 = vadd.f32 %v12508_v23, %v3550_v19  ;;  %v4353_v17 = vadd.f32 %v4266_v49, %v3934_v44  ;;  %14907 = vst [vmem:[#allocation110_spill] sm:$0xff] %v12740_v33  ;;  %v12742_v9 = vld [vmem:[#allocation2 + $0x70] sm:$0xff]  ;;  %v12744_v21 = vld [vmem:[#allocation2 + $0x78] sm:$0xff]  ;;  %v14910_v44 = vld [vmem:[#allocation21_spill] sm:$0xff] }
 0x289   : > { %v4448_v35 = vsel %vm4383_vm4, %v4351_v43, %v4416_v24  ;;  %vm4386_vm5 = vcmp.gt.f32.partialorder %v4354_v45, 0.0  ;;  %v4419_v20 = vmul.f32 %v12451_v57, %v4354_v45  ;;  %10113 = vmatmul.mubr.msk.f32.gmra.mxu1 %vm293_vm0, %v4549_v39  ;;  %v3551_v37 = vadd.f32 %v14908_v51, %v12662_v12  ;;  %v10076_v23 = vpop.f32.mrf.mxu0  ;;  %10165 = vmatprep.mubr.msk.f32.mxu0 %vm293_vm0, %v12740_v33  ;;  %v12751_v19 = vld [vmem:[#allocation2 + $0x79] sm:$0xff] }
 0x28a   : > { %4480 = vst.msk [vmem:[#allocation2 + $0x91] sm:$0xff] %vm293_vm0, %v4448_v35  ;;  %14909 = vst [vmem:[#allocation112_spill] sm:$0xff] %v12751_v19  ;;  %v3936_v43 = vadd.f32 %v12537_v14, %v3549_v50  ;;  %v4550_v49 = vmul.f32 %v12742_v9, %v14910_v44  ;;  %v14911_v39 = vld [vmem:[#allocation20_spill] sm:$0xff]  ;;  %vm4385_vm6 = vcmp.gt.f32.partialorder %v4353_v17, 0.0  ;;  %v4418_v12 = vmul.f32 %v12451_v57, %v4353_v17  ;;  %v14912_v35 = vld [vmem:[#allocation145_spill] sm:$0xff] }
 0x28b   : > { %v4551_v24 = vmul.f32 %v12744_v21, %v14911_v39  ;;  %v4451_v55 = vsel %vm4386_vm5, %v4354_v45, %v4419_v20  ;;  %v4356_v40 = vadd.f32 %v10076_v23, %v3937_v41  ;;  %10166 = vmatmul.mubr.msk.f32.gmra.mxu0 %vm293_vm0, %v12751_v19  ;;  %v2719_v51 = vadd.f32 %v14912_v35, %v12438_v25  ;;  %v14913_v33 = vld [vmem:[#allocation176_spill] sm:$0xff]  ;;  %v14914_v14 = vld [vmem:[#allocation115_spill] sm:$0xff]  ;;  %v4276_v44 = vpop.f32.mrf.mxu0  ;;  %v12768_v20 = vpop.f32.mrf.mxu1 }
 0x28c   : > { %v3554_v6 = vadd.f32 %v14913_v33, %v3135_v7  ;;  %v3136_v50 = vadd.f32 %v14914_v14, %v2717_v42  ;;  %4483 = vst.msk [vmem:[#allocation2 + $0xa9] sm:$0xff] %vm293_vm0, %v4451_v55  ;;  %10115 = vmatprep.mubr.msk.f32.mxu1 %vm293_vm0, %v4550_v49  ;;  %v3939_v45 = vadd.f32 %v12565_v48, %v3552_v18  ;;  %v12772_v25 = vld [vmem:[#allocation2 + $0x81] sm:$0xff]  ;;  %v14916_v33 = vld [vmem:[#allocation127_spill] sm:$0xff] }
 0x28d   : > { %v4450_v41 = vsel %vm4385_vm6, %v4353_v17, %v4418_v12  ;;  %vm4388_vm7 = vcmp.gt.f32.partialorder %v4356_v40, 0.0  ;;  %v4421_v23 = vmul.f32 %v12451_v57, %v4356_v40  ;;  %v4355_v19 = vadd.f32 %v4276_v44, %v3936_v43  ;;  %10116 = vmatmul.mubr.msk.f32.gmra.mxu1 %vm293_vm0, %v4551_v24  ;;  %14915 = vst [vmem:[#allocation114_spill] sm:$0xff] %v12772_v25  ;;  %v12774_v7 = vld [vmem:[#allocation2 + $0x80] sm:$0xff]  ;;  %v12776_v42 = vld [vmem:[#allocation2 + $0x88] sm:$0xff]  ;;  %v10079_v48 = vpop.f32.mrf.mxu0  ;;  %v14918_v43 = vld [vmem:[#allocation23_spill] sm:$0xff] }
 0x28e   : > { %v3553_v49 = vadd.f32 %v14916_v33, %v12697_v26  ;;  %4482 = vst.msk [vmem:[#allocation2 + $0xa1] sm:$0xff] %vm293_vm0, %v4450_v41  ;;  %10168 = vmatprep.mubr.msk.f32.mxu0 %vm293_vm0, %v12772_v25  ;;  %v12783_v18 = vld [vmem:[#allocation2 + $0x89] sm:$0xff]  ;;  %v3938_v17 = vadd.f32 %v12596_v27, %v3551_v37  ;;  %v4552_v44 = vmul.f32 %v12774_v7, %v14918_v43  ;;  %v14920_v14 = vld [vmem:[#allocation177_spill] sm:$0xff]  ;;  %v14921_v33 = vld [vmem:[#allocation144_spill] sm:$0xff] }
 0x28f   : > { %14917 = vst [vmem:[#allocation116_spill] sm:$0xff] %v12783_v18  ;;  %v14919_v24 = vld [vmem:[#allocation22_spill] sm:$0xff]  ;;  %v4453_v12 = vsel %vm4388_vm7, %v4356_v40, %v4421_v23  ;;  %vm4387_vm8 = vcmp.gt.f32.partialorder %v4355_v19, 0.0  ;;  %v4420_v26 = vmul.f32 %v12451_v57, %v4355_v19  ;;  %v4358_v35 = vadd.f32 %v10079_v48, %v3939_v45  ;;  %10169 = vmatmul.mubr.msk.f32.gmra.mxu0 %vm293_vm0, %v12783_v18  ;;  %v14923_v27 = vld [vmem:[#allocation137_spill] sm:$0xff]  ;;  %v4286_v43 = vpop.f32.mrf.mxu0  ;;  %v12800_v23 = vpop.f32.mrf.mxu1 }
 0x290   : > { %v4553_v55 = vmul.f32 %v12776_v42, %v14919_v24  ;;  %v3556_v41 = vadd.f32 %v14920_v14, %v3137_v47  ;;  %v14922_v25 = vld [vmem:[#allocation134_spill] sm:$0xff]  ;;  %v3138_v37 = vadd.f32 %v14923_v27, %v2719_v51  ;;  %4485 = vst.msk [vmem:[#allocation2 + $0xb9] sm:$0xff] %vm293_vm0, %v4453_v12  ;;  %10118 = vmatprep.mubr.msk.f32.mxu1 %vm293_vm0, %v4552_v44  ;;  %v14927_v44 = vld [vmem:[#allocation24_spill] sm:$0xff]  ;;  %v14928_v14 = vld [vmem:[#allocation147_spill] sm:$0xff] }
 0x291   : > { %v3139_v39 = vadd.f32 %v14922_v25, %v14921_v33  ;;  %v3941_v40 = vadd.f32 %v12632_v8, %v3554_v6  ;;  %v4452_v45 = vsel %vm4387_vm8, %v4355_v19, %v4420_v26  ;;  %vm4390_vm9 = vcmp.gt.f32.partialorder %v4358_v35, 0.0  ;;  %v12804_v47 = vld [vmem:[#allocation2 + $0x91] sm:$0xff]  ;;  %v10082_v8 = vpop.f32.mrf.mxu0  ;;  %v12814_v6 = vld [vmem:[#allocation2 + $0x99] sm:$0xff] }
 0x292   : > { %v4423_v48 = vmul.f32 %v12451_v57, %v4358_v35  ;;  %v4357_v18 = vadd.f32 %v4286_v43, %v3938_v17  ;;  %10119 = vmatmul.mubr.msk.f32.gmra.mxu1 %vm293_vm0, %v4553_v55  ;;  %14924 = vst [vmem:[#allocation118_spill] sm:$0xff] %v12804_v47  ;;  %v12806_v25 = vld [vmem:[#allocation2 + $0x90] sm:$0xff]  ;;  %v12808_v51 = vld [vmem:[#allocation2 + $0x98] sm:$0xff]  ;;  %v3555_v12 = vadd.f32 %v12373_v29, %v3136_v50  ;;  %4484 = vst.msk [vmem:[#allocation2 + $0xb1] sm:$0xff] %vm293_vm0, %v4452_v45 }
 0x293   : > { %10171 = vmatprep.mubr.msk.f32.mxu0 %vm293_vm0, %v12804_v47  ;;  %14925 = vst [vmem:[#allocation120_spill] sm:$0xff] %v12814_v6  ;;  %v3940_v19 = vadd.f32 %v12667_v61, %v3553_v49  ;;  %v14926_v17 = vld [vmem:[#allocation25_spill] sm:$0xff]  ;;  %v4555_v55 = vmul.f32 %v12808_v51, %v14927_v44  ;;  %v4360_v50 = vadd.f32 %v10082_v8, %v3941_v40  ;;  %v14929_v61 = vld [vmem:[#allocation146_spill] sm:$0xff]  ;;  %v14930_v49 = vld [vmem:[#allocation140_spill] sm:$0xff]  ;;  %v4296_v47 = vpop.f32.mrf.mxu0 }
 0x294   : > { %v4554_v43 = vmul.f32 %v12806_v25, %v14926_v17  ;;  %v4455_v26 = vsel %vm4390_vm9, %v4358_v35, %v4423_v48  ;;  %vm4389_vm10 = vcmp.gt.f32.partialorder %v4357_v18, 0.0  ;;  %v4422_v29 = vmul.f32 %v12451_v57, %v4357_v18  ;;  %10172 = vmatmul.mubr.msk.f32.gmra.mxu0 %vm293_vm0, %v12814_v6  ;;  %v10041_v48 = vpop.f32.mrf.mxu1 }
 0x295   : > { %v2721_v33 = vadd.f32 %v14928_v14, %v12446_v36  ;;  %v3558_v27 = vadd.f32 %v12391_v54, %v3139_v39  ;;  %v3141_v45 = vadd.f32 %v14930_v49, %v14929_v61  ;;  %4487 = vst.msk [vmem:[#allocation2 + $0xc9] sm:$0xff] %vm293_vm0, %v4455_v26  ;;  %v3943_v35 = vadd.f32 %v12702_v60, %v3556_v41  ;;  %v12834_v36 = vld [vmem:[#allocation2 + $0xa1] sm:$0xff]  ;;  %v12844_v60 = vld [vmem:[#allocation2 + $0xa9] sm:$0xff] }
 0x296   : > { %10121 = vmatprep.mubr.msk.f32.mxu1 %vm293_vm0, %v4554_v43  ;;  %v4454_v40 = vsel %vm4389_vm10, %v4357_v18, %v4422_v29  ;;  %vm4392_vm11 = vcmp.gt.f32.partialorder %v4360_v50, 0.0  ;;  %v4425_v8 = vmul.f32 %v12451_v57, %v4360_v50  ;;  %v4359_v6 = vadd.f32 %v4296_v47, %v3940_v19  ;;  %14931 = vst [vmem:[#allocation121_spill] sm:$0xff] %v12834_v36  ;;  %v12836_v54 = vld [vmem:[#allocation2 + $0xa0] sm:$0xff]  ;;  %v12838_v39 = vld [vmem:[#allocation2 + $0xa8] sm:$0xff]  ;;  %v10085_v43 = vpop.f32.mrf.mxu0  ;;  %v14933_v41 = vld [vmem:[#allocation27_spill] sm:$0xff] }
 0x297   : > { %10122 = vmatmul.mubr.msk.f32.gmra.mxu1 %vm293_vm0, %v4555_v55  ;;  %v3557_v26 = vadd.f32 %v12405_v31, %v3138_v37  ;;  %4486 = vst.msk [vmem:[#allocation2 + $0xc1] sm:$0xff] %vm293_vm0, %v4454_v40  ;;  %10174 = vmatprep.mubr.msk.f32.mxu0 %vm293_vm0, %v12834_v36  ;;  %14932 = vst [vmem:[#allocation122_spill] sm:$0xff] %v12844_v60  ;;  %v3942_v18 = vadd.f32 %v12736_v1, %v3555_v12  ;;  %v14934_v19 = vld [vmem:[#allocation26_spill] sm:$0xff]  ;;  %v14935_v61 = vld [vmem:[#allocation143_spill] sm:$0xff]  ;;  %v3907_v40 = vpop.f32.mrf.mxu1 }
 0x298   : > { %v4556_v47 = vmul.f32 %v12836_v54, %v14933_v41  ;;  %v4557_v55 = vmul.f32 %v12838_v39, %v14934_v19  ;;  %v4457_v29 = vsel %vm4392_vm11, %v4360_v50, %v4425_v8  ;;  %vm4391_vm12 = vcmp.gt.f32.partialorder %v4359_v6, 0.0  ;;  %10175 = vmatmul.mubr.msk.f32.gmra.mxu0 %vm293_vm0, %v12844_v60  ;;  %v4306_v1 = vpop.f32.mrf.mxu0  ;;  %v5310_v36 = vld [vmem:[#allocation2 + $0xa] sm:$0xff] }
 0x299   : > { %v4424_v31 = vmul.f32 %v12451_v57, %v4359_v6  ;;  %v4362_v37 = vadd.f32 %v10085_v43, %v3943_v35  ;;  %v3560_v14 = vadd.f32 %v12424_v56, %v3141_v45  ;;  %v3140_v49 = vadd.f32 %v14935_v61, %v2721_v33  ;;  %4489 = vst.msk [vmem:[#allocation2 + $0xd9] sm:$0xff] %vm293_vm0, %v4457_v29  ;;  %v12861_v43 = vld [vmem:[#allocation2 + $0xb1] sm:$0xff] }
 0x29a   : > { %10124 = vmatprep.mubr.msk.f32.mxu1 %vm293_vm0, %v4556_v47  ;;  %v3945_v12 = vadd.f32 %v12768_v20, %v3558_v27  ;;  %v4361_v35 = vadd.f32 %v4306_v1, %v3942_v18  ;;  %14936 = vst [vmem:[#allocation133_spill] sm:$0xff] %v12861_v43  ;;  %v12863_v56 = vld [vmem:[#allocation2 + $0xb0] sm:$0xff]  ;;  %v12865_v33 = vld [vmem:[#allocation2 + $0xb8] sm:$0xff]  ;;  %v10088_v47 = vpop.f32.mrf.mxu0  ;;  %10177 = vmatprep.mubr.msk.f32.mxu0 %vm293_vm0, %v12861_v43  ;;  %v14938_v27 = vld [vmem:[#allocation29_spill] sm:$0xff]  ;;  %v10096_v1 = vpop.f32.mrf.mxu1 }
 0x29b   : > { %v4456_v50 = vsel %vm4391_vm12, %v4359_v6, %v4424_v31  ;;  %vm4394_vm13 = vcmp.gt.f32.partialorder %v4362_v37, 0.0  ;;  %v4427_v8 = vmul.f32 %v12451_v57, %v4362_v37  ;;  %10125 = vmatmul.mubr.msk.f32.gmra.mxu1 %vm293_vm0, %v4557_v55  ;;  %v3559_v45 = vadd.f32 %v12441_v30, %v3140_v49  ;;  %v12871_v20 = vld [vmem:[#allocation2 + $0xb9] sm:$0xff] }
 0x29c   : > { %4488 = vst.msk [vmem:[#allocation2 + $0xd1] sm:$0xff] %vm293_vm0, %v4456_v50  ;;  %14937 = vst [vmem:[#allocation123_spill] sm:$0xff] %v12871_v20  ;;  %v3944_v6 = vadd.f32 %v12800_v23, %v3557_v26  ;;  %v4558_v18 = vmul.f32 %v12863_v56, %v14938_v27  ;;  %v14939_v55 = vld [vmem:[#allocation28_spill] sm:$0xff]  ;;  %vm4393_vm14 = vcmp.gt.f32.partialorder %v4361_v35, 0.0  ;;  %v4426_v30 = vmul.f32 %v12451_v57, %v4361_v35  ;;  %v12884_v49 = vld [vmem:[%s14307_s4] ss:$0 sm:$0xff]  ;;  %v4316_v23 = vpop.f32.mrf.mxu0 }
 0x29d   : > { %v4559_v29 = vmul.f32 %v12865_v33, %v14939_v55  ;;  %v4459_v31 = vsel %vm4394_vm13, %v4362_v37, %v4427_v8  ;;  %v4364_v61 = vadd.f32 %v10088_v47, %v3945_v12  ;;  %10178 = vmatmul.mubr.msk.f32.gmra.mxu0 %vm293_vm0, %v12871_v20  ;;  %14940 = vst [vmem:[#allocation124_spill] sm:$0xff] %v12884_v49 }
 0x29e   : > { %4491 = vst.msk [vmem:[#allocation2 + $0xe9] sm:$0xff] %vm293_vm0, %v4459_v31  ;;  %10127 = vmatprep.mubr.msk.f32.mxu1 %vm293_vm0, %v4558_v18  ;;  %v3947_v26 = vadd.f32 %v10041_v48, %v3560_v14  ;;  %v4458_v37 = vsel %vm4393_vm14, %v4361_v35, %v4426_v30  ;;  %v4363_v12 = vadd.f32 %v4316_v23, %v3944_v6  ;;  %v12890_v8 = vld [vmem:[#allocation2 + $0xc1] sm:$0xff]  ;;  %v10091_v31 = vpop.f32.mrf.mxu0  ;;  %v12899_v48 = vld [vmem:[#allocation2 + $0xc9] sm:$0xff] }
 0x29f   : > { %vm4396_vm15 = vcmp.gt.f32.partialorder %v4364_v61, 0.0  ;;  %v4429_v50 = vmul.f32 %v12451_v57, %v4364_v61  ;;  %10128 = vmatmul.mubr.msk.f32.gmra.mxu1 %vm293_vm0, %v4559_v29  ;;  %14941 = vst [vmem:[#allocation125_spill] sm:$0xff] %v12890_v8  ;;  %v12892_v47 = vld [vmem:[#allocation2 + $0xc0] sm:$0xff]  ;;  %v12894_v20 = vld [vmem:[#allocation2 + $0xc8] sm:$0xff]  ;;  %4490 = vst.msk [vmem:[#allocation2 + $0xe1] sm:$0xff] %vm293_vm0, %v4458_v37  ;;  %10180 = vmatprep.mubr.msk.f32.mxu0 %vm293_vm0, %v12890_v8  ;;  %v3946_v14 = vadd.f32 %v3907_v40, %v3559_v45 }
 0x2a0   : > { %14942 = vst [vmem:[#allocation126_spill] sm:$0xff] %v12899_v48  ;;  %v14943_v35 = vld [vmem:[#allocation31_spill] sm:$0xff]  ;;  %v14944_v18 = vld [vmem:[#allocation30_spill] sm:$0xff]  ;;  %vm4395_vm1 = vcmp.gt.f32.partialorder %v4363_v12, 0.0  ;;  %v4428_v23 = vmul.f32 %v12451_v57, %v4363_v12  ;;  %v4366_v43 = vadd.f32 %v10091_v31, %v3947_v26  ;;  %v4891_v37 = vadd.f32 %v10096_v1, %v12884_v49  ;;  %v4326_v8 = vpop.f32.mrf.mxu0  ;;  %v12922_v31 = vld [vmem:[#allocation2 + $0xd9] sm:$0xff] }
 0x2a1   : > { %v4560_v6 = vmul.f32 %v12892_v47, %v14943_v35  ;;  %v4561_v29 = vmul.f32 %v12894_v20, %v14944_v18  ;;  %v4461_v30 = vsel %vm4396_vm15, %v4364_v61, %v4429_v50  ;;  %10181 = vmatmul.mubr.msk.f32.gmra.mxu0 %vm293_vm0, %v12899_v48  ;;  %v4365_v60 = vadd.f32 %v4326_v8, %v3946_v14  ;;  %v14948_v8 = vld [vmem:[#allocation32_spill] sm:$0xff]  ;;  %v14960_v48 = vld [vmem:[#allocation39_spill] sm:$0xff] }
 0x2a2   : > { %4493 = vst.msk [vmem:[#allocation2 + $0xf9] sm:$0xff] %vm293_vm0, %v4461_v30  ;;  %v4460_v40 = vsel %vm4395_vm1, %v4363_v12, %v4428_v23  ;;  %vm4398_vm2 = vcmp.gt.f32.partialorder %v4366_v43, 0.0  ;;  %v4431_v45 = vmul.f32 %v12451_v57, %v4366_v43  ;;  %v10146_v1 = vpop.f32.mrf.mxu0  ;;  %14946 = vst [vmem:[#allocation128_spill] sm:$0xff] %v12922_v31  ;;  %v14947_v12 = vld [vmem:[#allocation33_spill] sm:$0xff] }
 0x2a3   : > { %10130 = vmatprep.mubr.msk.f32.mxu1 %vm293_vm0, %v4560_v6  ;;  %v12913_v61 = vld [vmem:[#allocation2 + $0xd1] sm:$0xff]  ;;  %4492 = vst.msk [vmem:[#allocation2 + $0xf1] sm:$0xff] %vm293_vm0, %v4460_v40  ;;  %vm4397_vm3 = vcmp.gt.f32.partialorder %v4365_v60, 0.0  ;;  %v4430_v30 = vmul.f32 %v12451_v57, %v4365_v60  ;;  %v12929_v23 = vadd.f32 %v10146_v1, %v4891_v37  ;;  %v14953_v1 = vld [vmem:[#allocation34_spill] sm:$0xff] }
 0x2a4   : > { %10131 = vmatmul.mubr.msk.f32.gmra.mxu1 %vm293_vm0, %v4561_v29  ;;  %14945 = vst [vmem:[#allocation53_spill] sm:$0xff] %v12913_v61  ;;  %v12915_v26 = vld [vmem:[#allocation2 + $0xd0] sm:$0xff]  ;;  %v12917_v50 = vld [vmem:[#allocation2 + $0xd8] sm:$0xff]  ;;  %10183 = vmatprep.mubr.msk.f32.mxu0 %vm293_vm0, %v12913_v61  ;;  %v4463_v29 = vsel %vm4398_vm2, %v4366_v43, %v4431_v45 }
 0x2a5   : > { %v4562_v6 = vmul.f32 %v12915_v26, %v14947_v12  ;;  %v4563_v14 = vmul.f32 %v12917_v50, %v14948_v8  ;;  %14949 = vst [vmem:[#allocation131_spill] sm:$0xff] %v12929_v23  ;;  %10184 = vmatmul.mubr.msk.f32.gmra.mxu0 %vm293_vm0, %v12922_v31  ;;  %4495 = vst.msk [vmem:[#allocation2 + $0x109] sm:$0xff] %vm293_vm0, %v4463_v29  ;;  %v4462_v40 = vsel %vm4397_vm3, %v4365_v60, %v4430_v30  ;;  %v12945_v57 = vld [vmem:[#allocation2 + $0xe9] sm:$0xff]  ;;  %v14957_v23 = vld [vmem:[#allocation37_spill] sm:$0xff] }
 0x2a6   : > { %v12936_v49 = vld [vmem:[#allocation2 + $0xe1] sm:$0xff]  ;;  %4494 = vst.msk [vmem:[#allocation2 + $0x101] sm:$0xff] %vm293_vm0, %v4462_v40  ;;  %14951 = vst [vmem:[#allocation132_spill] sm:$0xff] %v12945_v57  ;;  %v14952_v37 = vld [vmem:[#allocation35_spill] sm:$0xff] }
 0x2a7   : > { %10133 = vmatprep.mubr.msk.f32.mxu1 %vm293_vm0, %v4562_v6  ;;  %14950 = vst [vmem:[#allocation56_spill] sm:$0xff] %v12936_v49  ;;  %v12938_v61 = vld [vmem:[#allocation2 + $0xe0] sm:$0xff]  ;;  %v12940_v43 = vld [vmem:[#allocation2 + $0xe8] sm:$0xff]  ;;  %10186 = vmatprep.mubr.msk.f32.mxu0 %vm293_vm0, %v12936_v49  ;;  %v14959_v31 = vld [vmem:[#allocation36_spill] sm:$0xff] }
 0x2a8   : > { %10134 = vmatmul.mubr.msk.f32.gmra.mxu1 %vm293_vm0, %v4563_v14  ;;  %v4564_v45 = vmul.f32 %v12938_v61, %v14952_v37  ;;  %v4565_v60 = vmul.f32 %v12940_v43, %v14953_v1  ;;  %v5309_v6 = vld [vmem:[#allocation2 + $0x2] sm:$0xff] }
 0x2a9   : > { %10187 = vmatmul.mubr.msk.f32.gmra.mxu0 %vm293_vm0, %v12945_v57  ;;  %v12963_v40 = vld [vmem:[#allocation2 + $0xf9] sm:$0xff]  ;;  %v14958_v57 = vld [vmem:[#allocation7_spill] sm:$0xff] }
 0x2aa   : > { %10136 = vmatprep.mubr.msk.f32.mxu1 %vm293_vm0, %v4564_v45  ;;  %v12955_v14 = vld [vmem:[#allocation2 + $0xf1] sm:$0xff]  ;;  %14956 = vst [vmem:[#allocation49_spill] sm:$0xff] %v12963_v40  ;;  %v5760_v45 = vmul.f32 %v12540_v11, %v14958_v57  ;;  %v14961_v1 = vld [vmem:[#allocation9_spill] sm:$0xff]  ;;  %v5762_v11 = vmul.f32 %v12569_v63, %v14855_v3 }
 0x2ab   : > { %14954 = vst [vmem:[#allocation46_spill] sm:$0xff] %v12955_v14  ;;  %v12957_v29 = vld [vmem:[#allocation2 + $0xf0] sm:$0xff]  ;;  %v12959_v30 = vld [vmem:[#allocation2 + $0xf8] sm:$0xff]  ;;  %10189 = vmatprep.mubr.msk.f32.mxu0 %vm293_vm0, %v12955_v14  ;;  %v5341_v14 = vmul.f32 %v5309_v6, %v14960_v48  ;;  %v14962_v6 = vld [vmem:[#allocation38_spill] sm:$0xff] }
 0x2ac   : > { %10137 = vmatmul.mubr.msk.f32.gmra.mxu1 %vm293_vm0, %v4565_v60  ;;  %14955 = vst [vmem:[#allocation60_spill] sm:$0xff] %v12957_v29  ;;  %v4566_v49 = vmul.f32 %v12957_v29, %v14957_v23  ;;  %v4567_v60 = vmul.f32 %v12959_v30, %v14959_v31  ;;  %v5761_v23 = vmul.f32 %v12542_v32, %v14961_v1  ;;  %v12979_v29 = vld [vmem:[#allocation2 + $0x12] sm:$0xff]  ;;  %v12994_v1 = vld [vmem:[#allocation2 + $0x1a] sm:$0xff]  ;;  %v13021_v3 = vld [vmem:[#allocation2 + $0x2a] sm:$0xff] }
 0x2ad   : > { %10190 = vmatmul.mubr.msk.f32.gmra.mxu0 %vm293_vm0, %v12963_v40  ;;  %v13000_v63 = vld [vmem:[%s14306_s3 + $0x30] sm:$0xff]  ;;  %v13037_v57 = vld [vmem:[#allocation2 + $0x3a] sm:$0xff]  ;;  %v14975_v40 = vld [vmem:[#allocation54_spill] sm:$0xff] }
 0x2ae   : > { %10139 = vmatprep.mubr.msk.f32.mxu1 %vm293_vm0, %v4566_v49  ;;  %10244 = vmatprep.mubr.msk.f32.mxu0 %vm293_vm0, %v5760_v45  ;;  %v12987_v49 = vld [vmem:[%s14306_s3 + $0x38] sm:$0xff]  ;;  %v5342_v45 = vmul.f32 %v5310_v36, %v14962_v6  ;;  %v13005_v36 = vld [vmem:[#allocation2 + $0x22] sm:$0xff] }
 0x2b0   : > { %10140 = vmatmul.mubr.msk.f32.gmra.mxu1 %vm293_vm0, %v4567_v60  ;;  %v14963_v60 = vld [vmem:[#allocation40_spill] sm:$0xff] }
 0x2b1   : > { %10194 = vmatprep.mubr.msk.f32.mxu1 %vm293_vm0, %v5341_v14  ;;  %10245 = vmatmul.mubr.msk.f32.vlgmr.msra.gmra.mxu0 %vm293_vm0, %v5761_v23  ;;  %v5343_v32 = vmul.f32 %v12979_v29, %v14963_v60  ;;  %v5763_v23 = vmul.f32 %v12571_v4, %v14856_v62  ;;  %v10570_v14 = vld [vmem:[%s14306_s3 + $0x20] sm:$0xff]  ;;  %v14965_v4 = vld [vmem:[#allocation42_spill] sm:$0xff] }
 0x2b2   : > { %10247 = vmatprep.mubr.msk.f32.mxu0 %vm293_vm0, %v5762_v11  ;;  %10343 = vmatpush3.msra.mxu0 %v12514_v53  ;;  %v5764_v53 = vmul.f32 %v12602_v16, %v14863_v15  ;;  %v14964_v11 = vld [vmem:[#allocation41_spill] sm:$0xff]  ;;  %v5345_v62 = vmul.f32 %v13005_v36, %v14965_v4  ;;  %v13026_v16 = vld [vmem:[#allocation2 + $0x32] sm:$0xff] }
 0x2b3   : > { %10442 = vmatprep.subr.mxu0 %v12987_v49  ;;  %v14967_v15 = vld [vmem:[#allocation44_spill] sm:$0xff] }
 0x2b4   : > { %10195 = vmatmul.mubr.msk.f32.vlgmr.msra.gmra.mxu1 %vm293_vm0, %v5342_v45  ;;  %v5344_v45 = vmul.f32 %v12994_v1, %v14964_v11 }
 0x2b5   : > { %10293 = vmatpush3.msra.mxu1 %v10570_v14  ;;  %10197 = vmatprep.mubr.msk.f32.mxu1 %vm293_vm0, %v5343_v32  ;;  %v5765_v32 = vmul.f32 %v12604_v34, %v14864_v58  ;;  %v14966_v14 = vld [vmem:[#allocation43_spill] sm:$0xff]  ;;  %v13042_v34 = vld [vmem:[#allocation2 + $0x42] sm:$0xff] }
 0x2b6   : > { %10248 = vmatmul.mubr.msk.f32.gmra.mxu0 %vm293_vm0, %v5763_v23  ;;  %10392 = vmatprep.subr.mxu1 %v13000_v63  ;;  %v5766_v23 = vmul.f32 %v12638_v10, %v14874_v2  ;;  %v5768_v10 = vmul.f32 %v12673_v38, %v14884_v5  ;;  %v14969_v2 = vld [vmem:[#allocation47_spill] sm:$0xff]  ;;  %v5770_v38 = vmul.f32 %v12708_v59, %v14892_v13  ;;  %v14971_v5 = vld [vmem:[#allocation50_spill] sm:$0xff] }
 0x2b7   : > { %10250 = vmatprep.mubr.msk.f32.mxu0 %vm293_vm0, %v5764_v53  ;;  %v5346_v53 = vmul.f32 %v13021_v3, %v14966_v14  ;;  %v13053_v58 = vld [vmem:[#allocation2 + $0x4a] sm:$0xff] }
 0x2b8   : > { %10198 = vmatmul.mubr.msk.f32.gmra.mxu1 %vm293_vm0, %v5344_v45  ;;  %v5347_v45 = vmul.f32 %v13026_v16, %v14967_v15  ;;  %v14973_v59 = vld [vmem:[#allocation19_spill] sm:$0xff] }
 0x2b9   : > { %10200 = vmatprep.mubr.msk.f32.mxu1 %vm293_vm0, %v5345_v62  ;;  %v5767_v62 = vmul.f32 %v12640_v52, %v14875_v46  ;;  %v5769_v52 = vmul.f32 %v12675_v28, %v14885_v22  ;;  %v13069_v46 = vld [vmem:[#allocation2 + $0x5a] sm:$0xff]  ;;  %v13074_v22 = vld [vmem:[#allocation2 + $0x62] sm:$0xff] }
 0x2ba   : > { %10251 = vmatmul.mubr.msk.f32.gmra.mxu0 %vm293_vm0, %v5765_v32  ;;  %v14968_v32 = vld [vmem:[#allocation45_spill] sm:$0xff]  ;;  %v14972_v28 = vld [vmem:[#allocation16_spill] sm:$0xff] }
 0x2bb   : > { %10253 = vmatprep.mubr.msk.f32.mxu0 %vm293_vm0, %v5766_v23  ;;  %v5348_v23 = vmul.f32 %v13037_v57, %v14968_v32 }
 0x2bc   : > { %10201 = vmatmul.mubr.msk.f32.gmra.mxu1 %vm293_vm0, %v5346_v53  ;;  %v5349_v53 = vmul.f32 %v13042_v34, %v14969_v2 }
 0x2bd   : > { %10203 = vmatprep.mubr.msk.f32.mxu1 %vm293_vm0, %v5347_v45  ;;  %v13058_v45 = vld [vmem:[#allocation2 + $0x52] sm:$0xff] }
 0x2be   : > { %10254 = vmatmul.mubr.msk.f32.gmra.mxu0 %vm293_vm0, %v5767_v62  ;;  %v14970_v62 = vld [vmem:[#allocation48_spill] sm:$0xff] }
 0x2bf   : > { %10256 = vmatprep.mubr.msk.f32.mxu0 %vm293_vm0, %v5768_v10  ;;  %v5350_v10 = vmul.f32 %v13053_v58, %v14970_v62 }
 0x2c0   : > { %10204 = vmatmul.mubr.msk.f32.gmra.mxu1 %vm293_vm0, %v5348_v23  ;;  %v5351_v23 = vmul.f32 %v13058_v45, %v14971_v5  ;;  %v13085_v5 = vld [vmem:[#allocation2 + $0x6a] sm:$0xff] }
 0x2c1   : > { %10206 = vmatprep.mubr.msk.f32.mxu1 %vm293_vm0, %v5349_v53  ;;  %v5771_v53 = vmul.f32 %v12710_v0, %v14972_v28  ;;  %v14976_v0 = vld [vmem:[#allocation18_spill] sm:$0xff]  ;;  %v13090_v28 = vld [vmem:[#allocation2 + $0x72] sm:$0xff] }
 0x2c2   : > { %10257 = vmatmul.mubr.msk.f32.gmra.mxu0 %vm293_vm0, %v5769_v52  ;;  %v5772_v52 = vmul.f32 %v12742_v9, %v14973_v59  ;;  %v14977_v9 = vld [vmem:[#allocation21_spill] sm:$0xff] }
 0x2c3   : > { %10259 = vmatprep.mubr.msk.f32.mxu0 %vm293_vm0, %v5770_v38  ;;  %v14974_v38 = vld [vmem:[#allocation51_spill] sm:$0xff] }
 0x2c4   : > { %10207 = vmatmul.mubr.msk.f32.gmra.mxu1 %vm293_vm0, %v5350_v10  ;;  %v5352_v13 = vmul.f32 %v13069_v46, %v14974_v38  ;;  %v5353_v10 = vmul.f32 %v13074_v22, %v14975_v40  ;;  %v14979_v40 = vld [vmem:[#allocation58_spill] sm:$0xff]  ;;  %v13101_v38 = vld [vmem:[#allocation2 + $0x7a] sm:$0xff] }
 0x2c5   : > { %10209 = vmatprep.mubr.msk.f32.mxu1 %vm293_vm0, %v5351_v23  ;;  %v5773_v23 = vmul.f32 %v12744_v21, %v14976_v0  ;;  %v14980_v21 = vld [vmem:[#allocation20_spill] sm:$0xff]  ;;  %v13106_v0 = vld [vmem:[#allocation2 + $0x82] sm:$0xff] }
 0x2c6   : > { %10260 = vmatmul.mubr.msk.f32.gmra.mxu0 %vm293_vm0, %v5771_v53  ;;  %v5774_v53 = vmul.f32 %v12774_v7, %v14977_v9  ;;  %v14981_v7 = vld [vmem:[#allocation23_spill] sm:$0xff] }
 0x2c7   : > { %10262 = vmatprep.mubr.msk.f32.mxu0 %vm293_vm0, %v5772_v52  ;;  %v14978_v52 = vld [vmem:[#allocation55_spill] sm:$0xff] }
 0x2c8   : > { %10210 = vmatmul.mubr.msk.f32.gmra.mxu1 %vm293_vm0, %v5352_v13  ;;  %v5354_v59 = vmul.f32 %v13085_v5, %v14978_v52  ;;  %v5355_v13 = vmul.f32 %v13090_v28, %v14979_v40  ;;  %v14983_v40 = vld [vmem:[#allocation63_spill] sm:$0xff] }
 0x2c9   : > { %10212 = vmatprep.mubr.msk.f32.mxu1 %vm293_vm0, %v5353_v10  ;;  %v5775_v10 = vmul.f32 %v12776_v42, %v14980_v21  ;;  %v13117_v52 = vld [vmem:[#allocation2 + $0x8a] sm:$0xff]  ;;  %v5777_v42 = vmul.f32 %v12808_v51, %v14919_v24  ;;  %v13133_v21 = vld [vmem:[#allocation2 + $0x9a] sm:$0xff]  ;;  %v5779_v51 = vmul.f32 %v12838_v39, %v14927_v44  ;;  %v5781_v39 = vmul.f32 %v12865_v33, %v14934_v19 }
 0x2ca   : > { %10263 = vmatmul.mubr.msk.f32.gmra.mxu0 %vm293_vm0, %v5773_v23  ;;  %v5776_v23 = vmul.f32 %v12806_v25, %v14981_v7  ;;  %v5778_v25 = vmul.f32 %v12836_v54, %v14926_v17  ;;  %v14985_v7 = vld [vmem:[#allocation67_spill] sm:$0xff]  ;;  %v5780_v54 = vmul.f32 %v12863_v56, %v14933_v41  ;;  %v5782_v56 = vmul.f32 %v12892_v47, %v14938_v27  ;;  %v13165_v44 = vld [vmem:[#allocation2 + $0xba] sm:$0xff] }
 0x2cb   : > { %10265 = vmatprep.mubr.msk.f32.mxu0 %vm293_vm0, %v5774_v53  ;;  %v14982_v53 = vld [vmem:[#allocation59_spill] sm:$0xff]  ;;  %v5783_v33 = vmul.f32 %v12894_v20, %v14939_v55  ;;  %v5784_v47 = vmul.f32 %v12915_v26, %v14943_v35  ;;  %v5785_v20 = vmul.f32 %v12917_v50, %v14944_v18  ;;  %v5786_v26 = vmul.f32 %v12938_v61, %v14947_v12  ;;  %v13197_v55 = vld [vmem:[#allocation2 + $0xda] sm:$0xff] }
 0x2cc   : > { %10213 = vmatmul.mubr.msk.f32.gmra.mxu1 %vm293_vm0, %v5354_v59  ;;  %v5356_v9 = vmul.f32 %v13101_v38, %v14982_v53  ;;  %v5357_v59 = vmul.f32 %v13106_v0, %v14983_v40  ;;  %v14987_v17 = vld [vmem:[#allocation71_spill] sm:$0xff]  ;;  %v5787_v50 = vmul.f32 %v12940_v43, %v14948_v8  ;;  %v14995_v61 = vld [vmem:[#allocation60_spill] sm:$0xff]  ;;  %v13210_v18 = vld [vmem:[#allocation2 + $0x100] sm:$0xff] }
 0x2cd   : > { %10215 = vmatprep.mubr.msk.f32.mxu1 %vm293_vm0, %v5355_v13  ;;  %v13122_v13 = vld [vmem:[#allocation2 + $0x92] sm:$0xff]  ;;  %v13149_v24 = vld [vmem:[#allocation2 + $0xaa] sm:$0xff] }
 0x2ce   : > { %10266 = vmatmul.mubr.msk.f32.gmra.mxu0 %vm293_vm0, %v5775_v10  ;;  %v14984_v10 = vld [vmem:[#allocation64_spill] sm:$0xff]  ;;  %v14989_v41 = vld [vmem:[#allocation75_spill] sm:$0xff] }
 0x2cf   : > { %10268 = vmatprep.mubr.msk.f32.mxu0 %vm293_vm0, %v5776_v23  ;;  %v5358_v23 = vmul.f32 %v13117_v52, %v14984_v10  ;;  %v14991_v27 = vld [vmem:[#allocation79_spill] sm:$0xff] }
 0x2d0   : > { %10216 = vmatmul.mubr.msk.f32.gmra.mxu1 %vm293_vm0, %v5356_v9  ;;  %v5359_v9 = vmul.f32 %v13122_v13, %v14985_v7  ;;  %v13181_v19 = vld [vmem:[#allocation2 + $0xca] sm:$0xff] }
 0x2d1   : > { %10218 = vmatprep.mubr.msk.f32.mxu1 %vm293_vm0, %v5357_v59  ;;  %v13138_v59 = vld [vmem:[#allocation2 + $0xa2] sm:$0xff]  ;;  %v14993_v35 = vld [vmem:[#allocation83_spill] sm:$0xff] }
 0x2d2   : > { %10269 = vmatmul.mubr.msk.f32.gmra.mxu0 %vm293_vm0, %v5777_v42  ;;  %v14986_v42 = vld [vmem:[#allocation68_spill] sm:$0xff]  ;;  %v13215_v43 = vld [vmem:[#allocation2 + $0xea] sm:$0xff] }
 0x2d3   : > { %10271 = vmatprep.mubr.msk.f32.mxu0 %vm293_vm0, %v5778_v25  ;;  %v5360_v25 = vmul.f32 %v13133_v21, %v14986_v42 }
 0x2d4   : > { %10219 = vmatmul.mubr.msk.f32.gmra.mxu1 %vm293_vm0, %v5358_v23  ;;  %v5361_v23 = vmul.f32 %v13138_v59, %v14987_v17 }
 0x2d5   : > { %10221 = vmatprep.mubr.msk.f32.mxu1 %vm293_vm0, %v5359_v9  ;;  %v13154_v9 = vld [vmem:[#allocation2 + $0xb2] sm:$0xff] }
 0x2d6   : > { %10272 = vmatmul.mubr.msk.f32.gmra.mxu0 %vm293_vm0, %v5779_v51  ;;  %v14988_v51 = vld [vmem:[#allocation72_spill] sm:$0xff] }
 0x2d7   : > { %10274 = vmatprep.mubr.msk.f32.mxu0 %vm293_vm0, %v5780_v54  ;;  %v5362_v54 = vmul.f32 %v13149_v24, %v14988_v51 }
 0x2d8   : > { %10222 = vmatmul.mubr.msk.f32.gmra.mxu1 %vm293_vm0, %v5360_v25  ;;  %v5363_v25 = vmul.f32 %v13154_v9, %v14989_v41 }
 0x2d9   : > { %10224 = vmatprep.mubr.msk.f32.mxu1 %vm293_vm0, %v5361_v23  ;;  %v13170_v23 = vld [vmem:[#allocation2 + $0xc2] sm:$0xff] }
 0x2da   : > { %10275 = vmatmul.mubr.msk.f32.gmra.mxu0 %vm293_vm0, %v5781_v39  ;;  %v14990_v39 = vld [vmem:[#allocation76_spill] sm:$0xff] }
 0x2db   : > { %10277 = vmatprep.mubr.msk.f32.mxu0 %vm293_vm0, %v5782_v56  ;;  %v5364_v56 = vmul.f32 %v13165_v44, %v14990_v39 }
 0x2dc   : > { %10225 = vmatmul.mubr.msk.f32.gmra.mxu1 %vm293_vm0, %v5362_v54  ;;  %v5365_v54 = vmul.f32 %v13170_v23, %v14991_v27 }
 0x2dd   : > { %10227 = vmatprep.mubr.msk.f32.mxu1 %vm293_vm0, %v5363_v25  ;;  %v13186_v25 = vld [vmem:[#allocation2 + $0xd2] sm:$0xff] }
 0x2de   : > { %10278 = vmatmul.mubr.msk.f32.gmra.mxu0 %vm293_vm0, %v5783_v33  ;;  %v14992_v33 = vld [vmem:[#allocation80_spill] sm:$0xff] }
 0x2df   : > { %10280 = vmatprep.mubr.msk.f32.mxu0 %vm293_vm0, %v5784_v47  ;;  %v5366_v47 = vmul.f32 %v13181_v19, %v14992_v33 }
 0x2e0   : > { %10228 = vmatmul.mubr.msk.f32.gmra.mxu1 %vm293_vm0, %v5364_v56  ;;  %v5367_v56 = vmul.f32 %v13186_v25, %v14993_v35 }
 0x2e1   : > { %10230 = vmatprep.mubr.msk.f32.mxu1 %vm293_vm0, %v5365_v54  ;;  %v13202_v54 = vld [vmem:[#allocation2 + $0xe2] sm:$0xff] }
 0x2e2   : > { %10281 = vmatmul.mubr.msk.f32.gmra.mxu0 %vm293_vm0, %v5785_v20  ;;  %14994 = vst [vmem:[#allocation62_spill] sm:$0xff] %v13202_v54  ;;  %v5788_v20 = vmul.f32 %v14995_v61, %v14952_v37  ;;  %v13220_v61 = vld [vmem:[#allocation2 + $0xf2] sm:$0xff] }
 0x2e3   : > { %10283 = vmatprep.mubr.msk.f32.mxu0 %vm293_vm0, %v5786_v26  ;;  %v14996_v26 = vld [vmem:[#allocation84_spill] sm:$0xff] }
 0x2e4   : > { %10231 = vmatmul.mubr.msk.f32.gmra.mxu1 %vm293_vm0, %v5366_v47  ;;  %v5368_v12 = vmul.f32 %v13197_v55, %v14996_v26  ;;  %v14997_v47 = vld [vmem:[#allocation87_spill] sm:$0xff]  ;;  %v13225_v26 = vld [vmem:[#allocation2 + $0x108] sm:$0xff] }
 0x2e5   : > { %10233 = vmatprep.mubr.msk.f32.mxu1 %vm293_vm0, %v5367_v56  ;;  %v5369_v35 = vmul.f32 %v13202_v54, %v14997_v47  ;;  %v14998_v56 = vld [vmem:[#allocation34_spill] sm:$0xff] }
 0x2e6   : > { %10284 = vmatmul.mubr.msk.f32.gmra.mxu0 %vm293_vm0, %v5787_v50  ;;  %v5789_v8 = vmul.f32 %v12959_v30, %v14998_v56  ;;  %v14999_v50 = vld [vmem:[#allocation37_spill] sm:$0xff]  ;;  %v6147_v56 = vld [vmem:[#allocation2 + $0x11] sm:$0xff] }
 0x2e7   : > { %10286 = vmatprep.mubr.msk.f32.mxu0 %vm293_vm0, %v5788_v20  ;;  %v5790_v37 = vmul.f32 %v13210_v18, %v14999_v50  ;;  %v15000_v20 = vld [vmem:[#allocation88_spill] sm:$0xff]  ;;  %v15002_v50 = vld [vmem:[#allocation91_spill] sm:$0xff] }
 0x2e8   : > { %10234 = vmatmul.mubr.msk.f32.gmra.mxu1 %vm293_vm0, %v5368_v12  ;;  %v5370_v47 = vmul.f32 %v13215_v43, %v15000_v20  ;;  %v15001_v12 = vld [vmem:[#allocation90_spill] sm:$0xff]  ;;  %v13233_v30 = vld [vmem:[#allocation2 + $0xfa] sm:$0xff] }
 0x2e9   : > { %10236 = vmatprep.mubr.msk.f32.mxu1 %vm293_vm0, %v5369_v35  ;;  %v5371_v54 = vmul.f32 %v13220_v61, %v15001_v12  ;;  %v5791_v35 = vmul.f32 %v13225_v26, %v14959_v31  ;;  %v6568_v31 = vmul.f32 %v13005_v36, %v14963_v60  ;;  %v10571_v36 = vld [vmem:[#allocation2 + $0x21] sm:$0xff] }
 0x2ea   : > { %10287 = vmatmul.mubr.msk.f32.gmra.mxu0 %vm293_vm0, %v5789_v8  ;;  %v6566_v8 = vmul.f32 %v12979_v29, %v14960_v48  ;;  %v6148_v29 = vld [vmem:[#allocation2 + $0x19] sm:$0xff] }
 0x2eb   : > { %10289 = vmatprep.mubr.msk.f32.mxu0 %vm293_vm0, %v5790_v37  ;;  %v5372_v37 = vmul.f32 %v13233_v30, %v15002_v50 }
 0x2ec   : > { %10237 = vmatmul.mubr.msk.f32.gmra.mxu1 %vm293_vm0, %v5370_v47  ;;  %v6567_v47 = vmul.f32 %v12994_v1, %v14962_v6  ;;  %v6569_v1 = vmul.f32 %v13021_v3, %v14964_v11  ;;  %v6571_v3 = vmul.f32 %v13037_v57, %v14966_v14  ;;  %v6574_v57 = vmul.f32 %v13058_v45, %v14969_v2  ;;  %v15009_v45 = vld [vmem:[#allocation104_spill] sm:$0xff] }
 0x2ed   : > { %10239 = vmatprep.mubr.msk.f32.mxu1 %vm293_vm0, %v5371_v54  ;;  %v13257_v54 = vld [vmem:[%s14306_s3 + $0x40] sm:$0xff] }
 0x2ee   : > { %10290 = vmatmul.mubr.msk.f32.gmra.mxu0 %vm293_vm0, %v5791_v35  ;;  %v15004_v35 = vld [vmem:[#allocation98_spill] sm:$0xff] }
 0x2ef   : > { %10344 = vmatprep.mubr.msk.f32.mxu0 %vm293_vm0, %v6566_v8  ;;  %v6573_v8 = vmul.f32 %v13053_v58, %v14968_v32  ;;  %v15008_v58 = vld [vmem:[#allocation50_spill] sm:$0xff] }
 0x2f0   : > { %10240 = vmatmul.mubr.msk.f32.gmra.mxu1 %vm293_vm0, %v5372_v37  ;;  %v15005_v37 = vld [vmem:[#allocation100_spill] sm:$0xff] }
 0x2f1   : > { %10294 = vmatprep.mubr.msk.f32.mxu1 %vm293_vm0, %v6147_v56  ;;  %v6570_v56 = vmul.f32 %v13026_v16, %v14965_v4  ;;  %v6572_v16 = vmul.f32 %v13042_v34, %v14967_v15  ;;  %v15006_v34 = vld [vmem:[#allocation109_spill] sm:$0xff] }
 0x2f2   : > { %10345 = vmatmul.mubr.msk.f32.vlgmr.msra.gmra.mxu0 %vm293_vm0, %v6567_v47  ;;  %v6575_v47 = vmul.f32 %v13069_v46, %v14970_v62  ;;  %v15012_v46 = vld [vmem:[#allocation54_spill] sm:$0xff] }
 0x2f3   : > { %10347 = vmatprep.mubr.msk.f32.mxu0 %vm293_vm0, %v6568_v31  ;;  %10443 = vmatpush3.msra.mxu0 %v12987_v49  ;;  %v13269_v49 = vld [vmem:[#allocation2 + $0x29] sm:$0xff] }
 0x2f4   : > { %10295 = vmatmul.mubr.msk.f32.vlgmr.msra.gmra.mxu1 %vm293_vm0, %v6148_v29  ;;  %v15007_v31 = vld [vmem:[#allocation102_spill] sm:$0xff]  ;;  %v6576_v29 = vmul.f32 %v13074_v22, %v15008_v58  ;;  %v15013_v22 = vld [vmem:[#allocation108_spill] sm:$0xff] }
 0x2f5   : > { %10393 = vmatpush3.msra.mxu1 %v13000_v63  ;;  %10297 = vmatprep.mubr.msk.f32.mxu1 %vm293_vm0, %v10571_v36  ;;  %v15003_v63 = vld [vmem:[#allocation96_spill] sm:$0xff] }
 0x2f6   : > { %10348 = vmatmul.mubr.msk.f32.gmra.mxu0 %vm293_vm0, %v6569_v1  ;;  %10492 = vmatprep.subr.mxu1 %v13257_v54  ;;  %v15010_v1 = vld [vmem:[#allocation51_spill] sm:$0xff] }
 0x2f7   : > { %10350 = vmatprep.mubr.msk.f32.mxu0 %vm293_vm0, %v6570_v56  ;;  %v6577_v36 = vmul.f32 %v13085_v5, %v15010_v1  ;;  %v15011_v56 = vld [vmem:[#allocation106_spill] sm:$0xff] }
 0x2f8   : > { %10298 = vmatmul.mubr.msk.f32.gmra.mxu1 %vm293_vm0, %v13269_v49  ;;  %v15016_v5 = vld [vmem:[#allocation58_spill] sm:$0xff] }
 0x2f9   : > { %10300 = vmatprep.mubr.msk.f32.mxu1 %vm293_vm0, %v15003_v63  ;;  %v15014_v63 = vld [vmem:[#allocation55_spill] sm:$0xff] }
 0x2fa   : > { %10351 = vmatmul.mubr.msk.f32.gmra.mxu0 %vm293_vm0, %v6571_v3  ;;  %v6578_v3 = vmul.f32 %v13090_v28, %v15012_v46  ;;  %v15017_v28 = vld [vmem:[#allocation112_spill] sm:$0xff] }
 0x2fb   : > { %10353 = vmatprep.mubr.msk.f32.mxu0 %vm293_vm0, %v6572_v16  ;;  %v6579_v16 = vmul.f32 %v13101_v38, %v15014_v63  ;;  %v6582_v38 = vmul.f32 %v13122_v13, %v14983_v40  ;;  %v15021_v13 = vld [vmem:[#allocation120_spill] sm:$0xff] }
 0x2fc   : > { %10301 = vmatmul.mubr.msk.f32.gmra.mxu1 %vm293_vm0, %v15004_v35  ;;  %v15015_v35 = vld [vmem:[#allocation110_spill] sm:$0xff] }
 0x2fd   : > { %10303 = vmatprep.mubr.msk.f32.mxu1 %vm293_vm0, %v15005_v37  ;;  %v6581_v37 = vmul.f32 %v13117_v52, %v14982_v53  ;;  %v6584_v52 = vmul.f32 %v13138_v59, %v14985_v7  ;;  %v15023_v59 = vld [vmem:[#allocation122_spill] sm:$0xff] }
 0x2fe   : > { %10354 = vmatmul.mubr.msk.f32.gmra.mxu0 %vm293_vm0, %v6573_v8  ;;  %v6580_v8 = vmul.f32 %v13106_v0, %v15016_v5  ;;  %v15019_v0 = vld [vmem:[#allocation116_spill] sm:$0xff] }
 0x2ff   : > { %10356 = vmatprep.mubr.msk.f32.mxu0 %vm293_vm0, %v6574_v57  ;;  %v15018_v57 = vld [vmem:[#allocation114_spill] sm:$0xff] }
 0x300   : > { %10304 = vmatmul.mubr.msk.f32.gmra.mxu1 %vm293_vm0, %v15006_v34  ;;  %v6583_v34 = vmul.f32 %v13133_v21, %v14984_v10  ;;  %v6586_v21 = vmul.f32 %v13154_v9, %v14987_v17  ;;  %v15025_v9 = vld [vmem:[#allocation123_spill] sm:$0xff] }
 0x301   : > { %10306 = vmatprep.mubr.msk.f32.mxu1 %vm293_vm0, %v15007_v31  ;;  %v6585_v31 = vmul.f32 %v13149_v24, %v14986_v42  ;;  %v6588_v24 = vmul.f32 %v13170_v23, %v14989_v41  ;;  %v15027_v23 = vld [vmem:[#allocation126_spill] sm:$0xff]  ;;  %v6976_v41 = vld [vmem:[#allocation2 + $0xd8] sm:$0xff] }
 0x302   : > { %10357 = vmatmul.mubr.msk.f32.gmra.mxu0 %vm293_vm0, %v6575_v47  ;;  %v15020_v47 = vld [vmem:[#allocation118_spill] sm:$0xff] }
 0x303   : > { %10359 = vmatprep.mubr.msk.f32.mxu0 %vm293_vm0, %v6576_v29  ;;  %v15022_v29 = vld [vmem:[#allocation121_spill] sm:$0xff] }
 0x304   : > { %10307 = vmatmul.mubr.msk.f32.gmra.mxu1 %vm293_vm0, %v15009_v45  ;;  %v6587_v45 = vmul.f32 %v13165_v44, %v14988_v51  ;;  %v6590_v44 = vmul.f32 %v13186_v25, %v14991_v27  ;;  %v15031_v25 = vld [vmem:[#allocation128_spill] sm:$0xff] }
 0x305   : > { %10309 = vmatprep.mubr.msk.f32.mxu1 %vm293_vm0, %v15011_v56  ;;  %v6589_v56 = vmul.f32 %v13181_v19, %v14990_v39  ;;  %v15029_v19 = vld [vmem:[#allocation83_spill] sm:$0xff] }
 0x306   : > { %10360 = vmatmul.mubr.msk.f32.gmra.mxu0 %vm293_vm0, %v6577_v36  ;;  %v15024_v36 = vld [vmem:[#allocation133_spill] sm:$0xff] }
 0x307   : > { %10362 = vmatprep.mubr.msk.f32.mxu0 %vm293_vm0, %v6578_v3  ;;  %v15026_v3 = vld [vmem:[#allocation125_spill] sm:$0xff] }
 0x308   : > { %10310 = vmatmul.mubr.msk.f32.gmra.mxu1 %vm293_vm0, %v15013_v22  ;;  %v6591_v22 = vmul.f32 %v13197_v55, %v14992_v33  ;;  %v15034_v55 = vld [vmem:[#allocation87_spill] sm:$0xff] }
 0x309   : > { %10312 = vmatprep.mubr.msk.f32.mxu1 %vm293_vm0, %v15015_v35  ;;  %v15030_v35 = vld [vmem:[#allocation62_spill] sm:$0xff] }
 0x30a   : > { %10363 = vmatmul.mubr.msk.f32.gmra.mxu0 %vm293_vm0, %v6579_v16  ;;  %v15028_v16 = vld [vmem:[#allocation53_spill] sm:$0xff] }
 0x30b   : > { %10365 = vmatprep.mubr.msk.f32.mxu0 %vm293_vm0, %v6580_v8  ;;  %v6592_v8 = vmul.f32 %v15030_v35, %v15029_v19  ;;  %v6957_v35 = vld [vmem:[#allocation2 + $0x40] sm:$0xff]  ;;  %v6972_v19 = vld [vmem:[#allocation2 + $0xb8] sm:$0xff] }
 0x30c   : > { %10313 = vmatmul.mubr.msk.f32.gmra.mxu1 %vm293_vm0, %v15017_v28  ;;  %v15032_v28 = vld [vmem:[#allocation84_spill] sm:$0xff] }
 0x30d   : > { %10315 = vmatprep.mubr.msk.f32.mxu1 %vm293_vm0, %v15018_v57  ;;  %v15033_v57 = vld [vmem:[#allocation56_spill] sm:$0xff] }
 0x30e   : > { %10366 = vmatmul.mubr.msk.f32.gmra.mxu0 %vm293_vm0, %v6581_v37  ;;  %v6593_v37 = vmul.f32 %v13215_v43, %v15032_v28 }
 0x30f   : > { %10368 = vmatprep.mubr.msk.f32.mxu0 %vm293_vm0, %v6582_v38  ;;  %v6594_v38 = vmul.f32 %v13220_v61, %v15034_v55  ;;  %v15039_v61 = vld [vmem:[#allocation49_spill] sm:$0xff]  ;;  %v6970_v55 = vld [vmem:[#allocation2 + $0xa8] sm:$0xff] }
 0x310   : > { %10316 = vmatmul.mubr.msk.f32.gmra.mxu1 %vm293_vm0, %v15019_v0  ;;  %v13390_v0 = vld [vmem:[#allocation2 + $0x102] sm:$0xff] }
 0x311   : > { %10318 = vmatprep.mubr.msk.f32.mxu1 %vm293_vm0, %v15020_v47  ;;  %15035 = vst [vmem:[#allocation78_spill] sm:$0xff] %v13390_v0  ;;  %v6595_v47 = vmul.f32 %v13233_v30, %v15000_v20  ;;  %v6596_v43 = vmul.f32 %v13390_v0, %v15001_v12  ;;  %v6966_v12 = vld [vmem:[#allocation2 + $0x88] sm:$0xff]  ;;  %v6968_v20 = vld [vmem:[#allocation2 + $0x98] sm:$0xff] }
 0x312   : > { %10369 = vmatmul.mubr.msk.f32.gmra.mxu0 %vm293_vm0, %v6583_v34  ;;  %v15036_v34 = vld [vmem:[#allocation132_spill] sm:$0xff] }
 0x313   : > { %10371 = vmatprep.mubr.msk.f32.mxu0 %vm293_vm0, %v6584_v52  ;;  %v15037_v52 = vld [vmem:[#allocation46_spill] sm:$0xff] }
 0x314   : > { %10319 = vmatmul.mubr.msk.f32.gmra.mxu1 %vm293_vm0, %v15021_v13  ;;  %v13401_v13 = vld [vmem:[#allocation2 + $0x10a] sm:$0xff] }
 0x315   : > { %10321 = vmatprep.mubr.msk.f32.mxu1 %vm293_vm0, %v15022_v29  ;;  %15038 = vst [vmem:[#allocation65_spill] sm:$0xff] %v13401_v13  ;;  %v6597_v30 = vmul.f32 %v13401_v13, %v15002_v50  ;;  %v6953_v29 = vld [vmem:[#allocation2 + $0x20] sm:$0xff]  ;;  %v7374_v50 = vld [vmem:[#allocation2 + $0x31] sm:$0xff] }
 0x316   : > { %10372 = vmatmul.mubr.msk.f32.gmra.mxu0 %vm293_vm0, %v6585_v31  ;;  %v13407_v31 = vld [vmem:[#allocation2 + $0x101] sm:$0xff] }
 0x317   : > { %10374 = vmatprep.mubr.msk.f32.mxu0 %vm293_vm0, %v6586_v21  ;;  %v7372_v21 = vld [vmem:[#allocation2 + $0x21] sm:$0xff] }
 0x318   : > { %10322 = vmatmul.mubr.msk.f32.gmra.mxu1 %vm293_vm0, %v15023_v59  ;;  %v13415_v59 = vld [vmem:[#allocation2 + $0x109] sm:$0xff] }
 0x319   : > { %10324 = vmatprep.mubr.msk.f32.mxu1 %vm293_vm0, %v15024_v36 }
 0x31a   : > { %10375 = vmatmul.mubr.msk.f32.gmra.mxu0 %vm293_vm0, %v6587_v45  ;;  %v15040_v45 = vld [vmem:[#allocation7_spill] sm:$0xff] }
 0x31b   : > { %10377 = vmatprep.mubr.msk.f32.mxu0 %vm293_vm0, %v6588_v24  ;;  %v6985_v36 = vmul.f32 %v6953_v29, %v15040_v45  ;;  %v6954_v24 = vld [vmem:[#allocation2 + $0x28] sm:$0xff] }
 0x31c   : > { %10325 = vmatmul.mubr.msk.f32.gmra.mxu1 %vm293_vm0, %v15025_v9  ;;  %v6955_v9 = vld [vmem:[#allocation2 + $0x30] sm:$0xff] }
 0x31d   : > { %10327 = vmatprep.mubr.msk.f32.mxu1 %vm293_vm0, %v15026_v3 }
 0x31e   : > { %10378 = vmatmul.mubr.msk.f32.gmra.mxu0 %vm293_vm0, %v6589_v56  ;;  %v15041_v56 = vld [vmem:[#allocation9_spill] sm:$0xff] }
 0x31f   : > { %10380 = vmatprep.mubr.msk.f32.mxu0 %vm293_vm0, %v6590_v44  ;;  %v6986_v3 = vmul.f32 %v6954_v24, %v15041_v56  ;;  %v15042_v44 = vld [vmem:[#allocation6_spill] sm:$0xff]  ;;  %v7378_v24 = vld [vmem:[#allocation2 + $0x51] sm:$0xff] }
 0x320   : > { %10328 = vmatmul.mubr.msk.f32.gmra.mxu1 %vm293_vm0, %v15027_v23  ;;  %v6987_v23 = vmul.f32 %v6955_v9, %v15042_v44  ;;  %v15046_v9 = vld [vmem:[#allocation10_spill] sm:$0xff] }
 0x321   : > { %10330 = vmatprep.mubr.msk.f32.mxu1 %vm293_vm0, %v15028_v16  ;;  %v13426_v16 = vpop.f32.mrf.mxu0 }
 0x322   : > { %10381 = vmatmul.mubr.msk.f32.gmra.mxu0 %vm293_vm0, %v6591_v22  ;;  %v6956_v22 = vld [vmem:[#allocation2 + $0x38] sm:$0xff] }
 0x323   : > { %10383 = vmatprep.mubr.msk.f32.mxu0 %vm293_vm0, %v6592_v8  ;;  %v7375_v8 = vld [vmem:[#allocation2 + $0x39] sm:$0xff] }
 0x324   : > { %10331 = vmatmul.mubr.msk.f32.gmra.mxu1 %vm293_vm0, %v15031_v25  ;;  %v13431_v25 = vpop.f32.mrf.mxu1 }
 0x325   : > { %10333 = vmatprep.mubr.msk.f32.mxu1 %vm293_vm0, %v15033_v57  ;;  %v15043_v57 = vld [vmem:[#allocation8_spill] sm:$0xff] }
 0x326   : > { %10384 = vmatmul.mubr.msk.f32.gmra.mxu0 %vm293_vm0, %v6593_v37  ;;  %v7376_v37 = vld [vmem:[#allocation2 + $0x41] sm:$0xff] }
 0x327   : > { %10386 = vmatprep.mubr.msk.f32.mxu0 %vm293_vm0, %v6594_v38  ;;  %v6988_v38 = vmul.f32 %v6956_v22, %v15043_v57 }
 0x328   : > { %10334 = vmatmul.mubr.msk.f32.gmra.mxu1 %vm293_vm0, %v15036_v34  ;;  %v15044_v34 = vld [vmem:[#allocation11_spill] sm:$0xff] }
 0x329   : > { %10336 = vmatprep.mubr.msk.f32.mxu1 %vm293_vm0, %v15037_v52  ;;  %v6958_v52 = vld [vmem:[#allocation2 + $0x48] sm:$0xff] }
 0x32a   : > { %10387 = vmatmul.mubr.msk.f32.gmra.mxu0 %vm293_vm0, %v6595_v47  ;;  %v6989_v47 = vmul.f32 %v6957_v35, %v15044_v34 }
 0x32b   : > { %10389 = vmatprep.mubr.msk.f32.mxu0 %vm293_vm0, %v6596_v43 }
 0x32c   : > { %10337 = vmatmul.mubr.msk.f32.gmra.mxu1 %vm293_vm0, %v15039_v61 }
 0x32d   : > { %10339 = vmatprep.mubr.msk.f32.mxu1 %vm293_vm0, %v13407_v31 }
 0x32e   : > { %10390 = vmatmul.mubr.msk.f32.gmra.mxu0 %vm293_vm0, %v6597_v30  ;;  %v15045_v30 = vld [vmem:[#allocation124_spill] sm:$0xff] }
 0x32f   : > { %10444 = vmatprep.mubr.msk.f32.mxu0 %vm293_vm0, %v7372_v21  ;;  %v7377_v21 = vld [vmem:[#allocation2 + $0x49] sm:$0xff] }
 0x330   : > { %10340 = vmatmul.mubr.msk.f32.gmra.mxu1 %vm293_vm0, %v13415_v59 }
 0x331   : > { %10394 = vmatprep.mubr.msk.f32.mxu1 %vm293_vm0, %v6985_v36 }
 0x332   : > { %10445 = vmatmul.mubr.msk.f32.vlgmr.msra.gmra.mxu0 %vm293_vm0, %v13269_v49  ;;  %v10149_v49 = vpop.f32.mrf.mxu0 }
 0x333   : > { %10447 = vmatprep.mubr.msk.f32.mxu0 %vm293_vm0, %v7374_v50  ;;  %v10099_v43 = vpop.f32.mrf.mxu1  ;;  %v6990_v50 = vmul.f32 %v6958_v52, %v15046_v9 }
 0x334   : > { %10395 = vmatmul.mubr.msk.f32.vlgmr.msra.gmra.mxu1 %vm293_vm0, %v6986_v3  ;;  %v5128_v61 = vpop.f32.mrf.mxu0  ;;  %v4893_v29 = vadd.f32 %v10099_v43, %v15045_v30  ;;  %v15047_v3 = vld [vmem:[#allocation13_spill] sm:$0xff] }
 0x335   : > { %10493 = vmatpush3.msra.mxu1 %v13257_v54  ;;  %10397 = vmatprep.mubr.msk.f32.mxu1 %vm293_vm0, %v6987_v23  ;;  %v6959_v54 = vld [vmem:[#allocation2 + $0x50] sm:$0xff]  ;;  %v4741_v45 = vpop.f32.mrf.mxu1  ;;  %v6960_v23 = vld [vmem:[#allocation2 + $0x58] sm:$0xff]  ;;  %v7380_v43 = vld [vmem:[#allocation2 + $0x61] sm:$0xff] }
 0x336   : > { %10448 = vmatmul.mubr.msk.f32.gmra.mxu0 %vm293_vm0, %v7375_v8  ;;  %v10152_v36 = vpop.f32.mrf.mxu0  ;;  %v4892_v56 = vadd.f32 %v15045_v30, %v4741_v45  ;;  %v6991_v44 = vmul.f32 %v6959_v54, %v15047_v3  ;;  %v13445_v22 = vadd.f32 %v10149_v49, %v4893_v29  ;;  %v15048_v54 = vld [vmem:[#allocation12_spill] sm:$0xff] }
 0x337   : > { %10450 = vmatprep.mubr.msk.f32.mxu0 %vm293_vm0, %v7376_v37  ;;  %v10102_v35 = vpop.f32.mrf.mxu1  ;;  %v6961_v37 = vld [vmem:[#allocation2 + $0x60] sm:$0xff]  ;;  %v6992_v49 = vmul.f32 %v6960_v23, %v15048_v54 }
 0x338   : > { %10398 = vmatmul.mubr.msk.f32.gmra.mxu1 %vm293_vm0, %v6988_v38  ;;  %v5138_v8 = vpop.f32.mrf.mxu0  ;;  %v4895_v57 = vadd.f32 %v10102_v35, %v15045_v30  ;;  %v7379_v38 = vld [vmem:[#allocation2 + $0x59] sm:$0xff]  ;;  %v13450_v34 = vadd.f32 %v5128_v61, %v4892_v56  ;;  %v6963_v61 = vld [vmem:[#allocation2 + $0x70] sm:$0xff] }
 0x339   : > { %10400 = vmatprep.mubr.msk.f32.mxu1 %vm293_vm0, %v6989_v47  ;;  %v4751_v47 = vpop.f32.mrf.mxu1 }
 0x33a   : > { %10451 = vmatmul.mubr.msk.f32.gmra.mxu0 %vm293_vm0, %v7377_v21  ;;  %v10155_v52 = vpop.f32.mrf.mxu0  ;;  %v4894_v29 = vadd.f32 %v15045_v30, %v4751_v47  ;;  %v15049_v21 = vld [vmem:[#allocation15_spill] sm:$0xff]  ;;  %v13457_v9 = vadd.f32 %v10152_v36, %v4895_v57  ;;  %v15050_v47 = vld [vmem:[#allocation14_spill] sm:$0xff] }
 0x33b   : > { %10453 = vmatprep.mubr.msk.f32.mxu0 %vm293_vm0, %v7378_v24  ;;  %v6993_v45 = vmul.f32 %v6961_v37, %v15049_v21  ;;  %v6962_v24 = vld [vmem:[#allocation2 + $0x68] sm:$0xff]  ;;  %v7382_v37 = vld [vmem:[#allocation2 + $0x71] sm:$0xff] }
 0x33c   : > { %10401 = vmatmul.mubr.msk.f32.gmra.mxu1 %vm293_vm0, %v6990_v50  ;;  %v10105_v50 = vpop.f32.mrf.mxu1  ;;  %v5148_v3 = vpop.f32.mrf.mxu0  ;;  %v13462_v23 = vadd.f32 %v5138_v8, %v4894_v29  ;;  %v6994_v36 = vmul.f32 %v6962_v24, %v15050_v47  ;;  %v6965_v8 = vld [vmem:[#allocation2 + $0x80] sm:$0xff] }
 0x33d   : > { %10403 = vmatprep.mubr.msk.f32.mxu1 %vm293_vm0, %v6991_v44  ;;  %v4897_v56 = vadd.f32 %v10105_v50, %v15045_v30  ;;  %v7381_v44 = vld [vmem:[#allocation2 + $0x69] sm:$0xff] }
 0x33e   : > { %10454 = vmatmul.mubr.msk.f32.gmra.mxu0 %vm293_vm0, %v7379_v38  ;;  %v4761_v35 = vpop.f32.mrf.mxu1  ;;  %v10158_v38 = vpop.f32.mrf.mxu0 }
 0x33f   : > { %10456 = vmatprep.mubr.msk.f32.mxu0 %vm293_vm0, %v7380_v43  ;;  %v4896_v57 = vadd.f32 %v15045_v30, %v4761_v35  ;;  %v15051_v43 = vld [vmem:[#allocation17_spill] sm:$0xff]  ;;  %v13469_v21 = vadd.f32 %v10155_v52, %v4897_v56 }
 0x340   : > { %10404 = vmatmul.mubr.msk.f32.gmra.mxu1 %vm293_vm0, %v6992_v49  ;;  %v6995_v54 = vmul.f32 %v6963_v61, %v15051_v43  ;;  %v6964_v49 = vld [vmem:[#allocation2 + $0x78] sm:$0xff]  ;;  %v5158_v50 = vpop.f32.mrf.mxu0  ;;  %v7384_v61 = vld [vmem:[#allocation2 + $0x81] sm:$0xff] }
 0x341   : > { %10406 = vmatprep.mubr.msk.f32.mxu1 %vm293_vm0, %v6993_v45  ;;  %v10108_v45 = vpop.f32.mrf.mxu1  ;;  %v13474_v24 = vadd.f32 %v5148_v3, %v4896_v57  ;;  %v6967_v3 = vld [vmem:[#allocation2 + $0x90] sm:$0xff] }
 0x342   : > { %10457 = vmatmul.mubr.msk.f32.gmra.mxu0 %vm293_vm0, %v7381_v44  ;;  %v4899_v29 = vadd.f32 %v10108_v45, %v15045_v30  ;;  %v7383_v44 = vld [vmem:[#allocation2 + $0x79] sm:$0xff]  ;;  %v10161_v47 = vpop.f32.mrf.mxu0 }
 0x343   : > { %10459 = vmatprep.mubr.msk.f32.mxu0 %vm293_vm0, %v7382_v37  ;;  %v4771_v35 = vpop.f32.mrf.mxu1  ;;  %v15052_v37 = vld [vmem:[#allocation16_spill] sm:$0xff] }
 0x344   : > { %10407 = vmatmul.mubr.msk.f32.gmra.mxu1 %vm293_vm0, %v6994_v36  ;;  %v6996_v52 = vmul.f32 %v6964_v49, %v15052_v37  ;;  %v4898_v56 = vadd.f32 %v15045_v30, %v4771_v35  ;;  %v15053_v36 = vld [vmem:[#allocation19_spill] sm:$0xff]  ;;  %v13481_v45 = vadd.f32 %v10158_v38, %v4899_v29  ;;  %v5168_v13 = vpop.f32.mrf.mxu0 }
 0x345   : > { %10409 = vmatprep.mubr.msk.f32.mxu1 %vm293_vm0, %v6995_v54  ;;  %v6997_v43 = vmul.f32 %v6965_v8, %v15053_v36  ;;  %v10111_v54 = vpop.f32.mrf.mxu1  ;;  %v7386_v8 = vld [vmem:[#allocation2 + $0x91] sm:$0xff] }
 0x346   : > { %10460 = vmatmul.mubr.msk.f32.gmra.mxu0 %vm293_vm0, %v7383_v44  ;;  %v4901_v57 = vadd.f32 %v10111_v54, %v15045_v30  ;;  %v7385_v44 = vld [vmem:[#allocation2 + $0x89] sm:$0xff]  ;;  %v13486_v49 = vadd.f32 %v5158_v50, %v4898_v56  ;;  %v10164_v37 = vpop.f32.mrf.mxu0  ;;  %v6969_v50 = vld [vmem:[#allocation2 + $0xa0] sm:$0xff] }
 0x347   : > { %10462 = vmatprep.mubr.msk.f32.mxu0 %vm293_vm0, %v7384_v61  ;;  %v4781_v35 = vpop.f32.mrf.mxu1  ;;  %v15054_v61 = vld [vmem:[#allocation18_spill] sm:$0xff] }
 0x348   : > { %10410 = vmatmul.mubr.msk.f32.gmra.mxu1 %vm293_vm0, %v6996_v52  ;;  %v6998_v38 = vmul.f32 %v6966_v12, %v15054_v61  ;;  %v4900_v29 = vadd.f32 %v15045_v30, %v4781_v35  ;;  %v15055_v52 = vld [vmem:[#allocation21_spill] sm:$0xff]  ;;  %v13493_v54 = vadd.f32 %v10161_v47, %v4901_v57  ;;  %v5178_v0 = vpop.f32.mrf.mxu0 }
 0x349   : > { %10412 = vmatprep.mubr.msk.f32.mxu1 %vm293_vm0, %v6997_v43  ;;  %v6999_v36 = vmul.f32 %v6967_v3, %v15055_v52  ;;  %v10114_v43 = vpop.f32.mrf.mxu1  ;;  %v7388_v3 = vld [vmem:[#allocation2 + $0xa1] sm:$0xff] }
 0x34a   : > { %10463 = vmatmul.mubr.msk.f32.gmra.mxu0 %vm293_vm0, %v7385_v44  ;;  %v4903_v56 = vadd.f32 %v10114_v43, %v15045_v30  ;;  %v7387_v44 = vld [vmem:[#allocation2 + $0x99] sm:$0xff]  ;;  %v13498_v12 = vadd.f32 %v5168_v13, %v4900_v29  ;;  %v6971_v13 = vld [vmem:[#allocation2 + $0xb0] sm:$0xff] }
 0x34b   : > { %10465 = vmatprep.mubr.msk.f32.mxu0 %vm293_vm0, %v7386_v8  ;;  %v4791_v35 = vpop.f32.mrf.mxu1  ;;  %v10167_v61 = vpop.f32.mrf.mxu0  ;;  %v15056_v8 = vld [vmem:[#allocation20_spill] sm:$0xff] }
 0x34c   : > { %10413 = vmatmul.mubr.msk.f32.gmra.mxu1 %vm293_vm0, %v6998_v38  ;;  %v7000_v47 = vmul.f32 %v6968_v20, %v15056_v8  ;;  %v4902_v57 = vadd.f32 %v15045_v30, %v4791_v35  ;;  %v15057_v38 = vld [vmem:[#allocation23_spill] sm:$0xff]  ;;  %v13505_v43 = vadd.f32 %v10164_v37, %v4903_v56 }
 0x34d   : > { %10415 = vmatprep.mubr.msk.f32.mxu1 %vm293_vm0, %v6999_v36  ;;  %v7001_v52 = vmul.f32 %v6969_v50, %v15057_v38  ;;  %v10117_v36 = vpop.f32.mrf.mxu1  ;;  %v5188_v28 = vpop.f32.mrf.mxu0  ;;  %v7390_v50 = vld [vmem:[#allocation2 + $0xb1] sm:$0xff] }
 0x34e   : > { %10466 = vmatmul.mubr.msk.f32.gmra.mxu0 %vm293_vm0, %v7387_v44  ;;  %v4905_v29 = vadd.f32 %v10117_v36, %v15045_v30  ;;  %v7389_v44 = vld [vmem:[#allocation2 + $0xa9] sm:$0xff]  ;;  %v13510_v20 = vadd.f32 %v5178_v0, %v4902_v57  ;;  %v6973_v0 = vld [vmem:[#allocation2 + $0xc0] sm:$0xff] }
 0x34f   : > { %10468 = vmatprep.mubr.msk.f32.mxu0 %vm293_vm0, %v7388_v3  ;;  %v4801_v35 = vpop.f32.mrf.mxu1  ;;  %v10170_v8 = vpop.f32.mrf.mxu0  ;;  %v15058_v3 = vld [vmem:[#allocation22_spill] sm:$0xff] }
 0x350   : > { %10416 = vmatmul.mubr.msk.f32.gmra.mxu1 %vm293_vm0, %v7000_v47  ;;  %v7002_v37 = vmul.f32 %v6970_v55, %v15058_v3  ;;  %v4904_v56 = vadd.f32 %v15045_v30, %v4801_v35  ;;  %v15059_v47 = vld [vmem:[#allocation25_spill] sm:$0xff]  ;;  %v13517_v36 = vadd.f32 %v10167_v61, %v4905_v29 }
 0x351   : > { %10418 = vmatprep.mubr.msk.f32.mxu1 %vm293_vm0, %v7001_v52  ;;  %v7003_v38 = vmul.f32 %v6971_v13, %v15059_v47  ;;  %v5198_v33 = vpop.f32.mrf.mxu0  ;;  %v7392_v13 = vld [vmem:[#allocation2 + $0xc1] sm:$0xff]  ;;  %v13529_v29 = vld [vmem:[%s14307_s4] ss:$0 sm:$0xff] }
 0x352   : > { %10469 = vmatmul.mubr.msk.f32.gmra.mxu0 %vm293_vm0, %v7389_v44  ;;  %v10120_v52 = vpop.f32.mrf.mxu1  ;;  %v7391_v44 = vld [vmem:[#allocation2 + $0xb9] sm:$0xff]  ;;  %v13522_v55 = vadd.f32 %v5188_v28, %v4904_v56  ;;  %v6974_v28 = vld [vmem:[#allocation2 + $0xc8] sm:$0xff] }
 0x353   : > { %10471 = vmatprep.mubr.msk.f32.mxu0 %vm293_vm0, %v7390_v50  ;;  %v4907_v57 = vadd.f32 %v10120_v52, %v15045_v30  ;;  %v15060_v50 = vld [vmem:[#allocation24_spill] sm:$0xff]  ;;  %v15061_v30 = vld [vmem:[#allocation27_spill] sm:$0xff] }
 0x354   : > { %10419 = vmatmul.mubr.msk.f32.gmra.mxu1 %vm293_vm0, %v7002_v37  ;;  %v4811_v35 = vpop.f32.mrf.mxu1  ;;  %v10173_v3 = vpop.f32.mrf.mxu0  ;;  %v7004_v61 = vmul.f32 %v6972_v19, %v15060_v50  ;;  %v7005_v47 = vmul.f32 %v6973_v0, %v15061_v30  ;;  %v7393_v50 = vld [vmem:[#allocation2 + $0xc9] sm:$0xff]  ;;  %v7394_v0 = vld [vmem:[#allocation2 + $0xd1] sm:$0xff] }
 0x355   : > { %10421 = vmatprep.mubr.msk.f32.mxu1 %vm293_vm0, %v7003_v38  ;;  %v4906_v37 = vadd.f32 %v13529_v29, %v4811_v35  ;;  %v13534_v56 = vadd.f32 %v10170_v8, %v4907_v57 }
 0x356   : > { %10472 = vmatmul.mubr.msk.f32.gmra.mxu0 %vm293_vm0, %v7391_v44  ;;  %v5208_v52 = vpop.f32.mrf.mxu0  ;;  %v6975_v44 = vld [vmem:[#allocation2 + $0xd0] sm:$0xff] }
 0x357   : > { %10474 = vmatprep.mubr.msk.f32.mxu0 %vm293_vm0, %v7392_v13  ;;  %v10123_v38 = vpop.f32.mrf.mxu1  ;;  %v13539_v27 = vadd.f32 %v5198_v33, %v4906_v37  ;;  %v15062_v13 = vld [vmem:[#allocation26_spill] sm:$0xff]  ;;  %v6977_v33 = vld [vmem:[#allocation2 + $0xe0] sm:$0xff] }
 0x358   : > { %10422 = vmatmul.mubr.msk.f32.gmra.mxu1 %vm293_vm0, %v7004_v61  ;;  %v4909_v19 = vadd.f32 %v13529_v29, %v10123_v38  ;;  %v10176_v39 = vpop.f32.mrf.mxu0  ;;  %v7006_v8 = vmul.f32 %v6974_v28, %v15062_v13  ;;  %v15063_v61 = vld [vmem:[#allocation29_spill] sm:$0xff] }
 0x359   : > { %10424 = vmatprep.mubr.msk.f32.mxu1 %vm293_vm0, %v7005_v47  ;;  %v4821_v35 = vpop.f32.mrf.mxu1  ;;  %v7007_v30 = vmul.f32 %v6975_v44, %v15063_v61  ;;  %v7396_v44 = vld [vmem:[#allocation2 + $0xe1] sm:$0xff] }
 0x35a   : > { %10475 = vmatmul.mubr.msk.f32.gmra.mxu0 %vm293_vm0, %v7393_v50  ;;  %v4908_v57 = vadd.f32 %v13529_v29, %v4821_v35  ;;  %v13546_v38 = vadd.f32 %v10173_v3, %v4909_v19  ;;  %v5218_v51 = vpop.f32.mrf.mxu0  ;;  %v7395_v50 = vld [vmem:[#allocation2 + $0xd9] sm:$0xff] }
 0x35b   : > { %10477 = vmatprep.mubr.msk.f32.mxu0 %vm293_vm0, %v7394_v0  ;;  %v10126_v47 = vpop.f32.mrf.mxu1  ;;  %v15066_v0 = vld [vmem:[#allocation28_spill] sm:$0xff] }
 0x35c   : > { %15064 = vst [vmem:[#allocation52_spill] sm:$0xff] %v13546_v38  ;;  %10425 = vmatmul.mubr.msk.f32.gmra.mxu1 %vm293_vm0, %v7006_v8  ;;  %v4911_v37 = vadd.f32 %v13529_v29, %v10126_v47  ;;  %v13551_v28 = vadd.f32 %v5208_v52, %v4908_v57  ;;  %v7008_v3 = vmul.f32 %v6976_v41, %v15066_v0  ;;  %v15067_v8 = vld [vmem:[#allocation31_spill] sm:$0xff]  ;;  %v6978_v38 = vld [vmem:[#allocation2 + $0xe8] sm:$0xff] }
 0x35d   : > { %10427 = vmatprep.mubr.msk.f32.mxu1 %vm293_vm0, %v7007_v30  ;;  %v4831_v35 = vpop.f32.mrf.mxu1  ;;  %v10179_v13 = vpop.f32.mrf.mxu0  ;;  %v7009_v61 = vmul.f32 %v6977_v33, %v15067_v8  ;;  %v6979_v52 = vld [vmem:[#allocation2 + $0xf0] sm:$0xff] }
 0x35e   : > { %15065 = vst [vmem:[#allocation82_spill] sm:$0xff] %v13551_v28  ;;  %10478 = vmatmul.mubr.msk.f32.gmra.mxu0 %vm293_vm0, %v7395_v50  ;;  %v4910_v19 = vadd.f32 %v13529_v29, %v4831_v35  ;;  %v13558_v47 = vadd.f32 %v10176_v39, %v4911_v37  ;;  %v7397_v50 = vld [vmem:[#allocation2 + $0xe9] sm:$0xff]  ;;  %v7398_v33 = vld [vmem:[#allocation2 + $0xf1] sm:$0xff] }
 0x35f   : > { %10480 = vmatprep.mubr.msk.f32.mxu0 %vm293_vm0, %v7396_v44  ;;  %v10129_v30 = vpop.f32.mrf.mxu1  ;;  %v5228_v17 = vpop.f32.mrf.mxu0  ;;  %v15069_v44 = vld [vmem:[#allocation30_spill] sm:$0xff] }
 0x360   : > { %15068 = vst [vmem:[#allocation69_spill] sm:$0xff] %v13558_v47  ;;  %10428 = vmatmul.mubr.msk.f32.gmra.mxu1 %vm293_vm0, %v7008_v3  ;;  %v4913_v57 = vadd.f32 %v13529_v29, %v10129_v30  ;;  %v13563_v41 = vadd.f32 %v5218_v51, %v4910_v19  ;;  %v7010_v39 = vmul.f32 %v6978_v38, %v15069_v44  ;;  %v15070_v3 = vld [vmem:[#allocation33_spill] sm:$0xff]  ;;  %v6980_v47 = vld [vmem:[#allocation2 + $0xf8] sm:$0xff] }
 0x361   : > { %10430 = vmatprep.mubr.msk.f32.mxu1 %vm293_vm0, %v7009_v61  ;;  %v4841_v35 = vpop.f32.mrf.mxu1  ;;  %v10182_v0 = vpop.f32.mrf.mxu0  ;;  %v7011_v8 = vmul.f32 %v6979_v52, %v15070_v3  ;;  %v7399_v19 = vld [vmem:[#allocation2 + $0xf9] sm:$0xff] }
 0x362   : > { %10481 = vmatmul.mubr.msk.f32.gmra.mxu0 %vm293_vm0, %v7397_v50  ;;  %v4912_v37 = vadd.f32 %v13529_v29, %v4841_v35  ;;  %v13570_v30 = vadd.f32 %v10179_v13, %v4913_v57  ;;  %v15072_v57 = vld [vmem:[#allocation35_spill] sm:$0xff] }
 0x363   : > { %10483 = vmatprep.mubr.msk.f32.mxu0 %vm293_vm0, %v7398_v33  ;;  %v5238_v28 = vpop.f32.mrf.mxu0  ;;  %v15071_v33 = vld [vmem:[#allocation32_spill] sm:$0xff]  ;;  %v7013_v44 = vmul.f32 %v13210_v18, %v15072_v57  ;;  %v15073_v18 = vld [vmem:[#allocation34_spill] sm:$0xff] }
 0x364   : > { %v10132_v61 = vpop.f32.mrf.mxu1  ;;  %10431 = vmatmul.mubr.msk.f32.gmra.mxu1 %vm293_vm0, %v7010_v39  ;;  %v13575_v50 = vadd.f32 %v5228_v17, %v4912_v37  ;;  %v7012_v52 = vmul.f32 %v6980_v47, %v15071_v33  ;;  %v6983_v17 = vld [vmem:[#allocation2 + $0x110] sm:$0xff] }
 0x365   : > { %v4915_v51 = vadd.f32 %v13529_v29, %v10132_v61  ;;  %10433 = vmatprep.mubr.msk.f32.mxu1 %vm293_vm0, %v7011_v8  ;;  %v10185_v35 = vpop.f32.mrf.mxu0  ;;  %v7402_v37 = vld [vmem:[#allocation2 + $0x111] sm:$0xff] }
 0x366   : > { %v4851_v38 = vpop.f32.mrf.mxu1  ;;  %10484 = vmatmul.mubr.msk.f32.gmra.mxu0 %vm293_vm0, %v7399_v19 }
 0x367   : > { %v4914_v13 = vadd.f32 %v13529_v29, %v4851_v38  ;;  %10486 = vmatprep.mubr.msk.f32.mxu0 %vm293_vm0, %v13407_v31  ;;  %v13584_v39 = vadd.f32 %v10182_v0, %v4915_v51  ;;  %v5248_v8 = vpop.f32.mrf.mxu0  ;;  %v7014_v31 = vmul.f32 %v13225_v26, %v15073_v18  ;;  %v15074_v51 = vld [vmem:[#allocation37_spill] sm:$0xff] }
 0x368   : > { %v10135_v3 = vpop.f32.mrf.mxu1  ;;  %10434 = vmatmul.mubr.msk.f32.gmra.mxu1 %vm293_vm0, %v7012_v52  ;;  %v7015_v33 = vmul.f32 %v6983_v17, %v15074_v51  ;;  %v7403_v52 = vld [vmem:[#allocation2 + $0x119] sm:$0xff] }
 0x369   : > { %v4917_v61 = vadd.f32 %v13529_v29, %v10135_v3  ;;  %10436 = vmatprep.mubr.msk.f32.mxu1 %vm293_vm0, %v7013_v44  ;;  %v13589_v47 = vadd.f32 %v5238_v28, %v4914_v13  ;;  %v10188_v38 = vpop.f32.mrf.mxu0  ;;  %v7759_v13 = vld [vmem:[#allocation2 + $0x22] sm:$0xff] }
 0x36a   : > { %v4861_v19 = vpop.f32.mrf.mxu1  ;;  %10487 = vmatmul.mubr.msk.f32.gmra.mxu0 %vm293_vm0, %v13415_v59  ;;  %v15076_v51 = vld [vmem:[#allocation129_spill] sm:$0xff] }
 0x36b   : > { %v4916_v0 = vadd.f32 %v13529_v29, %v4861_v19  ;;  %10489 = vmatprep.mubr.msk.f32.mxu0 %vm293_vm0, %v7402_v37  ;;  %v13598_v57 = vadd.f32 %v10185_v35, %v4917_v61  ;;  %v5258_v28 = vpop.f32.mrf.mxu0  ;;  %v7791_v35 = vmul.f32 %v7759_v13, %v14960_v48  ;;  %v7760_v37 = vld [vmem:[#allocation2 + $0x2a] sm:$0xff]  ;;  %v4890_v48 = vadd.f32 %v13529_v29, %v13431_v25 }
 0x36c   : > { %v10138_v44 = vpop.f32.mrf.mxu1  ;;  %10437 = vmatmul.mubr.msk.f32.gmra.mxu1 %vm293_vm0, %v7014_v31 }
 0x36d   : > { %v4919_v3 = vadd.f32 %v13529_v29, %v10138_v44  ;;  %10439 = vmatprep.mubr.msk.f32.mxu1 %vm293_vm0, %v7015_v33  ;;  %v13603_v59 = vadd.f32 %v5248_v8, %v4916_v0  ;;  %v10191_v19 = vpop.f32.mrf.mxu0  ;;  %v7761_v44 = vld [vmem:[#allocation2 + $0x32] sm:$0xff] }
 0x36e   : > { %v4871_v26 = vpop.f32.mrf.mxu1  ;;  %10490 = vmatmul.mubr.msk.f32.gmra.mxu0 %vm293_vm0, %v7403_v52  ;;  %v7793_v13 = vmul.f32 %v7761_v44, %v14963_v60  ;;  %v7764_v44 = vld [vmem:[#allocation2 + $0x4a] sm:$0xff] }
 0x36f   : > { %v4918_v17 = vadd.f32 %v13529_v29, %v4871_v26  ;;  %v13608_v61 = vadd.f32 %v10188_v38, %v4919_v3  ;;  %v5268_v31 = vpop.f32.mrf.mxu0  ;;  %v7792_v26 = vmul.f32 %v7760_v37, %v14962_v6  ;;  %v7762_v3 = vld [vmem:[#allocation2 + $0x3a] sm:$0xff] }
 0x370   : > { %v10141_v18 = vpop.f32.mrf.mxu1  ;;  %10440 = vmatmul.mubr.msk.f32.gmra.mxu1 %vm293_vm0, %v15076_v51  ;;  %v7794_v60 = vmul.f32 %v7762_v3, %v14964_v11  ;;  %v7796_v11 = vmul.f32 %v7764_v44, %v14966_v14 }
 0x371   : > { %15075 = vst [vmem:[#allocation73_spill] sm:$0xff] %v13608_v61  ;;  %v4921_v8 = vadd.f32 %v13529_v29, %v10141_v18  ;;  %10494 = vmatprep.mubr.msk.f32.mxu1 %vm293_vm0, %v7791_v35  ;;  %v13614_v0 = vadd.f32 %v5258_v28, %v4918_v17  ;;  %v10246_v52 = vpop.f32.mrf.mxu0  ;;  %v7763_v28 = vld [vmem:[#allocation2 + $0x42] sm:$0xff]  ;;  %v5277_v17 = vadd.f32 %v13426_v16, %v4890_v48  ;;  %v15078_v35 = vld [vmem:[#allocation131_spill] sm:$0xff] }
 0x372   : > { %v4881_v33 = vpop.f32.mrf.mxu1  ;;  %v7765_v16 = vld [vmem:[#allocation2 + $0x52] sm:$0xff] }
 0x373   : > { %15077 = vst [vmem:[#allocation149_spill] sm:$0xff] %v13614_v0  ;;  %v4920_v38 = vadd.f32 %v13529_v29, %v4881_v33  ;;  %v13621_v51 = vadd.f32 %v10191_v19, %v4921_v8  ;;  %v5956_v18 = vpop.f32.mrf.mxu0  ;;  %v7795_v19 = vmul.f32 %v7763_v28, %v14965_v4 }
 0x374   : > { %v10196_v61 = vpop.f32.mrf.mxu1  ;;  %10495 = vmatmul.mubr.msk.f32.vlgmr.msra.gmra.mxu1 %vm293_vm0, %v7792_v26 }
 0x375   : > { %v5697_v0 = vadd.f32 %v10196_v61, %v15078_v35  ;;  %10497 = vmatprep.mubr.msk.f32.mxu1 %vm293_vm0, %v7793_v13  ;;  %v13627_v6 = vadd.f32 %v5268_v31, %v4920_v38 }
 0x376   : > { %v5537_v25 = vpop.f32.mrf.mxu1  ;;  %v10249_v29 = vpop.f32.mrf.mxu0 }
 0x377   : > { %v5696_v37 = vadd.f32 %v5537_v25, %v5277_v17  ;;  %v13631_v8 = vadd.f32 %v10246_v52, %v5697_v0  ;;  %v7797_v0 = vmul.f32 %v7765_v16, %v14967_v15  ;;  %v7766_v52 = vld [vmem:[#allocation2 + $0x5a] sm:$0xff] }
 0x378   : > { %v10199_v33 = vpop.f32.mrf.mxu1  ;;  %v5966_v26 = vpop.f32.mrf.mxu0  ;;  %10498 = vmatmul.mubr.msk.f32.gmra.mxu1 %vm293_vm0, %v7794_v60 }
 0x379   : > { %v5699_v61 = vadd.f32 %v10199_v33, %v13445_v22  ;;  %10500 = vmatprep.mubr.msk.f32.mxu1 %vm293_vm0, %v7795_v19  ;;  %v13636_v31 = vadd.f32 %v5956_v18, %v5696_v37  ;;  %v7767_v22 = vld [vmem:[#allocation2 + $0x62] sm:$0xff] }
 0x37a   : > { %v5547_v48 = vpop.f32.mrf.mxu1  ;;  %v10252_v38 = vpop.f32.mrf.mxu0  ;;  %v7799_v25 = vmul.f32 %v7767_v22, %v14969_v2 }
 0x37b   : > { %v5698_v4 = vadd.f32 %v5547_v48, %v13450_v34  ;;  %v13641_v13 = vadd.f32 %v10249_v29, %v5699_v61  ;;  %v7798_v34 = vmul.f32 %v7766_v52, %v14968_v32  ;;  %v7768_v29 = vld [vmem:[#allocation2 + $0x6a] sm:$0xff]  ;;  %v7770_v61 = vld [vmem:[#allocation2 + $0x7a] sm:$0xff] }
 0x37c   : > { %v10202_v3 = vpop.f32.mrf.mxu1  ;;  %v5976_v28 = vpop.f32.mrf.mxu0  ;;  %10501 = vmatmul.mubr.msk.f32.gmra.mxu1 %vm293_vm0, %v7796_v11 }
 0x37d   : > { %v5701_v17 = vadd.f32 %v10202_v3, %v13457_v9  ;;  %10503 = vmatprep.mubr.msk.f32.mxu1 %vm293_vm0, %v7797_v0  ;;  %v13646_v18 = vadd.f32 %v5966_v26, %v5698_v4  ;;  %v7769_v9 = vld [vmem:[#allocation2 + $0x72] sm:$0xff] }
 0x37e   : > { %v5557_v35 = vpop.f32.mrf.mxu1  ;;  %v10255_v14 = vpop.f32.mrf.mxu0  ;;  %v7801_v16 = vmul.f32 %v7769_v9, %v15008_v58 }
 0x37f   : > { %v5700_v15 = vadd.f32 %v5557_v35, %v13462_v23  ;;  %v13651_v60 = vadd.f32 %v10252_v38, %v5701_v17  ;;  %v7800_v23 = vmul.f32 %v7768_v29, %v14970_v62  ;;  %v7774_v29 = vld [vmem:[#allocation2 + $0x9a] sm:$0xff] }
 0x380   : > { %v10205_v37 = vpop.f32.mrf.mxu1  ;;  %v5986_v19 = vpop.f32.mrf.mxu0  ;;  %10504 = vmatmul.mubr.msk.f32.gmra.mxu1 %vm293_vm0, %v7798_v34 }
 0x381   : > { %v5703_v44 = vadd.f32 %v10205_v37, %v13469_v21  ;;  %10506 = vmatprep.mubr.msk.f32.mxu1 %vm293_vm0, %v7799_v25  ;;  %v13656_v33 = vadd.f32 %v5976_v28, %v5700_v15  ;;  %v7771_v21 = vld [vmem:[#allocation2 + $0x82] sm:$0xff]  ;;  %v7772_v28 = vld [vmem:[#allocation2 + $0x8a] sm:$0xff] }
 0x382   : > { %v5567_v26 = vpop.f32.mrf.mxu1  ;;  %v10258_v32 = vpop.f32.mrf.mxu0  ;;  %v7803_v3 = vmul.f32 %v7771_v21, %v15012_v46 }
 0x383   : > { %v5702_v2 = vadd.f32 %v5567_v26, %v13474_v24  ;;  %v13661_v48 = vadd.f32 %v10255_v14, %v5703_v44  ;;  %v7802_v24 = vmul.f32 %v7770_v61, %v15010_v1 }
 0x384   : > { %v10208_v38 = vpop.f32.mrf.mxu1  ;;  %v5996_v11 = vpop.f32.mrf.mxu0  ;;  %10507 = vmatmul.mubr.msk.f32.gmra.mxu1 %vm293_vm0, %v7800_v23 }
 0x385   : > { %v5705_v4 = vadd.f32 %v10208_v38, %v13481_v45  ;;  %10509 = vmatprep.mubr.msk.f32.mxu1 %vm293_vm0, %v7801_v16  ;;  %v13666_v0 = vadd.f32 %v5986_v19, %v5702_v2  ;;  %v7773_v45 = vld [vmem:[#allocation2 + $0x92] sm:$0xff]  ;;  %v7776_v2 = vld [vmem:[#allocation2 + $0xaa] sm:$0xff] }
 0x386   : > { %v5577_v52 = vpop.f32.mrf.mxu1  ;;  %v10261_v62 = vpop.f32.mrf.mxu0  ;;  %v7805_v25 = vmul.f32 %v7773_v45, %v15016_v5  ;;  %v15079_v45 = vld [vmem:[#allocation71_spill] sm:$0xff] }
 0x387   : > { %v5704_v58 = vadd.f32 %v5577_v52, %v13486_v49  ;;  %v13671_v22 = vadd.f32 %v10258_v32, %v5705_v4  ;;  %v7804_v49 = vmul.f32 %v7772_v28, %v15014_v63 }
 0x388   : > { %v10211_v17 = vpop.f32.mrf.mxu1  ;;  %v6006_v35 = vpop.f32.mrf.mxu0  ;;  %10510 = vmatmul.mubr.msk.f32.gmra.mxu1 %vm293_vm0, %v7802_v24 }
 0x389   : > { %v5707_v14 = vadd.f32 %v10211_v17, %v13493_v54  ;;  %10512 = vmatprep.mubr.msk.f32.mxu1 %vm293_vm0, %v7803_v3  ;;  %v13676_v34 = vadd.f32 %v5996_v11, %v5704_v58  ;;  %v7775_v54 = vld [vmem:[#allocation2 + $0xa2] sm:$0xff] }
 0x38a   : > { %v5587_v15 = vpop.f32.mrf.mxu1  ;;  %v10264_v1 = vpop.f32.mrf.mxu0  ;;  %v7807_v23 = vmul.f32 %v7775_v54, %v14983_v40  ;;  %v15081_v54 = vld [vmem:[#allocation72_spill] sm:$0xff] }
 0x38b   : > { %v5706_v46 = vadd.f32 %v5587_v15, %v13498_v12  ;;  %v13681_v37 = vadd.f32 %v10261_v62, %v5707_v14  ;;  %v7806_v12 = vmul.f32 %v7774_v29, %v14982_v53  ;;  %v7778_v62 = vld [vmem:[#allocation2 + $0xba] sm:$0xff]  ;;  %v7780_v15 = vld [vmem:[#allocation2 + $0xca] sm:$0xff] }
 0x38c   : > { %v10214_v19 = vpop.f32.mrf.mxu1  ;;  %v6016_v9 = vpop.f32.mrf.mxu0  ;;  %10513 = vmatmul.mubr.msk.f32.gmra.mxu1 %vm293_vm0, %v7804_v49 }
 0x38d   : > { %v5709_v44 = vadd.f32 %v10214_v19, %v13505_v43  ;;  %10515 = vmatprep.mubr.msk.f32.mxu1 %vm293_vm0, %v7805_v25  ;;  %v13686_v26 = vadd.f32 %v6006_v35, %v5706_v46  ;;  %v7777_v43 = vld [vmem:[#allocation2 + $0xb2] sm:$0xff] }
 0x38e   : > { %v5597_v32 = vpop.f32.mrf.mxu1  ;;  %v10267_v63 = vpop.f32.mrf.mxu0  ;;  %v7809_v52 = vmul.f32 %v7777_v43, %v14985_v7  ;;  %v15080_v25 = vld [vmem:[#allocation52_spill] sm:$0xff]  ;;  %v15084_v43 = vld [vmem:[#allocation69_spill] sm:$0xff] }
 0x38f   : > { %v5708_v5 = vadd.f32 %v5597_v32, %v13510_v20  ;;  %v13691_v16 = vadd.f32 %v10264_v1, %v5709_v44  ;;  %v7808_v20 = vmul.f32 %v7776_v2, %v14984_v10  ;;  %v15082_v44 = vld [vmem:[#allocation82_spill] sm:$0xff] }
 0x390   : > { %v10217_v61 = vpop.f32.mrf.mxu1  ;;  %v6026_v38 = vpop.f32.mrf.mxu0  ;;  %10516 = vmatmul.mubr.msk.f32.gmra.mxu1 %vm293_vm0, %v7806_v12 }
 0x391   : > { %v5711_v11 = vadd.f32 %v10217_v61, %v13517_v36  ;;  %10518 = vmatprep.mubr.msk.f32.mxu1 %vm293_vm0, %v7807_v23  ;;  %v13696_v21 = vadd.f32 %v6016_v9, %v5708_v5  ;;  %v7779_v36 = vld [vmem:[#allocation2 + $0xc2] sm:$0xff]  ;;  %v7782_v5 = vld [vmem:[#allocation2 + $0xda] sm:$0xff] }
 0x392   : > { %v5607_v4 = vpop.f32.mrf.mxu1  ;;  %v10270_v53 = vpop.f32.mrf.mxu0  ;;  %v7811_v14 = vmul.f32 %v7779_v36, %v15079_v45  ;;  %v7784_v36 = vld [vmem:[#allocation2 + $0xea] sm:$0xff] }
 0x393   : > { %v5710_v40 = vadd.f32 %v5607_v4, %v13522_v55  ;;  %v13701_v24 = vadd.f32 %v10267_v63, %v5711_v11  ;;  %v7810_v55 = vmul.f32 %v7778_v62, %v14986_v42  ;;  %v15083_v63 = vld [vmem:[#allocation75_spill] sm:$0xff] }
 0x394   : > { %v10220_v58 = vpop.f32.mrf.mxu1  ;;  %v6036_v3 = vpop.f32.mrf.mxu0  ;;  %10519 = vmatmul.mubr.msk.f32.gmra.mxu1 %vm293_vm0, %v7808_v20 }
 0x395   : > { %v5713_v28 = vadd.f32 %v10220_v58, %v13534_v56  ;;  %10521 = vmatprep.mubr.msk.f32.mxu1 %vm293_vm0, %v7809_v52  ;;  %v13706_v17 = vadd.f32 %v6026_v38, %v5710_v40  ;;  %v7781_v56 = vld [vmem:[#allocation2 + $0xd2] sm:$0xff]  ;;  %v7783_v38 = vld [vmem:[#allocation2 + $0xe2] sm:$0xff] }
 0x396   : > { %v5617_v35 = vpop.f32.mrf.mxu1  ;;  %v10273_v10 = vpop.f32.mrf.mxu0  ;;  %v7813_v12 = vmul.f32 %v7781_v56, %v15083_v63  ;;  %v15085_v40 = vld [vmem:[#allocation76_spill] sm:$0xff]  ;;  %v15086_v58 = vld [vmem:[#allocation79_spill] sm:$0xff] }
 0x397   : > { %v5712_v7 = vadd.f32 %v5617_v35, %v13539_v27  ;;  %v13711_v1 = vadd.f32 %v10270_v53, %v5713_v28  ;;  %v7812_v27 = vmul.f32 %v7780_v15, %v15081_v54  ;;  %v7814_v52 = vmul.f32 %v7782_v5, %v15085_v40  ;;  %v15088_v56 = vld [vmem:[#allocation83_spill] sm:$0xff]  ;;  %v15089_v63 = vld [vmem:[#allocation84_spill] sm:$0xff] }
 0x398   : > { %v10223_v49 = vpop.f32.mrf.mxu1  ;;  %v6046_v46 = vpop.f32.mrf.mxu0  ;;  %10522 = vmatmul.mubr.msk.f32.gmra.mxu1 %vm293_vm0, %v7810_v55  ;;  %v7785_v55 = vld [vmem:[#allocation2 + $0xf2] sm:$0xff] }
 0x399   : > { %v5715_v29 = vadd.f32 %v10223_v49, %v15080_v25  ;;  %10524 = vmatprep.mubr.msk.f32.mxu1 %vm293_vm0, %v7811_v14  ;;  %v13716_v19 = vadd.f32 %v6036_v3, %v5712_v7  ;;  %v7815_v3 = vmul.f32 %v7783_v38, %v15086_v58  ;;  %v15087_v49 = vld [vmem:[#allocation80_spill] sm:$0xff]  ;;  %v7817_v25 = vmul.f32 %v7785_v55, %v15088_v56  ;;  %v15090_v5 = vld [vmem:[#allocation87_spill] sm:$0xff] }
 0x39a   : > { %v5627_v9 = vpop.f32.mrf.mxu1  ;;  %v10276_v42 = vpop.f32.mrf.mxu0 }
 0x39b   : > { %v5714_v32 = vadd.f32 %v5627_v9, %v15082_v44  ;;  %v13721_v23 = vadd.f32 %v10273_v10, %v5715_v29  ;;  %v7786_v29 = vld [vmem:[#allocation2 + $0xfa] sm:$0xff] }
 0x39c   : > { %v10226_v2 = vpop.f32.mrf.mxu1  ;;  %v6056_v61 = vpop.f32.mrf.mxu0  ;;  %10525 = vmatmul.mubr.msk.f32.gmra.mxu1 %vm293_vm0, %v7812_v27 }
 0x39d   : > { %v5717_v11 = vadd.f32 %v10226_v2, %v15084_v43  ;;  %10527 = vmatprep.mubr.msk.f32.mxu1 %vm293_vm0, %v7813_v12  ;;  %v13726_v4 = vadd.f32 %v6046_v46, %v5714_v32  ;;  %v7818_v12 = vmul.f32 %v7786_v29, %v15089_v63  ;;  %v15091_v2 = vld [vmem:[#allocation78_spill] sm:$0xff] }
 0x39e   : > { %v5637_v53 = vpop.f32.mrf.mxu1  ;;  %v10279_v20 = vpop.f32.mrf.mxu0 }
 0x39f   : > { %v5716_v62 = vadd.f32 %v5637_v53, %v13563_v41  ;;  %v13731_v28 = vadd.f32 %v10276_v42, %v5717_v11  ;;  %v7816_v41 = vmul.f32 %v7784_v36, %v15087_v49  ;;  %v15094_v36 = vld [vmem:[#allocation90_spill] sm:$0xff] }
 0x3a0   : > { %v10229_v35 = vpop.f32.mrf.mxu1  ;;  %v6066_v10 = vpop.f32.mrf.mxu0  ;;  %10528 = vmatmul.mubr.msk.f32.gmra.mxu1 %vm293_vm0, %v7814_v52 }
 0x3a1   : > { %v5719_v7 = vadd.f32 %v10229_v35, %v13570_v30  ;;  %10530 = vmatprep.mubr.msk.f32.mxu1 %vm293_vm0, %v7815_v3  ;;  %v13736_v45 = vadd.f32 %v6056_v61, %v5716_v62  ;;  %v7819_v61 = vmul.f32 %v15091_v2, %v15090_v5  ;;  %v15092_v62 = vld [vmem:[#allocation88_spill] sm:$0xff] }
 0x3a2   : > { %v5647_v14 = vpop.f32.mrf.mxu1  ;;  %v10282_v15 = vpop.f32.mrf.mxu0 }
 0x3a3   : > { %v5718_v46 = vadd.f32 %v5647_v14, %v13575_v50  ;;  %v13741_v9 = vadd.f32 %v10279_v20, %v5719_v7 }
 0x3a4   : > { %v10232_v42 = vpop.f32.mrf.mxu1  ;;  %v6076_v54 = vpop.f32.mrf.mxu0  ;;  %10531 = vmatmul.mubr.msk.f32.gmra.mxu1 %vm293_vm0, %v7816_v41 }
 0x3a5   : > { %v5721_v30 = vadd.f32 %v10232_v42, %v13584_v39  ;;  %10533 = vmatprep.mubr.msk.f32.mxu1 %vm293_vm0, %v7817_v25  ;;  %v13746_v27 = vadd.f32 %v6066_v10, %v5718_v46  ;;  %v7789_v39 = vld [vmem:[#allocation2 + $0x112] sm:$0xff]  ;;  %v15096_v46 = vld [vmem:[#allocation149_spill] sm:$0xff] }
 0x3a6   : > { %v5657_v44 = vpop.f32.mrf.mxu1  ;;  %v10285_v32 = vpop.f32.mrf.mxu0  ;;  %v7821_v35 = vmul.f32 %v7789_v39, %v15094_v36  ;;  %v15097_v42 = vld [vmem:[#allocation85_spill] sm:$0xff] }
 0x3a7   : > { %v5720_v50 = vadd.f32 %v5657_v44, %v13589_v47  ;;  %v13752_v38 = vadd.f32 %v10282_v15, %v5721_v30  ;;  %v15093_v47 = vld [vmem:[#allocation65_spill] sm:$0xff] }
 0x3a8   : > { %v10235_v43 = vpop.f32.mrf.mxu1  ;;  %v6086_v11 = vpop.f32.mrf.mxu0  ;;  %10534 = vmatmul.mubr.msk.f32.gmra.mxu1 %vm293_vm0, %v7818_v12  ;;  %v7820_v58 = vmul.f32 %v15093_v47, %v15092_v62 }
 0x3a9   : > { %v5723_v53 = vadd.f32 %v10235_v43, %v13598_v57  ;;  %10536 = vmatprep.mubr.msk.f32.mxu1 %vm293_vm0, %v7819_v61  ;;  %v13757_v20 = vadd.f32 %v6076_v54, %v5720_v50  ;;  %v15095_v57 = vld [vmem:[#allocation73_spill] sm:$0xff] }
 0x3aa   : > { %v5667_v40 = vpop.f32.mrf.mxu1  ;;  %v10288_v52 = vpop.f32.mrf.mxu0 }
 0x3ab   : > { %v5722_v3 = vadd.f32 %v5667_v40, %v13603_v59  ;;  %v13763_v10 = vadd.f32 %v10285_v32, %v5723_v53 }
 0x3ac   : > { %v10238_v55 = vpop.f32.mrf.mxu1  ;;  %v6096_v7 = vpop.f32.mrf.mxu0  ;;  %10537 = vmatmul.mubr.msk.f32.gmra.mxu1 %vm293_vm0, %v7820_v58 }
 0x3ad   : > { %v5725_v14 = vadd.f32 %v10238_v55, %v15095_v57  ;;  %10539 = vmatprep.mubr.msk.f32.mxu1 %vm293_vm0, %v7821_v35  ;;  %v13768_v15 = vadd.f32 %v6086_v11, %v5722_v3 }
 0x3ae   : > { %v5677_v49 = vpop.f32.mrf.mxu1  ;;  %v10291_v41 = vpop.f32.mrf.mxu0 }
 0x3af   : > { %v5724_v56 = vadd.f32 %v5677_v49, %v15096_v46  ;;  %v13771_v25 = vadd.f32 %v10288_v52, %v5725_v14 }
 0x3b0   : > { %v10241_v59 = vpop.f32.mrf.mxu1  ;;  %v6106_v29 = vpop.f32.mrf.mxu0  ;;  %10540 = vmatmul.mubr.msk.f32.gmra.mxu1 %vm293_vm0, %v15097_v42 }
 0x3b1   : > { %v5727_v54 = vadd.f32 %v10241_v59, %v13621_v51  ;;  %v13776_v30 = vadd.f32 %v6096_v7, %v5724_v56 }
 0x3b2   : > { %v5687_v44 = vpop.f32.mrf.mxu1  ;;  %v13778_v32 = vpop.f32.mrf.mxu0 }
 0x3b3   : > { %v5726_v63 = vadd.f32 %v5687_v44, %v13627_v6  ;;  %v13781_v12 = vadd.f32 %v10291_v41, %v5727_v54 }
 0x3b4   : > { %v10296_v50 = vpop.f32.mrf.mxu1  ;;  %v13783_v5 = vpop.f32.mrf.mxu0 }
 0x3b5   : > { %v13786_v2 = vadd.f32 %v10296_v50, %v13631_v8  ;;  %v13788_v61 = vadd.f32 %v6106_v29, %v5726_v63 }
 0x3b6   : > { %v6343_v43 = vpop.f32.mrf.mxu1  ;;  %v13790_v11 = vpop.f32.mrf.mxu0 }
 0x3b7   : > { %v13793_v51 = vadd.f32 %v6343_v43, %v13636_v31 }
 0x3b8   : > { %v10299_v39 = vpop.f32.mrf.mxu1  ;;  %v13795_v53 = vpop.f32.mrf.mxu0 }
 0x3b9   : > { %v13798_v6 = vadd.f32 %v10299_v39, %v13641_v13 }
 0x3ba   : > { %v6353_v40 = vpop.f32.mrf.mxu1  ;;  %v13800_v52 = vpop.f32.mrf.mxu0 }
 0x3bb   : > { %v13803_v8 = vadd.f32 %v6353_v40, %v13646_v18 }
 0x3bc   : > { %v10302_v62 = vpop.f32.mrf.mxu1  ;;  %v13805_v47 = vpop.f32.mrf.mxu0 }
 0x3bd   : > { %v13808_v58 = vadd.f32 %v10302_v62, %v13651_v60 }
 0x3be   : > { %v6363_v31 = vpop.f32.mrf.mxu1  ;;  %v13810_v3 = vpop.f32.mrf.mxu0 }
 0x3bf   : > { %v13813_v36 = vadd.f32 %v6363_v31, %v13656_v33 }
 0x3c0   : > { %v10305_v13 = vpop.f32.mrf.mxu1  ;;  %v13815_v35 = vpop.f32.mrf.mxu0 }
 0x3c1   : > { %v13818_v55 = vadd.f32 %v10305_v13, %v13661_v48 }
 0x3c2   : > { %v6373_v18 = vpop.f32.mrf.mxu1  ;;  %v13820_v7 = vpop.f32.mrf.mxu0 }
 0x3c3   : > { %v13823_v57 = vadd.f32 %v6373_v18, %v13666_v0 }
 0x3c4   : > { %v10308_v60 = vpop.f32.mrf.mxu1  ;;  %v13825_v14 = vpop.f32.mrf.mxu0 }
 0x3c5   : > { %v13828_v49 = vadd.f32 %v10308_v60, %v13671_v22 }
 0x3c6   : > { %v6383_v33 = vpop.f32.mrf.mxu1  ;;  %v13830_v41 = vpop.f32.mrf.mxu0 }
 0x3c7   : > { %v13833_v46 = vadd.f32 %v6383_v33, %v13676_v34 }
 0x3c8   : > { %v10311_v48 = vpop.f32.mrf.mxu1  ;;  %v13835_v56 = vpop.f32.mrf.mxu0 }
 0x3c9   : > { %v13838_v59 = vadd.f32 %v10311_v48, %v13681_v37 }
 0x3ca   : > { %v6393_v0 = vpop.f32.mrf.mxu1  ;;  %v13840_v29 = vpop.f32.mrf.mxu0 }
 0x3cb   : > { %v13843_v42 = vadd.f32 %v6393_v0, %v13686_v26 }
 0x3cc   : > { %v10314_v22 = vpop.f32.mrf.mxu1  ;;  %v13845_v54 = vpop.f32.mrf.mxu0 }
 0x3cd   : > { %v13848_v44 = vadd.f32 %v10314_v22, %v13691_v16 }
 0x3ce   : > { %v6403_v34 = vpop.f32.mrf.mxu1  ;;  %v13850_v63 = vpop.f32.mrf.mxu0 }
 0x3cf   : > { %15098 = vst [vmem:[#allocation86_spill] sm:$0xff] %v13850_v63  ;;  %v13853_v50 = vadd.f32 %v6403_v34, %v13696_v21 }
 0x3d0   : > { %v10317_v37 = vpop.f32.mrf.mxu1  ;;  %v13855_v43 = vpop.f32.mrf.mxu0 }
 0x3d1   : > { %15099 = vst [vmem:[#allocation57_spill] sm:$0xff] %v13855_v43  ;;  %v13858_v39 = vadd.f32 %v10317_v37, %v13701_v24 }
 0x3d2   : > { %v6413_v26 = vpop.f32.mrf.mxu1  ;;  %v13860_v40 = vpop.f32.mrf.mxu0 }
 0x3d3   : > { %15100 = vst [vmem:[#allocation148_spill] sm:$0xff] %v13858_v39  ;;  %15101 = vst [vmem:[#allocation105_spill] sm:$0xff] %v13860_v40  ;;  %v13863_v62 = vadd.f32 %v6413_v26, %v13706_v17 }
 0x3d4   : > { %v10320_v16 = vpop.f32.mrf.mxu1  ;;  %v13865_v31 = vpop.f32.mrf.mxu0 }
 0x3d5   : > { %15102 = vst [vmem:[#allocation150_spill] sm:$0xff] %v13863_v62  ;;  %15103 = vst [vmem:[#allocation77_spill] sm:$0xff] %v13865_v31  ;;  %v13868_v13 = vadd.f32 %v10320_v16, %v13711_v1 }
 0x3d6   : > { %v6423_v21 = vpop.f32.mrf.mxu1  ;;  %v13870_v18 = vpop.f32.mrf.mxu0 }
 0x3d7   : > { %15104 = vst [vmem:[#allocation151_spill] sm:$0xff] %v13868_v13  ;;  %15105 = vst [vmem:[#allocation152_spill] sm:$0xff] %v13870_v18  ;;  %v13873_v60 = vadd.f32 %v6423_v21, %v13716_v19 }
 0x3d8   : > { %v10323_v24 = vpop.f32.mrf.mxu1  ;;  %v13875_v33 = vpop.f32.mrf.mxu0 }
 0x3d9   : > { %15106 = vst [vmem:[#allocation89_spill] sm:$0xff] %v13873_v60  ;;  %15107 = vst [vmem:[#allocation81_spill] sm:$0xff] %v13875_v33  ;;  %v13878_v48 = vadd.f32 %v10323_v24, %v13721_v23 }
 0x3da   : > { %v6433_v17 = vpop.f32.mrf.mxu1  ;;  %v13880_v0 = vpop.f32.mrf.mxu0 }
 0x3db   : > { %15108 = vst [vmem:[#allocation61_spill] sm:$0xff] %v13878_v48  ;;  %15109 = vst [vmem:[#allocation154_spill] sm:$0xff] %v13880_v0  ;;  %v13883_v22 = vadd.f32 %v6433_v17, %v13726_v4 }
 0x3dc   : > { %v10326_v1 = vpop.f32.mrf.mxu1  ;;  %v13885_v34 = vpop.f32.mrf.mxu0 }
 0x3dd   : > { %15110 = vst [vmem:[#allocation153_spill] sm:$0xff] %v13883_v22  ;;  %15111 = vst [vmem:[#allocation92_spill] sm:$0xff] %v13885_v34  ;;  %v13888_v37 = vadd.f32 %v10326_v1, %v13731_v28 }
 0x3de   : > { %v6443_v19 = vpop.f32.mrf.mxu1  ;;  %v13890_v26 = vpop.f32.mrf.mxu0 }
 0x3df   : > { %15112 = vst [vmem:[#allocation66_spill] sm:$0xff] %v13888_v37  ;;  %15113 = vst [vmem:[#allocation70_spill] sm:$0xff] %v13890_v26  ;;  %v13893_v16 = vadd.f32 %v6443_v19, %v13736_v45 }
 0x3e0   : > { %v10329_v23 = vpop.f32.mrf.mxu1  ;;  %v13895_v21 = vpop.f32.mrf.mxu0 }
 0x3e1   : > { %15114 = vst [vmem:[#allocation157_spill] sm:$0xff] %v13893_v16  ;;  %15115 = vst [vmem:[#allocation113_spill] sm:$0xff] %v13895_v21  ;;  %v13898_v24 = vadd.f32 %v10329_v23, %v13741_v9 }
 0x3e2   : > { %v6453_v4 = vpop.f32.mrf.mxu1  ;;  %v13900_v17 = vpop.f32.mrf.mxu0 }
 0x3e3   : > { %15116 = vst [vmem:[#allocation155_spill] sm:$0xff] %v13898_v24  ;;  %15117 = vst [vmem:[#allocation111_spill] sm:$0xff] %v13900_v17  ;;  %v13903_v34 = vadd.f32 %v6453_v4, %v13746_v27 }
 0x3e4   : > { %v10332_v28 = vpop.f32.mrf.mxu1  ;;  %v13905_v1 = vpop.f32.mrf.mxu0 }
 0x3e5   : > { %15118 = vst [vmem:[#allocation93_spill] sm:$0xff] %v13903_v34  ;;  %15119 = vst [vmem:[#allocation160_spill] sm:$0xff] %v13905_v1  ;;  %v13908_v26 = vadd.f32 %v10332_v28, %v13752_v38 }
 0x3e6   : > { %v6463_v45 = vpop.f32.mrf.mxu1  ;;  %v13910_v19 = vpop.f32.mrf.mxu0 }
 0x3e7   : > { %15120 = vst [vmem:[#allocation156_spill] sm:$0xff] %v13908_v26  ;;  %15121 = vst [vmem:[#allocation163_spill] sm:$0xff] %v13910_v19  ;;  %v13913_v21 = vadd.f32 %v6463_v45, %v13757_v20 }
 0x3e8   : > { %v10335_v9 = vpop.f32.mrf.mxu1  ;;  %v13915_v23 = vpop.f32.mrf.mxu0 }
 0x3e9   : > { %15122 = vst [vmem:[#allocation119_spill] sm:$0xff] %v13913_v21  ;;  %15123 = vst [vmem:[#allocation158_spill] sm:$0xff] %v13915_v23  ;;  %v13918_v17 = vadd.f32 %v10335_v9, %v13763_v10 }
 0x3ea   : > { %v6473_v27 = vpop.f32.mrf.mxu1  ;;  %v13920_v4 = vpop.f32.mrf.mxu0 }
 0x3eb   : > { %15124 = vst [vmem:[#allocation94_spill] sm:$0xff] %v13918_v17  ;;  %15125 = vst [vmem:[#allocation166_spill] sm:$0xff] %v13920_v4  ;;  %v13923_v1 = vadd.f32 %v6473_v27, %v13768_v15 }
 0x3ec   : > { %v10338_v38 = vpop.f32.mrf.mxu1  ;;  %v13925_v28 = vpop.f32.mrf.mxu0 }
 0x3ed   : > { %15126 = vst [vmem:[#allocation159_spill] sm:$0xff] %v13923_v1  ;;  %15127 = vst [vmem:[#allocation169_spill] sm:$0xff] %v13925_v28  ;;  %v13928_v19 = vadd.f32 %v10338_v38, %v13771_v25 }
 0x3ee   : > { %v6483_v20 = vpop.f32.mrf.mxu1  ;;  %v13930_v45 = vpop.f32.mrf.mxu0 }
 0x3ef   : > { %15128 = vst [vmem:[#allocation161_spill] sm:$0xff] %v13928_v19  ;;  %15129 = vst [vmem:[#allocation117_spill] sm:$0xff] %v13930_v45  ;;  %v13933_v23 = vadd.f32 %v6483_v20, %v13776_v30 }
 0x3f0   : > { %v10341_v10 = vpop.f32.mrf.mxu1  ;;  %v13935_v9 = vpop.f32.mrf.mxu0 }
 0x3f1   : > { %15130 = vst [vmem:[#allocation74_spill] sm:$0xff] %v13933_v23  ;;  %15131 = vst [vmem:[#allocation95_spill] sm:$0xff] %v13935_v9  ;;  %v13938_v4 = vadd.f32 %v10341_v10, %v13781_v12 }
 0x3f2   : > { %v6493_v15 = vpop.f32.mrf.mxu1  ;;  %v10446_v28 = vpop.f32.mrf.mxu0 }
 0x3f3   : > { %15132 = vst [vmem:[#allocation172_spill] sm:$0xff] %v13938_v4  ;;  %v13941_v27 = vadd.f32 %v6493_v15, %v13788_v61 }
 0x3f4   : > { %v10396_v1 = vpop.f32.mrf.mxu1  ;;  %v7568_v38 = vpop.f32.mrf.mxu0 }
 0x3f5   : > { %15133 = vst [vmem:[#allocation162_spill] sm:$0xff] %v13941_v27 }
 0x3f6   : > { %v7181_v25 = vpop.f32.mrf.mxu1  ;;  %v13943_v45 = vpop.f32.mrf.mxu0 }
 0x3f8   : > { %v10399_v19 = vpop.f32.mrf.mxu1  ;;  %v13947_v23 = vpop.f32.mrf.mxu0 }
 0x3fa   : > { %v7191_v17 = vpop.f32.mrf.mxu1  ;;  %v13953_v10 = vpop.f32.mrf.mxu0 }
 0x3fc   : > { %v10402_v30 = vpop.f32.mrf.mxu1  ;;  %v13959_v27 = vpop.f32.mrf.mxu0 }
 0x3fe   : > { %v13945_v20 = vpop.f32.mrf.mxu1  ;;  %v13965_v26 = vpop.f32.mrf.mxu0 }
 0x400   : > { %v13949_v9 = vpop.f32.mrf.mxu1  ;;  %v13971_v16 = vpop.f32.mrf.mxu0 }
 0x402   : > { %v13951_v12 = vpop.f32.mrf.mxu1  ;;  %v13977_v33 = vpop.f32.mrf.mxu0 }
 0x404   : > { %v13955_v61 = vpop.f32.mrf.mxu1  ;;  %v13983_v48 = vpop.f32.mrf.mxu0 }
 0x406   : > { %v13957_v15 = vpop.f32.mrf.mxu1  ;;  %v13989_v40 = vpop.f32.mrf.mxu0 }
 0x408   : > { %v13961_v4 = vpop.f32.mrf.mxu1  ;;  %v13995_v62 = vpop.f32.mrf.mxu0 }
 0x40a   : > { %v13963_v21 = vpop.f32.mrf.mxu1 }
 0x40c   : > { %v13967_v34 = vpop.f32.mrf.mxu1 }
 0x40e   : > { %v13969_v24 = vpop.f32.mrf.mxu1 }
 0x410   : > { %v13973_v0 = vpop.f32.mrf.mxu1 }
 0x411   : > { %15134 = vst [vmem:[#allocation175_spill] sm:$0xff] %v13973_v0 }
 0x412   : > { %v13975_v37 = vpop.f32.mrf.mxu1 }
 0x413   : > { %15135 = vst [vmem:[#allocation136_spill] sm:$0xff] %v13975_v37 }
 0x414   : > { %v13979_v22 = vpop.f32.mrf.mxu1 }
 0x415   : > { %15136 = vst [vmem:[#allocation164_spill] sm:$0xff] %v13979_v22  ;;  %v14001_v22 = vpop.f32.mrf.mxu0 }
 0x416   : > { %v13981_v18 = vpop.f32.mrf.mxu1  ;;  %15144 = vst [vmem:[#allocation168_spill] sm:$0xff] %v14001_v22 }
 0x417   : > { %15137 = vst [vmem:[#allocation135_spill] sm:$0xff] %v13981_v18 }
 0x418   : > { %v13985_v31 = vpop.f32.mrf.mxu1 }
 0x419   : > { %15138 = vst [vmem:[#allocation97_spill] sm:$0xff] %v13985_v31  ;;  %v14007_v31 = vpop.f32.mrf.mxu0 }
 0x41a   : > { %v13987_v60 = vpop.f32.mrf.mxu1  ;;  %15147 = vst [vmem:[#allocation101_spill] sm:$0xff] %v14007_v31 }
 0x41b   : > { %15139 = vst [vmem:[#allocation130_spill] sm:$0xff] %v13987_v60 }
 0x41c   : > { %v13991_v13 = vpop.f32.mrf.mxu1 }
 0x41d   : > { %15140 = vst [vmem:[#allocation165_spill] sm:$0xff] %v13991_v13  ;;  %v14013_v13 = vpop.f32.mrf.mxu0 }
 0x41e   : > { %v13993_v43 = vpop.f32.mrf.mxu1  ;;  %15150 = vst [vmem:[#allocation142_spill] sm:$0xff] %v14013_v13 }
 0x41f   : > { %15141 = vst [vmem:[#allocation139_spill] sm:$0xff] %v13993_v43 }
 0x420   : > { %v13997_v37 = vpop.f32.mrf.mxu1 }
 0x421   : > { %15142 = vst [vmem:[#allocation167_spill] sm:$0xff] %v13997_v37 }
 0x422   : > { %v13999_v0 = vpop.f32.mrf.mxu1 }
 0x423   : > { %15143 = vst [vmem:[#allocation99_spill] sm:$0xff] %v13999_v0  ;;  %v6922_v0 = vadd.f32 %v13778_v32, %v13786_v2 }
 0x424   : > { %v14003_v18 = vpop.f32.mrf.mxu1 }
 0x425   : > { %15145 = vst [vmem:[#allocation170_spill] sm:$0xff] %v14003_v18  ;;  %v7341_v22 = vadd.f32 %v10396_v1, %v6922_v0  ;;  %v14023_v18 = vpop.f32.mrf.mxu0 }
 0x426   : > { %v14005_v63 = vpop.f32.mrf.mxu1 }
 0x427   : > { %15146 = vst [vmem:[#allocation138_spill] sm:$0xff] %v14005_v63  ;;  %v6921_v63 = vadd.f32 %v13783_v5, %v13793_v51  ;;  %v14033_v2 = vpop.f32.mrf.mxu0  ;;  %v7728_v0 = vadd.f32 %v10446_v28, %v7341_v22  ;;  %v6926_v5 = vadd.f32 %v13800_v52, %v13808_v58  ;;  %v8276_v22 = vld [vmem:[%s10720_s26 + $0x8] sm:$0xff] }
 0x428   : > { %v14009_v60 = vpop.f32.mrf.mxu1 }
 0x429   : > { %15148 = vst [vmem:[#allocation103_spill] sm:$0xff] %v14009_v60  ;;  %v7340_v60 = vadd.f32 %v7181_v25, %v6921_v63 }
 0x42a   : > { %v14011_v39 = vpop.f32.mrf.mxu1 }
 0x42b   : > { %15149 = vst [vmem:[#allocation171_spill] sm:$0xff] %v14011_v39  ;;  %v6924_v39 = vadd.f32 %v13790_v11, %v13798_v6  ;;  %v7727_v11 = vadd.f32 %v7568_v38, %v7340_v60  ;;  %v7345_v6 = vadd.f32 %v10402_v30, %v6926_v5  ;;  %v6928_v60 = vadd.f32 %v13810_v3, %v13818_v55 }
 0x42c   : > { %v14015_v43 = vpop.f32.mrf.mxu1  ;;  %v6927_v3 = vadd.f32 %v13815_v35, %v13823_v57 }
 0x42d   : > { %15151 = vst [vmem:[#allocation173_spill] sm:$0xff] %v14015_v43  ;;  %v6923_v43 = vadd.f32 %v13795_v53, %v13803_v8  ;;  %v7343_v32 = vadd.f32 %v10399_v19, %v6924_v39  ;;  %v6925_v53 = vadd.f32 %v13805_v47, %v13813_v36  ;;  %v14041_v39 = vpop.f32.mrf.mxu0  ;;  %v7347_v38 = vadd.f32 %v13949_v9, %v6928_v60 }
 0x42e   : > { %v14019_v37 = vpop.f32.mrf.mxu1  ;;  %v7732_v30 = vadd.f32 %v13953_v10, %v7345_v6  ;;  %v6930_v9 = vadd.f32 %v13820_v7, %v13828_v49  ;;  %v8277_v6 = vld [vmem:[%s10720_s26 + $0x10] sm:$0xff] }
 0x42f   : > { %v7342_v1 = vadd.f32 %v7191_v17, %v6923_v43  ;;  %v7730_v52 = vadd.f32 %v13943_v45, %v7343_v32  ;;  %v7344_v58 = vadd.f32 %v13945_v20, %v6925_v53  ;;  %v8275_v45 = vld [vmem:[%s10720_s26] sm:$0xff]  ;;  %v14063_v20 = vpop.f32.mrf.mxu0 }
 0x430   : > { %v14025_v31 = vpop.f32.mrf.mxu1 }
 0x431   : > { %15152 = vst [vmem:[#allocation141_spill] sm:$0xff] %v14025_v31  ;;  %v14037_v31 = vstv %s8746_s29  ;;  %v7729_v28 = vadd.f32 %v13947_v23, %v7342_v1  ;;  %v8278_v1 = vld [vmem:[%s10720_s26 + $0x18] sm:$0xff]  ;;  %v7731_v10 = vadd.f32 %v13959_v27, %v7344_v58  ;;  %v14081_v27 = vpop.f32.mrf.mxu0 }
 0x432   : > { %v14031_v13 = vpop.f32.mrf.mxu1 }
 0x434   : > { %v10496_v51 = vpop.f32.mrf.mxu1 }
 0x435   : > { %v8147_v63 = vadd.f32 %v10496_v51, %v7728_v0  ;;  %v7346_v51 = vadd.f32 %v13951_v12, %v6927_v3  ;;  %v6929_v12 = vadd.f32 %v13825_v14, %v13833_v46  ;;  %v6932_v14 = vadd.f32 %v13830_v41, %v13838_v59 }
 0x436   : > { %v7987_v8 = vpop.f32.mrf.mxu1 }
 0x437   : > { %vm8179_vm4 = vcmp.gt.f32.partialorder %v8147_v63, 0.0  ;;  %v8212_v43 = vmul.f32 %v14037_v31, %v8147_v63  ;;  %v8146_v17 = vadd.f32 %v7987_v8, %v7727_v11  ;;  %v7349_v8 = vadd.f32 %v13955_v61, %v6930_v9 }
 0x438   : > { %v10499_v19 = vpop.f32.mrf.mxu1  ;;  %v7348_v61 = vadd.f32 %v13957_v15, %v6929_v12  ;;  %v6931_v15 = vadd.f32 %v13835_v56, %v13843_v42  ;;  %v6934_v56 = vadd.f32 %v13840_v29, %v13848_v44 }
 0x439   : > { %v8244_v47 = vsel %vm8179_vm4, %v8147_v63, %v8212_v43  ;;  %vm8178_vm5 = vcmp.gt.f32.partialorder %v8146_v17, 0.0  ;;  %v8211_v36 = vmul.f32 %v14037_v31, %v8146_v17  ;;  %v8149_v25 = vadd.f32 %v10499_v19, %v7730_v52  ;;  %v8280_v52 = vld [vmem:[%s10720_s26 + $0x28] sm:$0xff] }
 0x43a   : > { %v8308_v55 = vadd.f32 %v8276_v22, %v8244_v47  ;;  %v7997_v23 = vpop.f32.mrf.mxu1  ;;  %v7734_v43 = vadd.f32 %v13965_v26, %v7347_v38  ;;  %v7733_v26 = vadd.f32 %v13971_v16, %v7346_v51  ;;  %v8279_v47 = vld [vmem:[%s10720_s26 + $0x20] sm:$0xff]  ;;  %v14099_v16 = vpop.f32.mrf.mxu0  ;;  %v7353_v51 = vadd.f32 %v13967_v34, %v6934_v56 }
 0x43b   : > { %v8243_v32 = vsel %vm8178_vm5, %v8146_v17, %v8211_v36  ;;  %vm8181_vm6 = vcmp.gt.f32.partialorder %v8149_v25, 0.0  ;;  %v8214_v0 = vmul.f32 %v14037_v31, %v8149_v25  ;;  %v8148_v5 = vadd.f32 %v7997_v23, %v7729_v28 }
 0x43c   : > { %8340 = vst.msk [vmem:[%s14055_s9 + $0x8] sm:$0xff] %vm293_vm0, %v8308_v55  ;;  %v8307_v35 = vadd.f32 %v8275_v45, %v8243_v32  ;;  %v10502_v57 = vpop.f32.mrf.mxu1  ;;  %v7351_v45 = vadd.f32 %v13961_v4, %v6932_v14  ;;  %v8282_v55 = vld [vmem:[%s10720_s26 + $0x38] sm:$0xff]  ;;  %v7350_v4 = vadd.f32 %v13963_v21, %v6931_v15  ;;  %v6933_v21 = vadd.f32 %v13845_v54, %v13853_v50  ;;  %v15154_v54 = vld [vmem:[#allocation86_spill] sm:$0xff]  ;;  %v15161_v15 = vld [vmem:[#allocation105_spill] sm:$0xff] }
 0x43d   : > { %v8246_v63 = vsel %vm8181_vm6, %v8149_v25, %v8214_v0  ;;  %vm8180_vm7 = vcmp.gt.f32.partialorder %v8148_v5, 0.0  ;;  %v8213_v11 = vmul.f32 %v14037_v31, %v8148_v5  ;;  %v8151_v53 = vadd.f32 %v10502_v57, %v7732_v30  ;;  %v15158_v14 = vld [vmem:[#allocation168_spill] sm:$0xff] }
 0x43e   : > { %8339 = vst.msk [vmem:[%s14055_s9] sm:$0xff] %vm293_vm0, %v8307_v35  ;;  %v8310_v7 = vadd.f32 %v8278_v1, %v8246_v63  ;;  %v8007_v49 = vpop.f32.mrf.mxu1  ;;  %v7736_v25 = vadd.f32 %v13977_v33, %v7349_v8  ;;  %v7735_v33 = vadd.f32 %v13983_v48, %v7348_v61  ;;  %v8281_v1 = vld [vmem:[%s10720_s26 + $0x30] sm:$0xff]  ;;  %v7738_v9 = vadd.f32 %v13989_v40, %v7351_v45  ;;  %v14117_v48 = vpop.f32.mrf.mxu0 }
 0x43f   : > { %v8245_v22 = vsel %vm8180_vm7, %v8148_v5, %v8213_v11  ;;  %vm8183_vm8 = vcmp.gt.f32.partialorder %v8151_v53, 0.0  ;;  %v8216_v17 = vmul.f32 %v14037_v31, %v8151_v53  ;;  %v8150_v58 = vadd.f32 %v8007_v49, %v7731_v10  ;;  %v8284_v10 = vld [vmem:[%s10720_s26 + $0x48] sm:$0xff]  ;;  %v15153_v11 = vld [vmem:[#allocation148_spill] sm:$0xff]  ;;  %v15160_v45 = vld [vmem:[#allocation151_spill] sm:$0xff] }
 0x440   : > { %8342 = vst.msk [vmem:[%s14055_s9 + $0x18] sm:$0xff] %vm293_vm0, %v8310_v7  ;;  %v8309_v46 = vadd.f32 %v8277_v6, %v8245_v22  ;;  %v10505_v60 = vpop.f32.mrf.mxu1  ;;  %v7352_v34 = vadd.f32 %v13969_v24, %v6933_v21  ;;  %v6936_v50 = vadd.f32 %v15154_v54, %v15153_v11  ;;  %v7737_v40 = vadd.f32 %v13995_v62, %v7350_v4  ;;  %v8283_v7 = vld [vmem:[%s10720_s26 + $0x40] sm:$0xff]  ;;  %v15156_v24 = vld [vmem:[#allocation150_spill] sm:$0xff]  ;;  %v14135_v62 = vpop.f32.mrf.mxu0  ;;  %v8285_v4 = vld [vmem:[%s10720_s26 + $0x50] sm:$0xff] }
 0x441   : > { %v8248_v19 = vsel %vm8183_vm8, %v8151_v53, %v8216_v17  ;;  %vm8182_vm9 = vcmp.gt.f32.partialorder %v8150_v58, 0.0  ;;  %v8215_v28 = vmul.f32 %v14037_v31, %v8150_v58  ;;  %v8153_v36 = vadd.f32 %v10505_v60, %v7734_v43  ;;  %v15155_v43 = vld [vmem:[#allocation175_spill] sm:$0xff]  ;;  %v15157_v17 = vld [vmem:[#allocation57_spill] sm:$0xff]  ;;  %v15169_v11 = vld [vmem:[#allocation152_spill] sm:$0xff] }
 0x442   : > { %8341 = vst.msk [vmem:[%s14055_s9 + $0x10] sm:$0xff] %vm293_vm0, %v8309_v46  ;;  %v8312_v41 = vadd.f32 %v8280_v52, %v8248_v19  ;;  %v8017_v59 = vpop.f32.mrf.mxu1  ;;  %v7355_v22 = vadd.f32 %v15155_v43, %v6936_v50  ;;  %v6935_v52 = vadd.f32 %v15157_v17, %v15156_v24  ;;  %v7740_v46 = vadd.f32 %v15158_v14, %v7353_v51  ;;  %v8286_v19 = vld [vmem:[%s10720_s26 + $0x58] sm:$0xff]  ;;  %v15166_v51 = vld [vmem:[#allocation142_spill] sm:$0xff]  ;;  %v15172_v24 = vld [vmem:[#allocation81_spill] sm:$0xff] }
 0x443   : > { %v8247_v38 = vsel %vm8182_vm9, %v8150_v58, %v8215_v28  ;;  %vm8185_vm10 = vcmp.gt.f32.partialorder %v8153_v36, 0.0  ;;  %v8218_v3 = vmul.f32 %v14037_v31, %v8153_v36  ;;  %v8152_v23 = vadd.f32 %v8017_v59, %v7733_v26 }
 0x444   : > { %8344 = vst.msk [vmem:[%s14055_s9 + $0x28] sm:$0xff] %vm293_vm0, %v8312_v41  ;;  %v8311_v42 = vadd.f32 %v8279_v47, %v8247_v38  ;;  %v10508_v30 = vpop.f32.mrf.mxu1  ;;  %v15159_v47 = vld [vmem:[#allocation136_spill] sm:$0xff]  ;;  %v6938_v41 = vadd.f32 %v15161_v15, %v15160_v45  ;;  %v15162_v38 = vld [vmem:[#allocation101_spill] sm:$0xff]  ;;  %v7742_v21 = vadd.f32 %v15166_v51, %v7355_v22 }
 0x445   : > { %v8250_v32 = vsel %vm8185_vm10, %v8153_v36, %v8218_v3  ;;  %vm8184_vm11 = vcmp.gt.f32.partialorder %v8152_v23, 0.0  ;;  %v8217_v0 = vmul.f32 %v14037_v31, %v8152_v23  ;;  %v8155_v5 = vadd.f32 %v10508_v30, %v7736_v25  ;;  %v15171_v22 = vld [vmem:[#allocation153_spill] sm:$0xff] }
 0x446   : > { %8343 = vst.msk [vmem:[%s14055_s9 + $0x20] sm:$0xff] %vm293_vm0, %v8311_v42  ;;  %v8314_v29 = vadd.f32 %v8282_v55, %v8250_v32  ;;  %v8027_v44 = vpop.f32.mrf.mxu1  ;;  %v7354_v36 = vadd.f32 %v15159_v47, %v6935_v52  ;;  %v7739_v3 = vadd.f32 %v15162_v38, %v7352_v34  ;;  %v15163_v42 = vld [vmem:[#allocation164_spill] sm:$0xff]  ;;  %v15165_v32 = vld [vmem:[#allocation77_spill] sm:$0xff]  ;;  %v6939_v17 = vadd.f32 %v15172_v24, %v15171_v22  ;;  %v15174_v47 = vld [vmem:[#allocation66_spill] sm:$0xff] }
 0x447   : > { %v8249_v35 = vsel %vm8184_vm11, %v8152_v23, %v8217_v0  ;;  %vm8187_vm12 = vcmp.gt.f32.partialorder %v8155_v5, 0.0  ;;  %v8220_v57 = vmul.f32 %v14037_v31, %v8155_v5  ;;  %v8154_v63 = vadd.f32 %v8027_v44, %v7735_v33  ;;  %v15164_v33 = vld [vmem:[#allocation89_spill] sm:$0xff]  ;;  %v8289_v38 = vld [vmem:[%s10720_s26 + $0x70] sm:$0xff] }
 0x448   : > { %8346 = vst.msk [vmem:[%s14055_s9 + $0x38] sm:$0xff] %vm293_vm0, %v8314_v29  ;;  %v8313_v6 = vadd.f32 %v8281_v1, %v8249_v35  ;;  %v10511_v53 = vpop.f32.mrf.mxu1  ;;  %v7357_v30 = vadd.f32 %v15163_v42, %v6938_v41  ;;  %v6937_v0 = vadd.f32 %v15165_v32, %v15164_v33  ;;  %v14153_v29 = vpop.f32.mrf.mxu0  ;;  %v8288_v35 = vld [vmem:[%s10720_s26 + $0x68] sm:$0xff]  ;;  %v15168_v34 = vld [vmem:[#allocation61_spill] sm:$0xff] }
 0x449   : > { %v8252_v8 = vsel %vm8187_vm12, %v8155_v5, %v8220_v57  ;;  %vm8186_vm13 = vcmp.gt.f32.partialorder %v8154_v63, 0.0  ;;  %v8219_v12 = vmul.f32 %v14037_v31, %v8154_v63  ;;  %v8157_v49 = vadd.f32 %v10511_v53, %v7738_v9 }
 0x44a   : > { %8345 = vst.msk [vmem:[%s14055_s9 + $0x30] sm:$0xff] %vm293_vm0, %v8313_v6  ;;  %v8316_v58 = vadd.f32 %v8284_v10, %v8252_v8  ;;  %v8037_v61 = vpop.f32.mrf.mxu1  ;;  %v15167_v10 = vld [vmem:[#allocation135_spill] sm:$0xff]  ;;  %v6940_v54 = vadd.f32 %v15169_v11, %v15168_v34  ;;  %v7741_v53 = vadd.f32 %v14023_v18, %v7354_v36  ;;  %v14171_v18 = vpop.f32.mrf.mxu0  ;;  %v15175_v36 = vld [vmem:[#allocation154_spill] sm:$0xff] }
 0x44b   : > { %v8251_v60 = vsel %vm8186_vm13, %v8154_v63, %v8219_v12  ;;  %vm8189_vm14 = vcmp.gt.f32.partialorder %v8157_v49, 0.0  ;;  %v8222_v26 = vmul.f32 %v14037_v31, %v8157_v49  ;;  %v8156_v28 = vadd.f32 %v8037_v61, %v7737_v40  ;;  %v8287_v12 = vld [vmem:[%s10720_s26 + $0x60] sm:$0xff] }
 0x44c   : > { %8348 = vst.msk [vmem:[%s14055_s9 + $0x48] sm:$0xff] %vm293_vm0, %v8316_v58  ;;  %v8315_v59 = vadd.f32 %v8283_v7, %v8251_v60  ;;  %v10514_v25 = vpop.f32.mrf.mxu1  ;;  %v7356_v63 = vadd.f32 %v15167_v10, %v6937_v0  ;;  %v7744_v61 = vadd.f32 %v14033_v2, %v7357_v30  ;;  %v8290_v60 = vld [vmem:[%s10720_s26 + $0x78] sm:$0xff]  ;;  %v6942_v45 = vadd.f32 %v15175_v36, %v15174_v47  ;;  %v8293_v36 = vld [vmem:[%s10720_s26 + $0x90] sm:$0xff] }
 0x44d   : > { %v8254_v55 = vsel %vm8189_vm14, %v8157_v49, %v8222_v26  ;;  %vm8188_vm15 = vcmp.gt.f32.partialorder %v8156_v28, 0.0  ;;  %v8221_v23 = vmul.f32 %v14037_v31, %v8156_v28  ;;  %v8159_v56 = vadd.f32 %v10514_v25, %v7740_v46  ;;  %v15170_v49 = vld [vmem:[#allocation97_spill] sm:$0xff] }
 0x44e   : > { %8347 = vst.msk [vmem:[%s14055_s9 + $0x40] sm:$0xff] %vm293_vm0, %v8315_v59  ;;  %v8318_v1 = vadd.f32 %v8286_v19, %v8254_v55  ;;  %v8047_v5 = vpop.f32.mrf.mxu1  ;;  %v7359_v43 = vadd.f32 %v15170_v49, %v6940_v54  ;;  %v15173_v19 = vld [vmem:[#allocation130_spill] sm:$0xff]  ;;  %v7743_v2 = vadd.f32 %v14041_v39, %v7356_v63  ;;  %v15176_v55 = vld [vmem:[#allocation165_spill] sm:$0xff]  ;;  %v14189_v39 = vpop.f32.mrf.mxu0 }
 0x44f   : > { %v8253_v44 = vsel %vm8188_vm15, %v8156_v28, %v8221_v23  ;;  %vm8191_vm1 = vcmp.gt.f32.partialorder %v8159_v56, 0.0  ;;  %v8224_v9 = vmul.f32 %v14037_v31, %v8159_v56  ;;  %v8158_v57 = vadd.f32 %v8047_v5, %v7739_v3  ;;  %v8292_v5 = vld [vmem:[%s10720_s26 + $0x88] sm:$0xff]  ;;  %v8291_v54 = vld [vmem:[%s10720_s26 + $0x80] sm:$0xff] }
 0x450   : > { %8350 = vst.msk [vmem:[%s14055_s9 + $0x58] sm:$0xff] %vm293_vm0, %v8318_v1  ;;  %v8317_v50 = vadd.f32 %v8285_v4, %v8253_v44  ;;  %v10517_v6 = vpop.f32.mrf.mxu1  ;;  %v7358_v28 = vadd.f32 %v15173_v19, %v6939_v17  ;;  %v7361_v23 = vadd.f32 %v15176_v55, %v6942_v45  ;;  %v15177_v4 = vld [vmem:[#allocation157_spill] sm:$0xff]  ;;  %v7746_v32 = vadd.f32 %v14063_v20, %v7359_v43  ;;  %v8294_v17 = vld [vmem:[%s10720_s26 + $0x98] sm:$0xff] }
 0x451   : > { %v8256_v40 = vsel %vm8191_vm1, %v8159_v56, %v8224_v9  ;;  %vm8190_vm2 = vcmp.gt.f32.partialorder %v8158_v57, 0.0  ;;  %v8223_v8 = vmul.f32 %v14037_v31, %v8158_v57  ;;  %v8161_v7 = vadd.f32 %v10517_v6, %v7742_v21  ;;  %v15178_v56 = vld [vmem:[#allocation92_spill] sm:$0xff]  ;;  %v15179_v21 = vld [vmem:[#allocation139_spill] sm:$0xff] }
 0x452   : > { %8349 = vst.msk [vmem:[%s14055_s9 + $0x50] sm:$0xff] %vm293_vm0, %v8317_v50  ;;  %v8320_v52 = vadd.f32 %v8288_v35, %v8256_v40  ;;  %v8057_v58 = vpop.f32.mrf.mxu1  ;;  %v6941_v42 = vadd.f32 %v15178_v56, %v15177_v4  ;;  %v15180_v9 = vld [vmem:[#allocation155_spill] sm:$0xff]  ;;  %v15181_v35 = vld [vmem:[#allocation70_spill] sm:$0xff]  ;;  %v7745_v20 = vadd.f32 %v14081_v27, %v7358_v28  ;;  %v15183_v40 = vld [vmem:[#allocation93_spill] sm:$0xff]  ;;  %v7748_v43 = vadd.f32 %v14099_v16, %v7361_v23  ;;  %v14207_v27 = vpop.f32.mrf.mxu0 }
 0x453   : > { %v8255_v14 = vsel %vm8190_vm2, %v8158_v57, %v8223_v8  ;;  %vm8193_vm3 = vcmp.gt.f32.partialorder %v8161_v7, 0.0  ;;  %v8226_v46 = vmul.f32 %v14037_v31, %v8161_v7  ;;  %v8160_v26 = vadd.f32 %v8057_v58, %v7741_v53  ;;  %v15182_v6 = vld [vmem:[#allocation167_spill] sm:$0xff]  ;;  %v15184_v8 = vld [vmem:[#allocation113_spill] sm:$0xff]  ;;  %v8296_v56 = vld [vmem:[%s10720_s26 + $0xa8] sm:$0xff] }
 0x454   : > { %8352 = vst.msk [vmem:[%s14055_s9 + $0x68] sm:$0xff] %vm293_vm0, %v8320_v52  ;;  %v8319_v15 = vadd.f32 %v8287_v12, %v8255_v14  ;;  %v10520_v41 = vpop.f32.mrf.mxu1  ;;  %v7360_v44 = vadd.f32 %v15179_v21, %v6941_v42  ;;  %v6944_v57 = vadd.f32 %v15181_v35, %v15180_v9  ;;  %v6943_v12 = vadd.f32 %v15184_v8, %v15183_v40  ;;  %v15185_v58 = vld [vmem:[#allocation99_spill] sm:$0xff]  ;;  %v15186_v14 = vld [vmem:[#allocation156_spill] sm:$0xff]  ;;  %v8295_v9 = vld [vmem:[%s10720_s26 + $0xa0] sm:$0xff] }
 0x455   : > { %v8258_v59 = vsel %vm8193_vm3, %v8161_v7, %v8226_v46  ;;  %vm8192_vm4 = vcmp.gt.f32.partialorder %v8160_v26, 0.0  ;;  %v8225_v25 = vmul.f32 %v14037_v31, %v8160_v26  ;;  %v8163_v3 = vadd.f32 %v10520_v41, %v7744_v61  ;;  %v15187_v46 = vld [vmem:[#allocation111_spill] sm:$0xff]  ;;  %v8298_v40 = vld [vmem:[%s10720_s26 + $0xb8] sm:$0xff] }
 0x456   : > { %8351 = vst.msk [vmem:[%s14055_s9 + $0x60] sm:$0xff] %vm293_vm0, %v8319_v15  ;;  %v8322_v30 = vadd.f32 %v8290_v60, %v8258_v59  ;;  %v8067_v33 = vpop.f32.mrf.mxu1  ;;  %v7363_v53 = vadd.f32 %v15182_v6, %v6944_v57  ;;  %v7362_v61 = vadd.f32 %v15185_v58, %v6943_v12  ;;  %v6946_v60 = vadd.f32 %v15187_v46, %v15186_v14  ;;  %v15188_v15 = vld [vmem:[#allocation170_spill] sm:$0xff]  ;;  %v15190_v59 = vld [vmem:[#allocation160_spill] sm:$0xff]  ;;  %v15194_v57 = vld [vmem:[#allocation103_spill] sm:$0xff] }
 0x457   : > { %v8257_v0 = vsel %vm8192_vm4, %v8160_v26, %v8225_v25  ;;  %vm8195_vm5 = vcmp.gt.f32.partialorder %v8163_v3, 0.0  ;;  %v8228_v1 = vmul.f32 %v14037_v31, %v8163_v3  ;;  %v8162_v51 = vadd.f32 %v8067_v33, %v7743_v2  ;;  %v15189_v2 = vld [vmem:[#allocation119_spill] sm:$0xff]  ;;  %v15200_v46 = vld [vmem:[#allocation173_spill] sm:$0xff] }
 0x458   : > { %8354 = vst.msk [vmem:[%s14055_s9 + $0x78] sm:$0xff] %vm293_vm0, %v8322_v30  ;;  %v8321_v10 = vadd.f32 %v8289_v38, %v8257_v0  ;;  %v10523_v63 = vpop.f32.mrf.mxu1  ;;  %v7747_v16 = vadd.f32 %v14117_v48, %v7360_v44  ;;  %v7365_v41 = vadd.f32 %v15188_v15, %v6946_v60  ;;  %v6945_v25 = vadd.f32 %v15190_v59, %v15189_v2  ;;  %v7698_v48 = vpop.f32.mrf.mxu0  ;;  %v15191_v30 = vld [vmem:[#allocation138_spill] sm:$0xff]  ;;  %v15193_v0 = vld [vmem:[#allocation163_spill] sm:$0xff] }
 0x459   : > { %v8260_v34 = vsel %vm8195_vm5, %v8163_v3, %v8228_v1  ;;  %vm8194_vm6 = vcmp.gt.f32.partialorder %v8162_v51, 0.0  ;;  %v8227_v11 = vmul.f32 %v14037_v31, %v8162_v51  ;;  %v8165_v50 = vadd.f32 %v10523_v63, %v7746_v32  ;;  %v15192_v32 = vld [vmem:[#allocation94_spill] sm:$0xff]  ;;  %v15195_v63 = vld [vmem:[#allocation159_spill] sm:$0xff] }
 0x45a   : > { %8353 = vst.msk [vmem:[%s14055_s9 + $0x70] sm:$0xff] %vm293_vm0, %v8321_v10  ;;  %v8324_v7 = vadd.f32 %v8292_v5, %v8260_v34  ;;  %v8077_v49 = vpop.f32.mrf.mxu1  ;;  %v7750_v55 = vadd.f32 %v14135_v62, %v7363_v53  ;;  %v7364_v33 = vadd.f32 %v15191_v30, %v6945_v25  ;;  %v6948_v1 = vadd.f32 %v15193_v0, %v15192_v32  ;;  %v15197_v12 = vld [vmem:[#allocation171_spill] sm:$0xff]  ;;  %v15203_v25 = vld [vmem:[#allocation172_spill] sm:$0xff]  ;;  %v8299_v30 = vld [vmem:[%s10720_s26 + $0xc0] sm:$0xff] }
 0x45b   : > { %v8259_v22 = vsel %vm8194_vm6, %v8162_v51, %v8227_v11  ;;  %vm8197_vm7 = vcmp.gt.f32.partialorder %v8165_v50, 0.0  ;;  %v8230_v24 = vmul.f32 %v14037_v31, %v8165_v50  ;;  %v8164_v52 = vadd.f32 %v8077_v49, %v7745_v20  ;;  %v15196_v20 = vld [vmem:[#allocation158_spill] sm:$0xff]  ;;  %v15198_v49 = vld [vmem:[#allocation161_spill] sm:$0xff] }
 0x45c   : > { %8356 = vst.msk [vmem:[%s14055_s9 + $0x88] sm:$0xff] %vm293_vm0, %v8324_v7  ;;  %v8323_v26 = vadd.f32 %v8291_v54, %v8259_v22  ;;  %v10526_v19 = vpop.f32.mrf.mxu1  ;;  %v7749_v62 = vadd.f32 %v14153_v29, %v7362_v61  ;;  %v7367_v10 = vadd.f32 %v15194_v57, %v6948_v1  ;;  %v6947_v34 = vadd.f32 %v15196_v20, %v15195_v63  ;;  %v10488_v29 = vpop.f32.mrf.mxu0  ;;  %v8297_v61 = vld [vmem:[%s10720_s26 + $0xb0] sm:$0xff]  ;;  %v15205_v32 = vld [vmem:[#allocation141_spill] sm:$0xff] }
 0x45d   : > { %v8262_v28 = vsel %vm8197_vm7, %v8165_v50, %v8230_v24  ;;  %vm8196_vm8 = vcmp.gt.f32.partialorder %v8164_v52, 0.0  ;;  %v8229_v47 = vmul.f32 %v14037_v31, %v8164_v52  ;;  %v8167_v45 = vadd.f32 %v10526_v19, %v7748_v43  ;;  %v15199_v43 = vld [vmem:[#allocation166_spill] sm:$0xff]  ;;  %v15202_v19 = vld [vmem:[#allocation169_spill] sm:$0xff]  ;;  %v15207_v1 = vld [vmem:[#allocation95_spill] sm:$0xff] }
 0x45e   : > { %8355 = vst.msk [vmem:[%s14055_s9 + $0x80] sm:$0xff] %vm293_vm0, %v8323_v26  ;;  %v8326_v38 = vadd.f32 %v8294_v17, %v8262_v28  ;;  %v8087_v3 = vpop.f32.mrf.mxu1  ;;  %v7752_v50 = vadd.f32 %v14171_v18, %v7365_v41  ;;  %v7366_v7 = vadd.f32 %v15197_v12, %v6947_v34  ;;  %v6950_v22 = vadd.f32 %v15199_v43, %v15198_v49  ;;  %v15201_v26 = vld [vmem:[#allocation74_spill] sm:$0xff] }
 0x45f   : > { %v8261_v23 = vsel %vm8196_vm8, %v8164_v52, %v8229_v47  ;;  %vm8199_vm9 = vcmp.gt.f32.partialorder %v8167_v45, 0.0  ;;  %v8232_v4 = vmul.f32 %v14037_v31, %v8167_v45  ;;  %v8166_v42 = vadd.f32 %v8087_v3, %v7747_v16  ;;  %v8300_v41 = vld [vmem:[%s10720_s26 + $0xc8] sm:$0xff] }
 0x460   : > { %8358 = vst.msk [vmem:[%s14055_s9 + $0x98] sm:$0xff] %vm293_vm0, %v8326_v38  ;;  %v8325_v5 = vadd.f32 %v8293_v36, %v8261_v23  ;;  %v10529_v51 = vpop.f32.mrf.mxu1  ;;  %v7751_v18 = vadd.f32 %v14189_v39, %v7364_v33  ;;  %v7369_v60 = vadd.f32 %v15200_v46, %v6950_v22  ;;  %v6949_v16 = vadd.f32 %v15202_v19, %v15201_v26  ;;  %v7708_v39 = vpop.f32.mrf.mxu0  ;;  %v15204_v38 = vld [vmem:[#allocation117_spill] sm:$0xff]  ;;  %v8304_v12 = vld [vmem:[%s10720_s26 + $0xe8] sm:$0xff] }
 0x461   : > { %v8264_v21 = vsel %vm8199_vm9, %v8167_v45, %v8232_v4  ;;  %vm8198_vm10 = vcmp.gt.f32.partialorder %v8166_v42, 0.0  ;;  %v8231_v44 = vmul.f32 %v14037_v31, %v8166_v42  ;;  %v8169_v35 = vadd.f32 %v10529_v51, %v7750_v55 }
 0x462   : > { %8357 = vst.msk [vmem:[%s14055_s9 + $0x90] sm:$0xff] %vm293_vm0, %v8325_v5  ;;  %v8328_v11 = vadd.f32 %v8296_v56, %v8264_v21  ;;  %v8097_v54 = vpop.f32.mrf.mxu1  ;;  %v7754_v36 = vadd.f32 %v14207_v27, %v7367_v10  ;;  %v7368_v59 = vadd.f32 %v14019_v37, %v6949_v16  ;;  %v6952_v3 = vadd.f32 %v15204_v38, %v15203_v25  ;;  %v10491_v27 = vpop.f32.mrf.mxu0  ;;  %v15206_v37 = vld [vmem:[#allocation162_spill] sm:$0xff] }
 0x463   : > { %v8263_v6 = vsel %vm8198_vm10, %v8166_v42, %v8231_v44  ;;  %vm8201_vm11 = vcmp.gt.f32.partialorder %v8169_v35, 0.0  ;;  %v8234_v53 = vmul.f32 %v14037_v31, %v8169_v35  ;;  %v8168_v8 = vadd.f32 %v8097_v54, %v7749_v62 }
 0x464   : > { %8360 = vst.msk [vmem:[%s14055_s9 + $0xa8] sm:$0xff] %vm293_vm0, %v8328_v11  ;;  %v8327_v24 = vadd.f32 %v8295_v9, %v8263_v6  ;;  %v10532_v17 = vpop.f32.mrf.mxu1  ;;  %v7753_v4 = vadd.f32 %v7698_v48, %v7366_v7  ;;  %v7371_v0 = vadd.f32 %v15205_v32, %v6952_v3  ;;  %v6951_v5 = vadd.f32 %v15207_v1, %v15206_v37  ;;  %v8302_v9 = vld [vmem:[%s10720_s26 + $0xd8] sm:$0xff]  ;;  %v7718_v34 = vpop.f32.mrf.mxu0 }
 0x465   : > { %v8266_v52 = vsel %vm8201_vm11, %v8169_v35, %v8234_v53  ;;  %vm8200_vm12 = vcmp.gt.f32.partialorder %v8168_v8, 0.0  ;;  %v8233_v58 = vmul.f32 %v14037_v31, %v8168_v8  ;;  %v8171_v14 = vadd.f32 %v10532_v17, %v7752_v50  ;;  %v8301_v50 = vld [vmem:[%s10720_s26 + $0xd0] sm:$0xff] }
 0x466   : > { %8359 = vst.msk [vmem:[%s14055_s9 + $0xa0] sm:$0xff] %vm293_vm0, %v8327_v24  ;;  %v8330_v28 = vadd.f32 %v8298_v40, %v8266_v52  ;;  %v8107_v47 = vpop.f32.mrf.mxu1  ;;  %v7756_v48 = vadd.f32 %v10488_v29, %v7369_v60  ;;  %v7370_v57 = vadd.f32 %v14031_v13, %v6951_v5  ;;  %v7755_v20 = vadd.f32 %v7708_v39, %v7368_v59  ;;  %v8306_v60 = vld [vmem:[%s10720_s26 + $0xf8] sm:$0xff] }
 0x467   : > { %v8265_v45 = vsel %vm8200_vm12, %v8168_v8, %v8233_v58  ;;  %vm8203_vm13 = vcmp.gt.f32.partialorder %v8171_v14, 0.0  ;;  %v8236_v15 = vmul.f32 %v14037_v31, %v8171_v14  ;;  %v8170_v2 = vadd.f32 %v8107_v47, %v7751_v18  ;;  %v8303_v18 = vld [vmem:[%s10720_s26 + $0xe0] sm:$0xff]  ;;  %v8305_v47 = vld [vmem:[%s10720_s26 + $0xf0] sm:$0xff] }
 0x468   : > { %8362 = vst.msk [vmem:[%s14055_s9 + $0xb8] sm:$0xff] %vm293_vm0, %v8330_v28  ;;  %v8329_v55 = vadd.f32 %v8297_v61, %v8265_v45  ;;  %v10535_v23 = vpop.f32.mrf.mxu1  ;;  %v7758_v6 = vadd.f32 %v10491_v27, %v7371_v0  ;;  %v7757_v49 = vadd.f32 %v7718_v34, %v7370_v57 }
 0x469   : > { %v8268_v56 = vsel %vm8203_vm13, %v8171_v14, %v8236_v15  ;;  %vm8202_vm14 = vcmp.gt.f32.partialorder %v8170_v2, 0.0  ;;  %v8235_v42 = vmul.f32 %v14037_v31, %v8170_v2  ;;  %v8173_v33 = vadd.f32 %v10535_v23, %v7754_v36 }
 0x46a   : > { %8361 = vst.msk [vmem:[%s14055_s9 + $0xb0] sm:$0xff] %vm293_vm0, %v8329_v55  ;;  %v8332_v51 = vadd.f32 %v8300_v41, %v8268_v56  ;;  %v8117_v62 = vpop.f32.mrf.mxu1 }
 0x46b   : > { %v8267_v21 = vsel %vm8202_vm14, %v8170_v2, %v8235_v42  ;;  %vm8205_vm15 = vcmp.gt.f32.partialorder %v8173_v33, 0.0  ;;  %v8238_v44 = vmul.f32 %v14037_v31, %v8173_v33  ;;  %v8172_v35 = vadd.f32 %v8117_v62, %v7753_v4 }
 0x46c   : > { %8364 = vst.msk [vmem:[%s14055_s9 + $0xc8] sm:$0xff] %vm293_vm0, %v8332_v51  ;;  %v8331_v10 = vadd.f32 %v8299_v30, %v8267_v21  ;;  %v10538_v63 = vpop.f32.mrf.mxu1 }
 0x46d   : > { %v8270_v11 = vsel %vm8205_vm15, %v8173_v33, %v8238_v44  ;;  %vm8204_vm1 = vcmp.gt.f32.partialorder %v8172_v35, 0.0  ;;  %v8237_v54 = vmul.f32 %v14037_v31, %v8172_v35  ;;  %v8175_v29 = vadd.f32 %v10538_v63, %v7756_v48 }
 0x46e   : > { %8363 = vst.msk [vmem:[%s14055_s9 + $0xc0] sm:$0xff] %vm293_vm0, %v8331_v10  ;;  %v8334_v53 = vadd.f32 %v8302_v9, %v8270_v11  ;;  %v8127_v13 = vpop.f32.mrf.mxu1 }
 0x46f   : > { %v8269_v40 = vsel %vm8204_vm1, %v8172_v35, %v8237_v54  ;;  %vm8207_vm2 = vcmp.gt.f32.partialorder %v8175_v29, 0.0  ;;  %v8240_v8 = vmul.f32 %v14037_v31, %v8175_v29  ;;  %v8174_v7 = vadd.f32 %v8127_v13, %v7755_v20 }
 0x470   : > { %8366 = vst.msk [vmem:[%s14055_s9 + $0xd8] sm:$0xff] %vm293_vm0, %v8334_v53  ;;  %v8333_v43 = vadd.f32 %v8301_v50, %v8269_v40  ;;  %v10541_v22 = vpop.f32.mrf.mxu1 }
 0x471   : > { %v8272_v24 = vsel %vm8207_vm2, %v8175_v29, %v8240_v8  ;;  %vm8206_vm3 = vcmp.gt.f32.partialorder %v8174_v7, 0.0  ;;  %v8239_v17 = vmul.f32 %v14037_v31, %v8174_v7  ;;  %v8177_v52 = vadd.f32 %v10541_v22, %v7758_v6 }
 0x472   : > { %8365 = vst.msk [vmem:[%s14055_s9 + $0xd0] sm:$0xff] %vm293_vm0, %v8333_v43  ;;  %v8336_v58 = vadd.f32 %v8304_v12, %v8272_v24  ;;  %v8137_v61 = vpop.f32.mrf.mxu1 }
 0x473   : > { %v8271_v14 = vsel %vm8206_vm3, %v8174_v7, %v8239_v17  ;;  %vm8209_vm4 = vcmp.gt.f32.partialorder %v8177_v52, 0.0  ;;  %v8242_v46 = vmul.f32 %v14037_v31, %v8177_v52  ;;  %v8176_v26 = vadd.f32 %v8137_v61, %v7757_v49 }
 0x474   : > { %8368 = vst.msk [vmem:[%s14055_s9 + $0xe8] sm:$0xff] %vm293_vm0, %v8336_v58  ;;  %v8335_v19 = vadd.f32 %v8303_v18, %v8271_v14 }
 0x475   : > { %v8274_v16 = vsel %vm8209_vm4, %v8177_v52, %v8242_v46  ;;  %vm8208_vm5 = vcmp.gt.f32.partialorder %v8176_v26, 0.0  ;;  %v8241_v28 = vmul.f32 %v14037_v31, %v8176_v26 }
 0x476   : > { %8367 = vst.msk [vmem:[%s14055_s9 + $0xe0] sm:$0xff] %vm293_vm0, %v8335_v19  ;;  %v8338_v36 = vadd.f32 %v8306_v60, %v8274_v16 }
 0x477   : > { %v8273_v39 = vsel %vm8208_vm5, %v8176_v26, %v8241_v28 }
 0x478   : > { %8370 = vst.msk [vmem:[%s14055_s9 + $0xf8] sm:$0xff] %vm293_vm0, %v8338_v36  ;;  %v8337_v45 = vadd.f32 %v8305_v47, %v8273_v39 }
 0x47a   : > { %8369 = vst.msk [vmem:[%s14055_s9 + $0xf0] sm:$0xff] %vm293_vm0, %v8337_v45 }
 0x47b PF: > { %s18_s24 = sadd.s32 1, %s10598_s24  }
 0x47c   : > { %p15_p1 = scmp.ge.s32.totalorder %s18_s24, 4  }
 0x47e   :  { %17 = sbr.rel (!%p15_p1) target bundleno = 1 (0x1), region = 99 }
 0x483   :  { %8392 = vsyncpa [#allocation4], 1 }
 0x484   :  { %8394 = vsyncpa [#allocation4 + $0x1], 1 }

</bundles_post_ra>
